<compile_context>
chip_gen: v6e
topology: v6e:2x2x1
jax: 0.10.0
libtpu: 0.0.40
codegen_flags: <defaults>
</compile_context>

<pallas_src>
import functools

import jax
import jax.numpy as jnp
from jax import lax
from jax.experimental import pallas as pl
from jax.experimental.pallas import tpu as pltpu


def _round_up(x, m):
    return ((x + m - 1) // m) * m


def _chunk_size(n, pref):
    """Largest chunk size <= pref that divides n."""
    for d in range(min(pref, n), 0, -1):
        if n % d == 0:
            return d
    return 1


def _const_spec(shape):
    """Whole-array block whose index never changes -> stays resident in VMEM."""
    n = len(shape)
    return pl.BlockSpec(tuple(shape), lambda *_, _n=n: (0,) * _n)


def _gru_step(x, h, wi, wh, bi, bh, H):
    """PyTorch-semantics GRU cell, gates concatenated [r|z|n]; bf16 MXU, f32 acc."""
    gi = jnp.dot(x.astype(jnp.bfloat16), wi, preferred_element_type=jnp.float32) + bi
    gh = jnp.dot(h.astype(jnp.bfloat16), wh, preferred_element_type=jnp.float32) + bh
    r = jax.nn.sigmoid(gi[:, 0:H] + gh[:, 0:H])
    z = jax.nn.sigmoid(gi[:, H:2 * H] + gh[:, H:2 * H])
    n = jnp.tanh(gi[:, 2 * H:3 * H] + r * gh[:, 2 * H:3 * H])
    return (1.0 - z) * n + z * h


# ----------------------------------------------------------------------------
# Fused bidirectional GRU encoder: grid over chunks of Ts steps, inner unrolled
# loop, hidden state in VMEM scratch, weights resident (const index_map).
# ----------------------------------------------------------------------------
def _encoder_kernel(emb_f_ref, emb_b_ref,
                    wi_f_ref, wh_f_ref, bi_f_ref, bh_f_ref,
                    wi_b_ref, wh_b_ref, bi_b_ref, bh_b_ref,
                    out_f_ref, out_b_ref,
                    h_f_sc, h_b_sc):
    c = pl.program_id(0)
    Ts = emb_f_ref.shape[0]
    H = h_f_sc.shape[1]

    @pl.when(c == 0)
    def _():
        h_f_sc[...] = jnp.zeros_like(h_f_sc)
        h_b_sc[...] = jnp.zeros_like(h_b_sc)

    # Hoist weight loads out of the step loop.
    wi_f = wi_f_ref[...]; wh_f = wh_f_ref[...]
    bi_f = bi_f_ref[...]; bh_f = bh_f_ref[...]
    wi_b = wi_b_ref[...]; wh_b = wh_b_ref[...]
    bi_b = bi_b_ref[...]; bh_b = bh_b_ref[...]

    def step(i, carry):
        h_f, h_b = carry
        h_f = _gru_step(emb_f_ref[i], h_f, wi_f, wh_f, bi_f, bh_f, H)
        h_b = _gru_step(emb_b_ref[Ts - 1 - i], h_b, wi_b, wh_b, bi_b, bh_b, H)
        out_f_ref[i] = h_f
        out_b_ref[Ts - 1 - i] = h_b
        return h_f, h_b

    h_f, h_b = lax.fori_loop(0, Ts, step, (h_f_sc[...], h_b_sc[...]),
                             unroll=True)
    h_f_sc[...] = h_f
    h_b_sc[...] = h_b


def encoder_bigru(emb_t, p_f, p_b, hidden_size, steps_per_block=8):
    S, B, E = emb_t.shape
    H = hidden_size
    Ts = _chunk_size(S, steps_per_block)
    C = S // Ts

    def gru_args(p):
        return (p['wi'].astype(jnp.bfloat16), p['wh'].astype(jnp.bfloat16),
                p['bi'], p['bh'])

    args_f = gru_args(p_f)
    args_b = gru_args(p_b)

    step_f = pl.BlockSpec((Ts, B, E), lambda c: (c, 0, 0))
    step_b = pl.BlockSpec((Ts, B, E), lambda c: (C - 1 - c, 0, 0))
    out_f_spec = pl.BlockSpec((Ts, B, H), lambda c: (c, 0, 0))
    out_b_spec = pl.BlockSpec((Ts, B, H), lambda c: (C - 1 - c, 0, 0))

    return pl.pallas_call(
        _encoder_kernel,
        out_shape=(jax.ShapeDtypeStruct((S, B, H), jnp.float32),
                   jax.ShapeDtypeStruct((S, B, H), jnp.float32)),
        grid=(C,),
        in_specs=([step_f, step_b]
                  + [_const_spec(a.shape) for a in args_f]
                  + [_const_spec(a.shape) for a in args_b]),
        out_specs=(out_f_spec, out_b_spec),
        scratch_shapes=[pltpu.VMEM((B, H), jnp.float32),
                        pltpu.VMEM((B, H), jnp.float32)],
        compiler_params=pltpu.CompilerParams(
            dimension_semantics=("arbitrary",),
            vmem_limit_bytes=32 * 1024 * 1024),
    )(emb_t, emb_t, *args_f, *args_b)


# ----------------------------------------------------------------------------
# Fused decoder: grid over chunks of decode steps, inner unrolled loop fusing
# GRU + coverage attention + Reduce_State + vocab softmax + p_gen per step.
# Emits ONE lane-dense packed output [p_gen*p_vocab | (1-p_gen)*attn | covloss].
# ----------------------------------------------------------------------------
def _decoder_kernel(dec_emb_ref, enc_out_ref, enc_proj_ref, mask_ref, h0_ref,
                    red_w_ref, red_b_ref,
                    wi_ref, whh_ref, bi_ref, bh_ref,
                    ws_w_ref, ws_b_ref, wc_w_ref, wc_b_ref, v_w_ref, v_b_ref,
                    fc_wc_ref, fc_wh_ref, fc_b_ref,
                    gw_c_ref, gw_h_ref, gw_x_ref, gen_b_ref,
                    out_ref, dec_h_sc, cov_sc):
    c = pl.program_id(0)
    Td, B, _E = dec_emb_ref.shape
    S = mask_ref.shape[1]
    H = dec_h_sc.shape[1]
    V = fc_b_ref.shape[1]
    W = out_ref.shape[2]

    @pl.when(c == 0)
    def _():
        dec_h_sc[...] = h0_ref[...]           # Reduce_State(enc_hidden), hoisted to XLA
        cov_sc[...] = jnp.zeros_like(cov_sc)

    # Hoist constant loads / broadcasts out of the unrolled step loop.
    enc_out = enc_out_ref[...]                # (B, S, 2H)
    enc_proj = enc_proj_ref[...]              # (B, S, H)  = Wh(enc_output), precomputed
    pad_mask = mask_ref[...] <= 0.0           # True where padding
    red_w = red_w_ref[...]; red_b = red_b_ref[...]
    wi = wi_ref[...]; whh = whh_ref[...]; bi = bi_ref[...]; bh = bh_ref[...]
    ws_w = ws_w_ref[...]; ws_b = ws_b_ref[...]
    wc_w = wc_w_ref[...][None, :, :]
    wc_b = wc_b_ref[...][None, :, :]
    v_w = v_w_ref[...][None, :, :]
    v_b = v_b_ref[...]
    fc_wc = fc_wc_ref[...]; fc_wh = fc_wh_ref[...]; fc_b = fc_b_ref[...]
    gw_c = gw_c_ref[...]; gw_h = gw_h_ref[...]; gw_x = gw_x_ref[...]
    gen_b = gen_b_ref[...]
    pad_w = W - (V + S + 1)
    pad = jnp.zeros((B, pad_w), jnp.float32) if pad_w > 0 else None

    def step(i, carry):
        h, cov = carry
        x = dec_emb_ref[i]                                        # (B, E)
        new_h = _gru_step(x, h, wi, whh, bi, bh, H)               # (B, H)

        # ---- coverage attention ----
        dec_proj = jnp.dot(new_h.astype(jnp.bfloat16), ws_w,
                           preferred_element_type=jnp.float32) + ws_b
        attn_in = enc_proj + dec_proj[:, None, :] + cov[:, :, None] * wc_w + wc_b
        scores = jnp.sum(jnp.tanh(attn_in) * v_w, axis=2) + v_b   # (B, S)
        scores = jnp.where(pad_mask, -1e30, scores)
        m = jnp.max(scores, axis=1, keepdims=True)
        e = jnp.exp(scores - m)
        attn = e * pl.reciprocal(jnp.sum(e, axis=1, keepdims=True), approx=True)
        cov_new = cov + attn

        # Context: VPU weighted sum (avoids B one-row MXU matmuls), then Reduce_State.
        ctx = jnp.sum(attn[:, :, None] * enc_out, axis=1)         # (B, 2H)
        ctx_red = jnp.dot(ctx.astype(jnp.bfloat16), red_w,
                          preferred_element_type=jnp.float32) + red_b

        # ---- vocab distribution: accumulated partial matmuls, no lane concat ----
        logits = (jnp.dot(ctx_red.astype(jnp.bfloat16), fc_wc,
                          preferred_element_type=jnp.float32)
                  + jnp.dot(new_h.astype(jnp.bfloat16), fc_wh,
                            preferred_element_type=jnp.float32)
                  + fc_b)                                          # (B, V)
        lm = jnp.max(logits, axis=1, keepdims=True)
        le = jnp.exp(logits - lm)
        p_vocab = le * pl.reciprocal(jnp.sum(le, axis=1, keepdims=True), approx=True)

        # ---- generation gate: three row-vector reductions (no concat / matvec) ----
        score = (jnp.sum(ctx_red * gw_c, axis=1, keepdims=True)
                 + jnp.sum(new_h * gw_h, axis=1, keepdims=True)
                 + jnp.sum(x * gw_x, axis=1, keepdims=True) + gen_b)
        p_gen = jnp.clip(jax.nn.sigmoid(score), 0.001, 0.999)

        # Faithful to the reference: cal_loss uses the POST-update coverage.
        covloss = jnp.sum(jnp.minimum(attn, cov_new), axis=1, keepdims=True)

        # ONE lane-dense packed store per step.
        pieces = [p_gen * p_vocab, (1.0 - p_gen) * attn, covloss]
        if pad is not None:
            pieces.append(pad)
        out_ref[i] = jnp.concatenate(pieces, axis=1)

        # Faithful to the reference loop: the next GRU "hidden" is the reduced
        # context vector, not the GRU hidden.
        return ctx_red, cov_new

    h, cov = lax.fori_loop(0, Td, step, (dec_h_sc[...], cov_sc[...]),
                           unroll=True)
    dec_h_sc[...] = h
    cov_sc[...] = cov


def decoder_steps(dec_emb_t, enc_output, enc_proj, src_mask, dec_h0, params,
                  steps_per_block=8):
    Tm1, B, E = dec_emb_t.shape
    _, S, H2 = enc_output.shape
    H = H2 // 2
    V = params['fc_w'].shape[1]
    W = _round_up(V + S + 1, 128)          # lane-dense packed output width
    Td = _chunk_size(Tm1, steps_per_block)
    C = Tm1 // Td

    bf16 = lambda a: a.astype(jnp.bfloat16)
    gru = params['dec_gru']
    att = params['att']
    fc_w, gen_w = params['fc_w'], params['gen_w']

    args = (dec_emb_t, enc_output, enc_proj, src_mask, dec_h0,
            bf16(params['red_w']), params['red_b'],
            bf16(gru['wi']), bf16(gru['wh']), gru['bi'], gru['bh'],
            bf16(att['ws_w']), att['ws_b'], att['wc_w'], att['wc_b'],
            att['v_w'], att['v_b'],
            bf16(fc_w[:H]), bf16(fc_w[H:]), params['fc_b'],
            gen_w[0:H].T, gen_w[H:2 * H].T, gen_w[2 * H:].T, params['gen_b'])

    in_specs = ([pl.BlockSpec((Td, B, E), lambda c: (c, 0, 0))]
                + [_const_spec(a.shape) for a in args[1:]])
    out_specs = pl.BlockSpec((Td, B, W), lambda c: (c, 0, 0))

    # TODO(synk): at realistic vocab sizes fc_w must be V-tiled (extra grid axis
    # + online softmax) instead of kept fully VMEM-resident.
    return pl.pallas_call(
        _decoder_kernel,
        out_shape=jax.ShapeDtypeStruct((Tm1, B, W), jnp.float32),
        grid=(C,),
        in_specs=in_specs,
        out_specs=out_specs,
        scratch_shapes=[pltpu.VMEM((B, H), jnp.float32),   # decoder hidden carry
                        pltpu.VMEM((B, S), jnp.float32)],  # coverage carry
        compiler_params=pltpu.CompilerParams(
            dimension_semantics=("arbitrary",),
            vmem_limit_bytes=48 * 1024 * 1024),
    )(*args)


# ----------------------------------------------------------------------------
# Parameters (deterministic synthetic init — no checkpoint loading)
# ----------------------------------------------------------------------------
def init_params(key, vocab_size, embed_size, hidden_size):
    keys = iter(jax.random.split(key, 64))

    def nrm(shape, scale=0.1):
        return (scale * jax.random.normal(next(keys), shape)).astype(jnp.float32)

    def gru_params(in_dim, h):
        # gates concatenated along the output axis in the order [r | z | n]
        return dict(wi=nrm((in_dim, 3 * h)), wh=nrm((h, 3 * h)),
                    bi=nrm((1, 3 * h)), bh=nrm((1, 3 * h)))

    H, E, V = hidden_size, embed_size, vocab_size
    return dict(
        enc_embed=nrm((V, E), 0.5),
        dec_embed=nrm((V, E), 0.5),
        enc_gru_f=gru_params(E, H),
        enc_gru_b=gru_params(E, H),
        dec_gru=gru_params(E, H),
        att_Wh_w=nrm((2 * H, H)), att_Wh_b=nrm((1, H)),
        att=dict(ws_w=nrm((H, H)), ws_b=nrm((1, H)),
                 wc_w=nrm((1, H)), wc_b=nrm((1, H)),
                 v_w=nrm((1, H)), v_b=nrm((1, 1))),
        red_w=nrm((2 * H, H)), red_b=nrm((1, H)),
        # fc over cat([ctx_red, dec_h]); w_gen over cat([ctx_red, dec_h, emb])
        fc_w=nrm((2 * H, V)), fc_b=nrm((1, V)),
        gen_w=nrm((2 * H + E, 1)), gen_b=nrm((1, 1)),
    )


def replace_oov(ids, vocab_size, unk_id=1):
    return jnp.where(ids >= vocab_size, unk_id, ids)


# ----------------------------------------------------------------------------
# PGN.forward
# ----------------------------------------------------------------------------
@functools.partial(jax.jit, static_argnames=('extend_len',))
def pgn_forward(params, src_vecs, src_mask, tgt_vecs, extend_len, lamb=1.0):
    # teacher_force is fixed to 1.0 (python random() in the reference is
    # non-deterministic); nn.Dropout is treated as identity (eval mode).
    B, S = src_vecs.shape
    T = tgt_vecs.shape[1]
    V, _E = params['enc_embed'].shape
    H = params['red_w'].shape[1]

    # Pad the batch axis to >= 8 sublanes for the kernels; slice back after.
    Bp = _round_up(max(B, 8), 8)
    pb = Bp - B
    src_ids_p = jnp.pad(replace_oov(src_vecs, V), ((0, pb), (0, 0)))
    mask_p = jnp.pad(src_mask, ((0, pb), (0, 0)))
    tgt_p = jnp.pad(tgt_vecs, ((0, pb), (0, 0)))

    # ----- Encoder: embedding gather + fused bidirectional GRU kernel -----
    emb_t = jnp.take(params['enc_embed'], src_ids_p, axis=0).transpose(1, 0, 2)  # (S,Bp,E)
    out_f, out_b = encoder_bigru(emb_t, params['enc_gru_f'], params['enc_gru_b'], H)
    enc_output = jnp.concatenate([out_f, out_b], axis=-1).transpose(1, 0, 2)     # (Bp,S,2H)
    enc_hidden = jnp.concatenate([out_f[S - 1], out_b[0]], axis=-1)               # (Bp,2H)

    # Decode-invariant projections hoisted out of the decoder kernel (XLA).
    enc_proj = jnp.einsum('bsd,dh->bsh', enc_output, params['att_Wh_w']) + params['att_Wh_b']
    dec_h0 = enc_hidden @ params['red_w'] + params['red_b']                       # (Bp,H)

    # ----- Decoder: all T-1 steps in one fused kernel -----
    # TODO(synk): PGN.forward passes src_mask as (B,1,S) which broadcasts oddly
    # against (B,S,1) scores in torch; we use the documented (B,S) convention.
    dec_ids = replace_oov(tgt_p[:, :T - 1], V)              # teacher forcing
    dec_emb_t = jnp.take(params['dec_embed'], dec_ids, axis=0).transpose(1, 0, 2)
    packed = decoder_steps(dec_emb_t, enc_output, enc_proj, mask_p, dec_h0, params)
    packed = packed[:, :B]                                   # drop batch padding
    pv_scaled = packed[..., :V]                              # (T-1,B,V) = p_gen*p_vocab
    attn_scaled = packed[..., V:V + S]                       # (T-1,B,S) = (1-p_gen)*attn
    cov_loss = packed[..., V + S]                            # (T-1,B)

    # ----- extend_prob (pointer scatter-add) + cal_loss, vectorized over steps -----
    Tm1 = T - 1
    p_ext = jnp.concatenate(
        [pv_scaled, jnp.zeros((Tm1, B, extend_len), jnp.float32)], axis=-1)
    t_idx = jnp.arange(Tm1)[:, None, None]
    b_idx = jnp.arange(B)[None, :, None]
    p_ext = p_ext.at[t_idx, b_idx, src_vecs[None, :, :]].add(attn_scaled)

    targets = tgt_vecs[:, 1:].T[:, :, None]                         # (T-1,B,1)
    target_prob = jnp.take_along_axis(p_ext, targets, axis=2)       # (T-1,B,1)
    nll = -jnp.log(target_prob[..., 0] + 1e-9)                      # (T-1,B)
    step_mask = (tgt_vecs[:, 1:] != 0).astype(jnp.float32).T        # (T-1,B)

    # TODO(synk): faithful to the torch reference's cal_loss, where (B,)*(B,1)
    # broadcasts to (B,B) per step; reproduced here as an outer product.
    per_step = nll + lamb * cov_loss                                 # (T-1,B)
    batch_loss = jnp.sum(step_mask[:, :, None] * per_step[:, None, :], axis=0)  # (B,B)

    tgt_mask = (tgt_vecs != 0).astype(jnp.float32)
    tgt_lens = jnp.sum(tgt_mask, axis=1) - 1.0
    return jnp.mean(batch_loss / tgt_lens[None, :])


if __name__ == "__main__":
    VOCAB, EMBED, HIDDEN = 32, 32, 32
    B, S, T = 2, 8, 5

    key = jax.random.PRNGKey(0)
    kp, ks, kt = jax.random.split(key, 3)
    params = init_params(kp, VOCAB, EMBED, HIDDEN)

    src_vecs = jax.random.randint(ks, (B, S), 1, VOCAB, dtype=jnp.int32)
    src_vecs = src_vecs.at[0, S - 2:].set(0)        # padding at end of sample 0
    src_vecs = src_vecs.at[1, 3].set(VOCAB)         # one OOV id -> extended vocab slot
    src_mask = (src_vecs != 0).astype(jnp.float32)  # (B,S): 1 = valid, 0 = pad

    tgt_vecs = jax.random.randint(kt, (B, T), 1, VOCAB, dtype=jnp.int32)
    tgt_vecs = tgt_vecs.at[0, T - 1].set(0)         # pad last target of sample 0

    oov_dicts = [["<oov_a>"], ["<oov_a>", "<oov_b>"]]
    extend_len = max(len(d) for d in oov_dicts)

    loss = pgn_forward(params, src_vecs, src_mask, tgt_vecs,
                       extend_len=extend_len, lamb=1.0)
    loss = jax.block_until_ready(loss)
    assert jnp.isfinite(loss)
    print("KERNEL_OK")
</pallas_src>

<mosaic_0001>
module attributes {stable_mosaic.version = 11 : i64} {
  func.func private @main(%arg0: i32) attributes {dimension_semantics = [#tpu.dimension_semantics<core_parallel>], iteration_bounds = array<i64: 2>, tpu.core_type = #tpu.core_type<sc_scalar_subcore>, window_params = []} {
    return
  }
}

module attributes {stable_mosaic.version = 11 : i64} {
  func.func private @main(%arg0: i32) attributes {dimension_semantics = [#tpu.dimension_semantics<core_parallel>], iteration_bounds = array<i64: 2>, tpu.core_type = #tpu.core_type<sc_scalar_subcore>, window_params = []} {
    return
  }
}

module attributes {stable_mosaic.version = 11 : i64} {
  func.func @_encoder_kernel(%arg0: i32, %arg1: memref<8x8x32xf32, #tpu.memory_space<vmem>>, %arg2: memref<8x8x32xf32, #tpu.memory_space<vmem>>, %arg3: memref<32x96xbf16, #tpu.memory_space<vmem>>, %arg4: memref<32x96xbf16, #tpu.memory_space<vmem>>, %arg5: memref<1x96xf32, #tpu.memory_space<vmem>>, %arg6: memref<1x96xf32, #tpu.memory_space<vmem>>, %arg7: memref<32x96xbf16, #tpu.memory_space<vmem>>, %arg8: memref<32x96xbf16, #tpu.memory_space<vmem>>, %arg9: memref<1x96xf32, #tpu.memory_space<vmem>>, %arg10: memref<1x96xf32, #tpu.memory_space<vmem>>, %arg11: memref<8x8x32xf32, #tpu.memory_space<vmem>>, %arg12: memref<8x8x32xf32, #tpu.memory_space<vmem>>, %arg13: memref<8x32xf32, #tpu.memory_space<vmem>>, %arg14: memref<8x32xf32, #tpu.memory_space<vmem>>) attributes {dimension_semantics = [#tpu.dimension_semantics<arbitrary>], iteration_bounds = array<i64: 1>, scalar_prefetch = 0 : i64, scratch_operands = 2 : i64, tpu.core_type = #tpu.core_type<tc>, window_params = [{transform_indices = @transform_0, window_bounds = array<i64: 8, 8, 32>}, {transform_indices = @transform_1, window_bounds = array<i64: 8, 8, 32>}, {pipeline_mode = #tpu.pipeline_mode<synchronous>, transform_indices = @transform_2, window_bounds = array<i64: 32, 96>}, {pipeline_mode = #tpu.pipeline_mode<synchronous>, transform_indices = @transform_3, window_bounds = array<i64: 32, 96>}, {pipeline_mode = #tpu.pipeline_mode<synchronous>, transform_indices = @transform_4, window_bounds = array<i64: 1, 96>}, {pipeline_mode = #tpu.pipeline_mode<synchronous>, transform_indices = @transform_5, window_bounds = array<i64: 1, 96>}, {pipeline_mode = #tpu.pipeline_mode<synchronous>, transform_indices = @transform_6, window_bounds = array<i64: 32, 96>}, {pipeline_mode = #tpu.pipeline_mode<synchronous>, transform_indices = @transform_7, window_bounds = array<i64: 32, 96>}, {pipeline_mode = #tpu.pipeline_mode<synchronous>, transform_indices = @transform_8, window_bounds = array<i64: 1, 96>}, {pipeline_mode = #tpu.pipeline_mode<synchronous>, transform_indices = @transform_9, window_bounds = array<i64: 1, 96>}, {transform_indices = @transform_10, window_bounds = array<i64: 8, 8, 32>}, {transform_indices = @transform_11, window_bounds = array<i64: 8, 8, 32>}]} {
    %c0_i32 = arith.constant 0 : i32
    %0 = arith.cmpi eq, %arg0, %c0_i32 : i32
    %1 = arith.extui %0 : i1 to i32
    %c0_i32_0 = arith.constant 0 : i32
    %2 = arith.cmpi ne, %1, %c0_i32_0 : i32
    scf.if %2 {
      %cst_184 = arith.constant 0.000000e+00 : f32
      %687 = vector.broadcast %cst_184 : f32 to vector<8x32xf32>
      %c0_185 = arith.constant 0 : index
      %c0_186 = arith.constant 0 : index
      %688 = vector.load %arg13[%c0_185, %c0_186] : memref<8x32xf32, #tpu.memory_space<vmem>>, vector<8x32xf32>
      tpu.vector_store %arg13[%c0_185, %c0_186], %687 {strides = array<i32>} : memref<8x32xf32, #tpu.memory_space<vmem>>, vector<8x32xf32>,
      %cst_187 = arith.constant 0.000000e+00 : f32
      %689 = vector.broadcast %cst_187 : f32 to vector<8x32xf32>
      %c0_188 = arith.constant 0 : index
      %c0_189 = arith.constant 0 : index
      %690 = vector.load %arg14[%c0_188, %c0_189] : memref<8x32xf32, #tpu.memory_space<vmem>>, vector<8x32xf32>
      tpu.vector_store %arg14[%c0_188, %c0_189], %689 {strides = array<i32>} : memref<8x32xf32, #tpu.memory_space<vmem>>, vector<8x32xf32>,
    } else {
    }
    %c0 = arith.constant 0 : index
    %c0_1 = arith.constant 0 : index
    %3 = vector.load %arg3[%c0, %c0_1] : memref<32x96xbf16, #tpu.memory_space<vmem>>, vector<32x96xbf16>
    %c0_2 = arith.constant 0 : index
    %c0_3 = arith.constant 0 : index
    %4 = vector.load %arg4[%c0_2, %c0_3] : memref<32x96xbf16, #tpu.memory_space<vmem>>, vector<32x96xbf16>
    %c0_4 = arith.constant 0 : index
    %c0_5 = arith.constant 0 : index
    %5 = vector.load %arg5[%c0_4, %c0_5] : memref<1x96xf32, #tpu.memory_space<vmem>>, vector<1x96xf32>
    %c0_6 = arith.constant 0 : index
    %c0_7 = arith.constant 0 : index
    %6 = vector.load %arg6[%c0_6, %c0_7] : memref<1x96xf32, #tpu.memory_space<vmem>>, vector<1x96xf32>
    %c0_8 = arith.constant 0 : index
    %c0_9 = arith.constant 0 : index
    %7 = vector.load %arg7[%c0_8, %c0_9] : memref<32x96xbf16, #tpu.memory_space<vmem>>, vector<32x96xbf16>
    %c0_10 = arith.constant 0 : index
    %c0_11 = arith.constant 0 : index
    %8 = vector.load %arg8[%c0_10, %c0_11] : memref<32x96xbf16, #tpu.memory_space<vmem>>, vector<32x96xbf16>
    %c0_12 = arith.constant 0 : index
    %c0_13 = arith.constant 0 : index
    %9 = vector.load %arg9[%c0_12, %c0_13] : memref<1x96xf32, #tpu.memory_space<vmem>>, vector<1x96xf32>
    %c0_14 = arith.constant 0 : index
    %c0_15 = arith.constant 0 : index
    %10 = vector.load %arg10[%c0_14, %c0_15] : memref<1x96xf32, #tpu.memory_space<vmem>>, vector<1x96xf32>
    %c0_16 = arith.constant 0 : index
    %c0_17 = arith.constant 0 : index
    %11 = vector.load %arg13[%c0_16, %c0_17] : memref<8x32xf32, #tpu.memory_space<vmem>>, vector<8x32xf32>
    %c0_18 = arith.constant 0 : index
    %c0_19 = arith.constant 0 : index
    %12 = vector.load %arg14[%c0_18, %c0_19] : memref<8x32xf32, #tpu.memory_space<vmem>>, vector<8x32xf32>
    %c0_i32_20 = arith.constant 0 : i32
    %13 = arith.index_cast %c0_i32_20 : i32 to index
    %c0_21 = arith.constant 0 : index
    %c0_22 = arith.constant 0 : index
    %14 = vector.load %arg1[%13, %c0_21, %c0_22] : memref<8x8x32xf32, #tpu.memory_space<vmem>>, vector<1x8x32xf32>
    %15 = vector.shape_cast %14 : vector<1x8x32xf32> to vector<8x32xf32>
    %16 = arith.truncf %15 : vector<8x32xf32> to vector<8x32xbf16>
    %cst = arith.constant dense<0.000000e+00> : vector<8x96xf32>
    %17 = tpu.matmul %16, %3, %cst {dimension_numbers = #tpu.dot_dimension_numbers<[1], [0], [0], [1], [0, 0, 1, 1], [], []>} : vector<8x32xbf16>, vector<32x96xbf16>, vector<8x96xf32> -> vector<8x96xf32>
    %18 = vector.broadcast %5 : vector<1x96xf32> to vector<8x96xf32>
    %19 = arith.addf %17, %18 : vector<8x96xf32>
    %20 = arith.truncf %11 : vector<8x32xf32> to vector<8x32xbf16>
    %cst_23 = arith.constant dense<0.000000e+00> : vector<8x96xf32>
    %21 = tpu.matmul %20, %4, %cst_23 {dimension_numbers = #tpu.dot_dimension_numbers<[1], [0], [0], [1], [0, 0, 1, 1], [], []>} : vector<8x32xbf16>, vector<32x96xbf16>, vector<8x96xf32> -> vector<8x96xf32>
    %22 = vector.broadcast %6 : vector<1x96xf32> to vector<8x96xf32>
    %23 = arith.addf %21, %22 : vector<8x96xf32>
    %24 = vector.extract_strided_slice %19 {offsets = [0, 0], sizes = [8, 32], strides = [1, 1]} : vector<8x96xf32> to vector<8x32xf32>
    %25 = vector.extract_strided_slice %23 {offsets = [0, 0], sizes = [8, 32], strides = [1, 1]} : vector<8x96xf32> to vector<8x32xf32>
    %26 = arith.addf %24, %25 : vector<8x32xf32>
    %27 = arith.negf %26 : vector<8x32xf32>
    %28 = math.exp %27 : vector<8x32xf32>
    %cst_24 = arith.constant 1.000000e+00 : f32
    %29 = vector.broadcast %cst_24 : f32 to vector<8x32xf32>
    %30 = arith.addf %29, %28 : vector<8x32xf32>
    %31 = arith.divf %29, %30 : vector<8x32xf32>
    %32 = vector.extract_strided_slice %19 {offsets = [0, 32], sizes = [8, 32], strides = [1, 1]} : vector<8x96xf32> to vector<8x32xf32>
    %33 = vector.extract_strided_slice %23 {offsets = [0, 32], sizes = [8, 32], strides = [1, 1]} : vector<8x96xf32> to vector<8x32xf32>
    %34 = arith.addf %32, %33 : vector<8x32xf32>
    %35 = arith.negf %34 : vector<8x32xf32>
    %36 = math.exp %35 : vector<8x32xf32>
    %cst_25 = arith.constant 1.000000e+00 : f32
    %37 = vector.broadcast %cst_25 : f32 to vector<8x32xf32>
    %38 = arith.addf %37, %36 : vector<8x32xf32>
    %39 = arith.divf %37, %38 : vector<8x32xf32>
    %40 = vector.extract_strided_slice %19 {offsets = [0, 64], sizes = [8, 32], strides = [1, 1]} : vector<8x96xf32> to vector<8x32xf32>
    %41 = vector.extract_strided_slice %23 {offsets = [0, 64], sizes = [8, 32], strides = [1, 1]} : vector<8x96xf32> to vector<8x32xf32>
    %42 = arith.mulf %31, %41 : vector<8x32xf32>
    %43 = arith.addf %40, %42 : vector<8x32xf32>
    %44 = math.tanh %43 : vector<8x32xf32>
    %cst_26 = arith.constant 1.000000e+00 : f32
    %45 = vector.broadcast %cst_26 : f32 to vector<8x32xf32>
    %46 = arith.subf %45, %39 : vector<8x32xf32>
    %47 = arith.mulf %46, %44 : vector<8x32xf32>
    %48 = arith.mulf %39, %11 : vector<8x32xf32>
    %49 = arith.addf %47, %48 : vector<8x32xf32>
    %c7_i32 = arith.constant 7 : i32
    %50 = arith.subi %c7_i32, %c0_i32_20 : i32
    %51 = arith.index_cast %50 : i32 to index
    %c0_27 = arith.constant 0 : index
    %c0_28 = arith.constant 0 : index
    %52 = vector.load %arg2[%51, %c0_27, %c0_28] : memref<8x8x32xf32, #tpu.memory_space<vmem>>, vector<1x8x32xf32>
    %53 = vector.shape_cast %52 : vector<1x8x32xf32> to vector<8x32xf32>
    %54 = arith.truncf %53 : vector<8x32xf32> to vector<8x32xbf16>
    %cst_29 = arith.constant dense<0.000000e+00> : vector<8x96xf32>
    %55 = tpu.matmul %54, %7, %cst_29 {dimension_numbers = #tpu.dot_dimension_numbers<[1], [0], [0], [1], [0, 0, 1, 1], [], []>} : vector<8x32xbf16>, vector<32x96xbf16>, vector<8x96xf32> -> vector<8x96xf32>
    %56 = vector.broadcast %9 : vector<1x96xf32> to vector<8x96xf32>
    %57 = arith.addf %55, %56 : vector<8x96xf32>
    %58 = arith.truncf %12 : vector<8x32xf32> to vector<8x32xbf16>
    %cst_30 = arith.constant dense<0.000000e+00> : vector<8x96xf32>
    %59 = tpu.matmul %58, %8, %cst_30 {dimension_numbers = #tpu.dot_dimension_numbers<[1], [0], [0], [1], [0, 0, 1, 1], [], []>} : vector<8x32xbf16>, vector<32x96xbf16>, vector<8x96xf32> -> vector<8x96xf32>
    %60 = vector.broadcast %10 : vector<1x96xf32> to vector<8x96xf32>
    %61 = arith.addf %59, %60 : vector<8x96xf32>
    %62 = vector.extract_strided_slice %57 {offsets = [0, 0], sizes = [8, 32], strides = [1, 1]} : vector<8x96xf32> to vector<8x32xf32>
    %63 = vector.extract_strided_slice %61 {offsets = [0, 0], sizes = [8, 32], strides = [1, 1]} : vector<8x96xf32> to vector<8x32xf32>
    %64 = arith.addf %62, %63 : vector<8x32xf32>
    %65 = arith.negf %64 : vector<8x32xf32>
    %66 = math.exp %65 : vector<8x32xf32>
    %cst_31 = arith.constant 1.000000e+00 : f32
    %67 = vector.broadcast %cst_31 : f32 to vector<8x32xf32>
    %68 = arith.addf %67, %66 : vector<8x32xf32>
    %69 = arith.divf %67, %68 : vector<8x32xf32>
    %70 = vector.extract_strided_slice %57 {offsets = [0, 32], sizes = [8, 32], strides = [1, 1]} : vector<8x96xf32> to vector<8x32xf32>
    %71 = vector.extract_strided_slice %61 {offsets = [0, 32], sizes = [8, 32], strides = [1, 1]} : vector<8x96xf32> to vector<8x32xf32>
    %72 = arith.addf %70, %71 : vector<8x32xf32>
    %73 = arith.negf %72 : vector<8x32xf32>
    %74 = math.exp %73 : vector<8x32xf32>
    %cst_32 = arith.constant 1.000000e+00 : f32
    %75 = vector.broadcast %cst_32 : f32 to vector<8x32xf32>
    %76 = arith.addf %75, %74 : vector<8x32xf32>
    %77 = arith.divf %75, %76 : vector<8x32xf32>
    %78 = vector.extract_strided_slice %57 {offsets = [0, 64], sizes = [8, 32], strides = [1, 1]} : vector<8x96xf32> to vector<8x32xf32>
    %79 = vector.extract_strided_slice %61 {offsets = [0, 64], sizes = [8, 32], strides = [1, 1]} : vector<8x96xf32> to vector<8x32xf32>
    %80 = arith.mulf %69, %79 : vector<8x32xf32>
    %81 = arith.addf %78, %80 : vector<8x32xf32>
    %82 = math.tanh %81 : vector<8x32xf32>
    %cst_33 = arith.constant 1.000000e+00 : f32
    %83 = vector.broadcast %cst_33 : f32 to vector<8x32xf32>
    %84 = arith.subf %83, %77 : vector<8x32xf32>
    %85 = arith.mulf %84, %82 : vector<8x32xf32>
    %86 = arith.mulf %77, %12 : vector<8x32xf32>
    %87 = arith.addf %85, %86 : vector<8x32xf32>
    %88 = arith.index_cast %c0_i32_20 : i32 to index
    %c0_34 = arith.constant 0 : index
    %c0_35 = arith.constant 0 : index
    %89 = vector.load %arg11[%88, %c0_34, %c0_35] : memref<8x8x32xf32, #tpu.memory_space<vmem>>, vector<1x8x32xf32>
    %90 = vector.shape_cast %89 : vector<1x8x32xf32> to vector<8x32xf32>
    %91 = vector.shape_cast %49 : vector<8x32xf32> to vector<1x8x32xf32>
    tpu.vector_store %arg11[%88, %c0_34, %c0_35], %91 {strides = array<i32>} : memref<8x8x32xf32, #tpu.memory_space<vmem>>, vector<1x8x32xf32>,
    %c7_i32_36 = arith.constant 7 : i32
    %92 = arith.subi %c7_i32_36, %c0_i32_20 : i32
    %93 = arith.index_cast %92 : i32 to index
    %c0_37 = arith.constant 0 : index
    %c0_38 = arith.constant 0 : index
    %94 = vector.load %arg12[%93, %c0_37, %c0_38] : memref<8x8x32xf32, #tpu.memory_space<vmem>>, vector<1x8x32xf32>
    %95 = vector.shape_cast %94 : vector<1x8x32xf32> to vector<8x32xf32>
    %96 = vector.shape_cast %87 : vector<8x32xf32> to vector<1x8x32xf32>
    tpu.vector_store %arg12[%93, %c0_37, %c0_38], %96 {strides = array<i32>} : memref<8x8x32xf32, #tpu.memory_space<vmem>>, vector<1x8x32xf32>,
    %c1_i32 = arith.constant 1 : i32
    %97 = arith.index_cast %c1_i32 : i32 to index
    %c0_39 = arith.constant 0 : index
    %c0_40 = arith.constant 0 : index
    %98 = vector.load %arg1[%97, %c0_39, %c0_40] : memref<8x8x32xf32, #tpu.memory_space<vmem>>, vector<1x8x32xf32>
    %99 = vector.shape_cast %98 : vector<1x8x32xf32> to vector<8x32xf32>
    %100 = arith.truncf %99 : vector<8x32xf32> to vector<8x32xbf16>
    %cst_41 = arith.constant dense<0.000000e+00> : vector<8x96xf32>
    %101 = tpu.matmul %100, %3, %cst_41 {dimension_numbers = #tpu.dot_dimension_numbers<[1], [0], [0], [1], [0, 0, 1, 1], [], []>} : vector<8x32xbf16>, vector<32x96xbf16>, vector<8x96xf32> -> vector<8x96xf32>
    %102 = vector.broadcast %5 : vector<1x96xf32> to vector<8x96xf32>
    %103 = arith.addf %101, %102 : vector<8x96xf32>
    %104 = arith.truncf %49 : vector<8x32xf32> to vector<8x32xbf16>
    %cst_42 = arith.constant dense<0.000000e+00> : vector<8x96xf32>
    %105 = tpu.matmul %104, %4, %cst_42 {dimension_numbers = #tpu.dot_dimension_numbers<[1], [0], [0], [1], [0, 0, 1, 1], [], []>} : vector<8x32xbf16>, vector<32x96xbf16>, vector<8x96xf32> -> vector<8x96xf32>
    %106 = vector.broadcast %6 : vector<1x96xf32> to vector<8x96xf32>
    %107 = arith.addf %105, %106 : vector<8x96xf32>
    %108 = vector.extract_strided_slice %103 {offsets = [0, 0], sizes = [8, 32], strides = [1, 1]} : vector<8x96xf32> to vector<8x32xf32>
    %109 = vector.extract_strided_slice %107 {offsets = [0, 0], sizes = [8, 32], strides = [1, 1]} : vector<8x96xf32> to vector<8x32xf32>
    %110 = arith.addf %108, %109 : vector<8x32xf32>
    %111 = arith.negf %110 : vector<8x32xf32>
    %112 = math.exp %111 : vector<8x32xf32>
    %cst_43 = arith.constant 1.000000e+00 : f32
    %113 = vector.broadcast %cst_43 : f32 to vector<8x32xf32>
    %114 = arith.addf %113, %112 : vector<8x32xf32>
    %115 = arith.divf %113, %114 : vector<8x32xf32>
    %116 = vector.extract_strided_slice %103 {offsets = [0, 32], sizes = [8, 32], strides = [1, 1]} : vector<8x96xf32> to vector<8x32xf32>
    %117 = vector.extract_strided_slice %107 {offsets = [0, 32], sizes = [8, 32], strides = [1, 1]} : vector<8x96xf32> to vector<8x32xf32>
    %118 = arith.addf %116, %117 : vector<8x32xf32>
    %119 = arith.negf %118 : vector<8x32xf32>
    %120 = math.exp %119 : vector<8x32xf32>
    %cst_44 = arith.constant 1.000000e+00 : f32
    %121 = vector.broadcast %cst_44 : f32 to vector<8x32xf32>
    %122 = arith.addf %121, %120 : vector<8x32xf32>
    %123 = arith.divf %121, %122 : vector<8x32xf32>
    %124 = vector.extract_strided_slice %103 {offsets = [0, 64], sizes = [8, 32], strides = [1, 1]} : vector<8x96xf32> to vector<8x32xf32>
    %125 = vector.extract_strided_slice %107 {offsets = [0, 64], sizes = [8, 32], strides = [1, 1]} : vector<8x96xf32> to vector<8x32xf32>
    %126 = arith.mulf %115, %125 : vector<8x32xf32>
    %127 = arith.addf %124, %126 : vector<8x32xf32>
    %128 = math.tanh %127 : vector<8x32xf32>
    %cst_45 = arith.constant 1.000000e+00 : f32
    %129 = vector.broadcast %cst_45 : f32 to vector<8x32xf32>
    %130 = arith.subf %129, %123 : vector<8x32xf32>
    %131 = arith.mulf %130, %128 : vector<8x32xf32>
    %132 = arith.mulf %123, %49 : vector<8x32xf32>
    %133 = arith.addf %131, %132 : vector<8x32xf32>
    %c7_i32_46 = arith.constant 7 : i32
    %134 = arith.subi %c7_i32_46, %c1_i32 : i32
    %135 = arith.index_cast %134 : i32 to index
    %c0_47 = arith.constant 0 : index
    %c0_48 = arith.constant 0 : index
    %136 = vector.load %arg2[%135, %c0_47, %c0_48] : memref<8x8x32xf32, #tpu.memory_space<vmem>>, vector<1x8x32xf32>
    %137 = vector.shape_cast %136 : vector<1x8x32xf32> to vector<8x32xf32>
    %138 = arith.truncf %137 : vector<8x32xf32> to vector<8x32xbf16>
    %cst_49 = arith.constant dense<0.000000e+00> : vector<8x96xf32>
    %139 = tpu.matmul %138, %7, %cst_49 {dimension_numbers = #tpu.dot_dimension_numbers<[1], [0], [0], [1], [0, 0, 1, 1], [], []>} : vector<8x32xbf16>, vector<32x96xbf16>, vector<8x96xf32> -> vector<8x96xf32>
    %140 = vector.broadcast %9 : vector<1x96xf32> to vector<8x96xf32>
    %141 = arith.addf %139, %140 : vector<8x96xf32>
    %142 = arith.truncf %87 : vector<8x32xf32> to vector<8x32xbf16>
    %cst_50 = arith.constant dense<0.000000e+00> : vector<8x96xf32>
    %143 = tpu.matmul %142, %8, %cst_50 {dimension_numbers = #tpu.dot_dimension_numbers<[1], [0], [0], [1], [0, 0, 1, 1], [], []>} : vector<8x32xbf16>, vector<32x96xbf16>, vector<8x96xf32> -> vector<8x96xf32>
    %144 = vector.broadcast %10 : vector<1x96xf32> to vector<8x96xf32>
    %145 = arith.addf %143, %144 : vector<8x96xf32>
    %146 = vector.extract_strided_slice %141 {offsets = [0, 0], sizes = [8, 32], strides = [1, 1]} : vector<8x96xf32> to vector<8x32xf32>
    %147 = vector.extract_strided_slice %145 {offsets = [0, 0], sizes = [8, 32], strides = [1, 1]} : vector<8x96xf32> to vector<8x32xf32>
    %148 = arith.addf %146, %147 : vector<8x32xf32>
    %149 = arith.negf %148 : vector<8x32xf32>
    %150 = math.exp %149 : vector<8x32xf32>
    %cst_51 = arith.constant 1.000000e+00 : f32
    %151 = vector.broadcast %cst_51 : f32 to vector<8x32xf32>
    %152 = arith.addf %151, %150 : vector<8x32xf32>
    %153 = arith.divf %151, %152 : vector<8x32xf32>
    %154 = vector.extract_strided_slice %141 {offsets = [0, 32], sizes = [8, 32], strides = [1, 1]} : vector<8x96xf32> to vector<8x32xf32>
    %155 = vector.extract_strided_slice %145 {offsets = [0, 32], sizes = [8, 32], strides = [1, 1]} : vector<8x96xf32> to vector<8x32xf32>
    %156 = arith.addf %154, %155 : vector<8x32xf32>
    %157 = arith.negf %156 : vector<8x32xf32>
    %158 = math.exp %157 : vector<8x32xf32>
    %cst_52 = arith.constant 1.000000e+00 : f32
    %159 = vector.broadcast %cst_52 : f32 to vector<8x32xf32>
    %160 = arith.addf %159, %158 : vector<8x32xf32>
    %161 = arith.divf %159, %160 : vector<8x32xf32>
    %162 = vector.extract_strided_slice %141 {offsets = [0, 64], sizes = [8, 32], strides = [1, 1]} : vector<8x96xf32> to vector<8x32xf32>
    %163 = vector.extract_strided_slice %145 {offsets = [0, 64], sizes = [8, 32], strides = [1, 1]} : vector<8x96xf32> to vector<8x32xf32>
    %164 = arith.mulf %153, %163 : vector<8x32xf32>
    %165 = arith.addf %162, %164 : vector<8x32xf32>
    %166 = math.tanh %165 : vector<8x32xf32>
    %cst_53 = arith.constant 1.000000e+00 : f32
    %167 = vector.broadcast %cst_53 : f32 to vector<8x32xf32>
    %168 = arith.subf %167, %161 : vector<8x32xf32>
    %169 = arith.mulf %168, %166 : vector<8x32xf32>
    %170 = arith.mulf %161, %87 : vector<8x32xf32>
    %171 = arith.addf %169, %170 : vector<8x32xf32>
    %172 = arith.index_cast %c1_i32 : i32 to index
    %c0_54 = arith.constant 0 : index
    %c0_55 = arith.constant 0 : index
    %173 = vector.load %arg11[%172, %c0_54, %c0_55] : memref<8x8x32xf32, #tpu.memory_space<vmem>>, vector<1x8x32xf32>
    %174 = vector.shape_cast %173 : vector<1x8x32xf32> to vector<8x32xf32>
    %175 = vector.shape_cast %133 : vector<8x32xf32> to vector<1x8x32xf32>
    tpu.vector_store %arg11[%172, %c0_54, %c0_55], %175 {strides = array<i32>} : memref<8x8x32xf32, #tpu.memory_space<vmem>>, vector<1x8x32xf32>,
    %c7_i32_56 = arith.constant 7 : i32
    %176 = arith.subi %c7_i32_56, %c1_i32 : i32
    %177 = arith.index_cast %176 : i32 to index
    %c0_57 = arith.constant 0 : index
    %c0_58 = arith.constant 0 : index
    %178 = vector.load %arg12[%177, %c0_57, %c0_58] : memref<8x8x32xf32, #tpu.memory_space<vmem>>, vector<1x8x32xf32>
    %179 = vector.shape_cast %178 : vector<1x8x32xf32> to vector<8x32xf32>
    %180 = vector.shape_cast %171 : vector<8x32xf32> to vector<1x8x32xf32>
    tpu.vector_store %arg12[%177, %c0_57, %c0_58], %180 {strides = array<i32>} : memref<8x8x32xf32, #tpu.memory_space<vmem>>, vector<1x8x32xf32>,
    %c2_i32 = arith.constant 2 : i32
    %181 = arith.index_cast %c2_i32 : i32 to index
    %c0_59 = arith.constant 0 : index
    %c0_60 = arith.constant 0 : index
    %182 = vector.load %arg1[%181, %c0_59, %c0_60] : memref<8x8x32xf32, #tpu.memory_space<vmem>>, vector<1x8x32xf32>
    %183 = vector.shape_cast %182 : vector<1x8x32xf32> to vector<8x32xf32>
    %184 = arith.truncf %183 : vector<8x32xf32> to vector<8x32xbf16>
    %cst_61 = arith.constant dense<0.000000e+00> : vector<8x96xf32>
    %185 = tpu.matmul %184, %3, %cst_61 {dimension_numbers = #tpu.dot_dimension_numbers<[1], [0], [0], [1], [0, 0, 1, 1], [], []>} : vector<8x32xbf16>, vector<32x96xbf16>, vector<8x96xf32> -> vector<8x96xf32>
    %186 = vector.broadcast %5 : vector<1x96xf32> to vector<8x96xf32>
    %187 = arith.addf %185, %186 : vector<8x96xf32>
    %188 = arith.truncf %133 : vector<8x32xf32> to vector<8x32xbf16>
    %cst_62 = arith.constant dense<0.000000e+00> : vector<8x96xf32>
    %189 = tpu.matmul %188, %4, %cst_62 {dimension_numbers = #tpu.dot_dimension_numbers<[1], [0], [0], [1], [0, 0, 1, 1], [], []>} : vector<8x32xbf16>, vector<32x96xbf16>, vector<8x96xf32> -> vector<8x96xf32>
    %190 = vector.broadcast %6 : vector<1x96xf32> to vector<8x96xf32>
    %191 = arith.addf %189, %190 : vector<8x96xf32>
    %192 = vector.extract_strided_slice %187 {offsets = [0, 0], sizes = [8, 32], strides = [1, 1]} : vector<8x96xf32> to vector<8x32xf32>
    %193 = vector.extract_strided_slice %191 {offsets = [0, 0], sizes = [8, 32], strides = [1, 1]} : vector<8x96xf32> to vector<8x32xf32>
    %194 = arith.addf %192, %193 : vector<8x32xf32>
    %195 = arith.negf %194 : vector<8x32xf32>
    %196 = math.exp %195 : vector<8x32xf32>
    %cst_63 = arith.constant 1.000000e+00 : f32
    %197 = vector.broadcast %cst_63 : f32 to vector<8x32xf32>
    %198 = arith.addf %197, %196 : vector<8x32xf32>
    %199 = arith.divf %197, %198 : vector<8x32xf32>
    %200 = vector.extract_strided_slice %187 {offsets = [0, 32], sizes = [8, 32], strides = [1, 1]} : vector<8x96xf32> to vector<8x32xf32>
    %201 = vector.extract_strided_slice %191 {offsets = [0, 32], sizes = [8, 32], strides = [1, 1]} : vector<8x96xf32> to vector<8x32xf32>
    %202 = arith.addf %200, %201 : vector<8x32xf32>
    %203 = arith.negf %202 : vector<8x32xf32>
    %204 = math.exp %203 : vector<8x32xf32>
    %cst_64 = arith.constant 1.000000e+00 : f32
    %205 = vector.broadcast %cst_64 : f32 to vector<8x32xf32>
    %206 = arith.addf %205, %204 : vector<8x32xf32>
    %207 = arith.divf %205, %206 : vector<8x32xf32>
    %208 = vector.extract_strided_slice %187 {offsets = [0, 64], sizes = [8, 32], strides = [1, 1]} : vector<8x96xf32> to vector<8x32xf32>
    %209 = vector.extract_strided_slice %191 {offsets = [0, 64], sizes = [8, 32], strides = [1, 1]} : vector<8x96xf32> to vector<8x32xf32>
    %210 = arith.mulf %199, %209 : vector<8x32xf32>
    %211 = arith.addf %208, %210 : vector<8x32xf32>
    %212 = math.tanh %211 : vector<8x32xf32>
    %cst_65 = arith.constant 1.000000e+00 : f32
    %213 = vector.broadcast %cst_65 : f32 to vector<8x32xf32>
    %214 = arith.subf %213, %207 : vector<8x32xf32>
    %215 = arith.mulf %214, %212 : vector<8x32xf32>
    %216 = arith.mulf %207, %133 : vector<8x32xf32>
    %217 = arith.addf %215, %216 : vector<8x32xf32>
    %c7_i32_66 = arith.constant 7 : i32
    %218 = arith.subi %c7_i32_66, %c2_i32 : i32
    %219 = arith.index_cast %218 : i32 to index
    %c0_67 = arith.constant 0 : index
    %c0_68 = arith.constant 0 : index
    %220 = vector.load %arg2[%219, %c0_67, %c0_68] : memref<8x8x32xf32, #tpu.memory_space<vmem>>, vector<1x8x32xf32>
    %221 = vector.shape_cast %220 : vector<1x8x32xf32> to vector<8x32xf32>
    %222 = arith.truncf %221 : vector<8x32xf32> to vector<8x32xbf16>
    %cst_69 = arith.constant dense<0.000000e+00> : vector<8x96xf32>
    %223 = tpu.matmul %222, %7, %cst_69 {dimension_numbers = #tpu.dot_dimension_numbers<[1], [0], [0], [1], [0, 0, 1, 1], [], []>} : vector<8x32xbf16>, vector<32x96xbf16>, vector<8x96xf32> -> vector<8x96xf32>
    %224 = vector.broadcast %9 : vector<1x96xf32> to vector<8x96xf32>
    %225 = arith.addf %223, %224 : vector<8x96xf32>
    %226 = arith.truncf %171 : vector<8x32xf32> to vector<8x32xbf16>
    %cst_70 = arith.constant dense<0.000000e+00> : vector<8x96xf32>
    %227 = tpu.matmul %226, %8, %cst_70 {dimension_numbers = #tpu.dot_dimension_numbers<[1], [0], [0], [1], [0, 0, 1, 1], [], []>} : vector<8x32xbf16>, vector<32x96xbf16>, vector<8x96xf32> -> vector<8x96xf32>
    %228 = vector.broadcast %10 : vector<1x96xf32> to vector<8x96xf32>
    %229 = arith.addf %227, %228 : vector<8x96xf32>
    %230 = vector.extract_strided_slice %225 {offsets = [0, 0], sizes = [8, 32], strides = [1, 1]} : vector<8x96xf32> to vector<8x32xf32>
    %231 = vector.extract_strided_slice %229 {offsets = [0, 0], sizes = [8, 32], strides = [1, 1]} : vector<8x96xf32> to vector<8x32xf32>
    %232 = arith.addf %230, %231 : vector<8x32xf32>
    %233 = arith.negf %232 : vector<8x32xf32>
    %234 = math.exp %233 : vector<8x32xf32>
    %cst_71 = arith.constant 1.000000e+00 : f32
    %235 = vector.broadcast %cst_71 : f32 to vector<8x32xf32>
    %236 = arith.addf %235, %234 : vector<8x32xf32>
    %237 = arith.divf %235, %236 : vector<8x32xf32>
    %238 = vector.extract_strided_slice %225 {offsets = [0, 32], sizes = [8, 32], strides = [1, 1]} : vector<8x96xf32> to vector<8x32xf32>
    %239 = vector.extract_strided_slice %229 {offsets = [0, 32], sizes = [8, 32], strides = [1, 1]} : vector<8x96xf32> to vector<8x32xf32>
    %240 = arith.addf %238, %239 : vector<8x32xf32>
    %241 = arith.negf %240 : vector<8x32xf32>
    %242 = math.exp %241 : vector<8x32xf32>
    %cst_72 = arith.constant 1.000000e+00 : f32
    %243 = vector.broadcast %cst_72 : f32 to vector<8x32xf32>
    %244 = arith.addf %243, %242 : vector<8x32xf32>
    %245 = arith.divf %243, %244 : vector<8x32xf32>
    %246 = vector.extract_strided_slice %225 {offsets = [0, 64], sizes = [8, 32], strides = [1, 1]} : vector<8x96xf32> to vector<8x32xf32>
    %247 = vector.extract_strided_slice %229 {offsets = [0, 64], sizes = [8, 32], strides = [1, 1]} : vector<8x96xf32> to vector<8x32xf32>
    %248 = arith.mulf %237, %247 : vector<8x32xf32>
    %249 = arith.addf %246, %248 : vector<8x32xf32>
    %250 = math.tanh %249 : vector<8x32xf32>
    %cst_73 = arith.constant 1.000000e+00 : f32
    %251 = vector.broadcast %cst_73 : f32 to vector<8x32xf32>
    %252 = arith.subf %251, %245 : vector<8x32xf32>
    %253 = arith.mulf %252, %250 : vector<8x32xf32>
    %254 = arith.mulf %245, %171 : vector<8x32xf32>
    %255 = arith.addf %253, %254 : vector<8x32xf32>
    %256 = arith.index_cast %c2_i32 : i32 to index
    %c0_74 = arith.constant 0 : index
    %c0_75 = arith.constant 0 : index
    %257 = vector.load %arg11[%256, %c0_74, %c0_75] : memref<8x8x32xf32, #tpu.memory_space<vmem>>, vector<1x8x32xf32>
    %258 = vector.shape_cast %257 : vector<1x8x32xf32> to vector<8x32xf32>
    %259 = vector.shape_cast %217 : vector<8x32xf32> to vector<1x8x32xf32>
    tpu.vector_store %arg11[%256, %c0_74, %c0_75], %259 {strides = array<i32>} : memref<8x8x32xf32, #tpu.memory_space<vmem>>, vector<1x8x32xf32>,
    %c7_i32_76 = arith.constant 7 : i32
    %260 = arith.subi %c7_i32_76, %c2_i32 : i32
    %261 = arith.index_cast %260 : i32 to index
    %c0_77 = arith.constant 0 : index
    %c0_78 = arith.constant 0 : index
    %262 = vector.load %arg12[%261, %c0_77, %c0_78] : memref<8x8x32xf32, #tpu.memory_space<vmem>>, vector<1x8x32xf32>
    %263 = vector.shape_cast %262 : vector<1x8x32xf32> to vector<8x32xf32>
    %264 = vector.shape_cast %255 : vector<8x32xf32> to vector<1x8x32xf32>
    tpu.vector_store %arg12[%261, %c0_77, %c0_78], %264 {strides = array<i32>} : memref<8x8x32xf32, #tpu.memory_space<vmem>>, vector<1x8x32xf32>,
    %c3_i32 = arith.constant 3 : i32
    %265 = arith.index_cast %c3_i32 : i32 to index
    %c0_79 = arith.constant 0 : index
    %c0_80 = arith.constant 0 : index
    %266 = vector.load %arg1[%265, %c0_79, %c0_80] : memref<8x8x32xf32, #tpu.memory_space<vmem>>, vector<1x8x32xf32>
    %267 = vector.shape_cast %266 : vector<1x8x32xf32> to vector<8x32xf32>
    %268 = arith.truncf %267 : vector<8x32xf32> to vector<8x32xbf16>
    %cst_81 = arith.constant dense<0.000000e+00> : vector<8x96xf32>
    %269 = tpu.matmul %268, %3, %cst_81 {dimension_numbers = #tpu.dot_dimension_numbers<[1], [0], [0], [1], [0, 0, 1, 1], [], []>} : vector<8x32xbf16>, vector<32x96xbf16>, vector<8x96xf32> -> vector<8x96xf32>
    %270 = vector.broadcast %5 : vector<1x96xf32> to vector<8x96xf32>
    %271 = arith.addf %269, %270 : vector<8x96xf32>
    %272 = arith.truncf %217 : vector<8x32xf32> to vector<8x32xbf16>
    %cst_82 = arith.constant dense<0.000000e+00> : vector<8x96xf32>
    %273 = tpu.matmul %272, %4, %cst_82 {dimension_numbers = #tpu.dot_dimension_numbers<[1], [0], [0], [1], [0, 0, 1, 1], [], []>} : vector<8x32xbf16>, vector<32x96xbf16>, vector<8x96xf32> -> vector<8x96xf32>
    %274 = vector.broadcast %6 : vector<1x96xf32> to vector<8x96xf32>
    %275 = arith.addf %273, %274 : vector<8x96xf32>
    %276 = vector.extract_strided_slice %271 {offsets = [0, 0], sizes = [8, 32], strides = [1, 1]} : vector<8x96xf32> to vector<8x32xf32>
    %277 = vector.extract_strided_slice %275 {offsets = [0, 0], sizes = [8, 32], strides = [1, 1]} : vector<8x96xf32> to vector<8x32xf32>
    %278 = arith.addf %276, %277 : vector<8x32xf32>
    %279 = arith.negf %278 : vector<8x32xf32>
    %280 = math.exp %279 : vector<8x32xf32>
    %cst_83 = arith.constant 1.000000e+00 : f32
    %281 = vector.broadcast %cst_83 : f32 to vector<8x32xf32>
    %282 = arith.addf %281, %280 : vector<8x32xf32>
    %283 = arith.divf %281, %282 : vector<8x32xf32>
    %284 = vector.extract_strided_slice %271 {offsets = [0, 32], sizes = [8, 32], strides = [1, 1]} : vector<8x96xf32> to vector<8x32xf32>
    %285 = vector.extract_strided_slice %275 {offsets = [0, 32], sizes = [8, 32], strides = [1, 1]} : vector<8x96xf32> to vector<8x32xf32>
    %286 = arith.addf %284, %285 : vector<8x32xf32>
    %287 = arith.negf %286 : vector<8x32xf32>
    %288 = math.exp %287 : vector<8x32xf32>
    %cst_84 = arith.constant 1.000000e+00 : f32
    %289 = vector.broadcast %cst_84 : f32 to vector<8x32xf32>
    %290 = arith.addf %289, %288 : vector<8x32xf32>
    %291 = arith.divf %289, %290 : vector<8x32xf32>
    %292 = vector.extract_strided_slice %271 {offsets = [0, 64], sizes = [8, 32], strides = [1, 1]} : vector<8x96xf32> to vector<8x32xf32>
    %293 = vector.extract_strided_slice %275 {offsets = [0, 64], sizes = [8, 32], strides = [1, 1]} : vector<8x96xf32> to vector<8x32xf32>
    %294 = arith.mulf %283, %293 : vector<8x32xf32>
    %295 = arith.addf %292, %294 : vector<8x32xf32>
    %296 = math.tanh %295 : vector<8x32xf32>
    %cst_85 = arith.constant 1.000000e+00 : f32
    %297 = vector.broadcast %cst_85 : f32 to vector<8x32xf32>
    %298 = arith.subf %297, %291 : vector<8x32xf32>
    %299 = arith.mulf %298, %296 : vector<8x32xf32>
    %300 = arith.mulf %291, %217 : vector<8x32xf32>
    %301 = arith.addf %299, %300 : vector<8x32xf32>
    %c7_i32_86 = arith.constant 7 : i32
    %302 = arith.subi %c7_i32_86, %c3_i32 : i32
    %303 = arith.index_cast %302 : i32 to index
    %c0_87 = arith.constant 0 : index
    %c0_88 = arith.constant 0 : index
    %304 = vector.load %arg2[%303, %c0_87, %c0_88] : memref<8x8x32xf32, #tpu.memory_space<vmem>>, vector<1x8x32xf32>
    %305 = vector.shape_cast %304 : vector<1x8x32xf32> to vector<8x32xf32>
    %306 = arith.truncf %305 : vector<8x32xf32> to vector<8x32xbf16>
    %cst_89 = arith.constant dense<0.000000e+00> : vector<8x96xf32>
    %307 = tpu.matmul %306, %7, %cst_89 {dimension_numbers = #tpu.dot_dimension_numbers<[1], [0], [0], [1], [0, 0, 1, 1], [], []>} : vector<8x32xbf16>, vector<32x96xbf16>, vector<8x96xf32> -> vector<8x96xf32>
    %308 = vector.broadcast %9 : vector<1x96xf32> to vector<8x96xf32>
    %309 = arith.addf %307, %308 : vector<8x96xf32>
    %310 = arith.truncf %255 : vector<8x32xf32> to vector<8x32xbf16>
    %cst_90 = arith.constant dense<0.000000e+00> : vector<8x96xf32>
    %311 = tpu.matmul %310, %8, %cst_90 {dimension_numbers = #tpu.dot_dimension_numbers<[1], [0], [0], [1], [0, 0, 1, 1], [], []>} : vector<8x32xbf16>, vector<32x96xbf16>, vector<8x96xf32> -> vector<8x96xf32>
    %312 = vector.broadcast %10 : vector<1x96xf32> to vector<8x96xf32>
    %313 = arith.addf %311, %312 : vector<8x96xf32>
    %314 = vector.extract_strided_slice %309 {offsets = [0, 0], sizes = [8, 32], strides = [1, 1]} : vector<8x96xf32> to vector<8x32xf32>
    %315 = vector.extract_strided_slice %313 {offsets = [0, 0], sizes = [8, 32], strides = [1, 1]} : vector<8x96xf32> to vector<8x32xf32>
    %316 = arith.addf %314, %315 : vector<8x32xf32>
    %317 = arith.negf %316 : vector<8x32xf32>
    %318 = math.exp %317 : vector<8x32xf32>
    %cst_91 = arith.constant 1.000000e+00 : f32
    %319 = vector.broadcast %cst_91 : f32 to vector<8x32xf32>
    %320 = arith.addf %319, %318 : vector<8x32xf32>
    %321 = arith.divf %319, %320 : vector<8x32xf32>
    %322 = vector.extract_strided_slice %309 {offsets = [0, 32], sizes = [8, 32], strides = [1, 1]} : vector<8x96xf32> to vector<8x32xf32>
    %323 = vector.extract_strided_slice %313 {offsets = [0, 32], sizes = [8, 32], strides = [1, 1]} : vector<8x96xf32> to vector<8x32xf32>
    %324 = arith.addf %322, %323 : vector<8x32xf32>
    %325 = arith.negf %324 : vector<8x32xf32>
    %326 = math.exp %325 : vector<8x32xf32>
    %cst_92 = arith.constant 1.000000e+00 : f32
    %327 = vector.broadcast %cst_92 : f32 to vector<8x32xf32>
    %328 = arith.addf %327, %326 : vector<8x32xf32>
    %329 = arith.divf %327, %328 : vector<8x32xf32>
    %330 = vector.extract_strided_slice %309 {offsets = [0, 64], sizes = [8, 32], strides = [1, 1]} : vector<8x96xf32> to vector<8x32xf32>
    %331 = vector.extract_strided_slice %313 {offsets = [0, 64], sizes = [8, 32], strides = [1, 1]} : vector<8x96xf32> to vector<8x32xf32>
    %332 = arith.mulf %321, %331 : vector<8x32xf32>
    %333 = arith.addf %330, %332 : vector<8x32xf32>
    %334 = math.tanh %333 : vector<8x32xf32>
    %cst_93 = arith.constant 1.000000e+00 : f32
    %335 = vector.broadcast %cst_93 : f32 to vector<8x32xf32>
    %336 = arith.subf %335, %329 : vector<8x32xf32>
    %337 = arith.mulf %336, %334 : vector<8x32xf32>
    %338 = arith.mulf %329, %255 : vector<8x32xf32>
    %339 = arith.addf %337, %338 : vector<8x32xf32>
    %340 = arith.index_cast %c3_i32 : i32 to index
    %c0_94 = arith.constant 0 : index
    %c0_95 = arith.constant 0 : index
    %341 = vector.load %arg11[%340, %c0_94, %c0_95] : memref<8x8x32xf32, #tpu.memory_space<vmem>>, vector<1x8x32xf32>
    %342 = vector.shape_cast %341 : vector<1x8x32xf32> to vector<8x32xf32>
    %343 = vector.shape_cast %301 : vector<8x32xf32> to vector<1x8x32xf32>
    tpu.vector_store %arg11[%340, %c0_94, %c0_95], %343 {strides = array<i32>} : memref<8x8x32xf32, #tpu.memory_space<vmem>>, vector<1x8x32xf32>,
    %c7_i32_96 = arith.constant 7 : i32
    %344 = arith.subi %c7_i32_96, %c3_i32 : i32
    %345 = arith.index_cast %344 : i32 to index
    %c0_97 = arith.constant 0 : index
    %c0_98 = arith.constant 0 : index
    %346 = vector.load %arg12[%345, %c0_97, %c0_98] : memref<8x8x32xf32, #tpu.memory_space<vmem>>, vector<1x8x32xf32>
    %347 = vector.shape_cast %346 : vector<1x8x32xf32> to vector<8x32xf32>
    %348 = vector.shape_cast %339 : vector<8x32xf32> to vector<1x8x32xf32>
    tpu.vector_store %arg12[%345, %c0_97, %c0_98], %348 {strides = array<i32>} : memref<8x8x32xf32, #tpu.memory_space<vmem>>, vector<1x8x32xf32>,
    %c4_i32 = arith.constant 4 : i32
    %349 = arith.index_cast %c4_i32 : i32 to index
    %c0_99 = arith.constant 0 : index
    %c0_100 = arith.constant 0 : index
    %350 = vector.load %arg1[%349, %c0_99, %c0_100] : memref<8x8x32xf32, #tpu.memory_space<vmem>>, vector<1x8x32xf32>
    %351 = vector.shape_cast %350 : vector<1x8x32xf32> to vector<8x32xf32>
    %352 = arith.truncf %351 : vector<8x32xf32> to vector<8x32xbf16>
    %cst_101 = arith.constant dense<0.000000e+00> : vector<8x96xf32>
    %353 = tpu.matmul %352, %3, %cst_101 {dimension_numbers = #tpu.dot_dimension_numbers<[1], [0], [0], [1], [0, 0, 1, 1], [], []>} : vector<8x32xbf16>, vector<32x96xbf16>, vector<8x96xf32> -> vector<8x96xf32>
    %354 = vector.broadcast %5 : vector<1x96xf32> to vector<8x96xf32>
    %355 = arith.addf %353, %354 : vector<8x96xf32>
    %356 = arith.truncf %301 : vector<8x32xf32> to vector<8x32xbf16>
    %cst_102 = arith.constant dense<0.000000e+00> : vector<8x96xf32>
    %357 = tpu.matmul %356, %4, %cst_102 {dimension_numbers = #tpu.dot_dimension_numbers<[1], [0], [0], [1], [0, 0, 1, 1], [], []>} : vector<8x32xbf16>, vector<32x96xbf16>, vector<8x96xf32> -> vector<8x96xf32>
    %358 = vector.broadcast %6 : vector<1x96xf32> to vector<8x96xf32>
    %359 = arith.addf %357, %358 : vector<8x96xf32>
    %360 = vector.extract_strided_slice %355 {offsets = [0, 0], sizes = [8, 32], strides = [1, 1]} : vector<8x96xf32> to vector<8x32xf32>
    %361 = vector.extract_strided_slice %359 {offsets = [0, 0], sizes = [8, 32], strides = [1, 1]} : vector<8x96xf32> to vector<8x32xf32>
    %362 = arith.addf %360, %361 : vector<8x32xf32>
    %363 = arith.negf %362 : vector<8x32xf32>
    %364 = math.exp %363 : vector<8x32xf32>
    %cst_103 = arith.constant 1.000000e+00 : f32
    %365 = vector.broadcast %cst_103 : f32 to vector<8x32xf32>
    %366 = arith.addf %365, %364 : vector<8x32xf32>
    %367 = arith.divf %365, %366 : vector<8x32xf32>
    %368 = vector.extract_strided_slice %355 {offsets = [0, 32], sizes = [8, 32], strides = [1, 1]} : vector<8x96xf32> to vector<8x32xf32>
    %369 = vector.extract_strided_slice %359 {offsets = [0, 32], sizes = [8, 32], strides = [1, 1]} : vector<8x96xf32> to vector<8x32xf32>
    %370 = arith.addf %368, %369 : vector<8x32xf32>
    %371 = arith.negf %370 : vector<8x32xf32>
    %372 = math.exp %371 : vector<8x32xf32>
    %cst_104 = arith.constant 1.000000e+00 : f32
    %373 = vector.broadcast %cst_104 : f32 to vector<8x32xf32>
    %374 = arith.addf %373, %372 : vector<8x32xf32>
    %375 = arith.divf %373, %374 : vector<8x32xf32>
    %376 = vector.extract_strided_slice %355 {offsets = [0, 64], sizes = [8, 32], strides = [1, 1]} : vector<8x96xf32> to vector<8x32xf32>
    %377 = vector.extract_strided_slice %359 {offsets = [0, 64], sizes = [8, 32], strides = [1, 1]} : vector<8x96xf32> to vector<8x32xf32>
    %378 = arith.mulf %367, %377 : vector<8x32xf32>
    %379 = arith.addf %376, %378 : vector<8x32xf32>
    %380 = math.tanh %379 : vector<8x32xf32>
    %cst_105 = arith.constant 1.000000e+00 : f32
    %381 = vector.broadcast %cst_105 : f32 to vector<8x32xf32>
    %382 = arith.subf %381, %375 : vector<8x32xf32>
    %383 = arith.mulf %382, %380 : vector<8x32xf32>
    %384 = arith.mulf %375, %301 : vector<8x32xf32>
    %385 = arith.addf %383, %384 : vector<8x32xf32>
    %c7_i32_106 = arith.constant 7 : i32
    %386 = arith.subi %c7_i32_106, %c4_i32 : i32
    %387 = arith.index_cast %386 : i32 to index
    %c0_107 = arith.constant 0 : index
    %c0_108 = arith.constant 0 : index
    %388 = vector.load %arg2[%387, %c0_107, %c0_108] : memref<8x8x32xf32, #tpu.memory_space<vmem>>, vector<1x8x32xf32>
    %389 = vector.shape_cast %388 : vector<1x8x32xf32> to vector<8x32xf32>
    %390 = arith.truncf %389 : vector<8x32xf32> to vector<8x32xbf16>
    %cst_109 = arith.constant dense<0.000000e+00> : vector<8x96xf32>
    %391 = tpu.matmul %390, %7, %cst_109 {dimension_numbers = #tpu.dot_dimension_numbers<[1], [0], [0], [1], [0, 0, 1, 1], [], []>} : vector<8x32xbf16>, vector<32x96xbf16>, vector<8x96xf32> -> vector<8x96xf32>
    %392 = vector.broadcast %9 : vector<1x96xf32> to vector<8x96xf32>
    %393 = arith.addf %391, %392 : vector<8x96xf32>
    %394 = arith.truncf %339 : vector<8x32xf32> to vector<8x32xbf16>
    %cst_110 = arith.constant dense<0.000000e+00> : vector<8x96xf32>
    %395 = tpu.matmul %394, %8, %cst_110 {dimension_numbers = #tpu.dot_dimension_numbers<[1], [0], [0], [1], [0, 0, 1, 1], [], []>} : vector<8x32xbf16>, vector<32x96xbf16>, vector<8x96xf32> -> vector<8x96xf32>
    %396 = vector.broadcast %10 : vector<1x96xf32> to vector<8x96xf32>
    %397 = arith.addf %395, %396 : vector<8x96xf32>
    %398 = vector.extract_strided_slice %393 {offsets = [0, 0], sizes = [8, 32], strides = [1, 1]} : vector<8x96xf32> to vector<8x32xf32>
    %399 = vector.extract_strided_slice %397 {offsets = [0, 0], sizes = [8, 32], strides = [1, 1]} : vector<8x96xf32> to vector<8x32xf32>
    %400 = arith.addf %398, %399 : vector<8x32xf32>
    %401 = arith.negf %400 : vector<8x32xf32>
    %402 = math.exp %401 : vector<8x32xf32>
    %cst_111 = arith.constant 1.000000e+00 : f32
    %403 = vector.broadcast %cst_111 : f32 to vector<8x32xf32>
    %404 = arith.addf %403, %402 : vector<8x32xf32>
    %405 = arith.divf %403, %404 : vector<8x32xf32>
    %406 = vector.extract_strided_slice %393 {offsets = [0, 32], sizes = [8, 32], strides = [1, 1]} : vector<8x96xf32> to vector<8x32xf32>
    %407 = vector.extract_strided_slice %397 {offsets = [0, 32], sizes = [8, 32], strides = [1, 1]} : vector<8x96xf32> to vector<8x32xf32>
    %408 = arith.addf %406, %407 : vector<8x32xf32>
    %409 = arith.negf %408 : vector<8x32xf32>
    %410 = math.exp %409 : vector<8x32xf32>
    %cst_112 = arith.constant 1.000000e+00 : f32
    %411 = vector.broadcast %cst_112 : f32 to vector<8x32xf32>
    %412 = arith.addf %411, %410 : vector<8x32xf32>
    %413 = arith.divf %411, %412 : vector<8x32xf32>
    %414 = vector.extract_strided_slice %393 {offsets = [0, 64], sizes = [8, 32], strides = [1, 1]} : vector<8x96xf32> to vector<8x32xf32>
    %415 = vector.extract_strided_slice %397 {offsets = [0, 64], sizes = [8, 32], strides = [1, 1]} : vector<8x96xf32> to vector<8x32xf32>
    %416 = arith.mulf %405, %415 : vector<8x32xf32>
    %417 = arith.addf %414, %416 : vector<8x32xf32>
    %418 = math.tanh %417 : vector<8x32xf32>
    %cst_113 = arith.constant 1.000000e+00 : f32
    %419 = vector.broadcast %cst_113 : f32 to vector<8x32xf32>
    %420 = arith.subf %419, %413 : vector<8x32xf32>
    %421 = arith.mulf %420, %418 : vector<8x32xf32>
    %422 = arith.mulf %413, %339 : vector<8x32xf32>
    %423 = arith.addf %421, %422 : vector<8x32xf32>
    %424 = arith.index_cast %c4_i32 : i32 to index
    %c0_114 = arith.constant 0 : index
    %c0_115 = arith.constant 0 : index
    %425 = vector.load %arg11[%424, %c0_114, %c0_115] : memref<8x8x32xf32, #tpu.memory_space<vmem>>, vector<1x8x32xf32>
    %426 = vector.shape_cast %425 : vector<1x8x32xf32> to vector<8x32xf32>
    %427 = vector.shape_cast %385 : vector<8x32xf32> to vector<1x8x32xf32>
    tpu.vector_store %arg11[%424, %c0_114, %c0_115], %427 {strides = array<i32>} : memref<8x8x32xf32, #tpu.memory_space<vmem>>, vector<1x8x32xf32>,
    %c7_i32_116 = arith.constant 7 : i32
    %428 = arith.subi %c7_i32_116, %c4_i32 : i32
    %429 = arith.index_cast %428 : i32 to index
    %c0_117 = arith.constant 0 : index
    %c0_118 = arith.constant 0 : index
    %430 = vector.load %arg12[%429, %c0_117, %c0_118] : memref<8x8x32xf32, #tpu.memory_space<vmem>>, vector<1x8x32xf32>
    %431 = vector.shape_cast %430 : vector<1x8x32xf32> to vector<8x32xf32>
    %432 = vector.shape_cast %423 : vector<8x32xf32> to vector<1x8x32xf32>
    tpu.vector_store %arg12[%429, %c0_117, %c0_118], %432 {strides = array<i32>} : memref<8x8x32xf32, #tpu.memory_space<vmem>>, vector<1x8x32xf32>,
    %c5_i32 = arith.constant 5 : i32
    %433 = arith.index_cast %c5_i32 : i32 to index
    %c0_119 = arith.constant 0 : index
    %c0_120 = arith.constant 0 : index
    %434 = vector.load %arg1[%433, %c0_119, %c0_120] : memref<8x8x32xf32, #tpu.memory_space<vmem>>, vector<1x8x32xf32>
    %435 = vector.shape_cast %434 : vector<1x8x32xf32> to vector<8x32xf32>
    %436 = arith.truncf %435 : vector<8x32xf32> to vector<8x32xbf16>
    %cst_121 = arith.constant dense<0.000000e+00> : vector<8x96xf32>
    %437 = tpu.matmul %436, %3, %cst_121 {dimension_numbers = #tpu.dot_dimension_numbers<[1], [0], [0], [1], [0, 0, 1, 1], [], []>} : vector<8x32xbf16>, vector<32x96xbf16>, vector<8x96xf32> -> vector<8x96xf32>
    %438 = vector.broadcast %5 : vector<1x96xf32> to vector<8x96xf32>
    %439 = arith.addf %437, %438 : vector<8x96xf32>
    %440 = arith.truncf %385 : vector<8x32xf32> to vector<8x32xbf16>
    %cst_122 = arith.constant dense<0.000000e+00> : vector<8x96xf32>
    %441 = tpu.matmul %440, %4, %cst_122 {dimension_numbers = #tpu.dot_dimension_numbers<[1], [0], [0], [1], [0, 0, 1, 1], [], []>} : vector<8x32xbf16>, vector<32x96xbf16>, vector<8x96xf32> -> vector<8x96xf32>
    %442 = vector.broadcast %6 : vector<1x96xf32> to vector<8x96xf32>
    %443 = arith.addf %441, %442 : vector<8x96xf32>
    %444 = vector.extract_strided_slice %439 {offsets = [0, 0], sizes = [8, 32], strides = [1, 1]} : vector<8x96xf32> to vector<8x32xf32>
    %445 = vector.extract_strided_slice %443 {offsets = [0, 0], sizes = [8, 32], strides = [1, 1]} : vector<8x96xf32> to vector<8x32xf32>
    %446 = arith.addf %444, %445 : vector<8x32xf32>
    %447 = arith.negf %446 : vector<8x32xf32>
    %448 = math.exp %447 : vector<8x32xf32>
    %cst_123 = arith.constant 1.000000e+00 : f32
    %449 = vector.broadcast %cst_123 : f32 to vector<8x32xf32>
    %450 = arith.addf %449, %448 : vector<8x32xf32>
    %451 = arith.divf %449, %450 : vector<8x32xf32>
    %452 = vector.extract_strided_slice %439 {offsets = [0, 32], sizes = [8, 32], strides = [1, 1]} : vector<8x96xf32> to vector<8x32xf32>
    %453 = vector.extract_strided_slice %443 {offsets = [0, 32], sizes = [8, 32], strides = [1, 1]} : vector<8x96xf32> to vector<8x32xf32>
    %454 = arith.addf %452, %453 : vector<8x32xf32>
    %455 = arith.negf %454 : vector<8x32xf32>
    %456 = math.exp %455 : vector<8x32xf32>
    %cst_124 = arith.constant 1.000000e+00 : f32
    %457 = vector.broadcast %cst_124 : f32 to vector<8x32xf32>
    %458 = arith.addf %457, %456 : vector<8x32xf32>
    %459 = arith.divf %457, %458 : vector<8x32xf32>
    %460 = vector.extract_strided_slice %439 {offsets = [0, 64], sizes = [8, 32], strides = [1, 1]} : vector<8x96xf32> to vector<8x32xf32>
    %461 = vector.extract_strided_slice %443 {offsets = [0, 64], sizes = [8, 32], strides = [1, 1]} : vector<8x96xf32> to vector<8x32xf32>
    %462 = arith.mulf %451, %461 : vector<8x32xf32>
    %463 = arith.addf %460, %462 : vector<8x32xf32>
    %464 = math.tanh %463 : vector<8x32xf32>
    %cst_125 = arith.constant 1.000000e+00 : f32
    %465 = vector.broadcast %cst_125 : f32 to vector<8x32xf32>
    %466 = arith.subf %465, %459 : vector<8x32xf32>
    %467 = arith.mulf %466, %464 : vector<8x32xf32>
    %468 = arith.mulf %459, %385 : vector<8x32xf32>
    %469 = arith.addf %467, %468 : vector<8x32xf32>
    %c7_i32_126 = arith.constant 7 : i32
    %470 = arith.subi %c7_i32_126, %c5_i32 : i32
    %471 = arith.index_cast %470 : i32 to index
    %c0_127 = arith.constant 0 : index
    %c0_128 = arith.constant 0 : index
    %472 = vector.load %arg2[%471, %c0_127, %c0_128] : memref<8x8x32xf32, #tpu.memory_space<vmem>>, vector<1x8x32xf32>
    %473 = vector.shape_cast %472 : vector<1x8x32xf32> to vector<8x32xf32>
    %474 = arith.truncf %473 : vector<8x32xf32> to vector<8x32xbf16>
    %cst_129 = arith.constant dense<0.000000e+00> : vector<8x96xf32>
    %475 = tpu.matmul %474, %7, %cst_129 {dimension_numbers = #tpu.dot_dimension_numbers<[1], [0], [0], [1], [0, 0, 1, 1], [], []>} : vector<8x32xbf16>, vector<32x96xbf16>, vector<8x96xf32> -> vector<8x96xf32>
    %476 = vector.broadcast %9 : vector<1x96xf32> to vector<8x96xf32>
    %477 = arith.addf %475, %476 : vector<8x96xf32>
    %478 = arith.truncf %423 : vector<8x32xf32> to vector<8x32xbf16>
    %cst_130 = arith.constant dense<0.000000e+00> : vector<8x96xf32>
    %479 = tpu.matmul %478, %8, %cst_130 {dimension_numbers = #tpu.dot_dimension_numbers<[1], [0], [0], [1], [0, 0, 1, 1], [], []>} : vector<8x32xbf16>, vector<32x96xbf16>, vector<8x96xf32> -> vector<8x96xf32>
    %480 = vector.broadcast %10 : vector<1x96xf32> to vector<8x96xf32>
    %481 = arith.addf %479, %480 : vector<8x96xf32>
    %482 = vector.extract_strided_slice %477 {offsets = [0, 0], sizes = [8, 32], strides = [1, 1]} : vector<8x96xf32> to vector<8x32xf32>
    %483 = vector.extract_strided_slice %481 {offsets = [0, 0], sizes = [8, 32], strides = [1, 1]} : vector<8x96xf32> to vector<8x32xf32>
    %484 = arith.addf %482, %483 : vector<8x32xf32>
    %485 = arith.negf %484 : vector<8x32xf32>
    %486 = math.exp %485 : vector<8x32xf32>
    %cst_131 = arith.constant 1.000000e+00 : f32
    %487 = vector.broadcast %cst_131 : f32 to vector<8x32xf32>
    %488 = arith.addf %487, %486 : vector<8x32xf32>
    %489 = arith.divf %487, %488 : vector<8x32xf32>
    %490 = vector.extract_strided_slice %477 {offsets = [0, 32], sizes = [8, 32], strides = [1, 1]} : vector<8x96xf32> to vector<8x32xf32>
    %491 = vector.extract_strided_slice %481 {offsets = [0, 32], sizes = [8, 32], strides = [1, 1]} : vector<8x96xf32> to vector<8x32xf32>
    %492 = arith.addf %490, %491 : vector<8x32xf32>
    %493 = arith.negf %492 : vector<8x32xf32>
    %494 = math.exp %493 : vector<8x32xf32>
    %cst_132 = arith.constant 1.000000e+00 : f32
    %495 = vector.broadcast %cst_132 : f32 to vector<8x32xf32>
    %496 = arith.addf %495, %494 : vector<8x32xf32>
    %497 = arith.divf %495, %496 : vector<8x32xf32>
    %498 = vector.extract_strided_slice %477 {offsets = [0, 64], sizes = [8, 32], strides = [1, 1]} : vector<8x96xf32> to vector<8x32xf32>
    %499 = vector.extract_strided_slice %481 {offsets = [0, 64], sizes = [8, 32], strides = [1, 1]} : vector<8x96xf32> to vector<8x32xf32>
    %500 = arith.mulf %489, %499 : vector<8x32xf32>
    %501 = arith.addf %498, %500 : vector<8x32xf32>
    %502 = math.tanh %501 : vector<8x32xf32>
    %cst_133 = arith.constant 1.000000e+00 : f32
    %503 = vector.broadcast %cst_133 : f32 to vector<8x32xf32>
    %504 = arith.subf %503, %497 : vector<8x32xf32>
    %505 = arith.mulf %504, %502 : vector<8x32xf32>
    %506 = arith.mulf %497, %423 : vector<8x32xf32>
    %507 = arith.addf %505, %506 : vector<8x32xf32>
    %508 = arith.index_cast %c5_i32 : i32 to index
    %c0_134 = arith.constant 0 : index
    %c0_135 = arith.constant 0 : index
    %509 = vector.load %arg11[%508, %c0_134, %c0_135] : memref<8x8x32xf32, #tpu.memory_space<vmem>>, vector<1x8x32xf32>
    %510 = vector.shape_cast %509 : vector<1x8x32xf32> to vector<8x32xf32>
    %511 = vector.shape_cast %469 : vector<8x32xf32> to vector<1x8x32xf32>
    tpu.vector_store %arg11[%508, %c0_134, %c0_135], %511 {strides = array<i32>} : memref<8x8x32xf32, #tpu.memory_space<vmem>>, vector<1x8x32xf32>,
    %c7_i32_136 = arith.constant 7 : i32
    %512 = arith.subi %c7_i32_136, %c5_i32 : i32
    %513 = arith.index_cast %512 : i32 to index
    %c0_137 = arith.constant 0 : index
    %c0_138 = arith.constant 0 : index
    %514 = vector.load %arg12[%513, %c0_137, %c0_138] : memref<8x8x32xf32, #tpu.memory_space<vmem>>, vector<1x8x32xf32>
    %515 = vector.shape_cast %514 : vector<1x8x32xf32> to vector<8x32xf32>
    %516 = vector.shape_cast %507 : vector<8x32xf32> to vector<1x8x32xf32>
    tpu.vector_store %arg12[%513, %c0_137, %c0_138], %516 {strides = array<i32>} : memref<8x8x32xf32, #tpu.memory_space<vmem>>, vector<1x8x32xf32>,
    %c6_i32 = arith.constant 6 : i32
    %517 = arith.index_cast %c6_i32 : i32 to index
    %c0_139 = arith.constant 0 : index
    %c0_140 = arith.constant 0 : index
    %518 = vector.load %arg1[%517, %c0_139, %c0_140] : memref<8x8x32xf32, #tpu.memory_space<vmem>>, vector<1x8x32xf32>
    %519 = vector.shape_cast %518 : vector<1x8x32xf32> to vector<8x32xf32>
    %520 = arith.truncf %519 : vector<8x32xf32> to vector<8x32xbf16>
    %cst_141 = arith.constant dense<0.000000e+00> : vector<8x96xf32>
    %521 = tpu.matmul %520, %3, %cst_141 {dimension_numbers = #tpu.dot_dimension_numbers<[1], [0], [0], [1], [0, 0, 1, 1], [], []>} : vector<8x32xbf16>, vector<32x96xbf16>, vector<8x96xf32> -> vector<8x96xf32>
    %522 = vector.broadcast %5 : vector<1x96xf32> to vector<8x96xf32>
    %523 = arith.addf %521, %522 : vector<8x96xf32>
    %524 = arith.truncf %469 : vector<8x32xf32> to vector<8x32xbf16>
    %cst_142 = arith.constant dense<0.000000e+00> : vector<8x96xf32>
    %525 = tpu.matmul %524, %4, %cst_142 {dimension_numbers = #tpu.dot_dimension_numbers<[1], [0], [0], [1], [0, 0, 1, 1], [], []>} : vector<8x32xbf16>, vector<32x96xbf16>, vector<8x96xf32> -> vector<8x96xf32>
    %526 = vector.broadcast %6 : vector<1x96xf32> to vector<8x96xf32>
    %527 = arith.addf %525, %526 : vector<8x96xf32>
    %528 = vector.extract_strided_slice %523 {offsets = [0, 0], sizes = [8, 32], strides = [1, 1]} : vector<8x96xf32> to vector<8x32xf32>
    %529 = vector.extract_strided_slice %527 {offsets = [0, 0], sizes = [8, 32], strides = [1, 1]} : vector<8x96xf32> to vector<8x32xf32>
    %530 = arith.addf %528, %529 : vector<8x32xf32>
    %531 = arith.negf %530 : vector<8x32xf32>
    %532 = math.exp %531 : vector<8x32xf32>
    %cst_143 = arith.constant 1.000000e+00 : f32
    %533 = vector.broadcast %cst_143 : f32 to vector<8x32xf32>
    %534 = arith.addf %533, %532 : vector<8x32xf32>
    %535 = arith.divf %533, %534 : vector<8x32xf32>
    %536 = vector.extract_strided_slice %523 {offsets = [0, 32], sizes = [8, 32], strides = [1, 1]} : vector<8x96xf32> to vector<8x32xf32>
    %537 = vector.extract_strided_slice %527 {offsets = [0, 32], sizes = [8, 32], strides = [1, 1]} : vector<8x96xf32> to vector<8x32xf32>
    %538 = arith.addf %536, %537 : vector<8x32xf32>
    %539 = arith.negf %538 : vector<8x32xf32>
    %540 = math.exp %539 : vector<8x32xf32>
    %cst_144 = arith.constant 1.000000e+00 : f32
    %541 = vector.broadcast %cst_144 : f32 to vector<8x32xf32>
    %542 = arith.addf %541, %540 : vector<8x32xf32>
    %543 = arith.divf %541, %542 : vector<8x32xf32>
    %544 = vector.extract_strided_slice %523 {offsets = [0, 64], sizes = [8, 32], strides = [1, 1]} : vector<8x96xf32> to vector<8x32xf32>
    %545 = vector.extract_strided_slice %527 {offsets = [0, 64], sizes = [8, 32], strides = [1, 1]} : vector<8x96xf32> to vector<8x32xf32>
    %546 = arith.mulf %535, %545 : vector<8x32xf32>
    %547 = arith.addf %544, %546 : vector<8x32xf32>
    %548 = math.tanh %547 : vector<8x32xf32>
    %cst_145 = arith.constant 1.000000e+00 : f32
    %549 = vector.broadcast %cst_145 : f32 to vector<8x32xf32>
    %550 = arith.subf %549, %543 : vector<8x32xf32>
    %551 = arith.mulf %550, %548 : vector<8x32xf32>
    %552 = arith.mulf %543, %469 : vector<8x32xf32>
    %553 = arith.addf %551, %552 : vector<8x32xf32>
    %c7_i32_146 = arith.constant 7 : i32
    %554 = arith.subi %c7_i32_146, %c6_i32 : i32
    %555 = arith.index_cast %554 : i32 to index
    %c0_147 = arith.constant 0 : index
    %c0_148 = arith.constant 0 : index
    %556 = vector.load %arg2[%555, %c0_147, %c0_148] : memref<8x8x32xf32, #tpu.memory_space<vmem>>, vector<1x8x32xf32>
    %557 = vector.shape_cast %556 : vector<1x8x32xf32> to vector<8x32xf32>
    %558 = arith.truncf %557 : vector<8x32xf32> to vector<8x32xbf16>
    %cst_149 = arith.constant dense<0.000000e+00> : vector<8x96xf32>
    %559 = tpu.matmul %558, %7, %cst_149 {dimension_numbers = #tpu.dot_dimension_numbers<[1], [0], [0], [1], [0, 0, 1, 1], [], []>} : vector<8x32xbf16>, vector<32x96xbf16>, vector<8x96xf32> -> vector<8x96xf32>
    %560 = vector.broadcast %9 : vector<1x96xf32> to vector<8x96xf32>
    %561 = arith.addf %559, %560 : vector<8x96xf32>
    %562 = arith.truncf %507 : vector<8x32xf32> to vector<8x32xbf16>
    %cst_150 = arith.constant dense<0.000000e+00> : vector<8x96xf32>
    %563 = tpu.matmul %562, %8, %cst_150 {dimension_numbers = #tpu.dot_dimension_numbers<[1], [0], [0], [1], [0, 0, 1, 1], [], []>} : vector<8x32xbf16>, vector<32x96xbf16>, vector<8x96xf32> -> vector<8x96xf32>
    %564 = vector.broadcast %10 : vector<1x96xf32> to vector<8x96xf32>
    %565 = arith.addf %563, %564 : vector<8x96xf32>
    %566 = vector.extract_strided_slice %561 {offsets = [0, 0], sizes = [8, 32], strides = [1, 1]} : vector<8x96xf32> to vector<8x32xf32>
    %567 = vector.extract_strided_slice %565 {offsets = [0, 0], sizes = [8, 32], strides = [1, 1]} : vector<8x96xf32> to vector<8x32xf32>
    %568 = arith.addf %566, %567 : vector<8x32xf32>
    %569 = arith.negf %568 : vector<8x32xf32>
    %570 = math.exp %569 : vector<8x32xf32>
    %cst_151 = arith.constant 1.000000e+00 : f32
    %571 = vector.broadcast %cst_151 : f32 to vector<8x32xf32>
    %572 = arith.addf %571, %570 : vector<8x32xf32>
    %573 = arith.divf %571, %572 : vector<8x32xf32>
    %574 = vector.extract_strided_slice %561 {offsets = [0, 32], sizes = [8, 32], strides = [1, 1]} : vector<8x96xf32> to vector<8x32xf32>
    %575 = vector.extract_strided_slice %565 {offsets = [0, 32], sizes = [8, 32], strides = [1, 1]} : vector<8x96xf32> to vector<8x32xf32>
    %576 = arith.addf %574, %575 : vector<8x32xf32>
    %577 = arith.negf %576 : vector<8x32xf32>
    %578 = math.exp %577 : vector<8x32xf32>
    %cst_152 = arith.constant 1.000000e+00 : f32
    %579 = vector.broadcast %cst_152 : f32 to vector<8x32xf32>
    %580 = arith.addf %579, %578 : vector<8x32xf32>
    %581 = arith.divf %579, %580 : vector<8x32xf32>
    %582 = vector.extract_strided_slice %561 {offsets = [0, 64], sizes = [8, 32], strides = [1, 1]} : vector<8x96xf32> to vector<8x32xf32>
    %583 = vector.extract_strided_slice %565 {offsets = [0, 64], sizes = [8, 32], strides = [1, 1]} : vector<8x96xf32> to vector<8x32xf32>
    %584 = arith.mulf %573, %583 : vector<8x32xf32>
    %585 = arith.addf %582, %584 : vector<8x32xf32>
    %586 = math.tanh %585 : vector<8x32xf32>
    %cst_153 = arith.constant 1.000000e+00 : f32
    %587 = vector.broadcast %cst_153 : f32 to vector<8x32xf32>
    %588 = arith.subf %587, %581 : vector<8x32xf32>
    %589 = arith.mulf %588, %586 : vector<8x32xf32>
    %590 = arith.mulf %581, %507 : vector<8x32xf32>
    %591 = arith.addf %589, %590 : vector<8x32xf32>
    %592 = arith.index_cast %c6_i32 : i32 to index
    %c0_154 = arith.constant 0 : index
    %c0_155 = arith.constant 0 : index
    %593 = vector.load %arg11[%592, %c0_154, %c0_155] : memref<8x8x32xf32, #tpu.memory_space<vmem>>, vector<1x8x32xf32>
    %594 = vector.shape_cast %593 : vector<1x8x32xf32> to vector<8x32xf32>
    %595 = vector.shape_cast %553 : vector<8x32xf32> to vector<1x8x32xf32>
    tpu.vector_store %arg11[%592, %c0_154, %c0_155], %595 {strides = array<i32>} : memref<8x8x32xf32, #tpu.memory_space<vmem>>, vector<1x8x32xf32>,
    %c7_i32_156 = arith.constant 7 : i32
    %596 = arith.subi %c7_i32_156, %c6_i32 : i32
    %597 = arith.index_cast %596 : i32 to index
    %c0_157 = arith.constant 0 : index
    %c0_158 = arith.constant 0 : index
    %598 = vector.load %arg12[%597, %c0_157, %c0_158] : memref<8x8x32xf32, #tpu.memory_space<vmem>>, vector<1x8x32xf32>
    %599 = vector.shape_cast %598 : vector<1x8x32xf32> to vector<8x32xf32>
    %600 = vector.shape_cast %591 : vector<8x32xf32> to vector<1x8x32xf32>
    tpu.vector_store %arg12[%597, %c0_157, %c0_158], %600 {strides = array<i32>} : memref<8x8x32xf32, #tpu.memory_space<vmem>>, vector<1x8x32xf32>,
    %c7_i32_159 = arith.constant 7 : i32
    %601 = arith.index_cast %c7_i32_159 : i32 to index
    %c0_160 = arith.constant 0 : index
    %c0_161 = arith.constant 0 : index
    %602 = vector.load %arg1[%601, %c0_160, %c0_161] : memref<8x8x32xf32, #tpu.memory_space<vmem>>, vector<1x8x32xf32>
    %603 = vector.shape_cast %602 : vector<1x8x32xf32> to vector<8x32xf32>
    %604 = arith.truncf %603 : vector<8x32xf32> to vector<8x32xbf16>
    %cst_162 = arith.constant dense<0.000000e+00> : vector<8x96xf32>
    %605 = tpu.matmul %604, %3, %cst_162 {dimension_numbers = #tpu.dot_dimension_numbers<[1], [0], [0], [1], [0, 0, 1, 1], [], []>} : vector<8x32xbf16>, vector<32x96xbf16>, vector<8x96xf32> -> vector<8x96xf32>
    %606 = vector.broadcast %5 : vector<1x96xf32> to vector<8x96xf32>
    %607 = arith.addf %605, %606 : vector<8x96xf32>
    %608 = arith.truncf %553 : vector<8x32xf32> to vector<8x32xbf16>
    %cst_163 = arith.constant dense<0.000000e+00> : vector<8x96xf32>
    %609 = tpu.matmul %608, %4, %cst_163 {dimension_numbers = #tpu.dot_dimension_numbers<[1], [0], [0], [1], [0, 0, 1, 1], [], []>} : vector<8x32xbf16>, vector<32x96xbf16>, vector<8x96xf32> -> vector<8x96xf32>
    %610 = vector.broadcast %6 : vector<1x96xf32> to vector<8x96xf32>
    %611 = arith.addf %609, %610 : vector<8x96xf32>
    %612 = vector.extract_strided_slice %607 {offsets = [0, 0], sizes = [8, 32], strides = [1, 1]} : vector<8x96xf32> to vector<8x32xf32>
    %613 = vector.extract_strided_slice %611 {offsets = [0, 0], sizes = [8, 32], strides = [1, 1]} : vector<8x96xf32> to vector<8x32xf32>
    %614 = arith.addf %612, %613 : vector<8x32xf32>
    %615 = arith.negf %614 : vector<8x32xf32>
    %616 = math.exp %615 : vector<8x32xf32>
    %cst_164 = arith.constant 1.000000e+00 : f32
    %617 = vector.broadcast %cst_164 : f32 to vector<8x32xf32>
    %618 = arith.addf %617, %616 : vector<8x32xf32>
    %619 = arith.divf %617, %618 : vector<8x32xf32>
    %620 = vector.extract_strided_slice %607 {offsets = [0, 32], sizes = [8, 32], strides = [1, 1]} : vector<8x96xf32> to vector<8x32xf32>
    %621 = vector.extract_strided_slice %611 {offsets = [0, 32], sizes = [8, 32], strides = [1, 1]} : vector<8x96xf32> to vector<8x32xf32>
    %622 = arith.addf %620, %621 : vector<8x32xf32>
    %623 = arith.negf %622 : vector<8x32xf32>
    %624 = math.exp %623 : vector<8x32xf32>
    %cst_165 = arith.constant 1.000000e+00 : f32
    %625 = vector.broadcast %cst_165 : f32 to vector<8x32xf32>
    %626 = arith.addf %625, %624 : vector<8x32xf32>
    %627 = arith.divf %625, %626 : vector<8x32xf32>
    %628 = vector.extract_strided_slice %607 {offsets = [0, 64], sizes = [8, 32], strides = [1, 1]} : vector<8x96xf32> to vector<8x32xf32>
    %629 = vector.extract_strided_slice %611 {offsets = [0, 64], sizes = [8, 32], strides = [1, 1]} : vector<8x96xf32> to vector<8x32xf32>
    %630 = arith.mulf %619, %629 : vector<8x32xf32>
    %631 = arith.addf %628, %630 : vector<8x32xf32>
    %632 = math.tanh %631 : vector<8x32xf32>
    %cst_166 = arith.constant 1.000000e+00 : f32
    %633 = vector.broadcast %cst_166 : f32 to vector<8x32xf32>
    %634 = arith.subf %633, %627 : vector<8x32xf32>
    %635 = arith.mulf %634, %632 : vector<8x32xf32>
    %636 = arith.mulf %627, %553 : vector<8x32xf32>
    %637 = arith.addf %635, %636 : vector<8x32xf32>
    %c7_i32_167 = arith.constant 7 : i32
    %638 = arith.subi %c7_i32_167, %c7_i32_159 : i32
    %639 = arith.index_cast %638 : i32 to index
    %c0_168 = arith.constant 0 : index
    %c0_169 = arith.constant 0 : index
    %640 = vector.load %arg2[%639, %c0_168, %c0_169] : memref<8x8x32xf32, #tpu.memory_space<vmem>>, vector<1x8x32xf32>
    %641 = vector.shape_cast %640 : vector<1x8x32xf32> to vector<8x32xf32>
    %642 = arith.truncf %641 : vector<8x32xf32> to vector<8x32xbf16>
    %cst_170 = arith.constant dense<0.000000e+00> : vector<8x96xf32>
    %643 = tpu.matmul %642, %7, %cst_170 {dimension_numbers = #tpu.dot_dimension_numbers<[1], [0], [0], [1], [0, 0, 1, 1], [], []>} : vector<8x32xbf16>, vector<32x96xbf16>, vector<8x96xf32> -> vector<8x96xf32>
    %644 = vector.broadcast %9 : vector<1x96xf32> to vector<8x96xf32>
    %645 = arith.addf %643, %644 : vector<8x96xf32>
    %646 = arith.truncf %591 : vector<8x32xf32> to vector<8x32xbf16>
    %cst_171 = arith.constant dense<0.000000e+00> : vector<8x96xf32>
    %647 = tpu.matmul %646, %8, %cst_171 {dimension_numbers = #tpu.dot_dimension_numbers<[1], [0], [0], [1], [0, 0, 1, 1], [], []>} : vector<8x32xbf16>, vector<32x96xbf16>, vector<8x96xf32> -> vector<8x96xf32>
    %648 = vector.broadcast %10 : vector<1x96xf32> to vector<8x96xf32>
    %649 = arith.addf %647, %648 : vector<8x96xf32>
    %650 = vector.extract_strided_slice %645 {offsets = [0, 0], sizes = [8, 32], strides = [1, 1]} : vector<8x96xf32> to vector<8x32xf32>
    %651 = vector.extract_strided_slice %649 {offsets = [0, 0], sizes = [8, 32], strides = [1, 1]} : vector<8x96xf32> to vector<8x32xf32>
    %652 = arith.addf %650, %651 : vector<8x32xf32>
    %653 = arith.negf %652 : vector<8x32xf32>
    %654 = math.exp %653 : vector<8x32xf32>
    %cst_172 = arith.constant 1.000000e+00 : f32
    %655 = vector.broadcast %cst_172 : f32 to vector<8x32xf32>
    %656 = arith.addf %655, %654 : vector<8x32xf32>
    %657 = arith.divf %655, %656 : vector<8x32xf32>
    %658 = vector.extract_strided_slice %645 {offsets = [0, 32], sizes = [8, 32], strides = [1, 1]} : vector<8x96xf32> to vector<8x32xf32>
    %659 = vector.extract_strided_slice %649 {offsets = [0, 32], sizes = [8, 32], strides = [1, 1]} : vector<8x96xf32> to vector<8x32xf32>
    %660 = arith.addf %658, %659 : vector<8x32xf32>
    %661 = arith.negf %660 : vector<8x32xf32>
    %662 = math.exp %661 : vector<8x32xf32>
    %cst_173 = arith.constant 1.000000e+00 : f32
    %663 = vector.broadcast %cst_173 : f32 to vector<8x32xf32>
    %664 = arith.addf %663, %662 : vector<8x32xf32>
    %665 = arith.divf %663, %664 : vector<8x32xf32>
    %666 = vector.extract_strided_slice %645 {offsets = [0, 64], sizes = [8, 32], strides = [1, 1]} : vector<8x96xf32> to vector<8x32xf32>
    %667 = vector.extract_strided_slice %649 {offsets = [0, 64], sizes = [8, 32], strides = [1, 1]} : vector<8x96xf32> to vector<8x32xf32>
    %668 = arith.mulf %657, %667 : vector<8x32xf32>
    %669 = arith.addf %666, %668 : vector<8x32xf32>
    %670 = math.tanh %669 : vector<8x32xf32>
    %cst_174 = arith.constant 1.000000e+00 : f32
    %671 = vector.broadcast %cst_174 : f32 to vector<8x32xf32>
    %672 = arith.subf %671, %665 : vector<8x32xf32>
    %673 = arith.mulf %672, %670 : vector<8x32xf32>
    %674 = arith.mulf %665, %591 : vector<8x32xf32>
    %675 = arith.addf %673, %674 : vector<8x32xf32>
    %676 = arith.index_cast %c7_i32_159 : i32 to index
    %c0_175 = arith.constant 0 : index
    %c0_176 = arith.constant 0 : index
    %677 = vector.load %arg11[%676, %c0_175, %c0_176] : memref<8x8x32xf32, #tpu.memory_space<vmem>>, vector<1x8x32xf32>
    %678 = vector.shape_cast %677 : vector<1x8x32xf32> to vector<8x32xf32>
    %679 = vector.shape_cast %637 : vector<8x32xf32> to vector<1x8x32xf32>
    tpu.vector_store %arg11[%676, %c0_175, %c0_176], %679 {strides = array<i32>} : memref<8x8x32xf32, #tpu.memory_space<vmem>>, vector<1x8x32xf32>,
    %c7_i32_177 = arith.constant 7 : i32
    %680 = arith.subi %c7_i32_177, %c7_i32_159 : i32
    %681 = arith.index_cast %680 : i32 to index
    %c0_178 = arith.constant 0 : index
    %c0_179 = arith.constant 0 : index
    %682 = vector.load %arg12[%681, %c0_178, %c0_179] : memref<8x8x32xf32, #tpu.memory_space<vmem>>, vector<1x8x32xf32>
    %683 = vector.shape_cast %682 : vector<1x8x32xf32> to vector<8x32xf32>
    %684 = vector.shape_cast %675 : vector<8x32xf32> to vector<1x8x32xf32>
    tpu.vector_store %arg12[%681, %c0_178, %c0_179], %684 {strides = array<i32>} : memref<8x8x32xf32, #tpu.memory_space<vmem>>, vector<1x8x32xf32>,
    %c8_i32 = arith.constant 8 : i32
    %c0_180 = arith.constant 0 : index
    %c0_181 = arith.constant 0 : index
    %685 = vector.load %arg13[%c0_180, %c0_181] : memref<8x32xf32, #tpu.memory_space<vmem>>, vector<8x32xf32>
    tpu.vector_store %arg13[%c0_180, %c0_181], %637 {strides = array<i32>} : memref<8x32xf32, #tpu.memory_space<vmem>>, vector<8x32xf32>,
    %c0_182 = arith.constant 0 : index
    %c0_183 = arith.constant 0 : index
    %686 = vector.load %arg14[%c0_182, %c0_183] : memref<8x32xf32, #tpu.memory_space<vmem>>, vector<8x32xf32>
    tpu.vector_store %arg14[%c0_182, %c0_183], %675 {strides = array<i32>} : memref<8x32xf32, #tpu.memory_space<vmem>>, vector<8x32xf32>,
    return
  }
  func.func @transform_0(%arg0: i32) -> (i32, i32, i32) {
    %c0_i32 = arith.constant 0 : i32
    %c0_i32_0 = arith.constant 0 : i32
    %c0_i32_1 = arith.constant 0 : i32
    return %arg0, %c0_i32, %c0_i32_0 : i32, i32, i32
  }
  func.func @transform_1(%arg0: i32) -> (i32, i32, i32) {
    %c0_i32 = arith.constant 0 : i32
    %0 = arith.subi %c0_i32, %arg0 : i32
    %c0_i32_0 = arith.constant 0 : i32
    %c0_i32_1 = arith.constant 0 : i32
    %c0_i32_2 = arith.constant 0 : i32
    return %0, %c0_i32_0, %c0_i32_1 : i32, i32, i32
  }
  func.func @transform_2(%arg0: i32) -> (i32, i32) {
    %c0_i32 = arith.constant 0 : i32
    %c0_i32_0 = arith.constant 0 : i32
    %c0_i32_1 = arith.constant 0 : i32
    return %c0_i32, %c0_i32_0 : i32, i32
  }
  func.func @transform_3(%arg0: i32) -> (i32, i32) {
    %c0_i32 = arith.constant 0 : i32
    %c0_i32_0 = arith.constant 0 : i32
    %c0_i32_1 = arith.constant 0 : i32
    return %c0_i32, %c0_i32_0 : i32, i32
  }
  func.func @transform_4(%arg0: i32) -> (i32, i32) {
    %c0_i32 = arith.constant 0 : i32
    %c0_i32_0 = arith.constant 0 : i32
    %c0_i32_1 = arith.constant 0 : i32
    return %c0_i32, %c0_i32_0 : i32, i32
  }
  func.func @transform_5(%arg0: i32) -> (i32, i32) {
    %c0_i32 = arith.constant 0 : i32
    %c0_i32_0 = arith.constant 0 : i32
    %c0_i32_1 = arith.constant 0 : i32
    return %c0_i32, %c0_i32_0 : i32, i32
  }
  func.func @transform_6(%arg0: i32) -> (i32, i32) {
    %c0_i32 = arith.constant 0 : i32
    %c0_i32_0 = arith.constant 0 : i32
    %c0_i32_1 = arith.constant 0 : i32
    return %c0_i32, %c0_i32_0 : i32, i32
  }
  func.func @transform_7(%arg0: i32) -> (i32, i32) {
    %c0_i32 = arith.constant 0 : i32
    %c0_i32_0 = arith.constant 0 : i32
    %c0_i32_1 = arith.constant 0 : i32
    return %c0_i32, %c0_i32_0 : i32, i32
  }
  func.func @transform_8(%arg0: i32) -> (i32, i32) {
    %c0_i32 = arith.constant 0 : i32
    %c0_i32_0 = arith.constant 0 : i32
    %c0_i32_1 = arith.constant 0 : i32
    return %c0_i32, %c0_i32_0 : i32, i32
  }
  func.func @transform_9(%arg0: i32) -> (i32, i32) {
    %c0_i32 = arith.constant 0 : i32
    %c0_i32_0 = arith.constant 0 : i32
    %c0_i32_1 = arith.constant 0 : i32
    return %c0_i32, %c0_i32_0 : i32, i32
  }
  func.func @transform_10(%arg0: i32) -> (i32, i32, i32) {
    %c0_i32 = arith.constant 0 : i32
    %c0_i32_0 = arith.constant 0 : i32
    %c0_i32_1 = arith.constant 0 : i32
    return %arg0, %c0_i32, %c0_i32_0 : i32, i32, i32
  }
  func.func @transform_11(%arg0: i32) -> (i32, i32, i32) {
    %c0_i32 = arith.constant 0 : i32
    %0 = arith.subi %c0_i32, %arg0 : i32
    %c0_i32_0 = arith.constant 0 : i32
    %c0_i32_1 = arith.constant 0 : i32
    %c0_i32_2 = arith.constant 0 : i32
    return %0, %c0_i32_0, %c0_i32_1 : i32, i32, i32
  }
}

module attributes {stable_mosaic.version = 11 : i64} {
  func.func @_decoder_kernel(%arg0: i32, %arg1: memref<4x8x32xf32, #tpu.memory_space<vmem>>, %arg2: memref<8x8x64xf32, #tpu.memory_space<vmem>>, %arg3: memref<8x8x32xf32, #tpu.memory_space<vmem>>, %arg4: memref<8x8xf32, #tpu.memory_space<vmem>>, %arg5: memref<8x32xf32, #tpu.memory_space<vmem>>, %arg6: memref<64x32xbf16, #tpu.memory_space<vmem>>, %arg7: memref<1x32xf32, #tpu.memory_space<vmem>>, %arg8: memref<32x96xbf16, #tpu.memory_space<vmem>>, %arg9: memref<32x96xbf16, #tpu.memory_space<vmem>>, %arg10: memref<1x96xf32, #tpu.memory_space<vmem>>, %arg11: memref<1x96xf32, #tpu.memory_space<vmem>>, %arg12: memref<32x32xbf16, #tpu.memory_space<vmem>>, %arg13: memref<1x32xf32, #tpu.memory_space<vmem>>, %arg14: memref<1x32xf32, #tpu.memory_space<vmem>>, %arg15: memref<1x32xf32, #tpu.memory_space<vmem>>, %arg16: memref<1x32xf32, #tpu.memory_space<vmem>>, %arg17: memref<1x1xf32, #tpu.memory_space<vmem>>, %arg18: memref<32x32xbf16, #tpu.memory_space<vmem>>, %arg19: memref<32x32xbf16, #tpu.memory_space<vmem>>, %arg20: memref<1x32xf32, #tpu.memory_space<vmem>>, %arg21: memref<1x32xf32, #tpu.memory_space<vmem>>, %arg22: memref<1x32xf32, #tpu.memory_space<vmem>>, %arg23: memref<1x32xf32, #tpu.memory_space<vmem>>, %arg24: memref<1x1xf32, #tpu.memory_space<vmem>>, %arg25: memref<4x8x128xf32, #tpu.memory_space<vmem>>, %arg26: memref<8x32xf32, #tpu.memory_space<vmem>>, %arg27: memref<8x8xf32, #tpu.memory_space<vmem>>) attributes {dimension_semantics = [#tpu.dimension_semantics<arbitrary>], iteration_bounds = array<i64: 1>, scalar_prefetch = 0 : i64, scratch_operands = 2 : i64, tpu.core_type = #tpu.core_type<tc>, window_params = [{transform_indices = @transform_0, window_bounds = array<i64: 4, 8, 32>}, {pipeline_mode = #tpu.pipeline_mode<synchronous>, transform_indices = @transform_1, window_bounds = array<i64: 8, 8, 64>}, {pipeline_mode = #tpu.pipeline_mode<synchronous>, transform_indices = @transform_2, window_bounds = array<i64: 8, 8, 32>}, {pipeline_mode = #tpu.pipeline_mode<synchronous>, transform_indices = @transform_3, window_bounds = array<i64: 8, 8>}, {pipeline_mode = #tpu.pipeline_mode<synchronous>, transform_indices = @transform_4, window_bounds = array<i64: 8, 32>}, {pipeline_mode = #tpu.pipeline_mode<synchronous>, transform_indices = @transform_5, window_bounds = array<i64: 64, 32>}, {pipeline_mode = #tpu.pipeline_mode<synchronous>, transform_indices = @transform_6, window_bounds = array<i64: 1, 32>}, {pipeline_mode = #tpu.pipeline_mode<synchronous>, transform_indices = @transform_7, window_bounds = array<i64: 32, 96>}, {pipeline_mode = #tpu.pipeline_mode<synchronous>, transform_indices = @transform_8, window_bounds = array<i64: 32, 96>}, {pipeline_mode = #tpu.pipeline_mode<synchronous>, transform_indices = @transform_9, window_bounds = array<i64: 1, 96>}, {pipeline_mode = #tpu.pipeline_mode<synchronous>, transform_indices = @transform_10, window_bounds = array<i64: 1, 96>}, {pipeline_mode = #tpu.pipeline_mode<synchronous>, transform_indices = @transform_11, window_bounds = array<i64: 32, 32>}, {pipeline_mode = #tpu.pipeline_mode<synchronous>, transform_indices = @transform_12, window_bounds = array<i64: 1, 32>}, {pipeline_mode = #tpu.pipeline_mode<synchronous>, transform_indices = @transform_13, window_bounds = array<i64: 1, 32>}, {pipeline_mode = #tpu.pipeline_mode<synchronous>, transform_indices = @transform_14, window_bounds = array<i64: 1, 32>}, {pipeline_mode = #tpu.pipeline_mode<synchronous>, transform_indices = @transform_15, window_bounds = array<i64: 1, 32>}, {pipeline_mode = #tpu.pipeline_mode<synchronous>, transform_indices = @transform_16, window_bounds = array<i64: 1, 1>}, {pipeline_mode = #tpu.pipeline_mode<synchronous>, transform_indices = @transform_17, window_bounds = array<i64: 32, 32>}, {pipeline_mode = #tpu.pipeline_mode<synchronous>, transform_indices = @transform_18, window_bounds = array<i64: 32, 32>}, {pipeline_mode = #tpu.pipeline_mode<synchronous>, transform_indices = @transform_19, window_bounds = array<i64: 1, 32>}, {pipeline_mode = #tpu.pipeline_mode<synchronous>, transform_indices = @transform_20, window_bounds = array<i64: 1, 32>}, {pipeline_mode = #tpu.pipeline_mode<synchronous>, transform_indices = @transform_21, window_bounds = array<i64: 1, 32>}, {pipeline_mode = #tpu.pipeline_mode<synchronous>, transform_indices = @transform_22, window_bounds = array<i64: 1, 32>}, {pipeline_mode = #tpu.pipeline_mode<synchronous>, transform_indices = @transform_23, window_bounds = array<i64: 1, 1>}, {transform_indices = @transform_24, window_bounds = array<i64: 4, 8, 128>}]} {
    %c0_i32 = arith.constant 0 : i32
    %0 = arith.cmpi eq, %arg0, %c0_i32 : i32
    %1 = arith.extui %0 : i1 to i32
    %c0_i32_0 = arith.constant 0 : i32
    %2 = arith.cmpi ne, %1, %c0_i32_0 : i32
    scf.if %2 {
      %c0_168 = arith.constant 0 : index
      %c0_169 = arith.constant 0 : index
      %571 = vector.load %arg5[%c0_168, %c0_169] : memref<8x32xf32, #tpu.memory_space<vmem>>, vector<8x32xf32>
      %c0_170 = arith.constant 0 : index
      %c0_171 = arith.constant 0 : index
      %572 = vector.load %arg26[%c0_170, %c0_171] : memref<8x32xf32, #tpu.memory_space<vmem>>, vector<8x32xf32>
      tpu.vector_store %arg26[%c0_170, %c0_171], %571 {strides = array<i32>} : memref<8x32xf32, #tpu.memory_space<vmem>>, vector<8x32xf32>,
      %cst_172 = arith.constant 0.000000e+00 : f32
      %573 = vector.broadcast %cst_172 : f32 to vector<8x8xf32>
      %c0_173 = arith.constant 0 : index
      %c0_174 = arith.constant 0 : index
      %574 = vector.load %arg27[%c0_173, %c0_174] : memref<8x8xf32, #tpu.memory_space<vmem>>, vector<8x8xf32>
      tpu.vector_store %arg27[%c0_173, %c0_174], %573 {strides = array<i32>} : memref<8x8xf32, #tpu.memory_space<vmem>>, vector<8x8xf32>,
    } else {
    }
    %c0 = arith.constant 0 : index
    %c0_1 = arith.constant 0 : index
    %c0_2 = arith.constant 0 : index
    %3 = vector.load %arg2[%c0, %c0_1, %c0_2] : memref<8x8x64xf32, #tpu.memory_space<vmem>>, vector<8x8x64xf32>
    %c0_3 = arith.constant 0 : index
    %c0_4 = arith.constant 0 : index
    %c0_5 = arith.constant 0 : index
    %4 = vector.load %arg3[%c0_3, %c0_4, %c0_5] : memref<8x8x32xf32, #tpu.memory_space<vmem>>, vector<8x8x32xf32>
    %c0_6 = arith.constant 0 : index
    %c0_7 = arith.constant 0 : index
    %5 = vector.load %arg4[%c0_6, %c0_7] : memref<8x8xf32, #tpu.memory_space<vmem>>, vector<8x8xf32>
    %cst = arith.constant 0.000000e+00 : f32
    %6 = vector.broadcast %cst : f32 to vector<8x8xf32>
    %7 = arith.cmpf ole, %5, %6 : vector<8x8xf32>
    %c0_8 = arith.constant 0 : index
    %c0_9 = arith.constant 0 : index
    %8 = vector.load %arg6[%c0_8, %c0_9] : memref<64x32xbf16, #tpu.memory_space<vmem>>, vector<64x32xbf16>
    %c0_10 = arith.constant 0 : index
    %c0_11 = arith.constant 0 : index
    %9 = vector.load %arg7[%c0_10, %c0_11] : memref<1x32xf32, #tpu.memory_space<vmem>>, vector<1x32xf32>
    %c0_12 = arith.constant 0 : index
    %c0_13 = arith.constant 0 : index
    %10 = vector.load %arg8[%c0_12, %c0_13] : memref<32x96xbf16, #tpu.memory_space<vmem>>, vector<32x96xbf16>
    %c0_14 = arith.constant 0 : index
    %c0_15 = arith.constant 0 : index
    %11 = vector.load %arg9[%c0_14, %c0_15] : memref<32x96xbf16, #tpu.memory_space<vmem>>, vector<32x96xbf16>
    %c0_16 = arith.constant 0 : index
    %c0_17 = arith.constant 0 : index
    %12 = vector.load %arg10[%c0_16, %c0_17] : memref<1x96xf32, #tpu.memory_space<vmem>>, vector<1x96xf32>
    %c0_18 = arith.constant 0 : index
    %c0_19 = arith.constant 0 : index
    %13 = vector.load %arg11[%c0_18, %c0_19] : memref<1x96xf32, #tpu.memory_space<vmem>>, vector<1x96xf32>
    %c0_20 = arith.constant 0 : index
    %c0_21 = arith.constant 0 : index
    %14 = vector.load %arg12[%c0_20, %c0_21] : memref<32x32xbf16, #tpu.memory_space<vmem>>, vector<32x32xbf16>
    %c0_22 = arith.constant 0 : index
    %c0_23 = arith.constant 0 : index
    %15 = vector.load %arg13[%c0_22, %c0_23] : memref<1x32xf32, #tpu.memory_space<vmem>>, vector<1x32xf32>
    %c0_24 = arith.constant 0 : index
    %c0_25 = arith.constant 0 : index
    %16 = vector.load %arg14[%c0_24, %c0_25] : memref<1x32xf32, #tpu.memory_space<vmem>>, vector<1x32xf32>
    %17 = vector.shape_cast %16 : vector<1x32xf32> to vector<1x1x32xf32>
    %c0_26 = arith.constant 0 : index
    %c0_27 = arith.constant 0 : index
    %18 = vector.load %arg15[%c0_26, %c0_27] : memref<1x32xf32, #tpu.memory_space<vmem>>, vector<1x32xf32>
    %19 = vector.shape_cast %18 : vector<1x32xf32> to vector<1x1x32xf32>
    %c0_28 = arith.constant 0 : index
    %c0_29 = arith.constant 0 : index
    %20 = vector.load %arg16[%c0_28, %c0_29] : memref<1x32xf32, #tpu.memory_space<vmem>>, vector<1x32xf32>
    %21 = vector.shape_cast %20 : vector<1x32xf32> to vector<1x1x32xf32>
    %c0_30 = arith.constant 0 : index
    %c0_31 = arith.constant 0 : index
    %22 = vector.load %arg17[%c0_30, %c0_31] : memref<1x1xf32, #tpu.memory_space<vmem>>, vector<1x1xf32>
    %c0_32 = arith.constant 0 : index
    %c0_33 = arith.constant 0 : index
    %23 = vector.load %arg18[%c0_32, %c0_33] : memref<32x32xbf16, #tpu.memory_space<vmem>>, vector<32x32xbf16>
    %c0_34 = arith.constant 0 : index
    %c0_35 = arith.constant 0 : index
    %24 = vector.load %arg19[%c0_34, %c0_35] : memref<32x32xbf16, #tpu.memory_space<vmem>>, vector<32x32xbf16>
    %c0_36 = arith.constant 0 : index
    %c0_37 = arith.constant 0 : index
    %25 = vector.load %arg20[%c0_36, %c0_37] : memref<1x32xf32, #tpu.memory_space<vmem>>, vector<1x32xf32>
    %c0_38 = arith.constant 0 : index
    %c0_39 = arith.constant 0 : index
    %26 = vector.load %arg21[%c0_38, %c0_39] : memref<1x32xf32, #tpu.memory_space<vmem>>, vector<1x32xf32>
    %c0_40 = arith.constant 0 : index
    %c0_41 = arith.constant 0 : index
    %27 = vector.load %arg22[%c0_40, %c0_41] : memref<1x32xf32, #tpu.memory_space<vmem>>, vector<1x32xf32>
    %c0_42 = arith.constant 0 : index
    %c0_43 = arith.constant 0 : index
    %28 = vector.load %arg23[%c0_42, %c0_43] : memref<1x32xf32, #tpu.memory_space<vmem>>, vector<1x32xf32>
    %c0_44 = arith.constant 0 : index
    %c0_45 = arith.constant 0 : index
    %29 = vector.load %arg24[%c0_44, %c0_45] : memref<1x1xf32, #tpu.memory_space<vmem>>, vector<1x1xf32>
    %cst_46 = arith.constant 0.000000e+00 : f32
    %30 = vector.broadcast %cst_46 : f32 to vector<8x87xf32>
    %c0_47 = arith.constant 0 : index
    %c0_48 = arith.constant 0 : index
    %31 = vector.load %arg26[%c0_47, %c0_48] : memref<8x32xf32, #tpu.memory_space<vmem>>, vector<8x32xf32>
    %c0_49 = arith.constant 0 : index
    %c0_50 = arith.constant 0 : index
    %32 = vector.load %arg27[%c0_49, %c0_50] : memref<8x8xf32, #tpu.memory_space<vmem>>, vector<8x8xf32>
    %c0_i32_51 = arith.constant 0 : i32
    %33 = arith.index_cast %c0_i32_51 : i32 to index
    %c0_52 = arith.constant 0 : index
    %c0_53 = arith.constant 0 : index
    %34 = vector.load %arg1[%33, %c0_52, %c0_53] : memref<4x8x32xf32, #tpu.memory_space<vmem>>, vector<1x8x32xf32>
    %35 = vector.shape_cast %34 : vector<1x8x32xf32> to vector<8x32xf32>
    %36 = arith.truncf %35 : vector<8x32xf32> to vector<8x32xbf16>
    %cst_54 = arith.constant dense<0.000000e+00> : vector<8x96xf32>
    %37 = tpu.matmul %36, %10, %cst_54 {dimension_numbers = #tpu.dot_dimension_numbers<[1], [0], [0], [1], [0, 0, 1, 1], [], []>} : vector<8x32xbf16>, vector<32x96xbf16>, vector<8x96xf32> -> vector<8x96xf32>
    %38 = vector.broadcast %12 : vector<1x96xf32> to vector<8x96xf32>
    %39 = arith.addf %37, %38 : vector<8x96xf32>
    %40 = arith.truncf %31 : vector<8x32xf32> to vector<8x32xbf16>
    %cst_55 = arith.constant dense<0.000000e+00> : vector<8x96xf32>
    %41 = tpu.matmul %40, %11, %cst_55 {dimension_numbers = #tpu.dot_dimension_numbers<[1], [0], [0], [1], [0, 0, 1, 1], [], []>} : vector<8x32xbf16>, vector<32x96xbf16>, vector<8x96xf32> -> vector<8x96xf32>
    %42 = vector.broadcast %13 : vector<1x96xf32> to vector<8x96xf32>
    %43 = arith.addf %41, %42 : vector<8x96xf32>
    %44 = vector.extract_strided_slice %39 {offsets = [0, 0], sizes = [8, 32], strides = [1, 1]} : vector<8x96xf32> to vector<8x32xf32>
    %45 = vector.extract_strided_slice %43 {offsets = [0, 0], sizes = [8, 32], strides = [1, 1]} : vector<8x96xf32> to vector<8x32xf32>
    %46 = arith.addf %44, %45 : vector<8x32xf32>
    %47 = arith.negf %46 : vector<8x32xf32>
    %48 = math.exp %47 : vector<8x32xf32>
    %cst_56 = arith.constant 1.000000e+00 : f32
    %49 = vector.broadcast %cst_56 : f32 to vector<8x32xf32>
    %50 = arith.addf %49, %48 : vector<8x32xf32>
    %51 = arith.divf %49, %50 : vector<8x32xf32>
    %52 = vector.extract_strided_slice %39 {offsets = [0, 32], sizes = [8, 32], strides = [1, 1]} : vector<8x96xf32> to vector<8x32xf32>
    %53 = vector.extract_strided_slice %43 {offsets = [0, 32], sizes = [8, 32], strides = [1, 1]} : vector<8x96xf32> to vector<8x32xf32>
    %54 = arith.addf %52, %53 : vector<8x32xf32>
    %55 = arith.negf %54 : vector<8x32xf32>
    %56 = math.exp %55 : vector<8x32xf32>
    %cst_57 = arith.constant 1.000000e+00 : f32
    %57 = vector.broadcast %cst_57 : f32 to vector<8x32xf32>
    %58 = arith.addf %57, %56 : vector<8x32xf32>
    %59 = arith.divf %57, %58 : vector<8x32xf32>
    %60 = vector.extract_strided_slice %39 {offsets = [0, 64], sizes = [8, 32], strides = [1, 1]} : vector<8x96xf32> to vector<8x32xf32>
    %61 = vector.extract_strided_slice %43 {offsets = [0, 64], sizes = [8, 32], strides = [1, 1]} : vector<8x96xf32> to vector<8x32xf32>
    %62 = arith.mulf %51, %61 : vector<8x32xf32>
    %63 = arith.addf %60, %62 : vector<8x32xf32>
    %64 = math.tanh %63 : vector<8x32xf32>
    %cst_58 = arith.constant 1.000000e+00 : f32
    %65 = vector.broadcast %cst_58 : f32 to vector<8x32xf32>
    %66 = arith.subf %65, %59 : vector<8x32xf32>
    %67 = arith.mulf %66, %64 : vector<8x32xf32>
    %68 = arith.mulf %59, %31 : vector<8x32xf32>
    %69 = arith.addf %67, %68 : vector<8x32xf32>
    %70 = arith.truncf %69 : vector<8x32xf32> to vector<8x32xbf16>
    %cst_59 = arith.constant dense<0.000000e+00> : vector<8x32xf32>
    %71 = tpu.matmul %70, %14, %cst_59 {dimension_numbers = #tpu.dot_dimension_numbers<[1], [0], [0], [1], [0, 0, 1, 1], [], []>} : vector<8x32xbf16>, vector<32x32xbf16>, vector<8x32xf32> -> vector<8x32xf32>
    %72 = vector.broadcast %15 : vector<1x32xf32> to vector<8x32xf32>
    %73 = arith.addf %71, %72 : vector<8x32xf32>
    %74 = vector.shape_cast %73 : vector<8x32xf32> to vector<8x1x32xf32>
    %75 = vector.broadcast %74 : vector<8x1x32xf32> to vector<8x8x32xf32>
    %76 = arith.addf %4, %75 : vector<8x8x32xf32>
    %77 = vector.shape_cast %32 : vector<8x8xf32> to vector<8x8x1xf32>
    %78 = vector.broadcast %77 : vector<8x8x1xf32> to vector<8x8x32xf32>
    %79 = vector.broadcast %17 : vector<1x1x32xf32> to vector<8x8x32xf32>
    %80 = arith.mulf %78, %79 : vector<8x8x32xf32>
    %81 = arith.addf %76, %80 : vector<8x8x32xf32>
    %82 = vector.broadcast %19 : vector<1x1x32xf32> to vector<8x8x32xf32>
    %83 = arith.addf %81, %82 : vector<8x8x32xf32>
    %84 = math.tanh %83 : vector<8x8x32xf32>
    %85 = vector.broadcast %21 : vector<1x1x32xf32> to vector<8x8x32xf32>
    %86 = arith.mulf %84, %85 : vector<8x8x32xf32>
    %cst_60 = arith.constant dense<0.000000e+00> : vector<8x8xf32>
    %87 = vector.multi_reduction <add>, %86, %cst_60 [2] : vector<8x8x32xf32> to vector<8x8xf32>
    %88 = vector.broadcast %22 : vector<1x1xf32> to vector<8x8xf32>
    %89 = arith.addf %87, %88 : vector<8x8xf32>
    %cst_61 = arith.constant -1.000000e+30 : f32
    %90 = vector.broadcast %cst_61 : f32 to vector<8x8xf32>
    %91 = arith.select %7, %90, %89 : vector<8x8xi1>, vector<8x8xf32>
    %cst_62 = arith.constant dense<0xFF800000> : vector<8xf32>
    %92 = vector.multi_reduction <maximumf>, %91, %cst_62 [1] : vector<8x8xf32> to vector<8xf32>
    %93 = vector.shape_cast %92 : vector<8xf32> to vector<8x1xf32>
    %94 = vector.broadcast %93 : vector<8x1xf32> to vector<8x8xf32>
    %95 = arith.subf %91, %94 : vector<8x8xf32>
    %96 = math.exp %95 : vector<8x8xf32>
    %cst_63 = arith.constant dense<0.000000e+00> : vector<8xf32>
    %97 = vector.multi_reduction <add>, %96, %cst_63 [1] : vector<8x8xf32> to vector<8xf32>
    %98 = vector.shape_cast %97 : vector<8xf32> to vector<8x1xf32>
    %99 = tpu.reciprocal %98 {approx = true} : vector<8x1xf32> -> vector<8x1xf32>
    %100 = vector.broadcast %99 : vector<8x1xf32> to vector<8x8xf32>
    %101 = arith.mulf %96, %100 : vector<8x8xf32>
    %102 = arith.addf %32, %101 : vector<8x8xf32>
    %103 = vector.shape_cast %101 : vector<8x8xf32> to vector<8x8x1xf32>
    %104 = vector.broadcast %103 : vector<8x8x1xf32> to vector<8x8x64xf32>
    %105 = arith.mulf %104, %3 : vector<8x8x64xf32>
    %cst_64 = arith.constant dense<0.000000e+00> : vector<8x64xf32>
    %106 = vector.multi_reduction <add>, %105, %cst_64 [1] : vector<8x8x64xf32> to vector<8x64xf32>
    %107 = arith.truncf %106 : vector<8x64xf32> to vector<8x64xbf16>
    %cst_65 = arith.constant dense<0.000000e+00> : vector<8x32xf32>
    %108 = tpu.matmul %107, %8, %cst_65 {dimension_numbers = #tpu.dot_dimension_numbers<[1], [0], [0], [1], [0, 0, 1, 1], [], []>} : vector<8x64xbf16>, vector<64x32xbf16>, vector<8x32xf32> -> vector<8x32xf32>
    %109 = vector.broadcast %9 : vector<1x32xf32> to vector<8x32xf32>
    %110 = arith.addf %108, %109 : vector<8x32xf32>
    %111 = arith.truncf %110 : vector<8x32xf32> to vector<8x32xbf16>
    %cst_66 = arith.constant dense<0.000000e+00> : vector<8x32xf32>
    %112 = tpu.matmul %111, %23, %cst_66 {dimension_numbers = #tpu.dot_dimension_numbers<[1], [0], [0], [1], [0, 0, 1, 1], [], []>} : vector<8x32xbf16>, vector<32x32xbf16>, vector<8x32xf32> -> vector<8x32xf32>
    %113 = arith.truncf %69 : vector<8x32xf32> to vector<8x32xbf16>
    %cst_67 = arith.constant dense<0.000000e+00> : vector<8x32xf32>
    %114 = tpu.matmul %113, %24, %cst_67 {dimension_numbers = #tpu.dot_dimension_numbers<[1], [0], [0], [1], [0, 0, 1, 1], [], []>} : vector<8x32xbf16>, vector<32x32xbf16>, vector<8x32xf32> -> vector<8x32xf32>
    %115 = arith.addf %112, %114 : vector<8x32xf32>
    %116 = vector.broadcast %25 : vector<1x32xf32> to vector<8x32xf32>
    %117 = arith.addf %115, %116 : vector<8x32xf32>
    %cst_68 = arith.constant dense<0xFF800000> : vector<8xf32>
    %118 = vector.multi_reduction <maximumf>, %117, %cst_68 [1] : vector<8x32xf32> to vector<8xf32>
    %119 = vector.shape_cast %118 : vector<8xf32> to vector<8x1xf32>
    %120 = vector.broadcast %119 : vector<8x1xf32> to vector<8x32xf32>
    %121 = arith.subf %117, %120 : vector<8x32xf32>
    %122 = math.exp %121 : vector<8x32xf32>
    %cst_69 = arith.constant dense<0.000000e+00> : vector<8xf32>
    %123 = vector.multi_reduction <add>, %122, %cst_69 [1] : vector<8x32xf32> to vector<8xf32>
    %124 = vector.shape_cast %123 : vector<8xf32> to vector<8x1xf32>
    %125 = tpu.reciprocal %124 {approx = true} : vector<8x1xf32> -> vector<8x1xf32>
    %126 = vector.broadcast %125 : vector<8x1xf32> to vector<8x32xf32>
    %127 = arith.mulf %122, %126 : vector<8x32xf32>
    %128 = vector.broadcast %26 : vector<1x32xf32> to vector<8x32xf32>
    %129 = arith.mulf %110, %128 : vector<8x32xf32>
    %cst_70 = arith.constant dense<0.000000e+00> : vector<8xf32>
    %130 = vector.multi_reduction <add>, %129, %cst_70 [1] : vector<8x32xf32> to vector<8xf32>
    %131 = vector.shape_cast %130 : vector<8xf32> to vector<8x1xf32>
    %132 = vector.broadcast %27 : vector<1x32xf32> to vector<8x32xf32>
    %133 = arith.mulf %69, %132 : vector<8x32xf32>
    %cst_71 = arith.constant dense<0.000000e+00> : vector<8xf32>
    %134 = vector.multi_reduction <add>, %133, %cst_71 [1] : vector<8x32xf32> to vector<8xf32>
    %135 = vector.shape_cast %134 : vector<8xf32> to vector<8x1xf32>
    %136 = arith.addf %131, %135 : vector<8x1xf32>
    %137 = vector.broadcast %28 : vector<1x32xf32> to vector<8x32xf32>
    %138 = arith.mulf %35, %137 : vector<8x32xf32>
    %cst_72 = arith.constant dense<0.000000e+00> : vector<8xf32>
    %139 = vector.multi_reduction <add>, %138, %cst_72 [1] : vector<8x32xf32> to vector<8xf32>
    %140 = vector.shape_cast %139 : vector<8xf32> to vector<8x1xf32>
    %141 = arith.addf %136, %140 : vector<8x1xf32>
    %142 = vector.broadcast %29 : vector<1x1xf32> to vector<8x1xf32>
    %143 = arith.addf %141, %142 : vector<8x1xf32>
    %144 = arith.negf %143 : vector<8x1xf32>
    %145 = math.exp %144 : vector<8x1xf32>
    %cst_73 = arith.constant 1.000000e+00 : f32
    %146 = vector.broadcast %cst_73 : f32 to vector<8x1xf32>
    %147 = arith.addf %146, %145 : vector<8x1xf32>
    %148 = arith.divf %146, %147 : vector<8x1xf32>
    %cst_74 = arith.constant 1.000000e-03 : f32
    %cst_75 = arith.constant 9.990000e-01 : f32
    %149 = vector.broadcast %cst_74 : f32 to vector<8x1xf32>
    %150 = arith.maximumf %149, %148 : vector<8x1xf32>
    %151 = vector.broadcast %cst_75 : f32 to vector<8x1xf32>
    %152 = arith.minimumf %151, %150 : vector<8x1xf32>
    %153 = arith.minimumf %101, %102 : vector<8x8xf32>
    %cst_76 = arith.constant dense<0.000000e+00> : vector<8xf32>
    %154 = vector.multi_reduction <add>, %153, %cst_76 [1] : vector<8x8xf32> to vector<8xf32>
    %155 = vector.shape_cast %154 : vector<8xf32> to vector<8x1xf32>
    %156 = vector.broadcast %152 : vector<8x1xf32> to vector<8x32xf32>
    %157 = arith.mulf %156, %127 : vector<8x32xf32>
    %cst_77 = arith.constant 1.000000e+00 : f32
    %158 = vector.broadcast %cst_77 : f32 to vector<8x1xf32>
    %159 = arith.subf %158, %152 : vector<8x1xf32>
    %160 = vector.broadcast %159 : vector<8x1xf32> to vector<8x8xf32>
    %161 = arith.mulf %160, %101 : vector<8x8xf32>
    %162 = tpu.concatenate %157, %161, %155, %30 in 1 : vector<8x32xf32>, vector<8x8xf32>, vector<8x1xf32>, vector<8x87xf32> -> vector<8x128xf32>
    %163 = arith.index_cast %c0_i32_51 : i32 to index
    %c0_78 = arith.constant 0 : index
    %c0_79 = arith.constant 0 : index
    %164 = vector.load %arg25[%163, %c0_78, %c0_79] : memref<4x8x128xf32, #tpu.memory_space<vmem>>, vector<1x8x128xf32>
    %165 = vector.shape_cast %164 : vector<1x8x128xf32> to vector<8x128xf32>
    %166 = vector.shape_cast %162 : vector<8x128xf32> to vector<1x8x128xf32>
    tpu.vector_store %arg25[%163, %c0_78, %c0_79], %166 {strides = array<i32>} : memref<4x8x128xf32, #tpu.memory_space<vmem>>, vector<1x8x128xf32>,
    %c1_i32 = arith.constant 1 : i32
    %167 = arith.index_cast %c1_i32 : i32 to index
    %c0_80 = arith.constant 0 : index
    %c0_81 = arith.constant 0 : index
    %168 = vector.load %arg1[%167, %c0_80, %c0_81] : memref<4x8x32xf32, #tpu.memory_space<vmem>>, vector<1x8x32xf32>
    %169 = vector.shape_cast %168 : vector<1x8x32xf32> to vector<8x32xf32>
    %170 = arith.truncf %169 : vector<8x32xf32> to vector<8x32xbf16>
    %cst_82 = arith.constant dense<0.000000e+00> : vector<8x96xf32>
    %171 = tpu.matmul %170, %10, %cst_82 {dimension_numbers = #tpu.dot_dimension_numbers<[1], [0], [0], [1], [0, 0, 1, 1], [], []>} : vector<8x32xbf16>, vector<32x96xbf16>, vector<8x96xf32> -> vector<8x96xf32>
    %172 = vector.broadcast %12 : vector<1x96xf32> to vector<8x96xf32>
    %173 = arith.addf %171, %172 : vector<8x96xf32>
    %174 = arith.truncf %110 : vector<8x32xf32> to vector<8x32xbf16>
    %cst_83 = arith.constant dense<0.000000e+00> : vector<8x96xf32>
    %175 = tpu.matmul %174, %11, %cst_83 {dimension_numbers = #tpu.dot_dimension_numbers<[1], [0], [0], [1], [0, 0, 1, 1], [], []>} : vector<8x32xbf16>, vector<32x96xbf16>, vector<8x96xf32> -> vector<8x96xf32>
    %176 = vector.broadcast %13 : vector<1x96xf32> to vector<8x96xf32>
    %177 = arith.addf %175, %176 : vector<8x96xf32>
    %178 = vector.extract_strided_slice %173 {offsets = [0, 0], sizes = [8, 32], strides = [1, 1]} : vector<8x96xf32> to vector<8x32xf32>
    %179 = vector.extract_strided_slice %177 {offsets = [0, 0], sizes = [8, 32], strides = [1, 1]} : vector<8x96xf32> to vector<8x32xf32>
    %180 = arith.addf %178, %179 : vector<8x32xf32>
    %181 = arith.negf %180 : vector<8x32xf32>
    %182 = math.exp %181 : vector<8x32xf32>
    %cst_84 = arith.constant 1.000000e+00 : f32
    %183 = vector.broadcast %cst_84 : f32 to vector<8x32xf32>
    %184 = arith.addf %183, %182 : vector<8x32xf32>
    %185 = arith.divf %183, %184 : vector<8x32xf32>
    %186 = vector.extract_strided_slice %173 {offsets = [0, 32], sizes = [8, 32], strides = [1, 1]} : vector<8x96xf32> to vector<8x32xf32>
    %187 = vector.extract_strided_slice %177 {offsets = [0, 32], sizes = [8, 32], strides = [1, 1]} : vector<8x96xf32> to vector<8x32xf32>
    %188 = arith.addf %186, %187 : vector<8x32xf32>
    %189 = arith.negf %188 : vector<8x32xf32>
    %190 = math.exp %189 : vector<8x32xf32>
    %cst_85 = arith.constant 1.000000e+00 : f32
    %191 = vector.broadcast %cst_85 : f32 to vector<8x32xf32>
    %192 = arith.addf %191, %190 : vector<8x32xf32>
    %193 = arith.divf %191, %192 : vector<8x32xf32>
    %194 = vector.extract_strided_slice %173 {offsets = [0, 64], sizes = [8, 32], strides = [1, 1]} : vector<8x96xf32> to vector<8x32xf32>
    %195 = vector.extract_strided_slice %177 {offsets = [0, 64], sizes = [8, 32], strides = [1, 1]} : vector<8x96xf32> to vector<8x32xf32>
    %196 = arith.mulf %185, %195 : vector<8x32xf32>
    %197 = arith.addf %194, %196 : vector<8x32xf32>
    %198 = math.tanh %197 : vector<8x32xf32>
    %cst_86 = arith.constant 1.000000e+00 : f32
    %199 = vector.broadcast %cst_86 : f32 to vector<8x32xf32>
    %200 = arith.subf %199, %193 : vector<8x32xf32>
    %201 = arith.mulf %200, %198 : vector<8x32xf32>
    %202 = arith.mulf %193, %110 : vector<8x32xf32>
    %203 = arith.addf %201, %202 : vector<8x32xf32>
    %204 = arith.truncf %203 : vector<8x32xf32> to vector<8x32xbf16>
    %cst_87 = arith.constant dense<0.000000e+00> : vector<8x32xf32>
    %205 = tpu.matmul %204, %14, %cst_87 {dimension_numbers = #tpu.dot_dimension_numbers<[1], [0], [0], [1], [0, 0, 1, 1], [], []>} : vector<8x32xbf16>, vector<32x32xbf16>, vector<8x32xf32> -> vector<8x32xf32>
    %206 = vector.broadcast %15 : vector<1x32xf32> to vector<8x32xf32>
    %207 = arith.addf %205, %206 : vector<8x32xf32>
    %208 = vector.shape_cast %207 : vector<8x32xf32> to vector<8x1x32xf32>
    %209 = vector.broadcast %208 : vector<8x1x32xf32> to vector<8x8x32xf32>
    %210 = arith.addf %4, %209 : vector<8x8x32xf32>
    %211 = vector.shape_cast %102 : vector<8x8xf32> to vector<8x8x1xf32>
    %212 = vector.broadcast %211 : vector<8x8x1xf32> to vector<8x8x32xf32>
    %213 = vector.broadcast %17 : vector<1x1x32xf32> to vector<8x8x32xf32>
    %214 = arith.mulf %212, %213 : vector<8x8x32xf32>
    %215 = arith.addf %210, %214 : vector<8x8x32xf32>
    %216 = vector.broadcast %19 : vector<1x1x32xf32> to vector<8x8x32xf32>
    %217 = arith.addf %215, %216 : vector<8x8x32xf32>
    %218 = math.tanh %217 : vector<8x8x32xf32>
    %219 = vector.broadcast %21 : vector<1x1x32xf32> to vector<8x8x32xf32>
    %220 = arith.mulf %218, %219 : vector<8x8x32xf32>
    %cst_88 = arith.constant dense<0.000000e+00> : vector<8x8xf32>
    %221 = vector.multi_reduction <add>, %220, %cst_88 [2] : vector<8x8x32xf32> to vector<8x8xf32>
    %222 = vector.broadcast %22 : vector<1x1xf32> to vector<8x8xf32>
    %223 = arith.addf %221, %222 : vector<8x8xf32>
    %cst_89 = arith.constant -1.000000e+30 : f32
    %224 = vector.broadcast %cst_89 : f32 to vector<8x8xf32>
    %225 = arith.select %7, %224, %223 : vector<8x8xi1>, vector<8x8xf32>
    %cst_90 = arith.constant dense<0xFF800000> : vector<8xf32>
    %226 = vector.multi_reduction <maximumf>, %225, %cst_90 [1] : vector<8x8xf32> to vector<8xf32>
    %227 = vector.shape_cast %226 : vector<8xf32> to vector<8x1xf32>
    %228 = vector.broadcast %227 : vector<8x1xf32> to vector<8x8xf32>
    %229 = arith.subf %225, %228 : vector<8x8xf32>
    %230 = math.exp %229 : vector<8x8xf32>
    %cst_91 = arith.constant dense<0.000000e+00> : vector<8xf32>
    %231 = vector.multi_reduction <add>, %230, %cst_91 [1] : vector<8x8xf32> to vector<8xf32>
    %232 = vector.shape_cast %231 : vector<8xf32> to vector<8x1xf32>
    %233 = tpu.reciprocal %232 {approx = true} : vector<8x1xf32> -> vector<8x1xf32>
    %234 = vector.broadcast %233 : vector<8x1xf32> to vector<8x8xf32>
    %235 = arith.mulf %230, %234 : vector<8x8xf32>
    %236 = arith.addf %102, %235 : vector<8x8xf32>
    %237 = vector.shape_cast %235 : vector<8x8xf32> to vector<8x8x1xf32>
    %238 = vector.broadcast %237 : vector<8x8x1xf32> to vector<8x8x64xf32>
    %239 = arith.mulf %238, %3 : vector<8x8x64xf32>
    %cst_92 = arith.constant dense<0.000000e+00> : vector<8x64xf32>
    %240 = vector.multi_reduction <add>, %239, %cst_92 [1] : vector<8x8x64xf32> to vector<8x64xf32>
    %241 = arith.truncf %240 : vector<8x64xf32> to vector<8x64xbf16>
    %cst_93 = arith.constant dense<0.000000e+00> : vector<8x32xf32>
    %242 = tpu.matmul %241, %8, %cst_93 {dimension_numbers = #tpu.dot_dimension_numbers<[1], [0], [0], [1], [0, 0, 1, 1], [], []>} : vector<8x64xbf16>, vector<64x32xbf16>, vector<8x32xf32> -> vector<8x32xf32>
    %243 = vector.broadcast %9 : vector<1x32xf32> to vector<8x32xf32>
    %244 = arith.addf %242, %243 : vector<8x32xf32>
    %245 = arith.truncf %244 : vector<8x32xf32> to vector<8x32xbf16>
    %cst_94 = arith.constant dense<0.000000e+00> : vector<8x32xf32>
    %246 = tpu.matmul %245, %23, %cst_94 {dimension_numbers = #tpu.dot_dimension_numbers<[1], [0], [0], [1], [0, 0, 1, 1], [], []>} : vector<8x32xbf16>, vector<32x32xbf16>, vector<8x32xf32> -> vector<8x32xf32>
    %247 = arith.truncf %203 : vector<8x32xf32> to vector<8x32xbf16>
    %cst_95 = arith.constant dense<0.000000e+00> : vector<8x32xf32>
    %248 = tpu.matmul %247, %24, %cst_95 {dimension_numbers = #tpu.dot_dimension_numbers<[1], [0], [0], [1], [0, 0, 1, 1], [], []>} : vector<8x32xbf16>, vector<32x32xbf16>, vector<8x32xf32> -> vector<8x32xf32>
    %249 = arith.addf %246, %248 : vector<8x32xf32>
    %250 = vector.broadcast %25 : vector<1x32xf32> to vector<8x32xf32>
    %251 = arith.addf %249, %250 : vector<8x32xf32>
    %cst_96 = arith.constant dense<0xFF800000> : vector<8xf32>
    %252 = vector.multi_reduction <maximumf>, %251, %cst_96 [1] : vector<8x32xf32> to vector<8xf32>
    %253 = vector.shape_cast %252 : vector<8xf32> to vector<8x1xf32>
    %254 = vector.broadcast %253 : vector<8x1xf32> to vector<8x32xf32>
    %255 = arith.subf %251, %254 : vector<8x32xf32>
    %256 = math.exp %255 : vector<8x32xf32>
    %cst_97 = arith.constant dense<0.000000e+00> : vector<8xf32>
    %257 = vector.multi_reduction <add>, %256, %cst_97 [1] : vector<8x32xf32> to vector<8xf32>
    %258 = vector.shape_cast %257 : vector<8xf32> to vector<8x1xf32>
    %259 = tpu.reciprocal %258 {approx = true} : vector<8x1xf32> -> vector<8x1xf32>
    %260 = vector.broadcast %259 : vector<8x1xf32> to vector<8x32xf32>
    %261 = arith.mulf %256, %260 : vector<8x32xf32>
    %262 = vector.broadcast %26 : vector<1x32xf32> to vector<8x32xf32>
    %263 = arith.mulf %244, %262 : vector<8x32xf32>
    %cst_98 = arith.constant dense<0.000000e+00> : vector<8xf32>
    %264 = vector.multi_reduction <add>, %263, %cst_98 [1] : vector<8x32xf32> to vector<8xf32>
    %265 = vector.shape_cast %264 : vector<8xf32> to vector<8x1xf32>
    %266 = vector.broadcast %27 : vector<1x32xf32> to vector<8x32xf32>
    %267 = arith.mulf %203, %266 : vector<8x32xf32>
    %cst_99 = arith.constant dense<0.000000e+00> : vector<8xf32>
    %268 = vector.multi_reduction <add>, %267, %cst_99 [1] : vector<8x32xf32> to vector<8xf32>
    %269 = vector.shape_cast %268 : vector<8xf32> to vector<8x1xf32>
    %270 = arith.addf %265, %269 : vector<8x1xf32>
    %271 = vector.broadcast %28 : vector<1x32xf32> to vector<8x32xf32>
    %272 = arith.mulf %169, %271 : vector<8x32xf32>
    %cst_100 = arith.constant dense<0.000000e+00> : vector<8xf32>
    %273 = vector.multi_reduction <add>, %272, %cst_100 [1] : vector<8x32xf32> to vector<8xf32>
    %274 = vector.shape_cast %273 : vector<8xf32> to vector<8x1xf32>
    %275 = arith.addf %270, %274 : vector<8x1xf32>
    %276 = vector.broadcast %29 : vector<1x1xf32> to vector<8x1xf32>
    %277 = arith.addf %275, %276 : vector<8x1xf32>
    %278 = arith.negf %277 : vector<8x1xf32>
    %279 = math.exp %278 : vector<8x1xf32>
    %cst_101 = arith.constant 1.000000e+00 : f32
    %280 = vector.broadcast %cst_101 : f32 to vector<8x1xf32>
    %281 = arith.addf %280, %279 : vector<8x1xf32>
    %282 = arith.divf %280, %281 : vector<8x1xf32>
    %cst_102 = arith.constant 1.000000e-03 : f32
    %cst_103 = arith.constant 9.990000e-01 : f32
    %283 = vector.broadcast %cst_102 : f32 to vector<8x1xf32>
    %284 = arith.maximumf %283, %282 : vector<8x1xf32>
    %285 = vector.broadcast %cst_103 : f32 to vector<8x1xf32>
    %286 = arith.minimumf %285, %284 : vector<8x1xf32>
    %287 = arith.minimumf %235, %236 : vector<8x8xf32>
    %cst_104 = arith.constant dense<0.000000e+00> : vector<8xf32>
    %288 = vector.multi_reduction <add>, %287, %cst_104 [1] : vector<8x8xf32> to vector<8xf32>
    %289 = vector.shape_cast %288 : vector<8xf32> to vector<8x1xf32>
    %290 = vector.broadcast %286 : vector<8x1xf32> to vector<8x32xf32>
    %291 = arith.mulf %290, %261 : vector<8x32xf32>
    %cst_105 = arith.constant 1.000000e+00 : f32
    %292 = vector.broadcast %cst_105 : f32 to vector<8x1xf32>
    %293 = arith.subf %292, %286 : vector<8x1xf32>
    %294 = vector.broadcast %293 : vector<8x1xf32> to vector<8x8xf32>
    %295 = arith.mulf %294, %235 : vector<8x8xf32>
    %296 = tpu.concatenate %291, %295, %289, %30 in 1 : vector<8x32xf32>, vector<8x8xf32>, vector<8x1xf32>, vector<8x87xf32> -> vector<8x128xf32>
    %297 = arith.index_cast %c1_i32 : i32 to index
    %c0_106 = arith.constant 0 : index
    %c0_107 = arith.constant 0 : index
    %298 = vector.load %arg25[%297, %c0_106, %c0_107] : memref<4x8x128xf32, #tpu.memory_space<vmem>>, vector<1x8x128xf32>
    %299 = vector.shape_cast %298 : vector<1x8x128xf32> to vector<8x128xf32>
    %300 = vector.shape_cast %296 : vector<8x128xf32> to vector<1x8x128xf32>
    tpu.vector_store %arg25[%297, %c0_106, %c0_107], %300 {strides = array<i32>} : memref<4x8x128xf32, #tpu.memory_space<vmem>>, vector<1x8x128xf32>,
    %c2_i32 = arith.constant 2 : i32
    %301 = arith.index_cast %c2_i32 : i32 to index
    %c0_108 = arith.constant 0 : index
    %c0_109 = arith.constant 0 : index
    %302 = vector.load %arg1[%301, %c0_108, %c0_109] : memref<4x8x32xf32, #tpu.memory_space<vmem>>, vector<1x8x32xf32>
    %303 = vector.shape_cast %302 : vector<1x8x32xf32> to vector<8x32xf32>
    %304 = arith.truncf %303 : vector<8x32xf32> to vector<8x32xbf16>
    %cst_110 = arith.constant dense<0.000000e+00> : vector<8x96xf32>
    %305 = tpu.matmul %304, %10, %cst_110 {dimension_numbers = #tpu.dot_dimension_numbers<[1], [0], [0], [1], [0, 0, 1, 1], [], []>} : vector<8x32xbf16>, vector<32x96xbf16>, vector<8x96xf32> -> vector<8x96xf32>
    %306 = vector.broadcast %12 : vector<1x96xf32> to vector<8x96xf32>
    %307 = arith.addf %305, %306 : vector<8x96xf32>
    %308 = arith.truncf %244 : vector<8x32xf32> to vector<8x32xbf16>
    %cst_111 = arith.constant dense<0.000000e+00> : vector<8x96xf32>
    %309 = tpu.matmul %308, %11, %cst_111 {dimension_numbers = #tpu.dot_dimension_numbers<[1], [0], [0], [1], [0, 0, 1, 1], [], []>} : vector<8x32xbf16>, vector<32x96xbf16>, vector<8x96xf32> -> vector<8x96xf32>
    %310 = vector.broadcast %13 : vector<1x96xf32> to vector<8x96xf32>
    %311 = arith.addf %309, %310 : vector<8x96xf32>
    %312 = vector.extract_strided_slice %307 {offsets = [0, 0], sizes = [8, 32], strides = [1, 1]} : vector<8x96xf32> to vector<8x32xf32>
    %313 = vector.extract_strided_slice %311 {offsets = [0, 0], sizes = [8, 32], strides = [1, 1]} : vector<8x96xf32> to vector<8x32xf32>
    %314 = arith.addf %312, %313 : vector<8x32xf32>
    %315 = arith.negf %314 : vector<8x32xf32>
    %316 = math.exp %315 : vector<8x32xf32>
    %cst_112 = arith.constant 1.000000e+00 : f32
    %317 = vector.broadcast %cst_112 : f32 to vector<8x32xf32>
    %318 = arith.addf %317, %316 : vector<8x32xf32>
    %319 = arith.divf %317, %318 : vector<8x32xf32>
    %320 = vector.extract_strided_slice %307 {offsets = [0, 32], sizes = [8, 32], strides = [1, 1]} : vector<8x96xf32> to vector<8x32xf32>
    %321 = vector.extract_strided_slice %311 {offsets = [0, 32], sizes = [8, 32], strides = [1, 1]} : vector<8x96xf32> to vector<8x32xf32>
    %322 = arith.addf %320, %321 : vector<8x32xf32>
    %323 = arith.negf %322 : vector<8x32xf32>
    %324 = math.exp %323 : vector<8x32xf32>
    %cst_113 = arith.constant 1.000000e+00 : f32
    %325 = vector.broadcast %cst_113 : f32 to vector<8x32xf32>
    %326 = arith.addf %325, %324 : vector<8x32xf32>
    %327 = arith.divf %325, %326 : vector<8x32xf32>
    %328 = vector.extract_strided_slice %307 {offsets = [0, 64], sizes = [8, 32], strides = [1, 1]} : vector<8x96xf32> to vector<8x32xf32>
    %329 = vector.extract_strided_slice %311 {offsets = [0, 64], sizes = [8, 32], strides = [1, 1]} : vector<8x96xf32> to vector<8x32xf32>
    %330 = arith.mulf %319, %329 : vector<8x32xf32>
    %331 = arith.addf %328, %330 : vector<8x32xf32>
    %332 = math.tanh %331 : vector<8x32xf32>
    %cst_114 = arith.constant 1.000000e+00 : f32
    %333 = vector.broadcast %cst_114 : f32 to vector<8x32xf32>
    %334 = arith.subf %333, %327 : vector<8x32xf32>
    %335 = arith.mulf %334, %332 : vector<8x32xf32>
    %336 = arith.mulf %327, %244 : vector<8x32xf32>
    %337 = arith.addf %335, %336 : vector<8x32xf32>
    %338 = arith.truncf %337 : vector<8x32xf32> to vector<8x32xbf16>
    %cst_115 = arith.constant dense<0.000000e+00> : vector<8x32xf32>
    %339 = tpu.matmul %338, %14, %cst_115 {dimension_numbers = #tpu.dot_dimension_numbers<[1], [0], [0], [1], [0, 0, 1, 1], [], []>} : vector<8x32xbf16>, vector<32x32xbf16>, vector<8x32xf32> -> vector<8x32xf32>
    %340 = vector.broadcast %15 : vector<1x32xf32> to vector<8x32xf32>
    %341 = arith.addf %339, %340 : vector<8x32xf32>
    %342 = vector.shape_cast %341 : vector<8x32xf32> to vector<8x1x32xf32>
    %343 = vector.broadcast %342 : vector<8x1x32xf32> to vector<8x8x32xf32>
    %344 = arith.addf %4, %343 : vector<8x8x32xf32>
    %345 = vector.shape_cast %236 : vector<8x8xf32> to vector<8x8x1xf32>
    %346 = vector.broadcast %345 : vector<8x8x1xf32> to vector<8x8x32xf32>
    %347 = vector.broadcast %17 : vector<1x1x32xf32> to vector<8x8x32xf32>
    %348 = arith.mulf %346, %347 : vector<8x8x32xf32>
    %349 = arith.addf %344, %348 : vector<8x8x32xf32>
    %350 = vector.broadcast %19 : vector<1x1x32xf32> to vector<8x8x32xf32>
    %351 = arith.addf %349, %350 : vector<8x8x32xf32>
    %352 = math.tanh %351 : vector<8x8x32xf32>
    %353 = vector.broadcast %21 : vector<1x1x32xf32> to vector<8x8x32xf32>
    %354 = arith.mulf %352, %353 : vector<8x8x32xf32>
    %cst_116 = arith.constant dense<0.000000e+00> : vector<8x8xf32>
    %355 = vector.multi_reduction <add>, %354, %cst_116 [2] : vector<8x8x32xf32> to vector<8x8xf32>
    %356 = vector.broadcast %22 : vector<1x1xf32> to vector<8x8xf32>
    %357 = arith.addf %355, %356 : vector<8x8xf32>
    %cst_117 = arith.constant -1.000000e+30 : f32
    %358 = vector.broadcast %cst_117 : f32 to vector<8x8xf32>
    %359 = arith.select %7, %358, %357 : vector<8x8xi1>, vector<8x8xf32>
    %cst_118 = arith.constant dense<0xFF800000> : vector<8xf32>
    %360 = vector.multi_reduction <maximumf>, %359, %cst_118 [1] : vector<8x8xf32> to vector<8xf32>
    %361 = vector.shape_cast %360 : vector<8xf32> to vector<8x1xf32>
    %362 = vector.broadcast %361 : vector<8x1xf32> to vector<8x8xf32>
    %363 = arith.subf %359, %362 : vector<8x8xf32>
    %364 = math.exp %363 : vector<8x8xf32>
    %cst_119 = arith.constant dense<0.000000e+00> : vector<8xf32>
    %365 = vector.multi_reduction <add>, %364, %cst_119 [1] : vector<8x8xf32> to vector<8xf32>
    %366 = vector.shape_cast %365 : vector<8xf32> to vector<8x1xf32>
    %367 = tpu.reciprocal %366 {approx = true} : vector<8x1xf32> -> vector<8x1xf32>
    %368 = vector.broadcast %367 : vector<8x1xf32> to vector<8x8xf32>
    %369 = arith.mulf %364, %368 : vector<8x8xf32>
    %370 = arith.addf %236, %369 : vector<8x8xf32>
    %371 = vector.shape_cast %369 : vector<8x8xf32> to vector<8x8x1xf32>
    %372 = vector.broadcast %371 : vector<8x8x1xf32> to vector<8x8x64xf32>
    %373 = arith.mulf %372, %3 : vector<8x8x64xf32>
    %cst_120 = arith.constant dense<0.000000e+00> : vector<8x64xf32>
    %374 = vector.multi_reduction <add>, %373, %cst_120 [1] : vector<8x8x64xf32> to vector<8x64xf32>
    %375 = arith.truncf %374 : vector<8x64xf32> to vector<8x64xbf16>
    %cst_121 = arith.constant dense<0.000000e+00> : vector<8x32xf32>
    %376 = tpu.matmul %375, %8, %cst_121 {dimension_numbers = #tpu.dot_dimension_numbers<[1], [0], [0], [1], [0, 0, 1, 1], [], []>} : vector<8x64xbf16>, vector<64x32xbf16>, vector<8x32xf32> -> vector<8x32xf32>
    %377 = vector.broadcast %9 : vector<1x32xf32> to vector<8x32xf32>
    %378 = arith.addf %376, %377 : vector<8x32xf32>
    %379 = arith.truncf %378 : vector<8x32xf32> to vector<8x32xbf16>
    %cst_122 = arith.constant dense<0.000000e+00> : vector<8x32xf32>
    %380 = tpu.matmul %379, %23, %cst_122 {dimension_numbers = #tpu.dot_dimension_numbers<[1], [0], [0], [1], [0, 0, 1, 1], [], []>} : vector<8x32xbf16>, vector<32x32xbf16>, vector<8x32xf32> -> vector<8x32xf32>
    %381 = arith.truncf %337 : vector<8x32xf32> to vector<8x32xbf16>
    %cst_123 = arith.constant dense<0.000000e+00> : vector<8x32xf32>
    %382 = tpu.matmul %381, %24, %cst_123 {dimension_numbers = #tpu.dot_dimension_numbers<[1], [0], [0], [1], [0, 0, 1, 1], [], []>} : vector<8x32xbf16>, vector<32x32xbf16>, vector<8x32xf32> -> vector<8x32xf32>
    %383 = arith.addf %380, %382 : vector<8x32xf32>
    %384 = vector.broadcast %25 : vector<1x32xf32> to vector<8x32xf32>
    %385 = arith.addf %383, %384 : vector<8x32xf32>
    %cst_124 = arith.constant dense<0xFF800000> : vector<8xf32>
    %386 = vector.multi_reduction <maximumf>, %385, %cst_124 [1] : vector<8x32xf32> to vector<8xf32>
    %387 = vector.shape_cast %386 : vector<8xf32> to vector<8x1xf32>
    %388 = vector.broadcast %387 : vector<8x1xf32> to vector<8x32xf32>
    %389 = arith.subf %385, %388 : vector<8x32xf32>
    %390 = math.exp %389 : vector<8x32xf32>
    %cst_125 = arith.constant dense<0.000000e+00> : vector<8xf32>
    %391 = vector.multi_reduction <add>, %390, %cst_125 [1] : vector<8x32xf32> to vector<8xf32>
    %392 = vector.shape_cast %391 : vector<8xf32> to vector<8x1xf32>
    %393 = tpu.reciprocal %392 {approx = true} : vector<8x1xf32> -> vector<8x1xf32>
    %394 = vector.broadcast %393 : vector<8x1xf32> to vector<8x32xf32>
    %395 = arith.mulf %390, %394 : vector<8x32xf32>
    %396 = vector.broadcast %26 : vector<1x32xf32> to vector<8x32xf32>
    %397 = arith.mulf %378, %396 : vector<8x32xf32>
    %cst_126 = arith.constant dense<0.000000e+00> : vector<8xf32>
    %398 = vector.multi_reduction <add>, %397, %cst_126 [1] : vector<8x32xf32> to vector<8xf32>
    %399 = vector.shape_cast %398 : vector<8xf32> to vector<8x1xf32>
    %400 = vector.broadcast %27 : vector<1x32xf32> to vector<8x32xf32>
    %401 = arith.mulf %337, %400 : vector<8x32xf32>
    %cst_127 = arith.constant dense<0.000000e+00> : vector<8xf32>
    %402 = vector.multi_reduction <add>, %401, %cst_127 [1] : vector<8x32xf32> to vector<8xf32>
    %403 = vector.shape_cast %402 : vector<8xf32> to vector<8x1xf32>
    %404 = arith.addf %399, %403 : vector<8x1xf32>
    %405 = vector.broadcast %28 : vector<1x32xf32> to vector<8x32xf32>
    %406 = arith.mulf %303, %405 : vector<8x32xf32>
    %cst_128 = arith.constant dense<0.000000e+00> : vector<8xf32>
    %407 = vector.multi_reduction <add>, %406, %cst_128 [1] : vector<8x32xf32> to vector<8xf32>
    %408 = vector.shape_cast %407 : vector<8xf32> to vector<8x1xf32>
    %409 = arith.addf %404, %408 : vector<8x1xf32>
    %410 = vector.broadcast %29 : vector<1x1xf32> to vector<8x1xf32>
    %411 = arith.addf %409, %410 : vector<8x1xf32>
    %412 = arith.negf %411 : vector<8x1xf32>
    %413 = math.exp %412 : vector<8x1xf32>
    %cst_129 = arith.constant 1.000000e+00 : f32
    %414 = vector.broadcast %cst_129 : f32 to vector<8x1xf32>
    %415 = arith.addf %414, %413 : vector<8x1xf32>
    %416 = arith.divf %414, %415 : vector<8x1xf32>
    %cst_130 = arith.constant 1.000000e-03 : f32
    %cst_131 = arith.constant 9.990000e-01 : f32
    %417 = vector.broadcast %cst_130 : f32 to vector<8x1xf32>
    %418 = arith.maximumf %417, %416 : vector<8x1xf32>
    %419 = vector.broadcast %cst_131 : f32 to vector<8x1xf32>
    %420 = arith.minimumf %419, %418 : vector<8x1xf32>
    %421 = arith.minimumf %369, %370 : vector<8x8xf32>
    %cst_132 = arith.constant dense<0.000000e+00> : vector<8xf32>
    %422 = vector.multi_reduction <add>, %421, %cst_132 [1] : vector<8x8xf32> to vector<8xf32>
    %423 = vector.shape_cast %422 : vector<8xf32> to vector<8x1xf32>
    %424 = vector.broadcast %420 : vector<8x1xf32> to vector<8x32xf32>
    %425 = arith.mulf %424, %395 : vector<8x32xf32>
    %cst_133 = arith.constant 1.000000e+00 : f32
    %426 = vector.broadcast %cst_133 : f32 to vector<8x1xf32>
    %427 = arith.subf %426, %420 : vector<8x1xf32>
    %428 = vector.broadcast %427 : vector<8x1xf32> to vector<8x8xf32>
    %429 = arith.mulf %428, %369 : vector<8x8xf32>
    %430 = tpu.concatenate %425, %429, %423, %30 in 1 : vector<8x32xf32>, vector<8x8xf32>, vector<8x1xf32>, vector<8x87xf32> -> vector<8x128xf32>
    %431 = arith.index_cast %c2_i32 : i32 to index
    %c0_134 = arith.constant 0 : index
    %c0_135 = arith.constant 0 : index
    %432 = vector.load %arg25[%431, %c0_134, %c0_135] : memref<4x8x128xf32, #tpu.memory_space<vmem>>, vector<1x8x128xf32>
    %433 = vector.shape_cast %432 : vector<1x8x128xf32> to vector<8x128xf32>
    %434 = vector.shape_cast %430 : vector<8x128xf32> to vector<1x8x128xf32>
    tpu.vector_store %arg25[%431, %c0_134, %c0_135], %434 {strides = array<i32>} : memref<4x8x128xf32, #tpu.memory_space<vmem>>, vector<1x8x128xf32>,
    %c3_i32 = arith.constant 3 : i32
    %435 = arith.index_cast %c3_i32 : i32 to index
    %c0_136 = arith.constant 0 : index
    %c0_137 = arith.constant 0 : index
    %436 = vector.load %arg1[%435, %c0_136, %c0_137] : memref<4x8x32xf32, #tpu.memory_space<vmem>>, vector<1x8x32xf32>
    %437 = vector.shape_cast %436 : vector<1x8x32xf32> to vector<8x32xf32>
    %438 = arith.truncf %437 : vector<8x32xf32> to vector<8x32xbf16>
    %cst_138 = arith.constant dense<0.000000e+00> : vector<8x96xf32>
    %439 = tpu.matmul %438, %10, %cst_138 {dimension_numbers = #tpu.dot_dimension_numbers<[1], [0], [0], [1], [0, 0, 1, 1], [], []>} : vector<8x32xbf16>, vector<32x96xbf16>, vector<8x96xf32> -> vector<8x96xf32>
    %440 = vector.broadcast %12 : vector<1x96xf32> to vector<8x96xf32>
    %441 = arith.addf %439, %440 : vector<8x96xf32>
    %442 = arith.truncf %378 : vector<8x32xf32> to vector<8x32xbf16>
    %cst_139 = arith.constant dense<0.000000e+00> : vector<8x96xf32>
    %443 = tpu.matmul %442, %11, %cst_139 {dimension_numbers = #tpu.dot_dimension_numbers<[1], [0], [0], [1], [0, 0, 1, 1], [], []>} : vector<8x32xbf16>, vector<32x96xbf16>, vector<8x96xf32> -> vector<8x96xf32>
    %444 = vector.broadcast %13 : vector<1x96xf32> to vector<8x96xf32>
    %445 = arith.addf %443, %444 : vector<8x96xf32>
    %446 = vector.extract_strided_slice %441 {offsets = [0, 0], sizes = [8, 32], strides = [1, 1]} : vector<8x96xf32> to vector<8x32xf32>
    %447 = vector.extract_strided_slice %445 {offsets = [0, 0], sizes = [8, 32], strides = [1, 1]} : vector<8x96xf32> to vector<8x32xf32>
    %448 = arith.addf %446, %447 : vector<8x32xf32>
    %449 = arith.negf %448 : vector<8x32xf32>
    %450 = math.exp %449 : vector<8x32xf32>
    %cst_140 = arith.constant 1.000000e+00 : f32
    %451 = vector.broadcast %cst_140 : f32 to vector<8x32xf32>
    %452 = arith.addf %451, %450 : vector<8x32xf32>
    %453 = arith.divf %451, %452 : vector<8x32xf32>
    %454 = vector.extract_strided_slice %441 {offsets = [0, 32], sizes = [8, 32], strides = [1, 1]} : vector<8x96xf32> to vector<8x32xf32>
    %455 = vector.extract_strided_slice %445 {offsets = [0, 32], sizes = [8, 32], strides = [1, 1]} : vector<8x96xf32> to vector<8x32xf32>
    %456 = arith.addf %454, %455 : vector<8x32xf32>
    %457 = arith.negf %456 : vector<8x32xf32>
    %458 = math.exp %457 : vector<8x32xf32>
    %cst_141 = arith.constant 1.000000e+00 : f32
    %459 = vector.broadcast %cst_141 : f32 to vector<8x32xf32>
    %460 = arith.addf %459, %458 : vector<8x32xf32>
    %461 = arith.divf %459, %460 : vector<8x32xf32>
    %462 = vector.extract_strided_slice %441 {offsets = [0, 64], sizes = [8, 32], strides = [1, 1]} : vector<8x96xf32> to vector<8x32xf32>
    %463 = vector.extract_strided_slice %445 {offsets = [0, 64], sizes = [8, 32], strides = [1, 1]} : vector<8x96xf32> to vector<8x32xf32>
    %464 = arith.mulf %453, %463 : vector<8x32xf32>
    %465 = arith.addf %462, %464 : vector<8x32xf32>
    %466 = math.tanh %465 : vector<8x32xf32>
    %cst_142 = arith.constant 1.000000e+00 : f32
    %467 = vector.broadcast %cst_142 : f32 to vector<8x32xf32>
    %468 = arith.subf %467, %461 : vector<8x32xf32>
    %469 = arith.mulf %468, %466 : vector<8x32xf32>
    %470 = arith.mulf %461, %378 : vector<8x32xf32>
    %471 = arith.addf %469, %470 : vector<8x32xf32>
    %472 = arith.truncf %471 : vector<8x32xf32> to vector<8x32xbf16>
    %cst_143 = arith.constant dense<0.000000e+00> : vector<8x32xf32>
    %473 = tpu.matmul %472, %14, %cst_143 {dimension_numbers = #tpu.dot_dimension_numbers<[1], [0], [0], [1], [0, 0, 1, 1], [], []>} : vector<8x32xbf16>, vector<32x32xbf16>, vector<8x32xf32> -> vector<8x32xf32>
    %474 = vector.broadcast %15 : vector<1x32xf32> to vector<8x32xf32>
    %475 = arith.addf %473, %474 : vector<8x32xf32>
    %476 = vector.shape_cast %475 : vector<8x32xf32> to vector<8x1x32xf32>
    %477 = vector.broadcast %476 : vector<8x1x32xf32> to vector<8x8x32xf32>
    %478 = arith.addf %4, %477 : vector<8x8x32xf32>
    %479 = vector.shape_cast %370 : vector<8x8xf32> to vector<8x8x1xf32>
    %480 = vector.broadcast %479 : vector<8x8x1xf32> to vector<8x8x32xf32>
    %481 = vector.broadcast %17 : vector<1x1x32xf32> to vector<8x8x32xf32>
    %482 = arith.mulf %480, %481 : vector<8x8x32xf32>
    %483 = arith.addf %478, %482 : vector<8x8x32xf32>
    %484 = vector.broadcast %19 : vector<1x1x32xf32> to vector<8x8x32xf32>
    %485 = arith.addf %483, %484 : vector<8x8x32xf32>
    %486 = math.tanh %485 : vector<8x8x32xf32>
    %487 = vector.broadcast %21 : vector<1x1x32xf32> to vector<8x8x32xf32>
    %488 = arith.mulf %486, %487 : vector<8x8x32xf32>
    %cst_144 = arith.constant dense<0.000000e+00> : vector<8x8xf32>
    %489 = vector.multi_reduction <add>, %488, %cst_144 [2] : vector<8x8x32xf32> to vector<8x8xf32>
    %490 = vector.broadcast %22 : vector<1x1xf32> to vector<8x8xf32>
    %491 = arith.addf %489, %490 : vector<8x8xf32>
    %cst_145 = arith.constant -1.000000e+30 : f32
    %492 = vector.broadcast %cst_145 : f32 to vector<8x8xf32>
    %493 = arith.select %7, %492, %491 : vector<8x8xi1>, vector<8x8xf32>
    %cst_146 = arith.constant dense<0xFF800000> : vector<8xf32>
    %494 = vector.multi_reduction <maximumf>, %493, %cst_146 [1] : vector<8x8xf32> to vector<8xf32>
    %495 = vector.shape_cast %494 : vector<8xf32> to vector<8x1xf32>
    %496 = vector.broadcast %495 : vector<8x1xf32> to vector<8x8xf32>
    %497 = arith.subf %493, %496 : vector<8x8xf32>
    %498 = math.exp %497 : vector<8x8xf32>
    %cst_147 = arith.constant dense<0.000000e+00> : vector<8xf32>
    %499 = vector.multi_reduction <add>, %498, %cst_147 [1] : vector<8x8xf32> to vector<8xf32>
    %500 = vector.shape_cast %499 : vector<8xf32> to vector<8x1xf32>
    %501 = tpu.reciprocal %500 {approx = true} : vector<8x1xf32> -> vector<8x1xf32>
    %502 = vector.broadcast %501 : vector<8x1xf32> to vector<8x8xf32>
    %503 = arith.mulf %498, %502 : vector<8x8xf32>
    %504 = arith.addf %370, %503 : vector<8x8xf32>
    %505 = vector.shape_cast %503 : vector<8x8xf32> to vector<8x8x1xf32>
    %506 = vector.broadcast %505 : vector<8x8x1xf32> to vector<8x8x64xf32>
    %507 = arith.mulf %506, %3 : vector<8x8x64xf32>
    %cst_148 = arith.constant dense<0.000000e+00> : vector<8x64xf32>
    %508 = vector.multi_reduction <add>, %507, %cst_148 [1] : vector<8x8x64xf32> to vector<8x64xf32>
    %509 = arith.truncf %508 : vector<8x64xf32> to vector<8x64xbf16>
    %cst_149 = arith.constant dense<0.000000e+00> : vector<8x32xf32>
    %510 = tpu.matmul %509, %8, %cst_149 {dimension_numbers = #tpu.dot_dimension_numbers<[1], [0], [0], [1], [0, 0, 1, 1], [], []>} : vector<8x64xbf16>, vector<64x32xbf16>, vector<8x32xf32> -> vector<8x32xf32>
    %511 = vector.broadcast %9 : vector<1x32xf32> to vector<8x32xf32>
    %512 = arith.addf %510, %511 : vector<8x32xf32>
    %513 = arith.truncf %512 : vector<8x32xf32> to vector<8x32xbf16>
    %cst_150 = arith.constant dense<0.000000e+00> : vector<8x32xf32>
    %514 = tpu.matmul %513, %23, %cst_150 {dimension_numbers = #tpu.dot_dimension_numbers<[1], [0], [0], [1], [0, 0, 1, 1], [], []>} : vector<8x32xbf16>, vector<32x32xbf16>, vector<8x32xf32> -> vector<8x32xf32>
    %515 = arith.truncf %471 : vector<8x32xf32> to vector<8x32xbf16>
    %cst_151 = arith.constant dense<0.000000e+00> : vector<8x32xf32>
    %516 = tpu.matmul %515, %24, %cst_151 {dimension_numbers = #tpu.dot_dimension_numbers<[1], [0], [0], [1], [0, 0, 1, 1], [], []>} : vector<8x32xbf16>, vector<32x32xbf16>, vector<8x32xf32> -> vector<8x32xf32>
    %517 = arith.addf %514, %516 : vector<8x32xf32>
    %518 = vector.broadcast %25 : vector<1x32xf32> to vector<8x32xf32>
    %519 = arith.addf %517, %518 : vector<8x32xf32>
    %cst_152 = arith.constant dense<0xFF800000> : vector<8xf32>
    %520 = vector.multi_reduction <maximumf>, %519, %cst_152 [1] : vector<8x32xf32> to vector<8xf32>
    %521 = vector.shape_cast %520 : vector<8xf32> to vector<8x1xf32>
    %522 = vector.broadcast %521 : vector<8x1xf32> to vector<8x32xf32>
    %523 = arith.subf %519, %522 : vector<8x32xf32>
    %524 = math.exp %523 : vector<8x32xf32>
    %cst_153 = arith.constant dense<0.000000e+00> : vector<8xf32>
    %525 = vector.multi_reduction <add>, %524, %cst_153 [1] : vector<8x32xf32> to vector<8xf32>
    %526 = vector.shape_cast %525 : vector<8xf32> to vector<8x1xf32>
    %527 = tpu.reciprocal %526 {approx = true} : vector<8x1xf32> -> vector<8x1xf32>
    %528 = vector.broadcast %527 : vector<8x1xf32> to vector<8x32xf32>
    %529 = arith.mulf %524, %528 : vector<8x32xf32>
    %530 = vector.broadcast %26 : vector<1x32xf32> to vector<8x32xf32>
    %531 = arith.mulf %512, %530 : vector<8x32xf32>
    %cst_154 = arith.constant dense<0.000000e+00> : vector<8xf32>
    %532 = vector.multi_reduction <add>, %531, %cst_154 [1] : vector<8x32xf32> to vector<8xf32>
    %533 = vector.shape_cast %532 : vector<8xf32> to vector<8x1xf32>
    %534 = vector.broadcast %27 : vector<1x32xf32> to vector<8x32xf32>
    %535 = arith.mulf %471, %534 : vector<8x32xf32>
    %cst_155 = arith.constant dense<0.000000e+00> : vector<8xf32>
    %536 = vector.multi_reduction <add>, %535, %cst_155 [1] : vector<8x32xf32> to vector<8xf32>
    %537 = vector.shape_cast %536 : vector<8xf32> to vector<8x1xf32>
    %538 = arith.addf %533, %537 : vector<8x1xf32>
    %539 = vector.broadcast %28 : vector<1x32xf32> to vector<8x32xf32>
    %540 = arith.mulf %437, %539 : vector<8x32xf32>
    %cst_156 = arith.constant dense<0.000000e+00> : vector<8xf32>
    %541 = vector.multi_reduction <add>, %540, %cst_156 [1] : vector<8x32xf32> to vector<8xf32>
    %542 = vector.shape_cast %541 : vector<8xf32> to vector<8x1xf32>
    %543 = arith.addf %538, %542 : vector<8x1xf32>
    %544 = vector.broadcast %29 : vector<1x1xf32> to vector<8x1xf32>
    %545 = arith.addf %543, %544 : vector<8x1xf32>
    %546 = arith.negf %545 : vector<8x1xf32>
    %547 = math.exp %546 : vector<8x1xf32>
    %cst_157 = arith.constant 1.000000e+00 : f32
    %548 = vector.broadcast %cst_157 : f32 to vector<8x1xf32>
    %549 = arith.addf %548, %547 : vector<8x1xf32>
    %550 = arith.divf %548, %549 : vector<8x1xf32>
    %cst_158 = arith.constant 1.000000e-03 : f32
    %cst_159 = arith.constant 9.990000e-01 : f32
    %551 = vector.broadcast %cst_158 : f32 to vector<8x1xf32>
    %552 = arith.maximumf %551, %550 : vector<8x1xf32>
    %553 = vector.broadcast %cst_159 : f32 to vector<8x1xf32>
    %554 = arith.minimumf %553, %552 : vector<8x1xf32>
    %555 = arith.minimumf %503, %504 : vector<8x8xf32>
    %cst_160 = arith.constant dense<0.000000e+00> : vector<8xf32>
    %556 = vector.multi_reduction <add>, %555, %cst_160 [1] : vector<8x8xf32> to vector<8xf32>
    %557 = vector.shape_cast %556 : vector<8xf32> to vector<8x1xf32>
    %558 = vector.broadcast %554 : vector<8x1xf32> to vector<8x32xf32>
    %559 = arith.mulf %558, %529 : vector<8x32xf32>
    %cst_161 = arith.constant 1.000000e+00 : f32
    %560 = vector.broadcast %cst_161 : f32 to vector<8x1xf32>
    %561 = arith.subf %560, %554 : vector<8x1xf32>
    %562 = vector.broadcast %561 : vector<8x1xf32> to vector<8x8xf32>
    %563 = arith.mulf %562, %503 : vector<8x8xf32>
    %564 = tpu.concatenate %559, %563, %557, %30 in 1 : vector<8x32xf32>, vector<8x8xf32>, vector<8x1xf32>, vector<8x87xf32> -> vector<8x128xf32>
    %565 = arith.index_cast %c3_i32 : i32 to index
    %c0_162 = arith.constant 0 : index
    %c0_163 = arith.constant 0 : index
    %566 = vector.load %arg25[%565, %c0_162, %c0_163] : memref<4x8x128xf32, #tpu.memory_space<vmem>>, vector<1x8x128xf32>
    %567 = vector.shape_cast %566 : vector<1x8x128xf32> to vector<8x128xf32>
    %568 = vector.shape_cast %564 : vector<8x128xf32> to vector<1x8x128xf32>
    tpu.vector_store %arg25[%565, %c0_162, %c0_163], %568 {strides = array<i32>} : memref<4x8x128xf32, #tpu.memory_space<vmem>>, vector<1x8x128xf32>,
    %c4_i32 = arith.constant 4 : i32
    %c0_164 = arith.constant 0 : index
    %c0_165 = arith.constant 0 : index
    %569 = vector.load %arg26[%c0_164, %c0_165] : memref<8x32xf32, #tpu.memory_space<vmem>>, vector<8x32xf32>
    tpu.vector_store %arg26[%c0_164, %c0_165], %512 {strides = array<i32>} : memref<8x32xf32, #tpu.memory_space<vmem>>, vector<8x32xf32>,
    %c0_166 = arith.constant 0 : index
    %c0_167 = arith.constant 0 : index
    %570 = vector.load %arg27[%c0_166, %c0_167] : memref<8x8xf32, #tpu.memory_space<vmem>>, vector<8x8xf32>
    tpu.vector_store %arg27[%c0_166, %c0_167], %504 {strides = array<i32>} : memref<8x8xf32, #tpu.memory_space<vmem>>, vector<8x8xf32>,
    return
  }
  func.func @transform_0(%arg0: i32) -> (i32, i32, i32) {
    %c0_i32 = arith.constant 0 : i32
    %c0_i32_0 = arith.constant 0 : i32
    %c0_i32_1 = arith.constant 0 : i32
    return %arg0, %c0_i32, %c0_i32_0 : i32, i32, i32
  }
  func.func @transform_1(%arg0: i32) -> (i32, i32, i32) {
    %c0_i32 = arith.constant 0 : i32
    %c0_i32_0 = arith.constant 0 : i32
    %c0_i32_1 = arith.constant 0 : i32
    %c0_i32_2 = arith.constant 0 : i32
    return %c0_i32, %c0_i32_0, %c0_i32_1 : i32, i32, i32
  }
  func.func @transform_2(%arg0: i32) -> (i32, i32, i32) {
    %c0_i32 = arith.constant 0 : i32
    %c0_i32_0 = arith.constant 0 : i32
    %c0_i32_1 = arith.constant 0 : i32
    %c0_i32_2 = arith.constant 0 : i32
    return %c0_i32, %c0_i32_0, %c0_i32_1 : i32, i32, i32
  }
  func.func @transform_3(%arg0: i32) -> (i32, i32) {
    %c0_i32 = arith.constant 0 : i32
    %c0_i32_0 = arith.constant 0 : i32
    %c0_i32_1 = arith.constant 0 : i32
    return %c0_i32, %c0_i32_0 : i32, i32
  }
  func.func @transform_4(%arg0: i32) -> (i32, i32) {
    %c0_i32 = arith.constant 0 : i32
    %c0_i32_0 = arith.constant 0 : i32
    %c0_i32_1 = arith.constant 0 : i32
    return %c0_i32, %c0_i32_0 : i32, i32
  }
  func.func @transform_5(%arg0: i32) -> (i32, i32) {
    %c0_i32 = arith.constant 0 : i32
    %c0_i32_0 = arith.constant 0 : i32
    %c0_i32_1 = arith.constant 0 : i32
    return %c0_i32, %c0_i32_0 : i32, i32
  }
  func.func @transform_6(%arg0: i32) -> (i32, i32) {
    %c0_i32 = arith.constant 0 : i32
    %c0_i32_0 = arith.constant 0 : i32
    %c0_i32_1 = arith.constant 0 : i32
    return %c0_i32, %c0_i32_0 : i32, i32
  }
  func.func @transform_7(%arg0: i32) -> (i32, i32) {
    %c0_i32 = arith.constant 0 : i32
    %c0_i32_0 = arith.constant 0 : i32
    %c0_i32_1 = arith.constant 0 : i32
    return %c0_i32, %c0_i32_0 : i32, i32
  }
  func.func @transform_8(%arg0: i32) -> (i32, i32) {
    %c0_i32 = arith.constant 0 : i32
    %c0_i32_0 = arith.constant 0 : i32
    %c0_i32_1 = arith.constant 0 : i32
    return %c0_i32, %c0_i32_0 : i32, i32
  }
  func.func @transform_9(%arg0: i32) -> (i32, i32) {
    %c0_i32 = arith.constant 0 : i32
    %c0_i32_0 = arith.constant 0 : i32
    %c0_i32_1 = arith.constant 0 : i32
    return %c0_i32, %c0_i32_0 : i32, i32
  }
  func.func @transform_10(%arg0: i32) -> (i32, i32) {
    %c0_i32 = arith.constant 0 : i32
    %c0_i32_0 = arith.constant 0 : i32
    %c0_i32_1 = arith.constant 0 : i32
    return %c0_i32, %c0_i32_0 : i32, i32
  }
  func.func @transform_11(%arg0: i32) -> (i32, i32) {
    %c0_i32 = arith.constant 0 : i32
    %c0_i32_0 = arith.constant 0 : i32
    %c0_i32_1 = arith.constant 0 : i32
    return %c0_i32, %c0_i32_0 : i32, i32
  }
  func.func @transform_12(%arg0: i32) -> (i32, i32) {
    %c0_i32 = arith.constant 0 : i32
    %c0_i32_0 = arith.constant 0 : i32
    %c0_i32_1 = arith.constant 0 : i32
    return %c0_i32, %c0_i32_0 : i32, i32
  }
  func.func @transform_13(%arg0: i32) -> (i32, i32) {
    %c0_i32 = arith.constant 0 : i32
    %c0_i32_0 = arith.constant 0 : i32
    %c0_i32_1 = arith.constant 0 : i32
    return %c0_i32, %c0_i32_0 : i32, i32
  }
  func.func @transform_14(%arg0: i32) -> (i32, i32) {
    %c0_i32 = arith.constant 0 : i32
    %c0_i32_0 = arith.constant 0 : i32
    %c0_i32_1 = arith.constant 0 : i32
    return %c0_i32, %c0_i32_0 : i32, i32
  }
  func.func @transform_15(%arg0: i32) -> (i32, i32) {
    %c0_i32 = arith.constant 0 : i32
    %c0_i32_0 = arith.constant 0 : i32
    %c0_i32_1 = arith.constant 0 : i32
    return %c0_i32, %c0_i32_0 : i32, i32
  }
  func.func @transform_16(%arg0: i32) -> (i32, i32) {
    %c0_i32 = arith.constant 0 : i32
    %c0_i32_0 = arith.constant 0 : i32
    %c0_i32_1 = arith.constant 0 : i32
    return %c0_i32, %c0_i32_0 : i32, i32
  }
  func.func @transform_17(%arg0: i32) -> (i32, i32) {
    %c0_i32 = arith.constant 0 : i32
    %c0_i32_0 = arith.constant 0 : i32
    %c0_i32_1 = arith.constant 0 : i32
    return %c0_i32, %c0_i32_0 : i32, i32
  }
  func.func @transform_18(%arg0: i32) -> (i32, i32) {
    %c0_i32 = arith.constant 0 : i32
    %c0_i32_0 = arith.constant 0 : i32
    %c0_i32_1 = arith.constant 0 : i32
    return %c0_i32, %c0_i32_0 : i32, i32
  }
  func.func @transform_19(%arg0: i32) -> (i32, i32) {
    %c0_i32 = arith.constant 0 : i32
    %c0_i32_0 = arith.constant 0 : i32
    %c0_i32_1 = arith.constant 0 : i32
    return %c0_i32, %c0_i32_0 : i32, i32
  }
  func.func @transform_20(%arg0: i32) -> (i32, i32) {
    %c0_i32 = arith.constant 0 : i32
    %c0_i32_0 = arith.constant 0 : i32
    %c0_i32_1 = arith.constant 0 : i32
    return %c0_i32, %c0_i32_0 : i32, i32
  }
  func.func @transform_21(%arg0: i32) -> (i32, i32) {
    %c0_i32 = arith.constant 0 : i32
    %c0_i32_0 = arith.constant 0 : i32
    %c0_i32_1 = arith.constant 0 : i32
    return %c0_i32, %c0_i32_0 : i32, i32
  }
  func.func @transform_22(%arg0: i32) -> (i32, i32) {
    %c0_i32 = arith.constant 0 : i32
    %c0_i32_0 = arith.constant 0 : i32
    %c0_i32_1 = arith.constant 0 : i32
    return %c0_i32, %c0_i32_0 : i32, i32
  }
  func.func @transform_23(%arg0: i32) -> (i32, i32) {
    %c0_i32 = arith.constant 0 : i32
    %c0_i32_0 = arith.constant 0 : i32
    %c0_i32_1 = arith.constant 0 : i32
    return %c0_i32, %c0_i32_0 : i32, i32
  }
  func.func @transform_24(%arg0: i32) -> (i32, i32, i32) {
    %c0_i32 = arith.constant 0 : i32
    %c0_i32_0 = arith.constant 0 : i32
    %c0_i32_1 = arith.constant 0 : i32
    return %arg0, %c0_i32, %c0_i32_0 : i32, i32, i32
  }
}

</mosaic_0001>

<bundles_post_ra>
// kernel: pgn_forward.2
= control target key start
LH: loop header
LB: loop body
LE: loop exit
PB: predicated region body
PF: predicated region fallthrough
CT: control target
= control target key end

     0   :  { %vm78_vm0 = vcmask 261120   ;;  %v2773_v0 = vmov 0.0   ;;  %vm2774_vm1 = vmmov 0   ;;  %s2775_s20 = smov 64   ;;  %s2776_s27 = smov 32   ;;  %s3504_s3 = inlined_call_operand.vmem [shape: bf16[32,96], index: 3, kind: input, shape index: {}]   ;;  %s3505_s2 = inlined_call_operand.vmem [shape: bf16[32,96], index: 2, kind: input, shape index: {}]   ;;  %s3506_s0 = inlined_call_operand.vmem [shape: f32[8,8,32], index: 0, kind: input, shape index: {}, may-alias: {0,1}]   ;;  %s3507_s7 = inlined_call_operand.vmem [shape: bf16[32,96], index: 7, kind: input, shape index: {}]   ;;  %s3508_s6 = inlined_call_operand.vmem [shape: bf16[32,96], index: 6, kind: input, shape index: {}]   ;;  %s3509_s1 = inlined_call_operand.vmem [shape: f32[8,8,32], index: 1, kind: input, shape index: {}, may-alias: {0,1}]   ;;  %s3510_s5 = inlined_call_operand.vmem [shape: f32[1,96], index: 5, kind: input, shape index: {}]   ;;  %s3511_s9 = inlined_call_operand.vmem [shape: f32[1,96], index: 9, kind: input, shape index: {}]   ;;  %s3512_s4 = inlined_call_operand.vmem [shape: f32[1,96], index: 4, kind: input, shape index: {}]   ;;  %s3513_s8 = inlined_call_operand.vmem [shape: f32[1,96], index: 8, kind: input, shape index: {}]   ;;  %s3514_s10 = inlined_call_operand.vmem [shape: f32[8,8,32], index: 10, kind: output, shape index: {0}]   ;;  %s3515_s11 = inlined_call_operand.vmem [shape: f32[8,8,32], index: 11, kind: output, shape index: {1}]  }
   0x1   :  { %2404 = vmatprep.subr.bf16.mxu1 %v2773_v0  ;;  %2396 = vmatprep.subr.bf16.mxu0 %v2773_v0  ;;  %v2843_v1 = vld [vmem:[%s3504_s3 + $0x8] sm:$0xff]   ;;  %79 = vst.msk [vmem:[#allocation2] sm:$0xff] %vm78_vm0, %v2773_v0  ;;  %80 = vst.msk [vmem:[#allocation3] sm:$0xff] %vm78_vm0, %v2773_v0  ;;  %v2862_v3 = vld [vmem:[%s3504_s3] sm:$0xff]   ;;  %s2777_s28 = smov 96  }
   0x2   :  { %v2852_v2 = vld [vmem:[%s3505_s2 + $0x8] sm:$0xff]   ;;  %2408 = vmatprep.mubr.msk.bf16.mxu1 %vm2774_vm1, %v2773_v0  ;;  %2400 = vmatprep.mubr.msk.bf16.mxu0 %vm2774_vm1, %v2773_v0  ;;  %v2869_v4 = vld [vmem:[%s3505_s2] sm:$0xff]   ;;  %v2221_v14 = vld [vmem:[%s3509_s1 + $0x38] sm:$0xff] }
   0x3   :  { %2405 = vmatpush3.bf16.msra.mxu1 %v2843_v1  ;;  %2397 = vmatpush3.bf16.msra.mxu0 %v2852_v2  ;;  %v103_v5 = vld [vmem:[%s3506_s0] sm:$0xff]  ;;  %v2879_v7 = vld [vmem:[%s3507_s7 + $0x8] sm:$0xff]   ;;  %v261_v16 = vpack.c.bf16 %v2221_v14, %v2221_v14 }
   0x4   :  { %2406 = vmatprep.subr.bf16.mxu1 %v2773_v0  ;;  %2398 = vmatprep.subr.bf16.mxu0 %v2773_v0  ;;  %v104_v6 = vpack.c.bf16 %v103_v5, %v103_v5  ;;  %v2888_v9 = vld [vmem:[%s3508_s6 + $0x8] sm:$0xff]   ;;  %v2898_v11 = vld [vmem:[%s3507_s7] sm:$0xff]  }
   0x5   :  { %v2905_v12 = vld [vmem:[%s3508_s6] sm:$0xff]   ;;  %v2232_v61 = vld [vmem:[%s3506_s0 + $0x8] sm:$0xff] }
   0x6   :  { %v2941_v17 = vld [vmem:[%s3510_s5] ss:$0 sm:$0xff]  ;;  %v428_v62 = vpack.c.bf16 %v2232_v61, %v2232_v61 }
   0x7   :  { %2407 = vmatpush3.bf16.msra.mxu1 %v2862_v3  ;;  %2399 = vmatpush3.bf16.msra.mxu0 %v2869_v4  ;;  %v2948_v27 = vld [vmem:[%s3511_s9] ss:$0 sm:$0xff] }
   0x8   :  { %v2882_v8 = vld [vmem:[#allocation2] sm:$0xff]  ;;  %2420 = vmatprep.subr.bf16.mxu1 %v2773_v0  ;;  %2412 = vmatprep.subr.bf16.mxu0 %v2773_v0  ;;  %v2907_v13 = vld [vmem:[#allocation3] sm:$0xff] }
   0x9   :  { %v167_v10 = vpack.c.bf16 %v2882_v8, %v2882_v8  ;;  %v323_v15 = vpack.c.bf16 %v2907_v13, %v2907_v13  ;;  %v2955_v37 = vld [vmem:[%s3512_s4] ss:$0 sm:$0xff] }
   0xa   :  { %2401 = vmatmul.mubr.msk.bf16.vlgmr.msra.gmra.mxu0 %vm78_vm0, %v104_v6  ;;  %v2961_v40 = vld [vmem:[%s3513_s8] ss:$0 sm:$0xff]  ;;  %v2236_v6 = vld [vmem:[%s3509_s1 + $0x30] sm:$0xff] }
   0xb   :  { %2409 = vmatmul.mubr.msk.bf16.vlgmr.msra.gmra.mxu1 %vm78_vm0, %v167_v10  ;;  %2413 = vmatpush3.bf16.msra.mxu0 %v2888_v9  ;;  %v547_v10 = vpack.c.bf16 %v2236_v6, %v2236_v6 }
   0xc   :  { %2421 = vmatpush3.bf16.msra.mxu1 %v2879_v7  ;;  %2414 = vmatprep.subr.bf16.mxu0 %v2773_v0 }
   0xd   :  { %2422 = vmatprep.subr.bf16.mxu1 %v2773_v0  ;;  %2424 = vmatprep.mubr.msk.bf16.mxu1 %vm2774_vm1, %v2773_v0 }
   0xe   :  { %2416 = vmatprep.mubr.msk.bf16.mxu0 %vm2774_vm1, %v2773_v0 }
   0xf   :  { %2415 = vmatpush3.bf16.msra.mxu0 %v2905_v12 }
  0x10   :  { %2423 = vmatpush3.bf16.msra.mxu1 %v2898_v11  ;;  %2428 = vmatprep.subr.bf16.mxu0 %v2773_v0 }
  0x11   :  { %2436 = vmatprep.subr.bf16.mxu1 %v2773_v0 }
  0x12   :  { %2417 = vmatmul.mubr.msk.bf16.vlgmr.msra.gmra.mxu0 %vm78_vm0, %v261_v16 }
  0x13   :  { %2425 = vmatmul.mubr.msk.bf16.vlgmr.msra.gmra.mxu1 %vm78_vm0, %v323_v15  ;;  %2429 = vmatpush3.bf16.msra.mxu0 %v2852_v2 }
  0x14   :  { %2437 = vmatpush3.bf16.msra.mxu1 %v2843_v1  ;;  %2430 = vmatprep.subr.bf16.mxu0 %v2773_v0 }
  0x15   :  { %2438 = vmatprep.subr.bf16.mxu1 %v2773_v0  ;;  %2432 = vmatprep.mubr.msk.bf16.mxu0 %vm2774_vm1, %v2773_v0 }
  0x16   :  { %2440 = vmatprep.mubr.msk.bf16.mxu1 %vm2774_vm1, %v2773_v0 }
  0x17   :  { %2431 = vmatpush3.bf16.msra.mxu0 %v2869_v4 }
  0x18   :  { %2439 = vmatpush3.bf16.msra.mxu1 %v2862_v3  ;;  %2444 = vmatprep.subr.bf16.mxu0 %v2773_v0 }
  0x19   :  { %2452 = vmatprep.subr.bf16.mxu1 %v2773_v0 }
  0x1a   :  { %2433 = vmatmul.mubr.msk.bf16.vlgmr.msra.gmra.mxu0 %vm78_vm0, %v428_v62 }
  0x1b   :  { %2445 = vmatpush3.bf16.msra.mxu0 %v2888_v9  ;;  %2448 = vmatprep.mubr.msk.bf16.mxu0 %vm2774_vm1, %v2773_v0 }
  0x1c   :  { %2446 = vmatprep.subr.bf16.mxu0 %v2773_v0 }
  0x1f   :  { %2447 = vmatpush3.bf16.msra.mxu0 %v2905_v12 }
  0x20   :  { %2460 = vmatprep.subr.bf16.mxu0 %v2773_v0 }
  0x22   :  { %2449 = vmatmul.mubr.msk.bf16.vlgmr.msra.gmra.mxu0 %vm78_vm0, %v547_v10 }
  0x23   :  { %2461 = vmatpush3.bf16.msra.mxu0 %v2852_v2  ;;  %2464 = vmatprep.mubr.msk.bf16.mxu0 %vm2774_vm1, %v2773_v0 }
  0x24   :  { %2462 = vmatprep.subr.bf16.mxu0 %v2773_v0 }
  0x27   :  { %2463 = vmatpush3.bf16.msra.mxu0 %v2869_v4 }
  0x28   :  { %2476 = vmatprep.subr.bf16.mxu0 %v2773_v0 }
  0xca   :  { %v161_v19 = vpop.f32.mrf.mxu0 }
  0xcb   :  { %v223_v18 = vpop.f32.mrf.mxu1  ;;  %v162_v38 = vadd.f32 %v2955_v37, %v161_v19 }
  0xcc   :  { %v224_v20 = vadd.f32 %v2941_v17, %v223_v18  ;;  %v2402_v22 = vpop.f32.mrf.mxu0 }
  0xcd   :  { %v2410_v21 = vpop.f32.mrf.mxu1 }
  0xce   :  { %237 = vrot.lane.b32.xlu0 %v224_v20, %s2775_s20  ;;  %v164_v24 = vpop.f32.mrf.mxu0  ;;  %v229_v39 = vadd.f32 %v224_v20, %v162_v38 }
  0xcf   :  { %v226_v23 = vpop.f32.mrf.mxu1 }
  0xd0   :  { %v2403_v26 = vpop.f32.mrf.mxu0  ;;  %v2220_v41 = vmul.f32 -1.442695, %v229_v39 }
  0xd1   :  { %v2411_v25 = vpop.f32.mrf.mxu1 }
  0xd2   :  { %v317_v29 = vpop.f32.mrf.mxu0  ;;  %2665 = vpow2.f32 %v2220_v41 }
  0xd3   :  { %v379_v28 = vpop.f32.mrf.mxu1  ;;  %v318_v42 = vadd.f32 %v2961_v40, %v317_v29 }
  0xd4   :  { %v380_v30 = vadd.f32 %v2948_v27, %v379_v28  ;;  %v2418_v32 = vpop.f32.mrf.mxu0 }
  0xd5   :  { %v2426_v31 = vpop.f32.mrf.mxu1 }
  0xd6   :  { %393 = vrot.lane.b32.xlu0 %v380_v30, %s2775_s20  ;;  %v320_v34 = vpop.f32.mrf.mxu0  ;;  %v385_v43 = vadd.f32 %v380_v30, %v318_v42 }
  0xd7   :  { %v382_v33 = vpop.f32.mrf.mxu1 }
  0xd8   :  { %v2419_v36 = vpop.f32.mrf.mxu0  ;;  %v2230_v44 = vmul.f32 -1.442695, %v385_v43 }
  0xd9   :  { %v2427_v35 = vpop.f32.mrf.mxu1 }
  0xda   :  { %2667 = vpow2.f32 %v2230_v44  ;;  %v466_v28 = vpop.f32.mrf.mxu0 }
  0xdc   :  { %v2434_v29 = vpop.f32.mrf.mxu0 }
  0xde   :  { %v469_v30 = vpop.f32.mrf.mxu0 }
  0xdf   :  { %v2666_v45 = vpop.eup %2665 }
  0xe0   :  { %v233_v46 = vadd.f32 1.0, %v2666_v45  ;;  %v2435_v31 = vpop.f32.mrf.mxu0 }
  0xe2   :  { %2669 = vrcp.f32 %v233_v46  ;;  %v585_v32 = vpop.f32.mrf.mxu0 }
  0xe4   :  { %v2450_v33 = vpop.f32.mrf.mxu0 }
  0xe6   :  { %v588_v34 = vpop.f32.mrf.mxu0 }
  0xe7   :  { %v2668_v47 = vpop.eup %2667 }
  0xe8   :  { %v389_v48 = vadd.f32 1.0, %v2668_v47  ;;  %v2451_v35 = vpop.f32.mrf.mxu0 }
  0xea   :  { %2671 = vrcp.f32 %v389_v48  ;;  %v467_v48 = vadd.f32 %v2955_v37, %v466_v28 }
  0xef   :  { %v2670_v49 = vpop.eup %2669 }
  0xf0   :  { %v247_v5 = vsub.f32 1.0, %v2670_v49 }
  0xf7   :  { %v2672_v52 = vpop.eup %2671 }
  0xf8   :  { %v403_v19 = vsub.f32 1.0, %v2672_v52 }
 0x140   :  { %v238_v50 = vpop.permute.xlu0 %237 }
 0x141   :  { %v240_v51 = vmul.f32 %v2670_v49, %v238_v50 }
 0x143   :  { %242 = vrot.lane.b32.xlu1 %v240_v51, %s2775_s20  ;;  %v586_v51 = vadd.f32 %v2961_v40, %v585_v32 }
 0x148   :  { %v394_v53 = vpop.permute.xlu0 %393 }
 0x149   :  { %v396_v54 = vmul.f32 %v2672_v52, %v394_v53 }
 0x14b   :  { %398 = vrot.lane.b32.xlu1 %v396_v54, %s2775_s20 }
 0x14f   :  { %254 = vrot.lane.b32.xlu1 %v2882_v8, %s2776_s27 }
 0x153   :  { %410 = vrot.lane.b32.xlu1 %v2907_v13, %s2776_s27 }
 0x1b5   :  { %v243_v55 = vpop.permute.xlu1 %242 }
 0x1b6   :  { %v245_v56 = vadd.f32 %v243_v55, %v162_v38 }
 0x1b8   :  { %2673 = vtanh.f32 %v245_v56 }
 0x1bd   :  { %v399_v57 = vpop.permute.xlu1 %398 }
 0x1be   :  { %v401_v58 = vadd.f32 %v399_v57, %v318_v42 }
 0x1c0   :  { %2675 = vtanh.f32 %v401_v58 }
 0x1c1   :  { %v255_v63 = vpop.permute.xlu1 %254 }
 0x1c2   :  { %v257_v13 = vmul.f32 %v2670_v49, %v255_v63 }
 0x1c5   :  { %v2674_v59 = vpop.eup %2673  ;;  %v411_v18 = vpop.permute.xlu1 %410 }
 0x1c6   :  { %249 = vrot.lane.b32.xlu0 %v2674_v59, %s2777_s28  ;;  %v413_v21 = vmul.f32 %v2672_v52, %v411_v18 }
 0x1cd   :  { %v2676_v60 = vpop.eup %2675 }
 0x1ce   :  { %405 = vrot.lane.b32.xlu0 %v2676_v60, %s2777_s28 }
 0x238   :  { %v250_v8 = vpop.permute.xlu0 %249 }
 0x239   :  { %v252_v14 = vmul.f32 %v250_v8, %v247_v5 }
 0x23b   :  { %v2984_v15 = vadd.f32 %v257_v13, %v252_v14 }
 0x23d   :  { %v472_v16 = vpack.c.bf16 %v2984_v15, %v2984_v15 }
 0x23f   :  { %474 = vrot.lane.b32.xlu0 %v472_v16, %s2777_s28  ;;  %v2242_v16 = vld [vmem:[%s3506_s0 + $0x10] sm:$0xff] }
 0x240   :  { %v406_v20 = vpop.permute.xlu0 %405  ;;  %v678_v18 = vpack.c.bf16 %v2242_v16, %v2242_v16 }
 0x241   :  { %v408_v22 = vmul.f32 %v406_v20, %v403_v19  ;;  %v2246_v20 = vld [vmem:[%s3509_s1 + $0x28] sm:$0xff] }
 0x242   :  { %2465 = vmatmul.mubr.msk.bf16.vlgmr.msra.gmra.mxu0 %vm78_vm0, %v678_v18 }
 0x243   :  { %v2995_v23 = vadd.f32 %v413_v21, %v408_v22  ;;  %2477 = vmatpush3.bf16.msra.mxu0 %v2888_v9  ;;  %2480 = vmatprep.mubr.msk.bf16.mxu0 %vm2774_vm1, %v2773_v0  ;;  %v797_v22 = vpack.c.bf16 %v2246_v20, %v2246_v20 }
 0x244   :  { %2478 = vmatprep.subr.bf16.mxu0 %v2773_v0 }
 0x245   :  { %v591_v24 = vpack.c.bf16 %v2995_v23, %v2995_v23 }
 0x247   :  { %593 = vrot.lane.b32.xlu1 %v591_v24, %s2777_s28  ;;  %2479 = vmatpush3.bf16.msra.mxu0 %v2905_v12 }
 0x248   :  { %2492 = vmatprep.subr.bf16.mxu0 %v2773_v0 }
 0x24a   :  { %2481 = vmatmul.mubr.msk.bf16.vlgmr.msra.gmra.mxu0 %vm78_vm0, %v797_v22 }
 0x24b   :  { %2493 = vmatpush3.bf16.msra.mxu0 %v2852_v2  ;;  %2496 = vmatprep.mubr.msk.bf16.mxu0 %vm2774_vm1, %v2773_v0 }
 0x24c   :  { %2494 = vmatprep.subr.bf16.mxu0 %v2773_v0 }
 0x24f   :  { %2495 = vmatpush3.bf16.msra.mxu0 %v2869_v4 }
 0x250   :  { %2508 = vmatprep.subr.bf16.mxu0 %v2773_v0 }
 0x2b1   :  { %v475_v25 = vpop.permute.xlu0 %474 }
 0x2b2   :  { %2441 = vmatmul.mubr.msk.bf16.vlgmr.msra.gmra.mxu1 %vm78_vm0, %v475_v25 }
 0x2b3   :  { %2453 = vmatpush3.bf16.msra.mxu1 %v2879_v7  ;;  %2456 = vmatprep.mubr.msk.bf16.mxu1 %vm2774_vm1, %v2773_v0 }
 0x2b4   :  { %2454 = vmatprep.subr.bf16.mxu1 %v2773_v0 }
 0x2b7   :  { %2455 = vmatpush3.bf16.msra.mxu1 %v2898_v11 }
 0x2b8   :  { %2468 = vmatprep.subr.bf16.mxu1 %v2773_v0 }
 0x2b9   :  { %v594_v26 = vpop.permute.xlu1 %593 }
 0x2ba   :  { %2457 = vmatmul.mubr.msk.bf16.vlgmr.msra.gmra.mxu1 %vm78_vm0, %v594_v26 }
 0x2bb   :  { %2469 = vmatpush3.bf16.msra.mxu1 %v2843_v1  ;;  %2472 = vmatprep.mubr.msk.bf16.mxu1 %vm2774_vm1, %v2773_v0 }
 0x2bc   :  { %2470 = vmatprep.subr.bf16.mxu1 %v2773_v0 }
 0x2bf   :  { %2471 = vmatpush3.bf16.msra.mxu1 %v2862_v3 }
 0x2c0   :  { %2484 = vmatprep.subr.bf16.mxu1 %v2773_v0 }
 0x372   :  { %v513_v36 = vpop.f32.mrf.mxu1 }
 0x373   :  { %v514_v38 = vadd.f32 %v2941_v17, %v513_v36 }
 0x374   :  { %v2442_v39 = vpop.f32.mrf.mxu1 }
 0x375   :  { %527 = vrot.lane.b32.xlu0 %v514_v38, %s2775_s20  ;;  %v519_v49 = vadd.f32 %v514_v38, %v467_v48  ;;  %v716_v38 = vpop.f32.mrf.mxu0 }
 0x376   :  { %v516_v41 = vpop.f32.mrf.mxu1 }
 0x377   :  { %v2235_v50 = vmul.f32 -1.442695, %v519_v49  ;;  %v2466_v39 = vpop.f32.mrf.mxu0 }
 0x378   :  { %v2443_v42 = vpop.f32.mrf.mxu1 }
 0x379   :  { %2677 = vpow2.f32 %v2235_v50  ;;  %v719_v41 = vpop.f32.mrf.mxu0 }
 0x37a   :  { %v632_v43 = vpop.f32.mrf.mxu1 }
 0x37b   :  { %v633_v44 = vadd.f32 %v2948_v27, %v632_v43  ;;  %v2467_v42 = vpop.f32.mrf.mxu0 }
 0x37c   :  { %v2458_v45 = vpop.f32.mrf.mxu1 }
 0x37d   :  { %646 = vrot.lane.b32.xlu1 %v633_v44, %s2775_s20  ;;  %v638_v52 = vadd.f32 %v633_v44, %v586_v51  ;;  %v835_v43 = vpop.f32.mrf.mxu0 }
 0x37e   :  { %v635_v46 = vpop.f32.mrf.mxu1 }
 0x37f   :  { %v2239_v53 = vmul.f32 -1.442695, %v638_v52  ;;  %v2482_v44 = vpop.f32.mrf.mxu0 }
 0x380   :  { %v2459_v47 = vpop.f32.mrf.mxu1 }
 0x381   :  { %2679 = vpow2.f32 %v2239_v53  ;;  %v838_v45 = vpop.f32.mrf.mxu0 }
 0x383   :  { %v2483_v46 = vpop.f32.mrf.mxu0 }
 0x386   :  { %v2678_v54 = vpop.eup %2677 }
 0x387   :  { %v523_v55 = vadd.f32 1.0, %v2678_v54 }
 0x389   :  { %2681 = vrcp.f32 %v523_v55 }
 0x38e   :  { %v2680_v56 = vpop.eup %2679 }
 0x38f   :  { %v642_v57 = vadd.f32 1.0, %v2680_v56 }
 0x391   :  { %2683 = vrcp.f32 %v642_v57  ;;  %v717_v57 = vadd.f32 %v2955_v37, %v716_v38 }
 0x396   :  { %v2682_v58 = vpop.eup %2681 }
 0x397   :  { %v537_v19 = vsub.f32 1.0, %v2682_v58  ;;  %v543_v24 = vmul.f32 %v2682_v58, %v2984_v15 }
 0x39e   :  { %v2684_v61 = vpop.eup %2683 }
 0x39f   :  { %v656_v29 = vsub.f32 1.0, %v2684_v61  ;;  %v662_v31 = vmul.f32 %v2684_v61, %v2995_v23 }
 0x3e7   :  { %v528_v59 = vpop.permute.xlu0 %527 }
 0x3e8   :  { %v530_v60 = vmul.f32 %v2682_v58, %v528_v59 }
 0x3ea   :  { %532 = vrot.lane.b32.xlu0 %v530_v60, %s2775_s20  ;;  %v836_v60 = vadd.f32 %v2961_v40, %v835_v43 }
 0x3ef   :  { %v647_v62 = vpop.permute.xlu1 %646 }
 0x3f0   :  { %v649_v63 = vmul.f32 %v2684_v61, %v647_v62 }
 0x3f2   :  { %651 = vrot.lane.b32.xlu1 %v649_v63, %s2775_s20 }
 0x45c   :  { %v533_v5 = vpop.permute.xlu0 %532 }
 0x45d   :  { %v535_v6 = vadd.f32 %v533_v5, %v467_v48 }
 0x45f   :  { %2685 = vtanh.f32 %v535_v6 }
 0x464   :  { %v652_v8 = vpop.permute.xlu1 %651 }
 0x465   :  { %v654_v10 = vadd.f32 %v652_v8, %v586_v51 }
 0x467   :  { %2687 = vtanh.f32 %v654_v10 }
 0x46c   :  { %v2686_v13 = vpop.eup %2685 }
 0x46d   :  { %539 = vrot.lane.b32.xlu0 %v2686_v13, %s2777_s28 }
 0x474   :  { %v2688_v14 = vpop.eup %2687 }
 0x475   :  { %658 = vrot.lane.b32.xlu1 %v2688_v14, %s2777_s28 }
 0x4df   :  { %v540_v21 = vpop.permute.xlu0 %539 }
 0x4e0   :  { %v542_v25 = vmul.f32 %v540_v21, %v537_v19 }
 0x4e2   :  { %v3039_v26 = vadd.f32 %v543_v24, %v542_v25 }
 0x4e4   :  { %v722_v28 = vpack.c.bf16 %v3039_v26, %v3039_v26 }
 0x4e6   :  { %724 = vrot.lane.b32.xlu0 %v722_v28, %s2777_s28 }
 0x4e7   :  { %v659_v30 = vpop.permute.xlu1 %658 }
 0x4e8   :  { %v661_v32 = vmul.f32 %v659_v30, %v656_v29  ;;  %v2252_v29 = vld [vmem:[%s3506_s0 + $0x18] sm:$0xff] }
 0x4e9   :  { %v928_v30 = vpack.c.bf16 %v2252_v29, %v2252_v29 }
 0x4ea   :  { %v3051_v33 = vadd.f32 %v662_v31, %v661_v32  ;;  %v2256_v32 = vld [vmem:[%s3509_s1 + $0x20] sm:$0xff] }
 0x4eb   :  { %2497 = vmatmul.mubr.msk.bf16.vlgmr.msra.gmra.mxu0 %vm78_vm0, %v928_v30 }
 0x4ec   :  { %v841_v34 = vpack.c.bf16 %v3051_v33, %v3051_v33  ;;  %2509 = vmatpush3.bf16.msra.mxu0 %v2888_v9  ;;  %2512 = vmatprep.mubr.msk.bf16.mxu0 %vm2774_vm1, %v2773_v0 }
 0x4ed   :  { %2510 = vmatprep.subr.bf16.mxu0 %v2773_v0 }
 0x4ee   :  { %843 = vrot.lane.b32.xlu1 %v841_v34, %s2777_s28 }
 0x4f0   :  { %2511 = vmatpush3.bf16.msra.mxu0 %v2905_v12 }
 0x4f1   :  { %2524 = vmatprep.subr.bf16.mxu0 %v2773_v0 }
 0x558   :  { %v725_v35 = vpop.permute.xlu0 %724 }
 0x559   :  { %2473 = vmatmul.mubr.msk.bf16.vlgmr.msra.gmra.mxu1 %vm78_vm0, %v725_v35  ;;  %v1047_v35 = vpack.c.bf16 %v2256_v32, %v2256_v32 }
 0x55a   :  { %2485 = vmatpush3.bf16.msra.mxu1 %v2879_v7  ;;  %2488 = vmatprep.mubr.msk.bf16.mxu1 %vm2774_vm1, %v2773_v0 }
 0x55b   :  { %2486 = vmatprep.subr.bf16.mxu1 %v2773_v0  ;;  %2513 = vmatmul.mubr.msk.bf16.vlgmr.msra.gmra.mxu0 %vm78_vm0, %v1047_v35 }
 0x55c   :  { %2525 = vmatpush3.bf16.msra.mxu0 %v2852_v2  ;;  %2528 = vmatprep.mubr.msk.bf16.mxu0 %vm2774_vm1, %v2773_v0 }
 0x55d   :  { %2526 = vmatprep.subr.bf16.mxu0 %v2773_v0 }
 0x55e   :  { %2487 = vmatpush3.bf16.msra.mxu1 %v2898_v11 }
 0x55f   :  { %2500 = vmatprep.subr.bf16.mxu1 %v2773_v0 }
 0x560   :  { %v844_v36 = vpop.permute.xlu1 %843  ;;  %2527 = vmatpush3.bf16.msra.mxu0 %v2869_v4 }
 0x561   :  { %2489 = vmatmul.mubr.msk.bf16.vlgmr.msra.gmra.mxu1 %vm78_vm0, %v844_v36  ;;  %2540 = vmatprep.subr.bf16.mxu0 %v2773_v0 }
 0x562   :  { %2501 = vmatpush3.bf16.msra.mxu1 %v2843_v1  ;;  %2504 = vmatprep.mubr.msk.bf16.mxu1 %vm2774_vm1, %v2773_v0 }
 0x563   :  { %2502 = vmatprep.subr.bf16.mxu1 %v2773_v0 }
 0x566   :  { %2503 = vmatpush3.bf16.msra.mxu1 %v2862_v3 }
 0x567   :  { %2516 = vmatprep.subr.bf16.mxu1 %v2773_v0 }
 0x619   :  { %v763_v47 = vpop.f32.mrf.mxu1 }
 0x61a   :  { %v764_v48 = vadd.f32 %v2941_v17, %v763_v47 }
 0x61b   :  { %v2474_v49 = vpop.f32.mrf.mxu1 }
 0x61c   :  { %777 = vrot.lane.b32.xlu0 %v764_v48, %s2775_s20  ;;  %v769_v58 = vadd.f32 %v764_v48, %v717_v57 }
 0x61d   :  { %v766_v50 = vpop.f32.mrf.mxu1 }
 0x61e   :  { %v2245_v59 = vmul.f32 -1.442695, %v769_v58  ;;  %v966_v50 = vpop.f32.mrf.mxu0 }
 0x61f   :  { %v2475_v51 = vpop.f32.mrf.mxu1 }
 0x620   :  { %2689 = vpow2.f32 %v2245_v59  ;;  %v2498_v51 = vpop.f32.mrf.mxu0 }
 0x621   :  { %v882_v52 = vpop.f32.mrf.mxu1 }
 0x622   :  { %v883_v53 = vadd.f32 %v2948_v27, %v882_v52  ;;  %v969_v52 = vpop.f32.mrf.mxu0 }
 0x623   :  { %v2490_v54 = vpop.f32.mrf.mxu1 }
 0x624   :  { %896 = vrot.lane.b32.xlu1 %v883_v53, %s2775_s20  ;;  %v888_v61 = vadd.f32 %v883_v53, %v836_v60  ;;  %v2499_v53 = vpop.f32.mrf.mxu0 }
 0x625   :  { %v885_v55 = vpop.f32.mrf.mxu1 }
 0x626   :  { %v2249_v62 = vmul.f32 -1.442695, %v888_v61  ;;  %v1085_v54 = vpop.f32.mrf.mxu0 }
 0x627   :  { %v2491_v56 = vpop.f32.mrf.mxu1 }
 0x628   :  { %2691 = vpow2.f32 %v2249_v62  ;;  %v2514_v55 = vpop.f32.mrf.mxu0 }
 0x62a   :  { %v1088_v56 = vpop.f32.mrf.mxu0 }
 0x62d   :  { %v2690_v63 = vpop.eup %2689 }
 0x62e   :  { %v773_v5 = vadd.f32 1.0, %v2690_v63 }
 0x630   :  { %2693 = vrcp.f32 %v773_v5 }
 0x635   :  { %v2692_v6 = vpop.eup %2691 }
 0x636   :  { %v892_v8 = vadd.f32 1.0, %v2692_v6 }
 0x638   :  { %2695 = vrcp.f32 %v892_v8 }
 0x63d   :  { %v2694_v10 = vpop.eup %2693 }
 0x63e   :  { %v787_v31 = vsub.f32 1.0, %v2694_v10  ;;  %v793_v36 = vmul.f32 %v2694_v10, %v3039_v26 }
 0x645   :  { %v2696_v16 = vpop.eup %2695 }
 0x646   :  { %v906_v42 = vsub.f32 1.0, %v2696_v16  ;;  %v912_v44 = vmul.f32 %v2696_v16, %v3051_v33 }
 0x68e   :  { %v778_v13 = vpop.permute.xlu0 %777 }
 0x68f   :  { %v780_v14 = vmul.f32 %v2694_v10, %v778_v13  ;;  %v967_v13 = vadd.f32 %v2955_v37, %v966_v50 }
 0x691   :  { %782 = vrot.lane.b32.xlu0 %v780_v14, %s2775_s20 }
 0x696   :  { %v897_v18 = vpop.permute.xlu1 %896 }
 0x697   :  { %v899_v19 = vmul.f32 %v2696_v16, %v897_v18  ;;  %v1086_v18 = vadd.f32 %v2961_v40, %v1085_v54 }
 0x699   :  { %901 = vrot.lane.b32.xlu1 %v899_v19, %s2775_s20 }
 0x703   :  { %v783_v20 = vpop.permute.xlu0 %782 }
 0x704   :  { %v785_v21 = vadd.f32 %v783_v20, %v717_v57  ;;  %v2515_v57 = vpop.f32.mrf.mxu0 }
 0x706   :  { %2697 = vtanh.f32 %v785_v21 }
 0x70b   :  { %v902_v22 = vpop.permute.xlu1 %901 }
 0x70c   :  { %v904_v24 = vadd.f32 %v902_v22, %v836_v60 }
 0x70e   :  { %2699 = vtanh.f32 %v904_v24 }
 0x713   :  { %v2698_v25 = vpop.eup %2697 }
 0x714   :  { %789 = vrot.lane.b32.xlu0 %v2698_v25, %s2777_s28 }
 0x71b   :  { %v2700_v28 = vpop.eup %2699 }
 0x71c   :  { %908 = vrot.lane.b32.xlu1 %v2700_v28, %s2777_s28 }
 0x786   :  { %v790_v34 = vpop.permute.xlu0 %789 }
 0x787   :  { %v792_v38 = vmul.f32 %v790_v34, %v787_v31 }
 0x789   :  { %v3095_v39 = vadd.f32 %v793_v36, %v792_v38 }
 0x78b   :  { %v972_v41 = vpack.c.bf16 %v3095_v39, %v3095_v39 }
 0x78d   :  { %974 = vrot.lane.b32.xlu0 %v972_v41, %s2777_s28 }
 0x78e   :  { %v909_v43 = vpop.permute.xlu1 %908 }
 0x78f   :  { %v911_v45 = vmul.f32 %v909_v43, %v906_v42 }
 0x791   :  { %v3107_v46 = vadd.f32 %v912_v44, %v911_v45  ;;  %v2262_v44 = vld [vmem:[%s3506_s0 + $0x20] sm:$0xff] }
 0x792   :  { %v1178_v45 = vpack.c.bf16 %v2262_v44, %v2262_v44 }
 0x793   :  { %v1091_v47 = vpack.c.bf16 %v3107_v46, %v3107_v46 }
 0x794   :  { %2529 = vmatmul.mubr.msk.bf16.vlgmr.msra.gmra.mxu0 %vm78_vm0, %v1178_v45 }
 0x795   :  { %1093 = vrot.lane.b32.xlu1 %v1091_v47, %s2777_s28  ;;  %2541 = vmatpush3.bf16.msra.mxu0 %v2888_v9 }
 0x796   :  { %2544 = vmatprep.mubr.msk.bf16.mxu0 %vm2774_vm1, %v2773_v0  ;;  %2542 = vmatprep.subr.bf16.mxu0 %v2773_v0 }
 0x799   :  { %2543 = vmatpush3.bf16.msra.mxu0 %v2905_v12 }
 0x79a   :  { %2556 = vmatprep.subr.bf16.mxu0 %v2773_v0 }
 0x7ff   :  { %v975_v48 = vpop.permute.xlu0 %974 }
 0x800   :  { %2505 = vmatmul.mubr.msk.bf16.vlgmr.msra.gmra.mxu1 %vm78_vm0, %v975_v48  ;;  %v2266_v48 = vld [vmem:[%s3509_s1 + $0x18] sm:$0xff] }
 0x801   :  { %2517 = vmatpush3.bf16.msra.mxu1 %v2879_v7  ;;  %2520 = vmatprep.mubr.msk.bf16.mxu1 %vm2774_vm1, %v2773_v0  ;;  %v1297_v50 = vpack.c.bf16 %v2266_v48, %v2266_v48 }
 0x802   :  { %2518 = vmatprep.subr.bf16.mxu1 %v2773_v0 }
 0x803   :  { %2545 = vmatmul.mubr.msk.bf16.vlgmr.msra.gmra.mxu0 %vm78_vm0, %v1297_v50 }
 0x804   :  { %2557 = vmatpush3.bf16.msra.mxu0 %v2852_v2  ;;  %2560 = vmatprep.mubr.msk.bf16.mxu0 %vm2774_vm1, %v2773_v0 }
 0x805   :  { %2519 = vmatpush3.bf16.msra.mxu1 %v2898_v11  ;;  %2558 = vmatprep.subr.bf16.mxu0 %v2773_v0 }
 0x806   :  { %2532 = vmatprep.subr.bf16.mxu1 %v2773_v0 }
 0x807   :  { %v1094_v49 = vpop.permute.xlu1 %1093 }
 0x808   :  { %2521 = vmatmul.mubr.msk.bf16.vlgmr.msra.gmra.mxu1 %vm78_vm0, %v1094_v49  ;;  %2559 = vmatpush3.bf16.msra.mxu0 %v2869_v4 }
 0x809   :  { %2533 = vmatpush3.bf16.msra.mxu1 %v2843_v1  ;;  %2536 = vmatprep.mubr.msk.bf16.mxu1 %vm2774_vm1, %v2773_v0 }
 0x80a   :  { %2534 = vmatprep.subr.bf16.mxu1 %v2773_v0  ;;  %2572 = vmatprep.subr.bf16.mxu0 %v2773_v0 }
 0x80d   :  { %2535 = vmatpush3.bf16.msra.mxu1 %v2862_v3 }
 0x80e   :  { %2548 = vmatprep.subr.bf16.mxu1 %v2773_v0 }
 0x8c0   :  { %v1013_v58 = vpop.f32.mrf.mxu1 }
 0x8c1   :  { %v1014_v59 = vadd.f32 %v2941_v17, %v1013_v58 }
 0x8c2   :  { %v2506_v60 = vpop.f32.mrf.mxu1 }
 0x8c3   :  { %1027 = vrot.lane.b32.xlu0 %v1014_v59, %s2775_s20  ;;  %v1019_v14 = vadd.f32 %v1014_v59, %v967_v13 }
 0x8c4   :  { %v1016_v61 = vpop.f32.mrf.mxu1 }
 0x8c5   :  { %v2255_v16 = vmul.f32 -1.442695, %v1019_v14 }
 0x8c6   :  { %v2507_v62 = vpop.f32.mrf.mxu1 }
 0x8c7   :  { %2701 = vpow2.f32 %v2255_v16 }
 0x8c8   :  { %v1132_v63 = vpop.f32.mrf.mxu1 }
 0x8c9   :  { %v1133_v5 = vadd.f32 %v2948_v27, %v1132_v63 }
 0x8ca   :  { %v2522_v6 = vpop.f32.mrf.mxu1 }
 0x8cb   :  { %1146 = vrot.lane.b32.xlu1 %v1133_v5, %s2775_s20  ;;  %v1138_v19 = vadd.f32 %v1133_v5, %v1086_v18 }
 0x8cc   :  { %v1135_v8 = vpop.f32.mrf.mxu1 }
 0x8cd   :  { %v2259_v20 = vmul.f32 -1.442695, %v1138_v19 }
 0x8ce   :  { %v2523_v10 = vpop.f32.mrf.mxu1 }
 0x8cf   :  { %2703 = vpow2.f32 %v2259_v20 }
 0x8d4   :  { %v2702_v21 = vpop.eup %2701 }
 0x8d5   :  { %v1023_v22 = vadd.f32 1.0, %v2702_v21 }
 0x8d7   :  { %2705 = vrcp.f32 %v1023_v22 }
 0x8dc   :  { %v2704_v24 = vpop.eup %2703 }
 0x8dd   :  { %v1142_v25 = vadd.f32 1.0, %v2704_v24 }
 0x8df   :  { %2707 = vrcp.f32 %v1142_v25 }
 0x8e4   :  { %v2706_v28 = vpop.eup %2705 }
 0x8e5   :  { %v1037_v47 = vsub.f32 1.0, %v2706_v28  ;;  %v1043_v51 = vmul.f32 %v2706_v28, %v3095_v39 }
 0x8ec   :  { %v2708_v31 = vpop.eup %2707 }
 0x8ed   :  { %v1156_v55 = vsub.f32 1.0, %v2708_v31  ;;  %v1162_v57 = vmul.f32 %v2708_v31, %v3107_v46 }
 0x935   :  { %v1028_v29 = vpop.permute.xlu0 %1027 }
 0x936   :  { %v1030_v30 = vmul.f32 %v2706_v28, %v1028_v29 }
 0x938   :  { %1032 = vrot.lane.b32.xlu0 %v1030_v30, %s2775_s20 }
 0x93d   :  { %v1147_v32 = vpop.permute.xlu1 %1146 }
 0x93e   :  { %v1149_v34 = vmul.f32 %v2708_v31, %v1147_v32 }
 0x940   :  { %1151 = vrot.lane.b32.xlu1 %v1149_v34, %s2775_s20 }
 0x9aa   :  { %v1033_v35 = vpop.permute.xlu0 %1032 }
 0x9ab   :  { %v1035_v36 = vadd.f32 %v1033_v35, %v967_v13 }
 0x9ad   :  { %2709 = vtanh.f32 %v1035_v36 }
 0x9b2   :  { %v1152_v38 = vpop.permute.xlu1 %1151 }
 0x9b3   :  { %v1154_v41 = vadd.f32 %v1152_v38, %v1086_v18 }
 0x9b5   :  { %2711 = vtanh.f32 %v1154_v41 }
 0x9ba   :  { %v2710_v42 = vpop.eup %2709 }
 0x9bb   :  { %1039 = vrot.lane.b32.xlu0 %v2710_v42, %s2777_s28 }
 0x9c2   :  { %v2712_v43 = vpop.eup %2711 }
 0x9c3   :  { %1158 = vrot.lane.b32.xlu1 %v2712_v43, %s2777_s28 }
 0xa2d   :  { %v1040_v49 = vpop.permute.xlu0 %1039 }
 0xa2e   :  { %v1042_v52 = vmul.f32 %v1040_v49, %v1037_v47 }
 0xa30   :  { %v3151_v53 = vadd.f32 %v1043_v51, %v1042_v52  ;;  %v2272_v52 = vld [vmem:[%s3506_s0 + $0x28] sm:$0xff] }
 0xa32   :  { %v1222_v54 = vpack.c.bf16 %v3151_v53, %v3151_v53 }
 0xa34   :  { %1224 = vrot.lane.b32.xlu0 %v1222_v54, %s2777_s28  ;;  %v1428_v54 = vpack.c.bf16 %v2272_v52, %v2272_v52 }
 0xa35   :  { %v1159_v56 = vpop.permute.xlu1 %1158 }
 0xa36   :  { %v1161_v58 = vmul.f32 %v1159_v56, %v1156_v55  ;;  %2561 = vmatmul.mubr.msk.bf16.vlgmr.msra.gmra.mxu0 %vm78_vm0, %v1428_v54  ;;  %v2276_v56 = vld [vmem:[%s3509_s1 + $0x10] sm:$0xff] }
 0xa37   :  { %2573 = vmatpush3.bf16.msra.mxu0 %v2888_v9  ;;  %2576 = vmatprep.mubr.msk.bf16.mxu0 %vm2774_vm1, %v2773_v0 }
 0xa38   :  { %v3163_v2 = vadd.f32 %v1162_v57, %v1161_v58  ;;  %2574 = vmatprep.subr.bf16.mxu0 %v2773_v0  ;;  %v1547_v58 = vpack.c.bf16 %v2276_v56, %v2276_v56 }
 0xa3a   :  { %v1341_v59 = vpack.c.bf16 %v3163_v2, %v3163_v2 }
 0xa3b   :  { %2575 = vmatpush3.bf16.msra.mxu0 %v2905_v12 }
 0xa3c   :  { %1343 = vrot.lane.b32.xlu1 %v1341_v59, %s2777_s28  ;;  %2588 = vmatprep.subr.bf16.mxu0 %v2773_v0 }
 0xa3e   :  { %2577 = vmatmul.mubr.msk.bf16.vlgmr.msra.gmra.mxu0 %vm78_vm0, %v1547_v58 }
 0xa3f   :  { %2592 = vmatprep.mubr.msk.bf16.mxu0 %vm2774_vm1, %v2773_v0 }
 0xaa6   :  { %v1225_v60 = vpop.permute.xlu0 %1224 }
 0xaa7   :  { %2537 = vmatmul.mubr.msk.bf16.vlgmr.msra.gmra.mxu1 %vm78_vm0, %v1225_v60 }
 0xaa8   :  { %2549 = vmatpush3.bf16.msra.mxu1 %v2879_v7  ;;  %2552 = vmatprep.mubr.msk.bf16.mxu1 %vm2774_vm1, %v2773_v0  ;;  %v1216_v7 = vpop.f32.mrf.mxu0 }
 0xaa9   :  { %2550 = vmatprep.subr.bf16.mxu1 %v2773_v0  ;;  %v1217_v22 = vadd.f32 %v2955_v37, %v1216_v7 }
 0xaaa   :  { %v2530_v61 = vpop.f32.mrf.mxu0 }
 0xaab   :  { %v3224_v61 = vld [vmem:[%s3505_s2] sm:$0xff]  }
 0xaac   :  { %2551 = vmatpush3.bf16.msra.mxu1 %v2898_v11  ;;  %v1219_v62 = vpop.f32.mrf.mxu0 }
 0xaad   :  { %2564 = vmatprep.subr.bf16.mxu1 %v2773_v0 }
 0xaae   :  { %v1344_v4 = vpop.permute.xlu1 %1343  ;;  %v2531_v11 = vpop.f32.mrf.mxu0 }
 0xaaf   :  { %2553 = vmatmul.mubr.msk.bf16.vlgmr.msra.gmra.mxu1 %vm78_vm0, %v1344_v4  ;;  %v3212_v4 = vld [vmem:[%s3505_s2 + $0x8] sm:$0xff]  }
 0xab0   :  { %2565 = vmatpush3.bf16.msra.mxu1 %v2843_v1  ;;  %2568 = vmatprep.mubr.msk.bf16.mxu1 %vm2774_vm1, %v2773_v0  ;;  %v1335_v63 = vpop.f32.mrf.mxu0 }
 0xab1   :  { %2566 = vmatprep.subr.bf16.mxu1 %v2773_v0  ;;  %v1336_v28 = vadd.f32 %v2961_v40, %v1335_v63  ;;  %2589 = vmatpush3.bf16.msra.mxu0 %v3212_v4 }
 0xab2   :  { %v2546_v5 = vpop.f32.mrf.mxu0  ;;  %2590 = vmatprep.subr.bf16.mxu0 %v2773_v0 }
 0xab4   :  { %2567 = vmatpush3.bf16.msra.mxu1 %v2862_v3  ;;  %v1338_v6 = vpop.f32.mrf.mxu0 }
 0xab5   :  { %2580 = vmatprep.subr.bf16.mxu1 %v2773_v0  ;;  %2591 = vmatpush3.bf16.msra.mxu0 %v3224_v61 }
 0xab6   :  { %v2547_v8 = vpop.f32.mrf.mxu0  ;;  %2604 = vmatprep.subr.bf16.mxu0 %v2773_v0 }
 0xb67   :  { %v1263_v10 = vpop.f32.mrf.mxu1 }
 0xb68   :  { %v1264_v1 = vadd.f32 %v2941_v17, %v1263_v10  ;;  %v3238_v10 = vld [vmem:[%s3507_s7 + $0x8] sm:$0xff]  }
 0xb69   :  { %v2538_v13 = vpop.f32.mrf.mxu1 }
 0xb6a   :  { %1277 = vrot.lane.b32.xlu0 %v1264_v1, %s2775_s20  ;;  %v1269_v24 = vadd.f32 %v1264_v1, %v1217_v22  ;;  %v3247_v1 = vld [vmem:[%s3507_s7] sm:$0xff]  }
 0xb6b   :  { %v1266_v14 = vpop.f32.mrf.mxu1 }
 0xb6c   :  { %v2265_v25 = vmul.f32 -1.442695, %v1269_v24  ;;  %v3255_v14 = vld [vmem:[%s3504_s3 + $0x8] sm:$0xff]  }
 0xb6d   :  { %v2539_v16 = vpop.f32.mrf.mxu1 }
 0xb6e   :  { %2713 = vpow2.f32 %v2265_v25  ;;  %v3264_v16 = vld [vmem:[%s3504_s3] sm:$0xff]  }
 0xb6f   :  { %v1382_v18 = vpop.f32.mrf.mxu1 }
 0xb70   :  { %v1383_v3 = vadd.f32 %v2948_v27, %v1382_v18  ;;  %v1466_v18 = vpop.f32.mrf.mxu0 }
 0xb71   :  { %v2554_v19 = vpop.f32.mrf.mxu1 }
 0xb72   :  { %1396 = vrot.lane.b32.xlu1 %v1383_v3, %s2775_s20  ;;  %v1388_v29 = vadd.f32 %v1383_v3, %v1336_v28  ;;  %v2562_v3 = vpop.f32.mrf.mxu0 }
 0xb73   :  { %v1385_v20 = vpop.f32.mrf.mxu1 }
 0xb74   :  { %v2269_v30 = vmul.f32 -1.442695, %v1388_v29  ;;  %v1469_v19 = vpop.f32.mrf.mxu0 }
 0xb75   :  { %v2555_v21 = vpop.f32.mrf.mxu1 }
 0xb76   :  { %2715 = vpow2.f32 %v2269_v30  ;;  %v2563_v20 = vpop.f32.mrf.mxu0 }
 0xb78   :  { %v1585_v21 = vpop.f32.mrf.mxu0 }
 0xb7b   :  { %v2714_v31 = vpop.eup %2713 }
 0xb7c   :  { %v1273_v32 = vadd.f32 1.0, %v2714_v31 }
 0xb7e   :  { %2717 = vrcp.f32 %v1273_v32 }
 0xb83   :  { %v2716_v34 = vpop.eup %2715 }
 0xb84   :  { %v1392_v35 = vadd.f32 1.0, %v2716_v34 }
 0xb86   :  { %2719 = vrcp.f32 %v1392_v35 }
 0xb8b   :  { %v2718_v36 = vpop.eup %2717 }
 0xb8c   :  { %v1287_v55 = vsub.f32 1.0, %v2718_v36  ;;  %v1293_v59 = vmul.f32 %v2718_v36, %v3151_v53 }
 0xb93   :  { %v2720_v42 = vpop.eup %2719 }
 0xb94   :  { %v1406_v7 = vsub.f32 1.0, %v2720_v42  ;;  %v1412_v11 = vmul.f32 %v2720_v42, %v3163_v2 }
 0xbdc   :  { %v1278_v38 = vpop.permute.xlu0 %1277 }
 0xbdd   :  { %v1280_v41 = vmul.f32 %v2718_v36, %v1278_v38 }
 0xbdf   :  { %1282 = vrot.lane.b32.xlu0 %v1280_v41, %s2775_s20 }
 0xbe4   :  { %v1397_v43 = vpop.permute.xlu1 %1396 }
 0xbe5   :  { %v1399_v44 = vmul.f32 %v2720_v42, %v1397_v43  ;;  %v1467_v42 = vadd.f32 %v2955_v37, %v1466_v18 }
 0xbe7   :  { %1401 = vrot.lane.b32.xlu1 %v1399_v44, %s2775_s20 }
 0xc51   :  { %v1283_v45 = vpop.permute.xlu0 %1282 }
 0xc52   :  { %v1285_v47 = vadd.f32 %v1283_v45, %v1217_v22  ;;  %v2578_v22 = vpop.f32.mrf.mxu0  ;;  %v1586_v45 = vadd.f32 %v2961_v40, %v1585_v21 }
 0xc54   :  { %2721 = vtanh.f32 %v1285_v47  ;;  %v1588_v24 = vpop.f32.mrf.mxu0 }
 0xc56   :  { %v2579_v25 = vpop.f32.mrf.mxu0 }
 0xc59   :  { %v1402_v48 = vpop.permute.xlu1 %1401 }
 0xc5a   :  { %v1404_v49 = vadd.f32 %v1402_v48, %v1336_v28 }
 0xc5c   :  { %2723 = vtanh.f32 %v1404_v49 }
 0xc61   :  { %v2722_v50 = vpop.eup %2721 }
 0xc62   :  { %1289 = vrot.lane.b32.xlu0 %v2722_v50, %s2777_s28 }
 0xc69   :  { %v2724_v51 = vpop.eup %2723 }
 0xc6a   :  { %1408 = vrot.lane.b32.xlu1 %v2724_v51, %s2777_s28 }
 0xcd4   :  { %v1290_v57 = vpop.permute.xlu0 %1289 }
 0xcd5   :  { %v1292_v60 = vmul.f32 %v1290_v57, %v1287_v55 }
 0xcd7   :  { %v3207_v9 = vadd.f32 %v1293_v59, %v1292_v60 }
 0xcd9   :  { %v1472_v12 = vpack.c.bf16 %v3207_v9, %v3207_v9 }
 0xcdb   :  { %1474 = vrot.lane.b32.xlu0 %v1472_v12, %s2777_s28 }
 0xcdc   :  { %v1409_v62 = vpop.permute.xlu1 %1408 }
 0xcdd   :  { %v1411_v63 = vmul.f32 %v1409_v62, %v1406_v7  ;;  %v2282_v7 = vld [vmem:[%s3506_s0 + $0x30] sm:$0xff] }
 0xcde   :  { %v1678_v62 = vpack.c.bf16 %v2282_v7, %v2282_v7 }
 0xcdf   :  { %v3229_v5 = vadd.f32 %v1412_v11, %v1411_v63  ;;  %v3285_v11 = vld [vmem:[%s3508_s6 + $0x8] sm:$0xff]  }
 0xce0   :  { %2593 = vmatmul.mubr.msk.bf16.vlgmr.msra.gmra.mxu0 %vm78_vm0, %v1678_v62 }
 0xce1   :  { %v1591_v6 = vpack.c.bf16 %v3229_v5, %v3229_v5  ;;  %2605 = vmatpush3.bf16.msra.mxu0 %v3285_v11  ;;  %2608 = vmatprep.mubr.msk.bf16.mxu0 %vm2774_vm1, %v2773_v0 }
 0xce2   :  { %2606 = vmatprep.subr.bf16.mxu0 %v2773_v0 }
 0xce3   :  { %1593 = vrot.lane.b32.xlu1 %v1591_v6, %s2777_s28  ;;  %v3294_v6 = vld [vmem:[%s3508_s6] sm:$0xff]  }
 0xce5   :  { %2607 = vmatpush3.bf16.msra.mxu0 %v3294_v6 }
 0xce6   :  { %2620 = vmatprep.subr.bf16.mxu0 %v2773_v0 }
 0xd4d   :  { %v1475_v8 = vpop.permute.xlu0 %1474 }
 0xd4e   :  { %2569 = vmatmul.mubr.msk.bf16.vlgmr.msra.gmra.mxu1 %vm78_vm0, %v1475_v8  ;;  %v2286_v8 = vld [vmem:[%s3509_s1 + $0x8] sm:$0xff] }
 0xd4f   :  { %2581 = vmatpush3.bf16.msra.mxu1 %v3238_v10  ;;  %2584 = vmatprep.mubr.msk.bf16.mxu1 %vm2774_vm1, %v2773_v0  ;;  %v1797_v18 = vpack.c.bf16 %v2286_v8, %v2286_v8 }
 0xd50   :  { %2582 = vmatprep.subr.bf16.mxu1 %v2773_v0 }
 0xd51   :  { %2609 = vmatmul.mubr.msk.bf16.vlgmr.msra.gmra.mxu0 %vm78_vm0, %v1797_v18 }
 0xd52   :  { %2621 = vmatpush3.bf16.msra.mxu0 %v3212_v4  ;;  %2624 = vmatprep.mubr.msk.bf16.mxu0 %vm2774_vm1, %v2773_v0 }
 0xd53   :  { %2583 = vmatpush3.bf16.msra.mxu1 %v3247_v1  ;;  %2622 = vmatprep.subr.bf16.mxu0 %v2773_v0 }
 0xd54   :  { %2596 = vmatprep.subr.bf16.mxu1 %v2773_v0 }
 0xd55   :  { %v1594_v13 = vpop.permute.xlu1 %1593 }
 0xd56   :  { %2585 = vmatmul.mubr.msk.bf16.vlgmr.msra.gmra.mxu1 %vm78_vm0, %v1594_v13  ;;  %2623 = vmatpush3.bf16.msra.mxu0 %v3224_v61 }
 0xd57   :  { %2597 = vmatpush3.bf16.msra.mxu1 %v3255_v14  ;;  %2600 = vmatprep.mubr.msk.bf16.mxu1 %vm2774_vm1, %v2773_v0 }
 0xd58   :  { %2598 = vmatprep.subr.bf16.mxu1 %v2773_v0  ;;  %2636 = vmatprep.subr.bf16.mxu0 %v2773_v0 }
 0xd5b   :  { %2599 = vmatpush3.bf16.msra.mxu1 %v3264_v16 }
 0xd5c   :  { %2612 = vmatprep.subr.bf16.mxu1 %v2773_v0 }
 0xe0e   :  { %v1513_v28 = vpop.f32.mrf.mxu1 }
 0xe0f   :  { %v1514_v29 = vadd.f32 %v2941_v17, %v1513_v28 }
 0xe10   :  { %v2570_v30 = vpop.f32.mrf.mxu1 }
 0xe11   :  { %1527 = vrot.lane.b32.xlu0 %v1514_v29, %s2775_s20  ;;  %v1519_v43 = vadd.f32 %v1514_v29, %v1467_v42 }
 0xe12   :  { %v1516_v31 = vpop.f32.mrf.mxu1 }
 0xe13   :  { %v2275_v44 = vmul.f32 -1.442695, %v1519_v43  ;;  %v1716_v31 = vpop.f32.mrf.mxu0 }
 0xe14   :  { %v2571_v32 = vpop.f32.mrf.mxu1 }
 0xe15   :  { %2725 = vpow2.f32 %v2275_v44  ;;  %v2594_v32 = vpop.f32.mrf.mxu0 }
 0xe16   :  { %v1632_v34 = vpop.f32.mrf.mxu1 }
 0xe17   :  { %v1633_v35 = vadd.f32 %v2948_v27, %v1632_v34  ;;  %v1719_v34 = vpop.f32.mrf.mxu0 }
 0xe18   :  { %v2586_v36 = vpop.f32.mrf.mxu1 }
 0xe19   :  { %1646 = vrot.lane.b32.xlu1 %v1633_v35, %s2775_s20  ;;  %v1638_v17 = vadd.f32 %v1633_v35, %v1586_v45  ;;  %v2595_v35 = vpop.f32.mrf.mxu0 }
 0xe1a   :  { %v1635_v38 = vpop.f32.mrf.mxu1 }
 0xe1b   :  { %v2279_v47 = vmul.f32 -1.442695, %v1638_v17  ;;  %v1835_v36 = vpop.f32.mrf.mxu0 }
 0xe1c   :  { %v2587_v41 = vpop.f32.mrf.mxu1 }
 0xe1d   :  { %2727 = vpow2.f32 %v2279_v47  ;;  %v2610_v38 = vpop.f32.mrf.mxu0 }
 0xe1f   :  { %v1838_v41 = vpop.f32.mrf.mxu0 }
 0xe22   :  { %v2726_v48 = vpop.eup %2725 }
 0xe23   :  { %v1523_v49 = vadd.f32 1.0, %v2726_v48  ;;  %v3344_v48 = vld [vmem:[%s3511_s9] ss:$0 sm:$0xff] }
 0xe25   :  { %2729 = vrcp.f32 %v1523_v49 }
 0xe2a   :  { %v2728_v50 = vpop.eup %2727 }
 0xe2b   :  { %v1642_v27 = vadd.f32 1.0, %v2728_v50 }
 0xe2d   :  { %2731 = vrcp.f32 %v1642_v27 }
 0xe32   :  { %v2730_v51 = vpop.eup %2729 }
 0xe33   :  { %v1537_v63 = vsub.f32 1.0, %v2730_v51  ;;  %v1543_v3 = vmul.f32 %v2730_v51, %v3207_v9 }
 0xe3a   :  { %v2732_v37 = vpop.eup %2731 }
 0xe3b   :  { %v1656_v22 = vsub.f32 1.0, %v2732_v37  ;;  %v1662_v25 = vmul.f32 %v2732_v37, %v3229_v5 }
 0xe83   :  { %v1528_v52 = vpop.permute.xlu0 %1527 }
 0xe84   :  { %v1530_v54 = vmul.f32 %v2730_v51, %v1528_v52  ;;  %v3351_v52 = vld [vmem:[%s3512_s4] ss:$0 sm:$0xff] }
 0xe86   :  { %1532 = vrot.lane.b32.xlu0 %v1530_v54, %s2775_s20  ;;  %v1717_v54 = vadd.f32 %v3351_v52, %v1716_v31  ;;  %v2045_v31 = vld [vmem:[%s3509_s1] sm:$0xff] }
 0xe87   :  { %v2046_v34 = vpack.c.bf16 %v2045_v31, %v2045_v31 }
 0xe8b   :  { %v1647_v55 = vpop.permute.xlu1 %1646 }
 0xe8c   :  { %v1649_v56 = vmul.f32 %v2732_v37, %v1647_v55 }
 0xe8e   :  { %1651 = vrot.lane.b32.xlu1 %v1649_v56, %s2775_s20  ;;  %v3357_v56 = vld [vmem:[%s3513_s8] ss:$0 sm:$0xff] }
 0xef8   :  { %v1533_v40 = vpop.permute.xlu0 %1532 }
 0xef9   :  { %v1535_v57 = vadd.f32 %v1533_v40, %v1467_v42  ;;  %v2611_v42 = vpop.f32.mrf.mxu0  ;;  %v1836_v40 = vadd.f32 %v3357_v56, %v1835_v36 }
 0xefb   :  { %2733 = vtanh.f32 %v1535_v57 }
 0xf00   :  { %v1652_v58 = vpop.permute.xlu1 %1651 }
 0xf01   :  { %v1654_v59 = vadd.f32 %v1652_v58, %v1586_v45 }
 0xf03   :  { %2735 = vtanh.f32 %v1654_v59 }
 0xf08   :  { %v2734_v60 = vpop.eup %2733 }
 0xf09   :  { %1539 = vrot.lane.b32.xlu0 %v2734_v60, %s2777_s28 }
 0xf10   :  { %v2736_v12 = vpop.eup %2735 }
 0xf11   :  { %1658 = vrot.lane.b32.xlu1 %v2736_v12, %s2777_s28 }
 0xf7b   :  { %v1540_v13 = vpop.permute.xlu0 %1539 }
 0xf7c   :  { %v1542_v19 = vmul.f32 %v1540_v13, %v1537_v63 }
 0xf7e   :  { %v3303_v20 = vadd.f32 %v1543_v3, %v1542_v19 }
 0xf80   :  { %v1722_v21 = vpack.c.bf16 %v3303_v20, %v3303_v20 }
 0xf82   :  { %1724 = vrot.lane.b32.xlu0 %v1722_v21, %s2777_s28 }
 0xf83   :  { %v1659_v24 = vpop.permute.xlu1 %1658 }
 0xf84   :  { %v1661_v28 = vmul.f32 %v1659_v24, %v1656_v22 }
 0xf86   :  { %v3315_v4 = vadd.f32 %v1662_v25, %v1661_v28 }
 0xf88   :  { %v1841_v29 = vpack.c.bf16 %v3315_v4, %v3315_v4 }
 0xf8a   :  { %1843 = vrot.lane.b32.xlu1 %v1841_v29, %s2777_s28  ;;  %v2292_v29 = vld [vmem:[%s3506_s0 + $0x38] sm:$0xff] }
 0xff4   :  { %v1725_v30 = vpop.permute.xlu0 %1724 }
 0xff5   :  { %2601 = vmatmul.mubr.msk.bf16.vlgmr.msra.gmra.mxu1 %vm78_vm0, %v1725_v30  ;;  %v1928_v30 = vpack.c.bf16 %v2292_v29, %v2292_v29 }
 0xff6   :  { %2613 = vmatpush3.bf16.msra.mxu1 %v3238_v10  ;;  %2616 = vmatprep.mubr.msk.bf16.mxu1 %vm2774_vm1, %v2773_v0 }
 0xff7   :  { %2614 = vmatprep.subr.bf16.mxu1 %v2773_v0  ;;  %2625 = vmatmul.mubr.msk.bf16.vlgmr.msra.gmra.mxu0 %vm78_vm0, %v1928_v30 }
 0xff8   :  { %2637 = vmatpush3.bf16.msra.mxu0 %v3285_v11  ;;  %2640 = vmatprep.mubr.msk.bf16.mxu0 %vm2774_vm1, %v2773_v0 }
 0xff9   :  { %2638 = vmatprep.subr.bf16.mxu0 %v2773_v0 }
 0xffa   :  { %2615 = vmatpush3.bf16.msra.mxu1 %v3247_v1 }
 0xffb   :  { %2628 = vmatprep.subr.bf16.mxu1 %v2773_v0 }
 0xffc   :  { %v1844_v61 = vpop.permute.xlu1 %1843  ;;  %2639 = vmatpush3.bf16.msra.mxu0 %v3294_v6 }
 0xffd   :  { %2617 = vmatmul.mubr.msk.bf16.vlgmr.msra.gmra.mxu1 %vm78_vm0, %v1844_v61 }
 0xffe   :  { %2629 = vmatpush3.bf16.msra.mxu1 %v3255_v14  ;;  %2632 = vmatprep.mubr.msk.bf16.mxu1 %vm2774_vm1, %v2773_v0  ;;  %v3337_v14 = vld [vmem:[%s3510_s5] ss:$0 sm:$0xff] }
 0xfff   :  { %2630 = vmatprep.subr.bf16.mxu1 %v2773_v0  ;;  %2641 = vmatmul.mubr.msk.bf16.vlgmr.msra.gmra.mxu0 %vm78_vm0, %v2046_v34 }
0x1002   :  { %2631 = vmatpush3.bf16.msra.mxu1 %v3264_v16 }
0x1003   :  { %2644 = vmatprep.subr.bf16.mxu1 %v2773_v0 }
0x10b5   :  { %v1763_v43 = vpop.f32.mrf.mxu1 }
0x10b6   :  { %v1764_v44 = vadd.f32 %v3337_v14, %v1763_v43 }
0x10b7   :  { %v2602_v45 = vpop.f32.mrf.mxu1 }
0x10b8   :  { %1777 = vrot.lane.b32.xlu0 %v1764_v44, %s2775_s20  ;;  %v1769_v37 = vadd.f32 %v1764_v44, %v1717_v54 }
0x10b9   :  { %v1766_v16 = vpop.f32.mrf.mxu1 }
0x10ba   :  { %v2285_v55 = vmul.f32 -1.442695, %v1769_v37 }
0x10bb   :  { %v2603_v17 = vpop.f32.mrf.mxu1 }
0x10bc   :  { %2737 = vpow2.f32 %v2285_v55 }
0x10bd   :  { %v1882_v47 = vpop.f32.mrf.mxu1 }
0x10be   :  { %v1883_v49 = vadd.f32 %v3344_v48, %v1882_v47  ;;  %v1966_v47 = vpop.f32.mrf.mxu0 }
0x10bf   :  { %v2618_v50 = vpop.f32.mrf.mxu1 }
0x10c0   :  { %1896 = vrot.lane.b32.xlu1 %v1883_v49, %s2775_s20  ;;  %v1888_v57 = vadd.f32 %v1883_v49, %v1836_v40  ;;  %v2626_v49 = vpop.f32.mrf.mxu0 }
0x10c1   :  { %v1885_v27 = vpop.f32.mrf.mxu1 }
0x10c2   :  { %v2289_v58 = vmul.f32 -1.442695, %v1888_v57  ;;  %v1969_v50 = vpop.f32.mrf.mxu0 }
0x10c3   :  { %v2619_v51 = vpop.f32.mrf.mxu1 }
0x10c4   :  { %2739 = vpow2.f32 %v2289_v58  ;;  %v2627_v27 = vpop.f32.mrf.mxu0 }
0x10c6   :  { %v2084_v51 = vpop.f32.mrf.mxu0 }
0x10c9   :  { %v2738_v59 = vpop.eup %2737 }
0x10ca   :  { %v1773_v60 = vadd.f32 1.0, %v2738_v59 }
0x10cc   :  { %2741 = vrcp.f32 %v1773_v60 }
0x10d1   :  { %v2740_v12 = vpop.eup %2739 }
0x10d2   :  { %v1892_v7 = vadd.f32 1.0, %v2740_v12 }
0x10d4   :  { %2743 = vrcp.f32 %v1892_v7 }
0x10d9   :  { %v2742_v62 = vpop.eup %2741 }
0x10da   :  { %v1787_v61 = vsub.f32 1.0, %v2742_v62  ;;  %v1793_v35 = vmul.f32 %v2742_v62, %v3303_v20 }
0x10e1   :  { %v2744_v13 = vpop.eup %2743 }
0x10e2   :  { %v1906_v41 = vsub.f32 1.0, %v2744_v13  ;;  %v1912_v42 = vmul.f32 %v2744_v13, %v3315_v4 }
0x112a   :  { %v1778_v63 = vpop.permute.xlu0 %1777 }
0x112b   :  { %v1780_v8 = vmul.f32 %v2742_v62, %v1778_v63  ;;  %v1967_v62 = vadd.f32 %v3351_v52, %v1966_v47 }
0x112d   :  { %1782 = vrot.lane.b32.xlu0 %v1780_v8, %s2775_s20 }
0x1132   :  { %v1897_v18 = vpop.permute.xlu1 %1896 }
0x1133   :  { %v1899_v3 = vmul.f32 %v2744_v13, %v1897_v18  ;;  %v2085_v13 = vadd.f32 %v3357_v56, %v2084_v51 }
0x1135   :  { %1901 = vrot.lane.b32.xlu1 %v1899_v3, %s2775_s20 }
0x119f   :  { %v1783_v19 = vpop.permute.xlu0 %1782 }
0x11a0   :  { %v1785_v21 = vadd.f32 %v1783_v19, %v1717_v54  ;;  %v2642_v54 = vpop.f32.mrf.mxu0 }
0x11a2   :  { %2745 = vtanh.f32 %v1785_v21  ;;  %v2087_v37 = vpop.f32.mrf.mxu0 }
0x11a4   :  { %v2643_v55 = vpop.f32.mrf.mxu0 }
0x11a7   :  { %v1902_v22 = vpop.permute.xlu1 %1901 }
0x11a8   :  { %v1904_v24 = vadd.f32 %v1902_v22, %v1836_v40 }
0x11aa   :  { %2747 = vtanh.f32 %v1904_v24 }
0x11af   :  { %v2746_v25 = vpop.eup %2745 }
0x11b0   :  { %1789 = vrot.lane.b32.xlu0 %v2746_v25, %s2777_s28 }
0x11b7   :  { %v2748_v28 = vpop.eup %2747 }
0x11b8   :  { %1908 = vrot.lane.b32.xlu1 %v2748_v28, %s2777_s28 }
0x1222   :  { %v1790_v32 = vpop.permute.xlu0 %1789 }
0x1223   :  { %v1792_v36 = vmul.f32 %v1790_v32, %v1787_v61 }
0x1225   :  { %v3378_v11 = vadd.f32 %v1793_v35, %v1792_v36 }
0x1227   :  { %v1972_v38 = vpack.c.bf16 %v3378_v11, %v3378_v11 }
0x1229   :  { %1974 = vrot.lane.b32.xlu0 %v1972_v38, %s2777_s28 }
0x122a   :  { %v1909_v6 = vpop.permute.xlu1 %1908 }
0x122b   :  { %v1911_v43 = vmul.f32 %v1909_v6, %v1906_v41 }
0x122d   :  { %v3384_v44 = vadd.f32 %v1912_v42, %v1911_v43 }
0x122f   :  { %v2090_v45 = vpack.c.bf16 %v3384_v44, %v3384_v44 }
0x1231   :  { %2092 = vrot.lane.b32.xlu1 %v2090_v45, %s2777_s28 }
0x129b   :  { %v1975_v16 = vpop.permute.xlu0 %1974 }
0x129c   :  { %2633 = vmatmul.mubr.msk.bf16.vlgmr.msra.gmra.mxu1 %vm78_vm0, %v1975_v16 }
0x129d   :  { %2645 = vmatpush3.bf16.msra.mxu1 %v3238_v10  ;;  %2648 = vmatprep.mubr.msk.bf16.mxu1 %vm2774_vm1, %v2773_v0 }
0x129e   :  { %2646 = vmatprep.subr.bf16.mxu1 %v2773_v0 }
0x12a1   :  { %2647 = vmatpush3.bf16.msra.mxu1 %v3247_v1 }
0x12a3   :  { %v2093_v17 = vpop.permute.xlu1 %2092 }
0x12a4   :  { %2649 = vmatmul.mubr.msk.bf16.vlgmr.msra.gmra.mxu1 %vm78_vm0, %v2093_v17 }
0x135c   :  { %v2013_v40 = vpop.f32.mrf.mxu1 }
0x135d   :  { %v2014_v10 = vadd.f32 %v3337_v14, %v2013_v40 }
0x135e   :  { %v2634_v57 = vpop.f32.mrf.mxu1 }
0x135f   :  { %2027 = vrot.lane.b32.xlu0 %v2014_v10, %s2775_s20  ;;  %v2019_v63 = vadd.f32 %v2014_v10, %v1967_v62 }
0x1360   :  { %v2016_v0 = vpop.f32.mrf.mxu1 }
0x1361   :  { %v2295_v8 = vmul.f32 -1.442695, %v2019_v63 }
0x1362   :  { %v2635_v58 = vpop.f32.mrf.mxu1 }
0x1363   :  { %2749 = vpow2.f32 %v2295_v8 }
0x1364   :  { %v2131_v1 = vpop.f32.mrf.mxu1 }
0x1365   :  { %v2132_v59 = vadd.f32 %v3344_v48, %v2131_v1 }
0x1366   :  { %v2650_v60 = vpop.f32.mrf.mxu1 }
0x1367   :  { %2145 = vrot.lane.b32.xlu1 %v2132_v59, %s2775_s20  ;;  %v2137_v14 = vadd.f32 %v2132_v59, %v2085_v13 }
0x1368   :  { %v2134_v12 = vpop.f32.mrf.mxu1 }
0x1369   :  { %v2298_v18 = vmul.f32 -1.442695, %v2137_v14 }
0x136a   :  { %v2651_v7 = vpop.f32.mrf.mxu1 }
0x136b   :  { %2751 = vpow2.f32 %v2298_v18 }
0x1370   :  { %v2750_v3 = vpop.eup %2749 }
0x1371   :  { %v2023_v19 = vadd.f32 1.0, %v2750_v3 }
0x1373   :  { %2753 = vrcp.f32 %v2023_v19 }
0x1378   :  { %v2752_v21 = vpop.eup %2751 }
0x1379   :  { %v2141_v48 = vadd.f32 1.0, %v2752_v21 }
0x137b   :  { %2755 = vrcp.f32 %v2141_v48 }
0x1380   :  { %v2754_v22 = vpop.eup %2753 }
0x1388   :  { %v2756_v52 = vpop.eup %2755 }
0x13d1   :  { %v2028_v24 = vpop.permute.xlu0 %2027 }
0x13d2   :  { %v2030_v25 = vmul.f32 %v2754_v22, %v2028_v24 }
0x13d4   :  { %2032 = vrot.lane.b32.xlu0 %v2030_v25, %s2775_s20 }
0x13d9   :  { %v2146_v28 = vpop.permute.xlu1 %2145 }
0x13da   :  { %v2148_v29 = vmul.f32 %v2756_v52, %v2146_v28 }
0x13dc   :  { %2150 = vrot.lane.b32.xlu1 %v2148_v29, %s2775_s20 }
0x1446   :  { %v2033_v56 = vpop.permute.xlu0 %2032 }
0x1447   :  { %v2035_v30 = vadd.f32 %v2033_v56, %v1967_v62 }
0x1449   :  { %2757 = vtanh.f32 %v2035_v30 }
0x144e   :  { %v2151_v61 = vpop.permute.xlu1 %2150 }
0x144f   :  { %v2153_v31 = vadd.f32 %v2151_v61, %v2085_v13 }
0x1451   :  { %2759 = vtanh.f32 %v2153_v31 }
0x1456   :  { %v2758_v32 = vpop.eup %2757 }
0x1457   :  { %2039 = vrot.lane.b32.xlu0 %v2758_v32, %s2777_s28 }
0x145b   :  { %416 = vrot.lane.b32.xlu0 %v2984_v15, %s2777_s28  ;;  %v2037_v15 = vsub.f32 1.0, %v2754_v22 }
0x145e   :  { %v2760_v34 = vpop.eup %2759 }
0x145f   :  { %665 = vrot.lane.b32.xlu0 %v3039_v26, %s2777_s28  ;;  %2157 = vrot.lane.b32.xlu1 %v2760_v34, %s2777_s28  ;;  %v2043_v26 = vmul.f32 %v2754_v22, %v3378_v11 }
0x1463   :  { %915 = vrot.lane.b32.xlu0 %v3095_v39, %s2777_s28  ;;  %421 = vrot.lane.b32.xlu1 %v2995_v23, %s2777_s28 }
0x1467   :  { %1165 = vrot.lane.b32.xlu0 %v3151_v53, %s2777_s28  ;;  %671 = vrot.lane.b32.xlu1 %v3051_v33, %s2777_s28  ;;  %v2155_v53 = vsub.f32 1.0, %v2756_v52 }
0x146b   :  { %1415 = vrot.lane.b32.xlu0 %v3207_v9, %s2777_s28  ;;  %921 = vrot.lane.b32.xlu1 %v3107_v46, %s2777_s28 }
0x146f   :  { %1665 = vrot.lane.b32.xlu0 %v3303_v20, %s2777_s28  ;;  %1171 = vrot.lane.b32.xlu1 %v3163_v2, %s2777_s28 }
0x1473   :  { %1915 = vrot.lane.b32.xlu0 %v3378_v11, %s2777_s28  ;;  %1421 = vrot.lane.b32.xlu1 %v3229_v5, %s2777_s28  ;;  %v2161_v5 = vmul.f32 %v2756_v52, %v3384_v44 }
0x1477   :  { %1671 = vrot.lane.b32.xlu1 %v3315_v4, %s2777_s28 }
0x147b   :  { %1921 = vrot.lane.b32.xlu1 %v3384_v44, %s2777_s28 }
0x14c9   :  { %v2040_v23 = vpop.permute.xlu0 %2039 }
0x14ca   :  { %v2042_v33 = vmul.f32 %v2040_v23, %v2037_v15 }
0x14cc   :  { %v2044_v39 = vadd.f32 %v2043_v26, %v2042_v33 }
0x14cd   :  { %v417_v46 = vpop.permute.xlu0 %416 }
0x14ce   :  { %419 = vst.msk [vmem:[%s3514_s10] sm:$0xff] %vm78_vm0, %v417_v46  ;;  %2164 = vrot.lane.b32.xlu0 %v2044_v39, %s2777_s28 }
0x14d1   :  { %v666_v2 = vpop.permute.xlu0 %665  ;;  %v2158_v9 = vpop.permute.xlu1 %2157 }
0x14d2   :  { %2240 = vst.msk [vmem:[%s3514_s10 + $0x8] sm:$0xff] %vm78_vm0, %v666_v2  ;;  %v2160_v20 = vmul.f32 %v2158_v9, %v2155_v53 }
0x14d4   :  { %v2162_v4 = vadd.f32 %v2161_v5, %v2160_v20 }
0x14d5   :  { %v916_v35 = vpop.permute.xlu0 %915  ;;  %v422_v36 = vpop.permute.xlu1 %421 }
0x14d6   :  { %2250 = vst.msk [vmem:[%s3514_s10 + $0x10] sm:$0xff] %vm78_vm0, %v916_v35  ;;  %2231 = vst.msk [vmem:[%s3515_s11 + $0x38] sm:$0xff] %vm78_vm0, %v422_v36  ;;  %2170 = vrot.lane.b32.xlu1 %v2162_v4, %s2777_s28 }
0x14d9   :  { %v1166_v11 = vpop.permute.xlu0 %1165  ;;  %v672_v38 = vpop.permute.xlu1 %671 }
0x14da   :  { %2260 = vst.msk [vmem:[%s3514_s10 + $0x18] sm:$0xff] %vm78_vm0, %v1166_v11  ;;  %2241 = vst.msk [vmem:[%s3515_s11 + $0x30] sm:$0xff] %vm78_vm0, %v672_v38 }
0x14dd   :  { %v1416_v41 = vpop.permute.xlu0 %1415  ;;  %v922_v6 = vpop.permute.xlu1 %921 }
0x14de   :  { %2270 = vst.msk [vmem:[%s3514_s10 + $0x20] sm:$0xff] %vm78_vm0, %v1416_v41  ;;  %2251 = vst.msk [vmem:[%s3515_s11 + $0x28] sm:$0xff] %vm78_vm0, %v922_v6 }
0x14e1   :  { %v1666_v42 = vpop.permute.xlu0 %1665  ;;  %v1172_v43 = vpop.permute.xlu1 %1171 }
0x14e2   :  { %2280 = vst.msk [vmem:[%s3514_s10 + $0x28] sm:$0xff] %vm78_vm0, %v1666_v42  ;;  %2261 = vst.msk [vmem:[%s3515_s11 + $0x20] sm:$0xff] %vm78_vm0, %v1172_v43 }
0x14e5   :  { %v1916_v44 = vpop.permute.xlu0 %1915  ;;  %v1422_v45 = vpop.permute.xlu1 %1421 }
0x14e6   :  { %2290 = vst.msk [vmem:[%s3514_s10 + $0x30] sm:$0xff] %vm78_vm0, %v1916_v44  ;;  %2271 = vst.msk [vmem:[%s3515_s11 + $0x18] sm:$0xff] %vm78_vm0, %v1422_v45 }
0x14e9   :  { %v1672_v16 = vpop.permute.xlu1 %1671 }
0x14ea   :  { %2281 = vst.msk [vmem:[%s3515_s11 + $0x10] sm:$0xff] %vm78_vm0, %v1672_v16 }
0x14ed   :  { %v1922_v17 = vpop.permute.xlu1 %1921 }
0x14ee   :  { %2291 = vst.msk [vmem:[%s3515_s11 + $0x8] sm:$0xff] %vm78_vm0, %v1922_v17 }
0x1540   :  { %v2165_v47 = vpop.permute.xlu0 %2164 }
0x1541   :  { %2299 = vst.msk [vmem:[%s3514_s10 + $0x38] sm:$0xff] %vm78_vm0, %v2165_v47  ;;  %2174 = vst.msk [vmem:[#allocation2] sm:$0xff] %vm78_vm0, %v2165_v47 }
0x1548   :  { %v2171_v49 = vpop.permute.xlu1 %2170 }
0x1549   :  { %2173 = vst.msk [vmem:[%s3515_s11] sm:$0xff] %vm78_vm0, %v2171_v49  ;;  %2175 = vst.msk [vmem:[#allocation3] sm:$0xff] %vm78_vm0, %v2171_v49 }

// kernel: pgn_forward.3
= control target key start
LH: loop header
LB: loop body
LE: loop exit
PB: predicated region body
PF: predicated region fallthrough
CT: control target
= control target key end

     0   :  { %v5659_v0 = vmov 0.0   ;;  %vm4070_vm0 = vmmov 0   ;;  %vm87_vm1 = vcmask 261120   ;;  %s5657_s29 = smov 64   ;;  %s5655_s28 = smov 32   ;;  %vm89_vm2 = vcmask 64512   ;;  %s5621_s7 = inlined_call_operand.vmem [shape: bf16[32,96], index: 7, kind: input, shape index: {}]   ;;  %s5622_s8 = inlined_call_operand.vmem [shape: bf16[32,96], index: 8, kind: input, shape index: {}]   ;;  %s5623_s0 = inlined_call_operand.vmem [shape: f32[4,8,32], index: 0, kind: input, shape index: {}]   ;;  %s5624_s4 = inlined_call_operand.vmem [shape: f32[8,32], index: 4, kind: input, shape index: {}]   ;;  %s5625_s10 = inlined_call_operand.vmem [shape: f32[1,96], index: 10, kind: input, shape index: {}]   ;;  %s5626_s9 = inlined_call_operand.vmem [shape: f32[1,96], index: 9, kind: input, shape index: {}]   ;;  %s5627_s11 = inlined_call_operand.vmem [shape: bf16[32,32], index: 11, kind: input, shape index: {}]   ;;  %s5628_s18 = inlined_call_operand.vmem [shape: bf16[32,32], index: 18, kind: input, shape index: {}]   ;;  %s5629_s16 = inlined_call_operand.<no memory space> [shape: f32[1,1], index: 16, kind: input, shape index: {}]   ;;  %s5630_s12 = inlined_call_operand.vmem [shape: f32[1,32], index: 12, kind: input, shape index: {}]   ;;  %s5631_s13 = inlined_call_operand.vmem [shape: f32[1,32], index: 13, kind: input, shape index: {}]   ;;  %s5632_s2 = inlined_call_operand.vmem [shape: f32[8,8,32], index: 2, kind: input, shape index: {}]   ;;  %s5633_s14 = inlined_call_operand.vmem [shape: f32[1,32], index: 14, kind: input, shape index: {}]   ;;  %s5634_s15 = inlined_call_operand.vmem [shape: f32[1,32], index: 15, kind: input, shape index: {}]   ;;  %s5635_s3 = inlined_call_operand.vmem [shape: f32[8,8], index: 3, kind: input, shape index: {}]   ;;  %s5636_s5 = inlined_call_operand.vmem [shape: bf16[64,32], index: 5, kind: input, shape index: {}]   ;;  %s5637_s17 = inlined_call_operand.vmem [shape: bf16[32,32], index: 17, kind: input, shape index: {}]   ;;  %s5638_s1 = inlined_call_operand.vmem [shape: f32[8,8,64], index: 1, kind: input, shape index: {}]   ;;  %s5639_s6 = inlined_call_operand.vmem [shape: f32[1,32], index: 6, kind: input, shape index: {}]   ;;  %s5640_s21 = inlined_call_operand.vmem [shape: f32[1,32], index: 21, kind: input, shape index: {}]   ;;  %s5641_s19 = inlined_call_operand.vmem [shape: f32[1,32], index: 19, kind: input, shape index: {}]   ;;  %s5642_s20 = inlined_call_operand.vmem [shape: f32[1,32], index: 20, kind: input, shape index: {}]   ;;  %s5643_s22 = inlined_call_operand.vmem [shape: f32[1,32], index: 22, kind: input, shape index: {}]   ;;  %s5644_s23 = inlined_call_operand.<no memory space> [shape: f32[1,1], index: 23, kind: input, shape index: {}]   ;;  %s5645_s24 = inlined_call_operand.vmem [shape: f32[4,8,128], index: 24, kind: output, shape index: {}]  }
   0x1   :  { %5712 = sst [smem:[#allocation37_spill]] %s5621_s7  ;;  %3662 = vmatprep.subr.bf16.mxu0 %v5659_v0  ;;  %3670 = vmatprep.subr.bf16.mxu1 %v5659_v0  ;;  %v378_v39 = vlaneseq  ;;  %90 = vst.msk [vmem:[#allocation3] sm:$0xff] %vm89_vm2, %v5659_v0  ;;  %v4074_v63 = vmov 0   ;;  %vm668_vm3 = vcmask 1041409   ;;  %vm670_vm4 = vcmask 1042434   ;;  %s5754_s26 = smov 32  }
   0x2   :  { %5713 = sst [smem:[#allocation38_spill]] %s5622_s8  ;;  %3666 = vmatprep.mubr.msk.bf16.mxu0 %vm4070_vm0, %v5659_v0  ;;  %3674 = vmatprep.mubr.msk.bf16.mxu1 %vm4070_vm0, %v5659_v0  ;;  %s5653_s8 = smov 96   ;;  %vm672_vm5 = vcmask 1043459   ;;  %vm674_vm6 = vcmask 1044484   ;;  %vm676_vm7 = vcmask 1045509   ;;  %vm678_vm8 = vcmask 1046534  }
   0x3   :  { %5714 = sst [smem:[#allocation39_spill]] %s5623_s0  ;;  %v4283_v41 = vshrl.u32 %v378_v39, 7  ;;  %3877 = vset.pattern.permute.xlu0 %v4074_v63  ;;  %3878 = vset.pattern.permute.xlu1 %v4074_v63  ;;  %vm680_vm9 = vcmask 1047559   ;;  %vm761_vm11 = vcmask 523264   ;;  %vm1124_vm12 = vcmask 326656  }
   0x4   :  { %5715 = sst [smem:[#allocation40_spill]] %s5624_s4  ;;  %s5755_s4 = smov 96   ;;  %vm1126_vm13 = vcmask 334848  }
   0x5   :  { %5716 = sst [smem:[#allocation41_spill]] %s5625_s10  ;;  %v4289_v43 = vsub.s32 0, %v4283_v41  ;;  %v4292_v44 = vsub.s32 1, %v4283_v41  ;;  %v4295_v45 = vsub.s32 2, %v4283_v41  ;;  %v4298_v46 = vsub.s32 3, %v4283_v41 }
   0x6   :  { %5717 = sst [smem:[#allocation42_spill]] %s5626_s9  ;;  %v4311_v52 = vsub.s32 4, %v4283_v41  ;;  %v4314_v53 = vsub.s32 5, %v4283_v41  ;;  %v4321_v56 = vsub.s32 6, %v4283_v41  ;;  %v4324_v57 = vsub.s32 7, %v4283_v41 }
   0x7   :  { %5718 = sst [smem:[#allocation43_spill]] %s5627_s11 }
   0x8   :  { %5719 = sst [smem:[#allocation44_spill]] %s5628_s18  ;;  %v4300_v47 = vld [vmem:[#allocation3] sm:$0xff] }
   0x9   :  { %5720 = sst [smem:[#allocation45_spill]] %s5629_s16  ;;  %v474_v48 = vrot.slane %v4300_v47, %v4289_v43  ;;  %v481_v49 = vrot.slane %v4300_v47, %v4292_v44  ;;  %v488_v50 = vrot.slane %v4300_v47, %v4295_v45  ;;  %v495_v51 = vrot.slane %v4300_v47, %v4298_v46 }
   0xa   :  { %s5721_s27 = sld [smem:[#allocation37_spill]]  ;;  %v502_v54 = vrot.slane %v4300_v47, %v4311_v52  ;;  %v509_v55 = vrot.slane %v4300_v47, %v4314_v53  ;;  %v516_v58 = vrot.slane %v4300_v47, %v4321_v56  ;;  %v523_v59 = vrot.slane %v4300_v47, %v4324_v57 }
   0xb   :  { %s5722_s0 = sld [smem:[#allocation38_spill]] }
   0xc   :  { %s5723_s16 = sld [smem:[#allocation39_spill]] }
   0xd   :  { %s5724_s9 = sld [smem:[#allocation40_spill]] }
   0xe   :  { %s5725_s11 = sld [smem:[#allocation41_spill]] }
   0xf   :  { %s5726_s30 = sld [smem:[#allocation42_spill]] }
  0x10   :  { %v4206_v1 = vld [vmem:[%s5721_s27 + $0x8] sm:$0xff]   ;;  %v4221_v3 = vld [vmem:[%s5721_s27] sm:$0xff]   ;;  %s5727_s10 = sld [smem:[#allocation43_spill]] }
  0x11   :  { %v4211_v2 = vld [vmem:[%s5722_s0 + $0x8] sm:$0xff]   ;;  %3663 = vmatpush3.bf16.msra.mxu0 %v4206_v1  ;;  %v4228_v4 = vld [vmem:[%s5722_s0] sm:$0xff]   ;;  %s5729_s7 = sld [smem:[#allocation44_spill]] }
  0x12   :  { %3671 = vmatpush3.bf16.msra.mxu1 %v4211_v2  ;;  %3664 = vmatprep.subr.bf16.mxu0 %v5659_v0  ;;  %v152_v5 = vld [vmem:[%s5723_s16] sm:$0xff]  ;;  %s5730_s18 = sld [smem:[#allocation45_spill]] }
  0x13   :  { %3672 = vmatprep.subr.bf16.mxu1 %v5659_v0  ;;  %v86_v6 = vld [vmem:[%s5724_s9] sm:$0xff]  ;;  %v153_v7 = vpack.c.bf16 %v152_v5, %v152_v5 }
  0x14   :  { %88 = vst.msk [vmem:[#allocation2] sm:$0xff] %vm87_vm1, %v86_v6  ;;  %v4251_v12 = vld [vmem:[%s5725_s11] ss:$0 sm:$0xff] }
  0x15   :  { %3665 = vmatpush3.bf16.msra.mxu0 %v4221_v3  ;;  %v4258_v20 = vld [vmem:[%s5726_s30] ss:$0 sm:$0xff] }
  0x16   :  { %3673 = vmatpush3.bf16.msra.mxu1 %v4228_v4  ;;  %3678 = vmatprep.subr.bf16.mxu0 %v5659_v0  ;;  %v4265_v31 = vld [vmem:[%s5727_s10 + $0x8] sm:$0xff]   ;;  %v4272_v33 = vld [vmem:[%s5727_s10] sm:$0xff]  }
  0x17   :  { %3686 = vmatprep.subr.bf16.mxu1 %v5659_v0  ;;  %v4333_v60 = vld [vmem:[%s5729_s7 + $0x8] sm:$0xff]   ;;  %v4340_v62 = vld [vmem:[%s5729_s7] sm:$0xff]  }
  0x18   :  { %3667 = vmatmul.mubr.msk.bf16.vlgmr.msra.gmra.mxu0 %vm87_vm1, %v153_v7  ;;  %v29_v5 = vstv %s5730_s18 }
  0x19   :  { %3682 = vmatprep.mubr.msk.bf16.mxu0 %vm4070_vm0, %v5659_v0  ;;  %3679 = vmatpush3.bf16.msra.mxu0 %v4265_v31  ;;  %30 = vst [vmem:[#allocation4] sm:$0x1] %v29_v5 }
  0x1a   :  { %3680 = vmatprep.subr.bf16.mxu0 %v5659_v0 }
  0x1b   :  { %v150_v8 = vld [vmem:[#allocation2] sm:$0xff] }
  0x1c   :  { %v216_v9 = vpack.c.bf16 %v150_v8, %v150_v8 }
  0x1d   :  { %3681 = vmatpush3.bf16.msra.mxu0 %v4272_v33 }
  0x1e   :  { %3675 = vmatmul.mubr.msk.bf16.vlgmr.msra.gmra.mxu1 %vm87_vm1, %v216_v9  ;;  %3698 = vmatprep.subr.bf16.mxu0 %v5659_v0 }
  0x1f   :  { %3694 = vmatprep.mubr.msk.bf16.mxu1 %vm4070_vm0, %v5659_v0 }
  0xd8   :  { %v210_v10 = vpop.f32.mrf.mxu0 }
  0xd9   :  { %v211_v21 = vadd.f32 %v4258_v20, %v210_v10 }
  0xda   :  { %v3668_v11 = vpop.f32.mrf.mxu0 }
  0xdc   :  { %v213_v13 = vpop.f32.mrf.mxu0 }
  0xde   :  { %v272_v14 = vpop.f32.mrf.mxu1  ;;  %v3669_v15 = vpop.f32.mrf.mxu0 }
  0xdf   :  { %v273_v16 = vadd.f32 %v4251_v12, %v272_v14  ;;  %v4356_v14 = vld [vmem:[%s5630_s12] ss:$0 sm:$0xff] }
  0xe0   :  { %v3676_v17 = vpop.f32.mrf.mxu1 }
  0xe1   :  { %286 = vrot.lane.b32.xlu0 %v273_v16, %s5657_s29  ;;  %v278_v22 = vadd.f32 %v273_v16, %v211_v21 }
  0xe2   :  { %v275_v18 = vpop.f32.mrf.mxu1 }
  0xe3   :  { %v3525_v23 = vmul.f32 -1.442695, %v278_v22  ;;  %v4365_v22 = vld [vmem:[%s5631_s13] ss:$0 sm:$0xff] }
  0xe4   :  { %v3677_v19 = vpop.f32.mrf.mxu1 }
  0xe5   :  { %3893 = vpow2.f32 %v3525_v23 }
  0xf2   :  { %v3894_v24 = vpop.eup %3893 }
  0xf3   :  { %v282_v25 = vadd.f32 1.0, %v3894_v24 }
  0xf5   :  { %3895 = vrcp.f32 %v282_v25 }
 0x102   :  { %v3896_v26 = vpop.eup %3895 }
 0x103   :  { %v296_v35 = vsub.f32 1.0, %v3896_v26 }
 0x153   :  { %v287_v27 = vpop.permute.xlu0 %286 }
 0x154   :  { %v289_v28 = vmul.f32 %v3896_v26, %v287_v27 }
 0x156   :  { %291 = vrot.lane.b32.xlu0 %v289_v28, %s5657_s29 }
 0x1c8   :  { %v292_v29 = vpop.permute.xlu0 %291 }
 0x1c9   :  { %v294_v30 = vadd.f32 %v292_v29, %v211_v21 }
 0x1cb   :  { %3897 = vtanh.f32 %v294_v30 }
 0x1d8   :  { %v3898_v32 = vpop.eup %3897 }
 0x1d9   :  { %298 = vrot.lane.b32.xlu1 %v3898_v32, %s5653_s8 }
 0x1dd   :  { %303 = vrot.lane.b32.xlu1 %v150_v8, %s5655_s28  ;;  %v4075_v8 = vmov 1966171168   ;;  %s5752_s28 = smov 64  }
 0x1de   :  { %v376_v9 = vunpack.c.l.s4 %v4075_v8  ;;  %v4397_v8 = vld [vmem:[%s5632_s2 + $0x10] sm:$0xff] }
 0x1e0   :  { %v377_v11 = vunpack.c.0.s8 %v376_v9  ;;  %v4402_v9 = vld [vmem:[%s5632_s2 + $0x20] sm:$0xff] }
 0x1e1   :  { %476 = vbcast.lane.b32.xlu1 %v474_v48, 256 }
 0x1e2   :  { %v4359_v15 = vsub.s32 %v377_v11, %v4283_v41 }
 0x1e5   :  { %490 = vbcast.lane.b32.xlu1 %v488_v50, 256 }
 0x1e9   :  { %504 = vbcast.lane.b32.xlu1 %v502_v54, 256  ;;  %v4385_v54 = vld [vmem:[%s5632_s2 + $0x8] sm:$0xff] }
 0x1ed   :  { %518 = vbcast.lane.b32.xlu1 %v516_v58, 256 }
 0x24b   :  { %v299_v34 = vpop.permute.xlu1 %298 }
 0x24c   :  { %v301_v37 = vmul.f32 %v299_v34, %v296_v35 }
 0x24f   :  { %v304_v36 = vpop.permute.xlu1 %303 }
 0x250   :  { %v306_v38 = vmul.f32 %v3896_v26, %v304_v36 }
 0x252   :  { %v4278_v40 = vadd.f32 %v306_v38, %v301_v37  ;;  %v4377_v37 = vld [vmem:[%s5632_s2] sm:$0xff] }
 0x253   :  { %v477_v6 = vpop.permute.xlu1 %476 }
 0x254   :  { %5728 = vst [vmem:[#allocation6_spill] sm:$0xff] %v4278_v40  ;;  %v308_v42 = vpack.c.bf16 %v4278_v40, %v4278_v40  ;;  %v533_v30 = vmul.f32 %v4365_v22, %v477_v6 }
 0x256   :  { %316 = vrot.lane.b32.xlu0 %v308_v42, %s5653_s8 }
 0x257   :  { %v491_v10 = vpop.permute.xlu1 %490 }
 0x258   :  { %v535_v34 = vmul.f32 %v4365_v22, %v491_v10 }
 0x25a   :  { %483 = vbcast.lane.b32.xlu0 %v481_v49, 256 }
 0x25b   :  { %v505_v16 = vpop.permute.xlu1 %504 }
 0x25c   :  { %v537_v36 = vmul.f32 %v4365_v22, %v505_v16 }
 0x25e   :  { %497 = vbcast.lane.b32.xlu0 %v495_v51, 256 }
 0x25f   :  { %v519_v29 = vpop.permute.xlu1 %518 }
 0x262   :  { %511 = vbcast.lane.b32.xlu0 %v509_v55, 256 }
 0x266   :  { %525 = vbcast.lane.b32.xlu0 %v523_v59, 256 }
 0x2c8   :  { %v317_v61 = vpop.permute.xlu0 %316 }
 0x2c9   :  { %3683 = vmatmul.mubr.msk.bf16.vlgmr.msra.gmra.mxu0 %vm87_vm1, %v317_v61 }
 0x2ca   :  { %3699 = vmatpush3.bf16.msra.mxu0 %v4333_v60  ;;  %3702 = vmatprep.mubr.msk.bf16.mxu0 %vm4070_vm0, %v5659_v0 }
 0x2cb   :  { %3700 = vmatprep.subr.bf16.mxu0 %v5659_v0 }
 0x2cc   :  { %v484_v7 = vpop.permute.xlu0 %483 }
 0x2cd   :  { %v534_v32 = vmul.f32 %v4365_v22, %v484_v7 }
 0x2ce   :  { %3701 = vmatpush3.bf16.msra.mxu0 %v4340_v62 }
 0x2cf   :  { %3706 = vmatprep.subr.bf16.mxu0 %v5659_v0 }
 0x2d0   :  { %v498_v13 = vpop.permute.xlu0 %497 }
 0x2d1   :  { %3703 = vmatmul.mubr.msk.bf16.vlgmr.msra.gmra.mxu0 %vm87_vm1, %v317_v61  ;;  %v536_v55 = vmul.f32 %v4365_v22, %v498_v13  ;;  %v539_v61 = vmul.f32 %v4365_v22, %v519_v29  ;;  %v4409_v13 = vld [vmem:[%s5632_s2 + $0x18] sm:$0xff] }
 0x2d2   :  { %3710 = vmatprep.mubr.msk.bf16.mxu0 %vm4070_vm0, %v5659_v0 }
 0x2d4   :  { %v512_v19 = vpop.permute.xlu0 %511 }
 0x2d5   :  { %v538_v59 = vmul.f32 %v4365_v22, %v512_v19  ;;  %v4420_v19 = vld [vmem:[%s5632_s2 + $0x30] sm:$0xff] }
 0x2d6   :  { %5733 = vst [vmem:[#allocation9_spill] sm:$0xff] %v4420_v19 }
 0x2d8   :  { %v526_v50 = vpop.permute.xlu0 %525 }
 0x389   :  { %v367_v17 = vpop.f32.mrf.mxu0 }
 0x38a   :  { %v368_v18 = vadd.f32 %v4356_v14, %v367_v17  ;;  %v4415_v17 = vld [vmem:[%s5632_s2 + $0x28] sm:$0xff] }
 0x38b   :  { %v3684_v21 = vpop.f32.mrf.mxu0  ;;  %5732 = vst [vmem:[#allocation8_spill] sm:$0xff] %v4415_v17 }
 0x38c   :  { %v374_v23 = vcombine.high %v368_v18, %v368_v18  ;;  %v381_v24 = vrot.slane %v368_v18, %v4359_v15  ;;  %v540_v21 = vmul.f32 %v4365_v22, %v526_v50 }
 0x38d   :  { %v370_v25 = vpop.f32.mrf.mxu0 }
 0x38e   :  { %v388_v26 = vrot.slane %v374_v23, %v4359_v15  ;;  %v389_v27 = vcombine.high %v381_v24, %v381_v24  ;;  %v397_v28 = vrot.slane %v381_v24, %v4359_v15  ;;  %v4426_v23 = vld [vmem:[%s5633_s14] ss:$0 sm:$0xff] }
 0x38f   :  { %v3685_v35 = vpop.f32.mrf.mxu0  ;;  %5734 = vst [vmem:[#allocation10_spill] sm:$0xff] %v4426_v23 }
 0x390   :  { %v390_v38 = vcombine.high %v388_v26, %v388_v26  ;;  %v404_v42 = vrot.slane %v388_v26, %v4359_v15  ;;  %v411_v48 = vrot.slane %v389_v27, %v4359_v15  ;;  %v419_v49 = vcombine.high %v397_v28, %v397_v28 }
 0x391   :  { %v426_v51 = vrot.slane %v397_v28, %v4289_v43  ;;  %v4388_v58 = vpop.f32.mrf.mxu0 }
 0x392   :  { %5731 = vst [vmem:[#allocation7_spill] sm:$0xff] %v4388_v58  ;;  %v418_v63 = vrot.slane %v390_v38, %v4359_v15  ;;  %v420_v5 = vcombine.high %v404_v42, %v404_v42  ;;  %v421_v6 = vcombine.high %v411_v48, %v411_v48  ;;  %v430_v7 = vrot.slane %v411_v48, %v4289_v43 }
 0x393   :  { %v463_v10 = vadd.f32 %v426_v51, %v4377_v37  ;;  %v434_v11 = vrot.slane %v419_v49, %v4289_v43  ;;  %v442_v16 = vrot.slane %v404_v42, %v4289_v43  ;;  %v3704_v18 = vpop.f32.mrf.mxu0 }
 0x394   :  { %v464_v24 = vadd.f32 %v430_v7, %v4385_v54  ;;  %v438_v25 = vrot.slane %v421_v6, %v4289_v43  ;;  %v446_v26 = vrot.slane %v418_v63, %v4289_v43  ;;  %v450_v27 = vrot.slane %v420_v5, %v4289_v43  ;;  %v4440_v6 = vld [vmem:[%s5632_s2 + $0x38] sm:$0xff] }
 0x395   :  { %v541_v28 = vadd.f32 %v533_v30, %v463_v10  ;;  %v465_v29 = vadd.f32 %v434_v11, %v4397_v8  ;;  %v467_v35 = vadd.f32 %v442_v16, %v4402_v9  ;;  %v973_v38 = vpop.f32.mrf.mxu0  ;;  %v422_v42 = vcombine.high %v418_v63, %v418_v63  ;;  %5735 = vst [vmem:[#allocation11_spill] sm:$0xff] %v4440_v6 }
 0x396   :  { %v542_v48 = vadd.f32 %v534_v32, %v464_v24  ;;  %v466_v49 = vadd.f32 %v438_v25, %v4409_v13  ;;  %v468_v50 = vadd.f32 %v446_v26, %v4415_v17  ;;  %v469_v51 = vadd.f32 %v450_v27, %v4420_v19 }
 0x397   :  { %v555_v30 = vadd.f32 %v4426_v23, %v541_v28  ;;  %v543_v5 = vadd.f32 %v535_v34, %v465_v29  ;;  %v545_v7 = vadd.f32 %v537_v36, %v467_v35  ;;  %v454_v10 = vrot.slane %v422_v42, %v4289_v43  ;;  %v3705_v11 = vpop.f32.mrf.mxu0  ;;  %v4455_v28 = vld [vmem:[%s5634_s15] ss:$0 sm:$0xff] }
 0x398   :  { %v556_v32 = vadd.f32 %v4426_v23, %v542_v48  ;;  %v544_v63 = vadd.f32 %v536_v55, %v466_v49  ;;  %v546_v16 = vadd.f32 %v538_v59, %v468_v50  ;;  %v547_v36 = vadd.f32 %v539_v61, %v469_v51  ;;  %5736 = vst [vmem:[#allocation12_spill] sm:$0xff] %v4455_v28 }
 0x399   :  { %3899 = vtanh.f32 %v555_v30  ;;  %v557_v18 = vadd.f32 %v4426_v23, %v543_v5  ;;  %v559_v24 = vadd.f32 %v4426_v23, %v545_v7  ;;  %v470_v25 = vadd.f32 %v454_v10, %v4440_v6 }
 0x39a   :  { %3901 = vtanh.f32 %v556_v32  ;;  %v558_v26 = vadd.f32 %v4426_v23, %v544_v63  ;;  %v560_v34 = vadd.f32 %v4426_v23, %v546_v16  ;;  %v561_v59 = vadd.f32 %v4426_v23, %v547_v36 }
 0x39b   :  { %3903 = vtanh.f32 %v557_v18  ;;  %v548_v27 = vadd.f32 %v540_v21, %v470_v25 }
 0x39c   :  { %3905 = vtanh.f32 %v558_v26 }
 0x39d   :  { %3907 = vtanh.f32 %v559_v24  ;;  %v562_v55 = vadd.f32 %v4426_v23, %v548_v27  ;;  %v3533_v27 = vld [vmem:[#allocation4] ss:$0 sm:$0xff] }
 0x39e   :  { %3909 = vtanh.f32 %v560_v34 }
 0x39f   :  { %3911 = vtanh.f32 %v562_v55 }
 0x3a0   :  { %3913 = vtanh.f32 %v561_v59 }
 0x3a6   :  { %v3900_v29 = vpop.eup %3899 }
 0x3a7   :  { %v3902_v35 = vpop.eup %3901  ;;  %v577_v61 = vmul.f32 %v3900_v29, %v4455_v28 }
 0x3a8   :  { %v3904_v38 = vpop.eup %3903  ;;  %v578_v21 = vmul.f32 %v3902_v35, %v4455_v28 }
 0x3a9   :  { %v3906_v42 = vpop.eup %3905  ;;  %v585_v48 = vsel %vm87_vm1, %v577_v61, 0.0  ;;  %v579_v30 = vmul.f32 %v3904_v38, %v4455_v28  ;;  %v635_v38 = vand.u32 127, %v378_v39 }
 0x3aa   :  { %v3908_v49 = vpop.eup %3907  ;;  %586 = vadd.xlane.f32.xlu1 %v585_v48  ;;  %v588_v50 = vsel %vm87_vm1, %v578_v21, 0.0  ;;  %v580_v51 = vmul.f32 %v3906_v42, %v4455_v28 }
 0x3ab   :  { %v3910_v5 = vpop.eup %3909  ;;  %589 = vadd.xlane.f32.xlu0 %v588_v50  ;;  %v591_v32 = vsel %vm87_vm1, %v579_v30, 0.0  ;;  %v581_v63 = vmul.f32 %v3908_v49, %v4455_v28  ;;  %v4475_v48 = vsub.s32 %v635_v38, %v4283_v41 }
 0x3ac   :  { %v594_v7 = vsel %vm87_vm1, %v580_v51, 0.0  ;;  %v582_v10 = vmul.f32 %v3910_v5, %v4455_v28  ;;  %v3912_v11 = vpop.eup %3911 }
 0x3ad   :  { %v3914_v16 = vpop.eup %3913  ;;  %v584_v24 = vmul.f32 %v3912_v11, %v4455_v28  ;;  %v597_v25 = vsel %vm87_vm1, %v581_v63, 0.0  ;;  %5737 = vst [vmem:[#allocation13_spill] sm:$0xff] %v4475_v48 }
 0x3ae   :  { %595 = vadd.xlane.f32.xlu1 %v594_v7  ;;  %v600_v18 = vsel %vm87_vm1, %v582_v10, 0.0  ;;  %v583_v26 = vmul.f32 %v3914_v16, %v4455_v28 }
 0x3af   :  { %592 = vadd.xlane.f32.xlu0 %v591_v32  ;;  %v606_v34 = vsel %vm87_vm1, %v584_v24, 0.0 }
 0x3b0   :  { %v603_v36 = vsel %vm87_vm1, %v583_v26, 0.0 }
 0x3b2   :  { %601 = vadd.xlane.f32.xlu1 %v600_v18 }
 0x3b3   :  { %598 = vadd.xlane.f32.xlu0 %v597_v25  ;;  %v4495_v25 = vld [vmem:[%s5635_s3] sm:$0xff] }
 0x3b4   :  { %5739 = vst [vmem:[#allocation15_spill] sm:$0xff] %v4495_v25  ;;  %vm108_vm10 = vcmp.le.f32.partialorder %v4495_v25, 0.0 }
 0x3b6   :  { %607 = vadd.xlane.f32.xlu1 %v606_v34 }
 0x3b7   :  { %604 = vadd.xlane.f32.xlu0 %v603_v36 }
 0x3cd   :  { %615 = vperm.xlu0 %3877, %v3533_v27  }
 0x433   :  { %v587_v29 = vpop.xlane.xlu1 %586 }
 0x434   :  { %v590_v55 = vpop.xlane.xlu0 %589 }
 0x437   :  { %v596_v61 = vpop.xlane.xlu1 %595 }
 0x438   :  { %v593_v59 = vpop.xlane.xlu0 %592 }
 0x43b   :  { %v602_v42 = vpop.xlane.xlu1 %601 }
 0x43c   :  { %v599_v35 = vpop.xlane.xlu0 %598 }
 0x43f   :  { %v608_v32 = vpop.xlane.xlu1 %607 }
 0x440   :  { %v605_v21 = vpop.xlane.xlu0 %604 }
 0x448   :  { %v4477_v49 = vpop.permute.xlu0 %615 }
 0x449   :  { %5738 = vst [vmem:[#allocation14_spill] sm:$0xff] %v4477_v49  ;;  %v618_v50 = vadd.f32 %v4477_v49, %v587_v29  ;;  %v619_v51 = vadd.f32 %v4477_v49, %v590_v55  ;;  %v620_v30 = vadd.f32 %v4477_v49, %v593_v59  ;;  %v621_v5 = vadd.f32 %v4477_v49, %v596_v61 }
 0x44a   :  { %v622_v7 = vadd.f32 %v4477_v49, %v599_v35  ;;  %v623_v39 = vadd.f32 %v4477_v49, %v602_v42  ;;  %v624_v63 = vadd.f32 %v4477_v49, %v605_v21  ;;  %v625_v16 = vadd.f32 %v4477_v49, %v608_v32 }
 0x44b   :  { %v639_v10 = vrot.slane %v618_v50, %v4475_v48  ;;  %v643_v41 = vrot.slane %v619_v51, %v4475_v48  ;;  %v647_v11 = vrot.slane %v620_v30, %v4475_v48  ;;  %v651_v18 = vrot.slane %v621_v5, %v4475_v48 }
 0x44c   :  { %v655_v26 = vrot.slane %v622_v7, %v4475_v48  ;;  %v659_v36 = vrot.slane %v623_v39, %v4475_v48  ;;  %v663_v55 = vrot.slane %v624_v63, %v4475_v48  ;;  %v667_v29 = vrot.slane %v625_v16, %v4475_v48 }
 0x44d   :  { %v669_v24 = vsel %vm668_vm3, %v643_v41, %v639_v10 }
 0x44e   :  { %v671_v34 = vsel %vm670_vm4, %v647_v11, %v669_v24 }
 0x44f   :  { %v673_v27 = vsel %vm672_vm5, %v651_v18, %v671_v34  ;;  %v4531_v34 = vld [vmem:[%s5636_s5 + $0x18] sm:$0xff]  }
 0x450   :  { %v675_v59 = vsel %vm674_vm6, %v655_v26, %v673_v27  ;;  %3687 = vmatpush3.bf16.msra.mxu1 %v4531_v34  ;;  %v4540_v27 = vld [vmem:[%s5636_s5 + $0x10] sm:$0xff]  }
 0x451   :  { %v677_v35 = vsel %vm676_vm7, %v659_v36, %v675_v59  ;;  %3688 = vmatprep.subr.bf16.mxu1 %v5659_v0  ;;  %v4553_v59 = vld [vmem:[%s5636_s5] sm:$0xff]  }
 0x452   :  { %v679_v61 = vsel %vm678_vm8, %v663_v55, %v677_v35  ;;  %v4547_v55 = vld [vmem:[%s5636_s5 + $0x8] sm:$0xff]   ;;  %v4568_v35 = vld [vmem:[%s5638_s1] sm:$0xff] }
 0x453   :  { %v681_v38 = vsel %vm680_vm9, %v667_v29, %v679_v61  ;;  %v4560_v29 = vld [vmem:[%s5637_s17 + $0x8] sm:$0xff]   ;;  %5741 = vst [vmem:[#allocation17_spill] sm:$0xff] %v4568_v35 }
 0x454   :  { %v683_v21 = vsel %vm108_vm10, -1e+30, %v681_v38  ;;  %3689 = vmatpush3.bf16.msra.mxu1 %v4540_v27  ;;  %3707 = vmatpush3.bf16.msra.mxu0 %v4560_v29 }
 0x455   :  { %v685_v42 = vsel %vm89_vm2, %v683_v21, -inf  ;;  %3690 = vmatprep.subr.bf16.mxu1 %v5659_v0  ;;  %3708 = vmatprep.subr.bf16.mxu0 %v5659_v0 }
 0x456   :  { %686 = vmax.xlane.f32.xlu1 %v685_v42 }
 0x458   :  { %3691 = vmatpush3.bf16.msra.mxu1 %v4547_v55 }
 0x459   :  { %3692 = vmatprep.subr.bf16.mxu1 %v5659_v0 }
 0x45c   :  { %3693 = vmatpush3.bf16.msra.mxu1 %v4553_v59 }
 0x45d   :  { %3714 = vmatprep.subr.bf16.mxu1 %v5659_v0 }
 0x4df   :  { %v687_v50 = vpop.xlane.xlu1 %686 }
 0x4e0   :  { %v688_v51 = vsub.f32 %v683_v21, %v687_v50  ;;  %v4574_v21 = vld [vmem:[%s5638_s1 + $0x30] sm:$0xff]  ;;  %v4579_v50 = vld [vmem:[%s5638_s1 + $0x8] sm:$0xff] }
 0x4e1   :  { %5742 = vst [vmem:[#allocation18_spill] sm:$0xff] %v4574_v21  ;;  %5743 = vst [vmem:[#allocation19_spill] sm:$0xff] %v4579_v50 }
 0x4e2   :  { %v689_v30 = vmul.f32 1.442695, %v688_v51 }
 0x4e4   :  { %3915 = vpow2.f32 %v689_v30 }
 0x4f1   :  { %v3916_v5 = vpop.eup %3915 }
 0x4f2   :  { %v691_v7 = vsel %vm89_vm2, %v3916_v5, 0.0 }
 0x4f3   :  { %692 = vadd.xlane.f32.xlu1 %v691_v7 }
 0x57c   :  { %v693_v39 = vpop.xlane.xlu1 %692 }
 0x57d   :  { %3917 = vrcp.f32 %v693_v39 }
 0x58a   :  { %v3918_v10 = vpop.eup %3917 }
 0x58b   :  { %v4512_v41 = vmul.f32 %v3918_v10, %v3916_v5  ;;  %v4587_v10 = vld [vmem:[%s5638_s1 + $0x10] sm:$0xff] }
 0x58c   :  { %5744 = vst [vmem:[#allocation20_spill] sm:$0xff] %v4587_v10 }
 0x58d   :  { %5740 = vst [vmem:[#allocation16_spill] sm:$0xff] %v4512_v41  ;;  %v742_v11 = vrot.slane %v4512_v41, %v4321_v56  ;;  %v700_v32 = vrot.slane %v4512_v41, %v4289_v43  ;;  %v707_v63 = vrot.slane %v4512_v41, %v4292_v44  ;;  %v714_v16 = vrot.slane %v4512_v41, %v4295_v45 }
 0x58e   :  { %v721_v18 = vrot.slane %v4512_v41, %v4298_v46  ;;  %v728_v24 = vrot.slane %v4512_v41, %v4311_v52  ;;  %v735_v26 = vrot.slane %v4512_v41, %v4314_v53  ;;  %v749_v36 = vrot.slane %v4512_v41, %v4324_v57 }
 0x58f   :  { %744 = vbcast.lane.b32.xlu0 %v742_v11, 256  ;;  %702 = vbcast.lane.b32.xlu1 %v700_v32, 256 }
 0x593   :  { %709 = vbcast.lane.b32.xlu1 %v707_v63, 256 }
 0x597   :  { %716 = vbcast.lane.b32.xlu1 %v714_v16, 256 }
 0x59b   :  { %723 = vbcast.lane.b32.xlu1 %v721_v18, 256 }
 0x59f   :  { %730 = vbcast.lane.b32.xlu1 %v728_v24, 256 }
 0x5a3   :  { %737 = vbcast.lane.b32.xlu1 %v735_v26, 256 }
 0x5a7   :  { %751 = vbcast.lane.b32.xlu1 %v749_v36, 256  ;;  %v4595_v36 = vld [vmem:[%s5638_s1 + $0x18] sm:$0xff] }
 0x5a8   :  { %5745 = vst [vmem:[#allocation21_spill] sm:$0xff] %v4595_v36 }
 0x601   :  { %v703_v61 = vpop.permute.xlu1 %702  ;;  %v745_v42 = vpop.permute.xlu0 %744 }
 0x602   :  { %v753_v38 = vmul.f32 %v703_v61, %v4568_v35  ;;  %v759_v5 = vmul.f32 %v745_v42, %v4574_v21 }
 0x604   :  { %v762_v51 = vsel %vm761_vm11, %v753_v38, 0.0  ;;  %v804_v16 = vsel %vm761_vm11, %v759_v5, 0.0 }
 0x605   :  { %v710_v30 = vpop.permute.xlu1 %709  ;;  %v763_v7 = vrot.slane %v762_v51, 4  ;;  %v805_v38 = vrot.slane %v804_v16, 4 }
 0x606   :  { %v754_v39 = vmul.f32 %v710_v30, %v4579_v50 }
 0x607   :  { %v764_v18 = vadd.f32 %v763_v7, %v762_v51  ;;  %v4602_v51 = vld [vmem:[%s5638_s1 + $0x20] sm:$0xff]  ;;  %v806_v7 = vadd.f32 %v805_v38, %v804_v16 }
 0x608   :  { %v769_v11 = vsel %vm761_vm11, %v754_v39, 0.0  ;;  %5746 = vst [vmem:[#allocation22_spill] sm:$0xff] %v4602_v51 }
 0x609   :  { %v770_v32 = vrot.slane %v769_v11, 4  ;;  %v717_v63 = vpop.permute.xlu1 %716  ;;  %v765_v39 = vrot.slane %v764_v18, 2 }
 0x60a   :  { %v755_v24 = vmul.f32 %v717_v63, %v4587_v10 }
 0x60b   :  { %v771_v26 = vadd.f32 %v770_v32, %v769_v11 }
 0x60c   :  { %v776_v61 = vsel %vm761_vm11, %v755_v24, 0.0  ;;  %v766_v24 = vadd.f32 %v765_v39, %v764_v18 }
 0x60d   :  { %v772_v42 = vrot.slane %v771_v26, 2  ;;  %v777_v30 = vrot.slane %v776_v61, 4  ;;  %v724_v0 = vpop.permute.xlu1 %723 }
 0x60e   :  { %v756_v40 = vmul.f32 %v724_v0, %v4595_v36  ;;  %v4609_v0 = vld [vmem:[%s5638_s1 + $0x28] sm:$0xff]  ;;  %v807_v36 = vrot.slane %v806_v7, 2 }
 0x60f   :  { %v778_v58 = vadd.f32 %v777_v30, %v776_v61  ;;  %v773_v11 = vadd.f32 %v772_v42, %v771_v26  ;;  %5747 = vst [vmem:[#allocation23_spill] sm:$0xff] %v4609_v0  ;;  %v767_v26 = vrot.slane %v766_v24, 1 }
 0x610   :  { %v783_v5 = vsel %vm761_vm11, %v756_v40, 0.0 }
 0x611   :  { %v779_v32 = vrot.slane %v778_v58, 2  ;;  %v731_v63 = vpop.permute.xlu1 %730  ;;  %v784_v21 = vrot.slane %v783_v5, 4  ;;  %v774_v50 = vrot.slane %v773_v11, 1  ;;  %v768_v48 = vadd.f32 %v767_v26, %v766_v24 }
 0x612   :  { %v757_v10 = vmul.f32 %v731_v63, %v4602_v51 }
 0x613   :  { %v780_v35 = vadd.f32 %v779_v32, %v778_v58  ;;  %v785_v61 = vadd.f32 %v784_v21, %v783_v5  ;;  %v4616_v58 = vld [vmem:[%s5638_s1 + $0x38] sm:$0xff]  ;;  %v808_v5 = vadd.f32 %v807_v36, %v806_v7  ;;  %v818_v36 = vpack.c.bf16 %v768_v48, %v768_v48 }
 0x614   :  { %v790_v30 = vsel %vm761_vm11, %v757_v10, 0.0  ;;  %5748 = vst [vmem:[#allocation24_spill] sm:$0xff] %v4616_v58  ;;  %v775_v10 = vadd.f32 %v774_v50, %v773_v11 }
 0x615   :  { %v791_v40 = vrot.slane %v790_v30, 4  ;;  %v738_v16 = vpop.permute.xlu1 %737  ;;  %v781_v38 = vrot.slane %v780_v35, 1  ;;  %v786_v42 = vrot.slane %v785_v61, 2 }
 0x616   :  { %v758_v18 = vmul.f32 %v738_v16, %v4609_v0  ;;  %v819_v23 = vpack.c.bf16 %v775_v10, %v775_v10 }
 0x617   :  { %v792_v39 = vadd.f32 %v791_v40, %v790_v30  ;;  %v787_v32 = vadd.f32 %v786_v42, %v785_v61  ;;  %v782_v49 = vadd.f32 %v781_v38, %v780_v35 }
 0x618   :  { %v797_v21 = vsel %vm761_vm11, %v758_v18, 0.0  ;;  %v809_v18 = vrot.slane %v808_v5, 1  ;;  %v841_v35 = vunpack.c.l.b16 %v819_v23 }
 0x619   :  { %v793_v63 = vrot.slane %v792_v39, 2  ;;  %v798_v51 = vrot.slane %v797_v21, 4  ;;  %v752_v25 = vpop.permute.xlu1 %751  ;;  %v788_v28 = vrot.slane %v787_v32, 1  ;;  %v820_v50 = vpack.c.bf16 %v782_v49, %v782_v49 }
 0x61a   :  { %v760_v6 = vmul.f32 %v752_v25, %v4616_v58 }
 0x61b   :  { %v794_v16 = vadd.f32 %v793_v63, %v792_v39  ;;  %v799_v30 = vadd.f32 %v798_v51, %v797_v21  ;;  %v789_v40 = vadd.f32 %v788_v28, %v787_v32  ;;  %v810_v39 = vadd.f32 %v809_v18, %v808_v5 }
 0x61c   :  { %v811_v0 = vsel %vm761_vm11, %v760_v6, 0.0  ;;  %v842_v51 = vunpack.c.l.b16 %v820_v50  ;;  %v840_v28 = vunpack.c.l.b16 %v818_v36  ;;  %v5749_v50 = vmov 0.0  }
 0x61d   :  { %v795_v19 = vrot.slane %v794_v16, 1  ;;  %v800_v61 = vrot.slane %v799_v30, 2  ;;  %v812_v42 = vrot.slane %v811_v0, 4  ;;  %v821_v7 = vpack.c.bf16 %v789_v40, %v789_v40 }
 0x61e   :  { %v848_v63 = vsel %vm668_vm3, %v841_v35, %v840_v28  ;;  %v824_v49 = vpack.c.bf16 %v810_v39, %v810_v39 }
 0x61f   :  { %v796_v11 = vadd.f32 %v795_v19, %v794_v16  ;;  %v801_v17 = vadd.f32 %v800_v61, %v799_v30  ;;  %v813_v24 = vadd.f32 %v812_v42, %v811_v0  ;;  %v843_v32 = vunpack.c.l.b16 %v821_v7 }
 0x620   :  { %v849_v19 = vsel %vm670_vm4, %v842_v51, %v848_v63  ;;  %v846_v61 = vunpack.c.l.b16 %v824_v49 }
 0x621   :  { %v822_v26 = vpack.c.bf16 %v796_v11, %v796_v11  ;;  %v802_v38 = vrot.slane %v801_v17, 1  ;;  %v814_v25 = vrot.slane %v813_v24, 2  ;;  %v850_v0 = vsel %vm672_vm5, %v843_v32, %v849_v19 }
 0x623   :  { %v803_v6 = vadd.f32 %v802_v38, %v801_v17  ;;  %v815_v21 = vadd.f32 %v814_v25, %v813_v24  ;;  %v844_v10 = vunpack.c.l.b16 %v822_v26 }
 0x625   :  { %v823_v58 = vpack.c.bf16 %v803_v6, %v803_v6  ;;  %v816_v48 = vrot.slane %v815_v21, 1  ;;  %v851_v30 = vsel %vm674_vm6, %v844_v10, %v850_v0 }
 0x627   :  { %v845_v23 = vunpack.c.l.b16 %v823_v58  ;;  %v817_v16 = vadd.f32 %v816_v48, %v815_v21  ;;  %v4638_v58 = vld [vmem:[%s5637_s17] sm:$0xff]  }
 0x628   :  { %3709 = vmatpush3.bf16.msra.mxu0 %v4638_v58 }
 0x629   :  { %v852_v5 = vsel %vm676_vm7, %v845_v23, %v851_v30  ;;  %v825_v40 = vpack.c.bf16 %v817_v16, %v817_v16  ;;  %3722 = vmatprep.subr.bf16.mxu0 %v5749_v50 }
 0x62a   :  { %v853_v42 = vsel %vm678_vm8, %v846_v61, %v852_v5 }
 0x62b   :  { %v847_v17 = vunpack.c.l.b16 %v825_v40 }
 0x62d   :  { %v854_v18 = vsel %vm680_vm9, %v847_v17, %v853_v42 }
 0x62e   :  { %v855_v36 = vpack.c.b16 %v854_v18, %v854_v18 }
 0x630   :  { %3695 = vmatmul.mubr.msk.bf16.vlgmr.msra.gmra.mxu1 %vm761_vm11, %v855_v36 }
 0x631   :  { %3715 = vmatpush3.bf16.msra.mxu1 %v4206_v1  ;;  %3718 = vmatprep.mubr.msk.bf16.mxu1 %vm4070_vm0, %v5749_v50  ;;  %v3552_v1 = vld [vmem:[%s5723_s16 + $0x8] sm:$0xff] }
 0x632   :  { %3716 = vmatprep.subr.bf16.mxu1 %v5749_v50  ;;  %v1131_v7 = vpack.c.bf16 %v3552_v1, %v3552_v1 }
 0x635   :  { %3717 = vmatpush3.bf16.msra.mxu1 %v4221_v3  ;;  %v4655_v3 = vld [vmem:[%s5639_s6] ss:$0 sm:$0xff] }
 0x636   :  { %3730 = vmatprep.subr.bf16.mxu1 %v5749_v50 }
 0x638   :  { %3719 = vmatmul.mubr.msk.bf16.vlgmr.msra.gmra.mxu1 %vm87_vm1, %v1131_v7 }
 0x639   :  { %3731 = vmatpush3.bf16.msra.mxu1 %v4265_v31  ;;  %3734 = vmatprep.mubr.msk.bf16.mxu1 %vm4070_vm0, %v5749_v50 }
 0x63a   :  { %3732 = vmatprep.subr.bf16.mxu1 %v5749_v50 }
 0x63d   :  { %3733 = vmatpush3.bf16.msra.mxu1 %v4272_v33 }
 0x63e   :  { %3750 = vmatprep.subr.bf16.mxu1 %v5749_v50 }
 0x6f0   :  { %v917_v11 = vpop.f32.mrf.mxu1 }
 0x6f1   :  { %v4658_v24 = vadd.f32 %v4655_v3, %v917_v11 }
 0x6f2   :  { %v3696_v35 = vpop.f32.mrf.mxu1 }
 0x6f3   :  { %5750 = vst [vmem:[#allocation25_spill] sm:$0xff] %v4658_v24  ;;  %v923_v31 = vpack.c.bf16 %v4658_v24, %v4658_v24 }
 0x6f4   :  { %v920_v26 = vpop.f32.mrf.mxu1 }
 0x6f5   :  { %3711 = vmatmul.mubr.msk.bf16.vlgmr.msra.gmra.mxu0 %vm87_vm1, %v923_v31 }
 0x6f6   :  { %3723 = vmatpush3.bf16.msra.mxu0 %v4211_v2  ;;  %v3697_v33 = vpop.f32.mrf.mxu1  ;;  %3726 = vmatprep.mubr.msk.bf16.mxu0 %vm4070_vm0, %v5749_v50 }
 0x6f7   :  { %3724 = vmatprep.subr.bf16.mxu0 %v5749_v50 }
 0x6f8   :  { %v1169_v2 = vpop.f32.mrf.mxu1 }
 0x6fa   :  { %3725 = vmatpush3.bf16.msra.mxu0 %v4228_v4  ;;  %v3720_v4 = vpop.f32.mrf.mxu1 }
 0x6fb   :  { %3738 = vmatprep.subr.bf16.mxu0 %v5749_v50 }
 0x6fd   :  { %3727 = vmatmul.mubr.msk.bf16.vlgmr.msra.gmra.mxu0 %vm87_vm1, %v923_v31 }
 0x6fe   :  { %3739 = vmatpush3.bf16.msra.mxu0 %v4531_v34  ;;  %3746 = vmatprep.mubr.msk.bf16.mxu0 %vm4070_vm0, %v5749_v50  ;;  %v1172_v34 = vpop.f32.mrf.mxu1 }
 0x6ff   :  { %3740 = vmatprep.subr.bf16.mxu0 %v5749_v50 }
 0x700   :  { %v3721_v38 = vpop.f32.mrf.mxu1 }
 0x702   :  { %3741 = vmatpush3.bf16.msra.mxu0 %v4540_v27 }
 0x703   :  { %3742 = vmatprep.subr.bf16.mxu0 %v5749_v50 }
 0x706   :  { %3743 = vmatpush3.bf16.msra.mxu0 %v4547_v55 }
 0x707   :  { %3744 = vmatprep.subr.bf16.mxu0 %v5749_v50 }
 0x70a   :  { %3745 = vmatpush3.bf16.msra.mxu0 %v4553_v59  ;;  %v1170_v59 = vadd.f32 %v4258_v20, %v1169_v2 }
 0x70b   :  { %3766 = vmatprep.subr.bf16.mxu0 %v5749_v50 }
 0x7b5   :  { %v4680_v25 = vpop.f32.mrf.mxu0 }
 0x7b6   :  { %5751 = vst [vmem:[#allocation26_spill] sm:$0xff] %v4680_v25 }
 0x7b7   :  { %v3712_v39 = vpop.f32.mrf.mxu0 }
 0x7b9   :  { %v1028_v51 = vpop.f32.mrf.mxu0 }
 0x7bb   :  { %v3713_v28 = vpop.f32.mrf.mxu0 }
 0x7bd   :  { %v1209_v27 = vpop.f32.mrf.mxu0 }
 0x7be   :  { %v1210_v32 = vadd.f32 %v4251_v12, %v1209_v27  ;;  %v4688_v12 = vadd.f32 %v4512_v41, %v4300_v47 }
 0x7bf   :  { %v3728_v6 = vpop.f32.mrf.mxu0 }
 0x7c0   :  { %1223 = vrot.lane.b32.xlu0 %v1210_v32, %s5752_s28  ;;  %v1215_v10 = vadd.f32 %v1210_v32, %v1170_v59  ;;  %5753 = vst [vmem:[#allocation27_spill] sm:$0xff] %v4688_v12  ;;  %v1393_v20 = vrot.slane %v4688_v12, %v4289_v43  ;;  %v1407_v16 = vrot.slane %v4688_v12, %v4295_v45 }
 0x7c1   :  { %v1212_v55 = vpop.f32.mrf.mxu0  ;;  %v1421_v30 = vrot.slane %v4688_v12, %v4311_v52  ;;  %v1435_v5 = vrot.slane %v4688_v12, %v4321_v56  ;;  %v1400_v35 = vrot.slane %v4688_v12, %v4292_v44  ;;  %v1414_v31 = vrot.slane %v4688_v12, %v4298_v46 }
 0x7c2   :  { %v3555_v63 = vmul.f32 -1.442695, %v1215_v10  ;;  %v1428_v26 = vrot.slane %v4688_v12, %v4314_v53  ;;  %v1442_v33 = vrot.slane %v4688_v12, %v4324_v57 }
 0x7c3   :  { %v3729_v21 = vpop.f32.mrf.mxu0 }
 0x7c4   :  { %3919 = vpow2.f32 %v3555_v63 }
 0x7d1   :  { %v3920_v48 = vpop.eup %3919 }
 0x7d2   :  { %v1219_v49 = vadd.f32 1.0, %v3920_v48 }
 0x7d4   :  { %3921 = vrcp.f32 %v1219_v49 }
 0x7e1   :  { %v3922_v19 = vpop.eup %3921 }
 0x7e2   :  { %v1233_v42 = vsub.f32 1.0, %v3922_v19 }
 0x832   :  { %v1224_v0 = vpop.permute.xlu0 %1223 }
 0x833   :  { %v1226_v23 = vmul.f32 %v3922_v19, %v1224_v0 }
 0x835   :  { %1228 = vrot.lane.b32.xlu1 %v1226_v23, %s5752_s28 }
 0x839   :  { %1240 = vrot.lane.b32.xlu1 %v4658_v24, %s5754_s26 }
 0x83d   :  { %1395 = vbcast.lane.b32.xlu1 %v1393_v20, 256 }
 0x841   :  { %1409 = vbcast.lane.b32.xlu1 %v1407_v16, 256 }
 0x845   :  { %1423 = vbcast.lane.b32.xlu1 %v1421_v30, 256 }
 0x849   :  { %1437 = vbcast.lane.b32.xlu1 %v1435_v5, 256 }
 0x8a7   :  { %v1229_v47 = vpop.permute.xlu1 %1228 }
 0x8a8   :  { %v1231_v40 = vadd.f32 %v1229_v47, %v1170_v59 }
 0x8aa   :  { %3923 = vtanh.f32 %v1231_v40 }
 0x8ab   :  { %v1241_v17 = vpop.permute.xlu1 %1240 }
 0x8ac   :  { %v1243_v36 = vmul.f32 %v3922_v19, %v1241_v17 }
 0x8b7   :  { %v3924_v61 = vpop.eup %3923 }
 0x8b8   :  { %1235 = vrot.lane.b32.xlu0 %v3924_v61, %s5755_s4 }
 0x92a   :  { %v1236_v18 = vpop.permute.xlu0 %1235 }
 0x92b   :  { %v1238_v1 = vmul.f32 %v1236_v18, %v1233_v42 }
 0x92d   :  { %v4701_v7 = vadd.f32 %v1243_v36, %v1238_v1 }
 0x92f   :  { %5756 = vst [vmem:[#allocation28_spill] sm:$0xff] %v4701_v7  ;;  %v1245_v11 = vpack.c.bf16 %v4701_v7, %v4701_v7 }
 0x931   :  { %1247 = vrot.lane.b32.xlu0 %v1245_v11, %s5755_s4 }
 0x935   :  { %1402 = vbcast.lane.b32.xlu0 %v1400_v35, 256 }
 0x939   :  { %1416 = vbcast.lane.b32.xlu0 %v1414_v31, 256 }
 0x93d   :  { %1430 = vbcast.lane.b32.xlu0 %v1428_v26, 256 }
 0x941   :  { %1444 = vbcast.lane.b32.xlu0 %v1442_v33, 256 }
 0x9a3   :  { %v1248_v2 = vpop.permute.xlu0 %1247 }
 0x9a4   :  { %3735 = vmatmul.mubr.msk.bf16.vlgmr.msra.gmra.mxu1 %vm87_vm1, %v1248_v2 }
 0x9a5   :  { %3751 = vmatpush3.bf16.msra.mxu1 %v4333_v60  ;;  %3754 = vmatprep.mubr.msk.bf16.mxu1 %vm4070_vm0, %v5749_v50  ;;  %v1396_v60 = vpop.permute.xlu1 %1395 }
 0x9a6   :  { %3752 = vmatprep.subr.bf16.mxu1 %v5749_v50  ;;  %v1446_v10 = vmul.f32 %v4365_v22, %v1396_v60 }
 0x9a7   :  { %v1403_v34 = vpop.permute.xlu0 %1402 }
 0x9a8   :  { %v1447_v30 = vmul.f32 %v4365_v22, %v1403_v34 }
 0x9a9   :  { %3753 = vmatpush3.bf16.msra.mxu1 %v4340_v62  ;;  %v1410_v4 = vpop.permute.xlu1 %1409 }
 0x9aa   :  { %3758 = vmatprep.subr.bf16.mxu1 %v5749_v50  ;;  %v1448_v63 = vmul.f32 %v4365_v22, %v1410_v4 }
 0x9ab   :  { %v1417_v62 = vpop.permute.xlu0 %1416 }
 0x9ac   :  { %3755 = vmatmul.mubr.msk.bf16.vlgmr.msra.gmra.mxu1 %vm87_vm1, %v1248_v2  ;;  %v1449_v5 = vmul.f32 %v4365_v22, %v1417_v62 }
 0x9ad   :  { %3759 = vmatpush3.bf16.msra.mxu1 %v4560_v29  ;;  %3762 = vmatprep.mubr.msk.bf16.mxu1 %vm4070_vm0, %v5749_v50  ;;  %v1424_v38 = vpop.permute.xlu1 %1423 }
 0x9ae   :  { %3760 = vmatprep.subr.bf16.mxu1 %v5749_v50  ;;  %v1450_v48 = vmul.f32 %v4365_v22, %v1424_v38 }
 0x9af   :  { %v1431_v49 = vpop.permute.xlu0 %1430 }
 0x9b0   :  { %v1451_v36 = vmul.f32 %v4365_v22, %v1431_v49  ;;  %v5760_v49 = vld [vmem:[#allocation10_spill] sm:$0xff] }
 0x9b1   :  { %3761 = vmatpush3.bf16.msra.mxu1 %v4638_v58  ;;  %v1438_v6 = vpop.permute.xlu1 %1437 }
 0x9b2   :  { %3774 = vmatprep.subr.bf16.mxu1 %v5749_v50  ;;  %v1452_v16 = vmul.f32 %v4365_v22, %v1438_v6 }
 0x9b3   :  { %v1445_v4 = vpop.permute.xlu0 %1444 }
 0xa64   :  { %v1286_v39 = vpop.f32.mrf.mxu1 }
 0xa65   :  { %v1287_v51 = vadd.f32 %v4356_v14, %v1286_v39 }
 0xa66   :  { %v3736_v28 = vpop.f32.mrf.mxu1 }
 0xa67   :  { %v1293_v27 = vcombine.high %v1287_v51, %v1287_v51  ;;  %v1300_v29 = vrot.slane %v1287_v51, %v4359_v15 }
 0xa68   :  { %v1289_v32 = vpop.f32.mrf.mxu1 }
 0xa69   :  { %v1307_v55 = vrot.slane %v1293_v27, %v4359_v15  ;;  %v1308_v21 = vcombine.high %v1300_v29, %v1300_v29  ;;  %v1316_v59 = vrot.slane %v1300_v29, %v4359_v15  ;;  %v5758_v27 = vld [vmem:[#allocation8_spill] sm:$0xff]  ;;  %v5759_v32 = vld [vmem:[#allocation9_spill] sm:$0xff] }
 0xa6a   :  { %v3737_v19 = vpop.f32.mrf.mxu1 }
 0xa6b   :  { %v1309_v14 = vcombine.high %v1307_v55, %v1307_v55  ;;  %v1323_v0 = vrot.slane %v1307_v55, %v4359_v15  ;;  %v1330_v23 = vrot.slane %v1308_v21, %v4359_v15  ;;  %v1338_v20 = vcombine.high %v1316_v59, %v1316_v59 }
 0xa6c   :  { %v1345_v47 = vrot.slane %v1316_v59, %v4289_v43  ;;  %v4741_v40 = vpop.f32.mrf.mxu1 }
 0xa6d   :  { %5757 = vst [vmem:[#allocation29_spill] sm:$0xff] %v4741_v40  ;;  %v1337_v61 = vrot.slane %v1309_v14, %v4359_v15  ;;  %v1339_v17 = vcombine.high %v1323_v0, %v1323_v0  ;;  %v1340_v42 = vcombine.high %v1330_v23, %v1330_v23  ;;  %v1349_v18 = vrot.slane %v1330_v23, %v4289_v43  ;;  %v5761_v14 = vld [vmem:[#allocation11_spill] sm:$0xff] }
 0xa6e   :  { %v1353_v1 = vrot.slane %v1338_v20, %v4289_v43  ;;  %v1361_v11 = vrot.slane %v1323_v0, %v4289_v43  ;;  %v1382_v35 = vadd.f32 %v1345_v47, %v4377_v37  ;;  %v3756_v31 = vpop.f32.mrf.mxu1 }
 0xa6f   :  { %v1341_v26 = vcombine.high %v1337_v61, %v1337_v61  ;;  %v1357_v33 = vrot.slane %v1340_v42, %v4289_v43  ;;  %v1365_v2 = vrot.slane %v1337_v61, %v4289_v43  ;;  %v1369_v60 = vrot.slane %v1339_v17, %v4289_v43  ;;  %v5762_v17 = vld [vmem:[#allocation12_spill] sm:$0xff] }
 0xa70   :  { %v1383_v34 = vadd.f32 %v1349_v18, %v4385_v54  ;;  %v1384_v38 = vadd.f32 %v1353_v1, %v4397_v8  ;;  %v1386_v62 = vadd.f32 %v1361_v11, %v4402_v9  ;;  %v1454_v39 = vadd.f32 %v1446_v10, %v1382_v35  ;;  %v1812_v51 = vpop.f32.mrf.mxu1 }
 0xa71   :  { %v1373_v28 = vrot.slane %v1341_v26, %v4289_v43  ;;  %v1385_v37 = vadd.f32 %v1357_v33, %v4409_v13  ;;  %v1387_v29 = vadd.f32 %v1365_v2, %v5758_v27  ;;  %v1388_v6 = vadd.f32 %v1369_v60, %v5759_v32 }
 0xa72   :  { %v1455_v55 = vadd.f32 %v1447_v30, %v1383_v34  ;;  %v1456_v21 = vadd.f32 %v1448_v63, %v1384_v38  ;;  %v1458_v59 = vadd.f32 %v1450_v48, %v1386_v62  ;;  %v1462_v19 = vadd.f32 %v5760_v49, %v1454_v39  ;;  %v3757_v54 = vpop.f32.mrf.mxu1 }
 0xa73   :  { %v1453_v8 = vmul.f32 %v4365_v22, %v1445_v4  ;;  %v1389_v9 = vadd.f32 %v1373_v28, %v5761_v14  ;;  %v1457_v10 = vadd.f32 %v1449_v5, %v1385_v37  ;;  %v1459_v0 = vadd.f32 %v1451_v36, %v1387_v29  ;;  %v5764_v54 = vld [vmem:[#allocation13_spill] sm:$0xff] }
 0xa74   :  { %v1463_v23 = vadd.f32 %v5760_v49, %v1455_v55  ;;  %v1464_v13 = vadd.f32 %v5760_v49, %v1456_v21  ;;  %v1466_v20 = vadd.f32 %v5760_v49, %v1458_v59  ;;  %3925 = vtanh.f32 %v1462_v19  ;;  %v5763_v21 = vld [vmem:[#allocation14_spill] sm:$0xff] }
 0xa75   :  { %v1461_v47 = vadd.f32 %v1453_v8, %v1389_v9  ;;  %v1465_v63 = vadd.f32 %v5760_v49, %v1457_v10  ;;  %v1460_v48 = vadd.f32 %v1452_v16, %v1388_v6  ;;  %v1467_v30 = vadd.f32 %v5760_v49, %v1459_v0 }
 0xa76   :  { %3927 = vtanh.f32 %v1463_v23 }
 0xa77   :  { %3929 = vtanh.f32 %v1464_v13  ;;  %v1469_v22 = vadd.f32 %v5760_v49, %v1461_v47  ;;  %v1468_v5 = vadd.f32 %v5760_v49, %v1460_v48 }
 0xa78   :  { %3931 = vtanh.f32 %v1466_v20 }
 0xa79   :  { %3933 = vtanh.f32 %v1465_v63 }
 0xa7a   :  { %3935 = vtanh.f32 %v1467_v30 }
 0xa7b   :  { %3937 = vtanh.f32 %v1469_v22 }
 0xa7c   :  { %3939 = vtanh.f32 %v1468_v5 }
 0xa81   :  { %v3926_v61 = vpop.eup %3925 }
 0xa82   :  { %v1478_v42 = vmul.f32 %v3926_v61, %v5762_v17 }
 0xa83   :  { %v3928_v18 = vpop.eup %3927 }
 0xa84   :  { %v3930_v36 = vpop.eup %3929  ;;  %v1486_v16 = vsel %vm87_vm1, %v1478_v42, 0.0  ;;  %v1479_v1 = vmul.f32 %v3928_v18, %v5762_v17 }
 0xa85   :  { %v3932_v11 = vpop.eup %3931  ;;  %1487 = vadd.xlane.f32.xlu1 %v1486_v16  ;;  %v1480_v26 = vmul.f32 %v3930_v36, %v5762_v17 }
 0xa86   :  { %v3934_v35 = vpop.eup %3933  ;;  %v1489_v31 = vsel %vm87_vm1, %v1479_v1, 0.0  ;;  %v1482_v62 = vmul.f32 %v3932_v11, %v5762_v17 }
 0xa87   :  { %v3936_v33 = vpop.eup %3935  ;;  %1490 = vadd.xlane.f32.xlu0 %v1489_v31  ;;  %v1481_v2 = vmul.f32 %v3934_v35, %v5762_v17  ;;  %v1492_v38 = vsel %vm87_vm1, %v1480_v26, 0.0 }
 0xa88   :  { %v1483_v4 = vmul.f32 %v3936_v33, %v5762_v17  ;;  %v3938_v34 = vpop.eup %3937  ;;  %v1498_v37 = vsel %vm87_vm1, %v1482_v62, 0.0 }
 0xa89   :  { %v1495_v60 = vsel %vm87_vm1, %v1481_v2, 0.0  ;;  %v3940_v39 = vpop.eup %3939  ;;  %v1485_v28 = vmul.f32 %v3938_v34, %v5762_v17 }
 0xa8a   :  { %1496 = vadd.xlane.f32.xlu1 %v1495_v60  ;;  %v1501_v51 = vsel %vm87_vm1, %v1483_v4, 0.0  ;;  %v1484_v27 = vmul.f32 %v3940_v39, %v5762_v17 }
 0xa8b   :  { %1493 = vadd.xlane.f32.xlu0 %v1492_v38  ;;  %v1507_v29 = vsel %vm87_vm1, %v1485_v28, 0.0 }
 0xa8c   :  { %v1504_v32 = vsel %vm87_vm1, %v1484_v27, 0.0 }
 0xa8e   :  { %1502 = vadd.xlane.f32.xlu1 %v1501_v51 }
 0xa8f   :  { %1499 = vadd.xlane.f32.xlu0 %v1498_v37 }
 0xa92   :  { %1508 = vadd.xlane.f32.xlu1 %v1507_v29 }
 0xa93   :  { %1505 = vadd.xlane.f32.xlu0 %v1504_v32 }
 0xb0e   :  { %v1488_v6 = vpop.xlane.xlu1 %1487 }
 0xb0f   :  { %v1510_v49 = vadd.f32 %v1488_v6, %v5763_v21 }
 0xb10   :  { %v1491_v55 = vpop.xlane.xlu0 %1490 }
 0xb11   :  { %v1511_v59 = vadd.f32 %v1491_v55, %v5763_v21  ;;  %v1529_v10 = vrot.slane %v1510_v49, %v5764_v54 }
 0xb13   :  { %v1497_v19 = vpop.xlane.xlu1 %1496  ;;  %v1533_v8 = vrot.slane %v1511_v59, %v5764_v54 }
 0xb14   :  { %v1494_v14 = vpop.xlane.xlu0 %1493  ;;  %v1513_v0 = vadd.f32 %v1497_v19, %v5763_v21 }
 0xb15   :  { %v1512_v9 = vadd.f32 %v1494_v14, %v5763_v21  ;;  %v1558_v20 = vsel %vm668_vm3, %v1533_v8, %v1529_v10  ;;  %v5767_v10 = vld [vmem:[#allocation19_spill] sm:$0xff] }
 0xb16   :  { %v1541_v30 = vrot.slane %v1513_v0, %v5764_v54 }
 0xb17   :  { %v1537_v23 = vrot.slane %v1512_v9, %v5764_v54  ;;  %v1503_v13 = vpop.xlane.xlu1 %1502 }
 0xb18   :  { %v1500_v47 = vpop.xlane.xlu0 %1499  ;;  %v1515_v22 = vadd.f32 %v1503_v13, %v5763_v21 }
 0xb19   :  { %v1559_v63 = vsel %vm670_vm4, %v1537_v23, %v1558_v20  ;;  %v1514_v48 = vadd.f32 %v1500_v47, %v5763_v21  ;;  %v5768_v23 = vld [vmem:[#allocation17_spill] sm:$0xff] }
 0xb1a   :  { %v1560_v17 = vsel %vm672_vm5, %v1541_v30, %v1559_v63  ;;  %v1549_v1 = vrot.slane %v1515_v22, %v5764_v54 }
 0xb1b   :  { %v1545_v5 = vrot.slane %v1514_v48, %v5764_v54  ;;  %v1509_v61 = vpop.xlane.xlu1 %1508 }
 0xb1c   :  { %v1517_v42 = vadd.f32 %v1509_v61, %v5763_v21  ;;  %v1506_v18 = vpop.xlane.xlu0 %1505 }
 0xb1d   :  { %v1561_v36 = vsel %vm674_vm6, %v1545_v5, %v1560_v17  ;;  %v1516_v16 = vadd.f32 %v1506_v18, %v5763_v21  ;;  %v5769_v5 = vld [vmem:[#allocation20_spill] sm:$0xff]  ;;  %v5770_v17 = vld [vmem:[#allocation21_spill] sm:$0xff] }
 0xb1e   :  { %v1557_v35 = vrot.slane %v1517_v42, %v5764_v54  ;;  %v1562_v31 = vsel %vm676_vm7, %v1549_v1, %v1561_v36 }
 0xb1f   :  { %v1553_v11 = vrot.slane %v1516_v16, %v5764_v54 }
 0xb21   :  { %v1563_v26 = vsel %vm678_vm8, %v1553_v11, %v1562_v31 }
 0xb22   :  { %v1564_v33 = vsel %vm680_vm9, %v1557_v35, %v1563_v26 }
 0xb23   :  { %v1566_v60 = vsel %vm108_vm10, -1e+30, %v1564_v33 }
 0xb24   :  { %v1567_v4 = vsel %vm89_vm2, %v1566_v60, -inf }
 0xb25   :  { %1568 = vmax.xlane.f32.xlu0 %v1567_v4  ;;  %v5771_v4 = vld [vmem:[#allocation22_spill] sm:$0xff] }
 0xbae   :  { %v1569_v34 = vpop.xlane.xlu0 %1568 }
 0xbaf   :  { %v1570_v38 = vsub.f32 %v1566_v60, %v1569_v34 }
 0xbb1   :  { %v1571_v62 = vmul.f32 1.442695, %v1570_v38  ;;  %v5772_v38 = vld [vmem:[#allocation23_spill] sm:$0xff] }
 0xbb3   :  { %3941 = vpow2.f32 %v1571_v62 }
 0xbc0   :  { %v3942_v39 = vpop.eup %3941 }
 0xbc1   :  { %v1573_v51 = vsel %vm89_vm2, %v3942_v39, 0.0 }
 0xbc2   :  { %1574 = vadd.xlane.f32.xlu1 %v1573_v51 }
 0xc4b   :  { %v1575_v28 = vpop.xlane.xlu1 %1574 }
 0xc4c   :  { %3943 = vrcp.f32 %v1575_v28 }
 0xc59   :  { %v3944_v37 = vpop.eup %3943 }
 0xc5a   :  { %v4812_v27 = vmul.f32 %v3944_v37, %v3942_v39 }
 0xc5c   :  { %5766 = vst [vmem:[#allocation8_spill] sm:$0xff] %v4812_v27  ;;  %v1589_v29 = vrot.slane %v4812_v27, %v4292_v44  ;;  %v1582_v32 = vrot.slane %v4812_v27, %v4289_v43  ;;  %v1596_v6 = vrot.slane %v4812_v27, %v4295_v45  ;;  %v1603_v55 = vrot.slane %v4812_v27, %v4298_v46 }
 0xc5d   :  { %v1610_v59 = vrot.slane %v4812_v27, %v4311_v52  ;;  %v1617_v49 = vrot.slane %v4812_v27, %v4314_v53  ;;  %v1624_v19 = vrot.slane %v4812_v27, %v4321_v56  ;;  %v1631_v8 = vrot.slane %v4812_v27, %v4324_v57 }
 0xc5e   :  { %1591 = vbcast.lane.b32.xlu1 %v1589_v29, 256  ;;  %1584 = vbcast.lane.b32.xlu0 %v1582_v32, 256 }
 0xc62   :  { %1598 = vbcast.lane.b32.xlu1 %v1596_v6, 256  ;;  %1605 = vbcast.lane.b32.xlu0 %v1603_v55, 256 }
 0xc66   :  { %1612 = vbcast.lane.b32.xlu1 %v1610_v59, 256  ;;  %1619 = vbcast.lane.b32.xlu0 %v1617_v49, 256 }
 0xc6a   :  { %1626 = vbcast.lane.b32.xlu1 %v1624_v19, 256  ;;  %1633 = vbcast.lane.b32.xlu0 %v1631_v8, 256 }
 0xcd0   :  { %v1592_v14 = vpop.permute.xlu1 %1591  ;;  %v1585_v9 = vpop.permute.xlu0 %1584 }
 0xcd1   :  { %v1636_v0 = vmul.f32 %v1592_v14, %v5767_v10  ;;  %v1635_v13 = vmul.f32 %v1585_v9, %v5768_v23  ;;  %v5773_v10 = vld [vmem:[#allocation18_spill] sm:$0xff]  ;;  %v5774_v23 = vld [vmem:[#allocation24_spill] sm:$0xff] }
 0xcd3   :  { %v1650_v20 = vsel %vm761_vm11, %v1636_v0, 0.0  ;;  %v1643_v47 = vsel %vm761_vm11, %v1635_v13, 0.0 }
 0xcd4   :  { %v1651_v63 = vrot.slane %v1650_v20, 4  ;;  %v1644_v48 = vrot.slane %v1643_v47, 4  ;;  %v1599_v30 = vpop.permute.xlu1 %1598  ;;  %v1606_v22 = vpop.permute.xlu0 %1605 }
 0xcd5   :  { %v1637_v61 = vmul.f32 %v1599_v30, %v5769_v5  ;;  %v1638_v42 = vmul.f32 %v1606_v22, %v5770_v17 }
 0xcd6   :  { %v1652_v18 = vadd.f32 %v1651_v63, %v1650_v20  ;;  %v1645_v36 = vadd.f32 %v1644_v48, %v1643_v47 }
 0xcd7   :  { %v1657_v16 = vsel %vm761_vm11, %v1637_v61, 0.0  ;;  %v1664_v1 = vsel %vm761_vm11, %v1638_v42, 0.0 }
 0xcd8   :  { %v1653_v11 = vrot.slane %v1652_v18, 2  ;;  %v1646_v35 = vrot.slane %v1645_v36, 2  ;;  %v1658_v31 = vrot.slane %v1657_v16, 4  ;;  %v1665_v26 = vrot.slane %v1664_v1, 4  ;;  %v1613_v33 = vpop.permute.xlu1 %1612  ;;  %v1620_v60 = vpop.permute.xlu0 %1619 }
 0xcd9   :  { %v1639_v34 = vmul.f32 %v1613_v33, %v5771_v4  ;;  %v1640_v62 = vmul.f32 %v1620_v60, %v5772_v38 }
 0xcda   :  { %v1654_v39 = vadd.f32 %v1653_v11, %v1652_v18  ;;  %v1647_v51 = vadd.f32 %v1646_v35, %v1645_v36  ;;  %v1659_v28 = vadd.f32 %v1658_v31, %v1657_v16  ;;  %v1666_v37 = vadd.f32 %v1665_v26, %v1664_v1 }
 0xcdb   :  { %v1671_v29 = vsel %vm761_vm11, %v1639_v34, 0.0  ;;  %v1678_v32 = vsel %vm761_vm11, %v1640_v62, 0.0 }
 0xcdc   :  { %v1655_v6 = vrot.slane %v1654_v39, 1  ;;  %v1648_v55 = vrot.slane %v1647_v51, 1  ;;  %v1660_v59 = vrot.slane %v1659_v28, 2  ;;  %v1667_v49 = vrot.slane %v1666_v37, 2  ;;  %v1627_v19 = vpop.permute.xlu1 %1626  ;;  %v1634_v8 = vpop.permute.xlu0 %1633 }
 0xcdd   :  { %v1672_v14 = vrot.slane %v1671_v29, 4  ;;  %v1679_v9 = vrot.slane %v1678_v32, 4  ;;  %v1641_v0 = vmul.f32 %v1627_v19, %v5773_v10  ;;  %v1642_v13 = vmul.f32 %v1634_v8, %v5774_v23 }
 0xcde   :  { %v1656_v20 = vadd.f32 %v1655_v6, %v1654_v39  ;;  %v1649_v47 = vadd.f32 %v1648_v55, %v1647_v51  ;;  %v1661_v63 = vadd.f32 %v1660_v59, %v1659_v28  ;;  %v1668_v48 = vadd.f32 %v1667_v49, %v1666_v37 }
 0xcdf   :  { %v1673_v30 = vadd.f32 %v1672_v14, %v1671_v29  ;;  %v1680_v22 = vadd.f32 %v1679_v9, %v1678_v32  ;;  %v1685_v5 = vsel %vm761_vm11, %v1641_v0, 0.0  ;;  %v1692_v61 = vsel %vm761_vm11, %v1642_v13, 0.0 }
 0xce0   :  { %v1700_v17 = vpack.c.bf16 %v1656_v20, %v1656_v20  ;;  %v1699_v42 = vpack.c.bf16 %v1649_v47, %v1649_v47  ;;  %v1662_v18 = vrot.slane %v1661_v63, 1  ;;  %v1669_v36 = vrot.slane %v1668_v48, 1 }
 0xce1   :  { %v1674_v16 = vrot.slane %v1673_v30, 2  ;;  %v1681_v1 = vrot.slane %v1680_v22, 2  ;;  %v1686_v11 = vrot.slane %v1685_v5, 4  ;;  %v1693_v35 = vrot.slane %v1692_v61, 4 }
 0xce2   :  { %v1663_v31 = vadd.f32 %v1662_v18, %v1661_v63  ;;  %v1670_v26 = vadd.f32 %v1669_v36, %v1668_v48  ;;  %v1716_v38 = vunpack.c.l.b16 %v1700_v17  ;;  %v1715_v62 = vunpack.c.l.b16 %v1699_v42 }
 0xce3   :  { %v1675_v33 = vadd.f32 %v1674_v16, %v1673_v30  ;;  %v1682_v60 = vadd.f32 %v1681_v1, %v1680_v22  ;;  %v1687_v4 = vadd.f32 %v1686_v11, %v1685_v5  ;;  %v1694_v34 = vadd.f32 %v1693_v35, %v1692_v61  ;;  %v4857_v11 = vld [vmem:[%s5721_s27 + $0x8] sm:$0xff]   ;;  %v4866_v35 = vld [vmem:[%s5721_s27] sm:$0xff]  }
 0xce4   :  { %v1701_v39 = vpack.c.bf16 %v1663_v31, %v1663_v31  ;;  %v1702_v51 = vpack.c.bf16 %v1670_v26, %v1670_v26  ;;  %v1723_v8 = vsel %vm668_vm3, %v1716_v38, %v1715_v62  ;;  %v3562_v31 = vld [vmem:[%s5723_s16 + $0x10] sm:$0xff] }
 0xce5   :  { %v1676_v28 = vrot.slane %v1675_v33, 1  ;;  %v1683_v37 = vrot.slane %v1682_v60, 1  ;;  %v1688_v29 = vrot.slane %v1687_v4, 2  ;;  %v1695_v32 = vrot.slane %v1694_v34, 2 }
 0xce6   :  { %v1717_v6 = vunpack.c.l.b16 %v1701_v39  ;;  %v1718_v14 = vunpack.c.l.b16 %v1702_v51  ;;  %v1925_v26 = vpack.c.bf16 %v3562_v31, %v3562_v31  ;;  %v4899_v51 = vld [vmem:[%s5722_s0 + $0x8] sm:$0xff]  }
 0xce7   :  { %v1677_v55 = vadd.f32 %v1676_v28, %v1675_v33  ;;  %v1684_v59 = vadd.f32 %v1683_v37, %v1682_v60  ;;  %v1689_v49 = vadd.f32 %v1688_v29, %v1687_v4  ;;  %v1696_v19 = vadd.f32 %v1695_v32, %v1694_v34  ;;  %v4877_v33 = vld [vmem:[%s5727_s10 + $0x8] sm:$0xff]   ;;  %v4886_v60 = vld [vmem:[%s5727_s10] sm:$0xff]   ;;  %v4916_v37 = vld [vmem:[%s5636_s5 + $0x18] sm:$0xff]  }
 0xce8   :  { %v1724_v9 = vsel %vm670_vm4, %v1717_v6, %v1723_v8  ;;  %v4925_v29 = vld [vmem:[%s5636_s5 + $0x10] sm:$0xff]   ;;  %v4932_v32 = vld [vmem:[%s5636_s5 + $0x8] sm:$0xff]   ;;  %v4939_v6 = vld [vmem:[%s5636_s5] sm:$0xff]  }
 0xce9   :  { %v1703_v10 = vpack.c.bf16 %v1677_v55, %v1677_v55  ;;  %v1704_v0 = vpack.c.bf16 %v1684_v59, %v1684_v59  ;;  %v1690_v23 = vrot.slane %v1689_v49, 1  ;;  %v1697_v13 = vrot.slane %v1696_v19, 1 }
 0xcea   :  { %v1725_v63 = vsel %vm672_vm5, %v1718_v14, %v1724_v9 }
 0xceb   :  { %v1719_v20 = vunpack.c.l.b16 %v1703_v10  ;;  %v1691_v47 = vadd.f32 %v1690_v23, %v1689_v49  ;;  %v1720_v48 = vunpack.c.l.b16 %v1704_v0  ;;  %v1698_v30 = vadd.f32 %v1697_v13, %v1696_v19  ;;  %v4948_v23 = vld [vmem:[%s5725_s11] ss:$0 sm:$0xff] }
 0xced   :  { %v1726_v22 = vsel %vm674_vm6, %v1719_v20, %v1725_v63  ;;  %v1705_v5 = vpack.c.bf16 %v1691_v47, %v1691_v47  ;;  %v1706_v61 = vpack.c.bf16 %v1698_v30, %v1698_v30 }
 0xcee   :  { %v1727_v42 = vsel %vm676_vm7, %v1720_v48, %v1726_v22  ;;  %v4955_v48 = vld [vmem:[%s5726_s30] ss:$0 sm:$0xff] }
 0xcef   :  { %v1721_v17 = vunpack.c.l.b16 %v1705_v5  ;;  %v1722_v18 = vunpack.c.l.b16 %v1706_v61 }
 0xcf1   :  { %v1728_v36 = vsel %vm678_vm8, %v1721_v17, %v1727_v42 }
 0xcf2   :  { %v1729_v16 = vsel %vm680_vm9, %v1722_v18, %v1728_v36 }
 0xcf3   :  { %v1730_v1 = vpack.c.b16 %v1729_v16, %v1729_v16  ;;  %v4961_v16 = vadd.f32 %v4812_v27, %v4688_v12 }
 0xcf5   :  { %3747 = vmatmul.mubr.msk.bf16.vlgmr.msra.gmra.mxu0 %vm761_vm11, %v1730_v1  ;;  %v2187_v1 = vrot.slane %v4961_v16, %v4289_v43  ;;  %v2201_v31 = vrot.slane %v4961_v16, %v4295_v45 }
 0xcf6   :  { %3767 = vmatpush3.bf16.msra.mxu0 %v4857_v11  ;;  %3770 = vmatprep.mubr.msk.bf16.mxu0 %vm4070_vm0, %v5749_v50 }
 0xcf7   :  { %3768 = vmatprep.subr.bf16.mxu0 %v5749_v50 }
 0xcfa   :  { %3769 = vmatpush3.bf16.msra.mxu0 %v4866_v35 }
 0xcfb   :  { %3782 = vmatprep.subr.bf16.mxu0 %v5749_v50 }
 0xcfd   :  { %3771 = vmatmul.mubr.msk.bf16.vlgmr.msra.gmra.mxu0 %vm87_vm1, %v1925_v26  ;;  %v2215_v26 = vrot.slane %v4961_v16, %v4311_v52 }
 0xcfe   :  { %3783 = vmatpush3.bf16.msra.mxu0 %v4877_v33  ;;  %3786 = vmatprep.mubr.msk.bf16.mxu0 %vm4070_vm0, %v5749_v50 }
 0xcff   :  { %3784 = vmatprep.subr.bf16.mxu0 %v5749_v50 }
 0xd02   :  { %3785 = vmatpush3.bf16.msra.mxu0 %v4886_v60 }
 0xd03   :  { %3802 = vmatprep.subr.bf16.mxu0 %v5749_v50 }
 0xdb5   :  { %v1768_v4 = vpop.f32.mrf.mxu0 }
 0xdb6   :  { %v4891_v34 = vadd.f32 %v4655_v3, %v1768_v4  ;;  %v4908_v3 = vld [vmem:[%s5722_s0] sm:$0xff]   ;;  %v2229_v4 = vrot.slane %v4961_v16, %v4321_v56 }
 0xdb7   :  { %v3748_v38 = vpop.f32.mrf.mxu0 }
 0xdb8   :  { %5775 = vst [vmem:[#allocation9_spill] sm:$0xff] %v4891_v34  ;;  %v1774_v62 = vpack.c.bf16 %v4891_v34, %v4891_v34 }
 0xdb9   :  { %v1771_v39 = vpop.f32.mrf.mxu0 }
 0xdba   :  { %3763 = vmatmul.mubr.msk.bf16.vlgmr.msra.gmra.mxu1 %vm87_vm1, %v1774_v62 }
 0xdbb   :  { %3775 = vmatpush3.bf16.msra.mxu1 %v4899_v51  ;;  %v3749_v28 = vpop.f32.mrf.mxu0  ;;  %3778 = vmatprep.mubr.msk.bf16.mxu1 %vm4070_vm0, %v5749_v50 }
 0xdbc   :  { %3776 = vmatprep.subr.bf16.mxu1 %v5749_v50 }
 0xdbd   :  { %v1963_v55 = vpop.f32.mrf.mxu0 }
 0xdbe   :  { %v1964_v30 = vadd.f32 %v4955_v48, %v1963_v55 }
 0xdbf   :  { %3777 = vmatpush3.bf16.msra.mxu1 %v4908_v3  ;;  %v3772_v59 = vpop.f32.mrf.mxu0 }
 0xdc0   :  { %3790 = vmatprep.subr.bf16.mxu1 %v5749_v50 }
 0xdc1   :  { %v1966_v49 = vpop.f32.mrf.mxu0 }
 0xdc2   :  { %3779 = vmatmul.mubr.msk.bf16.vlgmr.msra.gmra.mxu1 %vm87_vm1, %v1774_v62 }
 0xdc3   :  { %3791 = vmatpush3.bf16.msra.mxu1 %v4916_v37  ;;  %3798 = vmatprep.mubr.msk.bf16.mxu1 %vm4070_vm0, %v5749_v50  ;;  %v3773_v19 = vpop.f32.mrf.mxu0 }
 0xdc4   :  { %3792 = vmatprep.subr.bf16.mxu1 %v5749_v50 }
 0xdc7   :  { %3793 = vmatpush3.bf16.msra.mxu1 %v4925_v29 }
 0xdc8   :  { %3794 = vmatprep.subr.bf16.mxu1 %v5749_v50 }
 0xdcb   :  { %3795 = vmatpush3.bf16.msra.mxu1 %v4932_v32 }
 0xdcc   :  { %3796 = vmatprep.subr.bf16.mxu1 %v5749_v50 }
 0xdcf   :  { %3797 = vmatpush3.bf16.msra.mxu1 %v4939_v6 }
 0xdd0   :  { %3818 = vmatprep.subr.bf16.mxu1 %v5749_v50 }
 0xe7a   :  { %v4943_v8 = vpop.f32.mrf.mxu1 }
 0xe7b   :  { %5776 = vst [vmem:[#allocation10_spill] sm:$0xff] %v4943_v8 }
 0xe7c   :  { %v3764_v14 = vpop.f32.mrf.mxu1 }
 0xe7e   :  { %v1855_v9 = vpop.f32.mrf.mxu1 }
 0xe80   :  { %v3765_v10 = vpop.f32.mrf.mxu1 }
 0xe81   :  { %v2194_v10 = vrot.slane %v4961_v16, %v4292_v44 }
 0xe82   :  { %v2003_v0 = vpop.f32.mrf.mxu1 }
 0xe83   :  { %v2004_v13 = vadd.f32 %v4948_v23, %v2003_v0  ;;  %v2208_v0 = vrot.slane %v4961_v16, %v4298_v46 }
 0xe84   :  { %v3780_v20 = vpop.f32.mrf.mxu1 }
 0xe85   :  { %2017 = vrot.lane.b32.xlu1 %v2004_v13, %s5752_s28  ;;  %v2009_v22 = vadd.f32 %v2004_v13, %v1964_v30  ;;  %v2222_v13 = vrot.slane %v4961_v16, %v4314_v53  ;;  %v2236_v20 = vrot.slane %v4961_v16, %v4324_v57 }
 0xe86   :  { %v2006_v47 = vpop.f32.mrf.mxu1 }
 0xe87   :  { %v3565_v5 = vmul.f32 -1.442695, %v2009_v22  ;;  %v5008_v22 = vld [vmem:[%s5637_s17 + $0x8] sm:$0xff]  }
 0xe88   :  { %v3781_v63 = vpop.f32.mrf.mxu1 }
 0xe89   :  { %3945 = vpow2.f32 %v3565_v5  ;;  %v4991_v63 = vld [vmem:[%s5729_s7 + $0x8] sm:$0xff]  }
 0xe96   :  { %v3946_v61 = vpop.eup %3945 }
 0xe97   :  { %v2013_v17 = vadd.f32 1.0, %v3946_v61 }
 0xe99   :  { %3947 = vrcp.f32 %v2013_v17 }
 0xea6   :  { %v3948_v42 = vpop.eup %3947 }
 0xea7   :  { %v2027_v55 = vsub.f32 1.0, %v3948_v42 }
 0xef7   :  { %v2018_v18 = vpop.permute.xlu1 %2017 }
 0xef8   :  { %v2020_v36 = vmul.f32 %v3948_v42, %v2018_v18 }
 0xefa   :  { %2022 = vrot.lane.b32.xlu0 %v2020_v36, %s5752_s28 }
 0xefe   :  { %2034 = vrot.lane.b32.xlu0 %v4891_v34, %s5754_s26 }
 0xf02   :  { %2189 = vbcast.lane.b32.xlu0 %v2187_v1, 256  ;;  %v5019_v1 = vld [vmem:[%s5630_s12] ss:$0 sm:$0xff] }
 0xf06   :  { %2203 = vbcast.lane.b32.xlu0 %v2201_v31, 256 }
 0xf0a   :  { %2217 = vbcast.lane.b32.xlu0 %v2215_v26, 256 }
 0xf0e   :  { %2231 = vbcast.lane.b32.xlu0 %v2229_v4, 256 }
 0xf6c   :  { %v2023_v38 = vpop.permute.xlu0 %2022 }
 0xf6d   :  { %v2025_v62 = vadd.f32 %v2023_v38, %v1964_v30  ;;  %v5000_v30 = vld [vmem:[%s5729_s7] sm:$0xff]  }
 0xf6f   :  { %3949 = vtanh.f32 %v2025_v62 }
 0xf70   :  { %v2035_v28 = vpop.permute.xlu0 %2034 }
 0xf71   :  { %v2037_v49 = vmul.f32 %v3948_v42, %v2035_v28 }
 0xf74   :  { %v2190_v5 = vpop.permute.xlu0 %2189 }
 0xf78   :  { %v2204_v61 = vpop.permute.xlu0 %2203 }
 0xf7c   :  { %v3950_v39 = vpop.eup %3949  ;;  %v2218_v42 = vpop.permute.xlu0 %2217 }
 0xf7d   :  { %2029 = vrot.lane.b32.xlu1 %v3950_v39, %s5755_s4 }
 0xf80   :  { %v2232_v62 = vpop.permute.xlu0 %2231 }
 0xfef   :  { %v2030_v59 = vpop.permute.xlu1 %2029 }
 0xff0   :  { %v2032_v19 = vmul.f32 %v2030_v59, %v2027_v55  ;;  %v5028_v59 = vld [vmem:[%s5631_s13] ss:$0 sm:$0xff] }
 0xff2   :  { %v4974_v14 = vadd.f32 %v2037_v49, %v2032_v19  ;;  %v2240_v49 = vmul.f32 %v5028_v59, %v2190_v5  ;;  %v2242_v19 = vmul.f32 %v5028_v59, %v2204_v61 }
 0xff4   :  { %5777 = vst [vmem:[#allocation11_spill] sm:$0xff] %v4974_v14  ;;  %v2039_v9 = vpack.c.bf16 %v4974_v14, %v4974_v14 }
 0xff6   :  { %2041 = vrot.lane.b32.xlu1 %v2039_v9, %s5755_s4  ;;  %v2244_v9 = vmul.f32 %v5028_v59, %v2218_v42 }
 0xffa   :  { %2196 = vbcast.lane.b32.xlu1 %v2194_v10, 256 }
 0xffe   :  { %2210 = vbcast.lane.b32.xlu1 %v2208_v0, 256 }
0x1002   :  { %2224 = vbcast.lane.b32.xlu1 %v2222_v13, 256 }
0x1006   :  { %2238 = vbcast.lane.b32.xlu1 %v2236_v20, 256 }
0x1068   :  { %v2042_v47 = vpop.permute.xlu1 %2041 }
0x1069   :  { %3787 = vmatmul.mubr.msk.bf16.vlgmr.msra.gmra.mxu0 %vm87_vm1, %v2042_v47 }
0x106a   :  { %3803 = vmatpush3.bf16.msra.mxu0 %v4991_v63  ;;  %3806 = vmatprep.mubr.msk.bf16.mxu0 %vm4070_vm0, %v5749_v50 }
0x106b   :  { %3804 = vmatprep.subr.bf16.mxu0 %v5749_v50 }
0x106c   :  { %v2197_v17 = vpop.permute.xlu1 %2196 }
0x106e   :  { %3805 = vmatpush3.bf16.msra.mxu0 %v5000_v30 }
0x106f   :  { %3810 = vmatprep.subr.bf16.mxu0 %v5749_v50 }
0x1070   :  { %v2211_v36 = vpop.permute.xlu1 %2210 }
0x1071   :  { %3807 = vmatmul.mubr.msk.bf16.vlgmr.msra.gmra.mxu0 %vm87_vm1, %v2042_v47 }
0x1072   :  { %3811 = vmatpush3.bf16.msra.mxu0 %v5008_v22  ;;  %3814 = vmatprep.mubr.msk.bf16.mxu0 %vm4070_vm0, %v5749_v50 }
0x1073   :  { %3812 = vmatprep.subr.bf16.mxu0 %v5749_v50 }
0x1074   :  { %v2225_v0 = vpop.permute.xlu1 %2224 }
0x1076   :  { %3813 = vmatpush3.bf16.msra.mxu0 %v4638_v58 }
0x1077   :  { %3826 = vmatprep.subr.bf16.mxu0 %v5749_v50 }
0x1078   :  { %v2239_v12 = vpop.permute.xlu1 %2238 }
0x1129   :  { %v2080_v18 = vpop.f32.mrf.mxu0 }
0x112a   :  { %v2081_v31 = vadd.f32 %v5019_v1, %v2080_v18 }
0x112b   :  { %v3788_v26 = vpop.f32.mrf.mxu0 }
0x112c   :  { %v2087_v4 = vcombine.high %v2081_v31, %v2081_v31  ;;  %v2094_v38 = vrot.slane %v2081_v31, %v4359_v15  ;;  %v2246_v31 = vmul.f32 %v5028_v59, %v2232_v62  ;;  %v2241_v26 = vmul.f32 %v5028_v59, %v2197_v17  ;;  %v5049_v17 = vld [vmem:[%s5632_s2] sm:$0xff] }
0x112d   :  { %v2083_v58 = vpop.f32.mrf.mxu0 }
0x112e   :  { %v2101_v39 = vrot.slane %v2087_v4, %v4359_v15  ;;  %v2102_v28 = vcombine.high %v2094_v38, %v2094_v38  ;;  %v2110_v55 = vrot.slane %v2094_v38, %v4359_v15  ;;  %v2243_v4 = vmul.f32 %v5028_v59, %v2211_v36 }
0x112f   :  { %v3789_v10 = vpop.f32.mrf.mxu0 }
0x1130   :  { %v2103_v13 = vcombine.high %v2101_v39, %v2101_v39  ;;  %v2117_v20 = vrot.slane %v2101_v39, %v4359_v15  ;;  %v2124_v47 = vrot.slane %v2102_v28, %v4359_v15  ;;  %v2132_v18 = vcombine.high %v2110_v55, %v2110_v55 }
0x1131   :  { %v2139_v5 = vrot.slane %v2110_v55, %v4289_v43  ;;  %v5039_v38 = vpop.f32.mrf.mxu0  ;;  %v2245_v39 = vmul.f32 %v5028_v59, %v2225_v0  ;;  %v5058_v0 = vld [vmem:[%s5632_s2 + $0x8] sm:$0xff] }
0x1132   :  { %5778 = vst [vmem:[#allocation12_spill] sm:$0xff] %v5039_v38  ;;  %v2131_v61 = vrot.slane %v2103_v13, %v4359_v15  ;;  %v2133_v42 = vcombine.high %v2117_v20, %v2117_v20  ;;  %v2134_v58 = vcombine.high %v2124_v47, %v2124_v47  ;;  %v2143_v10 = vrot.slane %v2124_v47, %v4289_v43 }
0x1133   :  { %v2147_v28 = vrot.slane %v2132_v18, %v4289_v43  ;;  %v2155_v62 = vrot.slane %v2117_v20, %v4289_v43  ;;  %v2176_v36 = vadd.f32 %v5049_v17, %v2139_v5  ;;  %v3808_v55 = vpop.f32.mrf.mxu0  ;;  %v5064_v18 = vld [vmem:[%s5632_s2 + $0x10] sm:$0xff] }
0x1134   :  { %v2135_v27 = vcombine.high %v2131_v61, %v2131_v61  ;;  %v2151_v13 = vrot.slane %v2134_v58, %v4289_v43  ;;  %v2159_v38 = vrot.slane %v2131_v61, %v4289_v43  ;;  %v2163_v47 = vrot.slane %v2133_v42, %v4289_v43  ;;  %v5070_v61 = vld [vmem:[%s5632_s2 + $0x20] sm:$0xff] }
0x1135   :  { %v2177_v20 = vadd.f32 %v5058_v0, %v2143_v10  ;;  %v2178_v5 = vadd.f32 %v5064_v18, %v2147_v28  ;;  %5779 = vst [vmem:[#allocation19_spill] sm:$0xff] %v5070_v61  ;;  %v2180_v42 = vadd.f32 %v5070_v61, %v2155_v62  ;;  %v2248_v58 = vadd.f32 %v2240_v49, %v2176_v36  ;;  %v2606_v55 = vpop.f32.mrf.mxu0  ;;  %v5077_v10 = vld [vmem:[%s5632_s2 + $0x18] sm:$0xff]  ;;  %v5083_v28 = vld [vmem:[%s5632_s2 + $0x28] sm:$0xff]  ;;  %v5089_v49 = vld [vmem:[%s5632_s2 + $0x30] sm:$0xff] }
0x1136   :  { %v2167_v8 = vrot.slane %v2135_v27, %v4289_v43  ;;  %5780 = vst [vmem:[#allocation17_spill] sm:$0xff] %v5077_v10  ;;  %v2179_v40 = vadd.f32 %v5077_v10, %v2151_v13  ;;  %5781 = vst [vmem:[#allocation20_spill] sm:$0xff] %v5083_v28  ;;  %v2181_v7 = vadd.f32 %v5083_v28, %v2159_v38  ;;  %v5095_v13 = vld [vmem:[%s5633_s14] ss:$0 sm:$0xff]  ;;  %v5101_v38 = vld [vmem:[%s5632_s2 + $0x38] sm:$0xff] }
0x1137   :  { %5782 = vst [vmem:[#allocation21_spill] sm:$0xff] %v5089_v49  ;;  %v2182_v27 = vadd.f32 %v5089_v49, %v2163_v47  ;;  %v2249_v62 = vadd.f32 %v2241_v26, %v2177_v20  ;;  %v2250_v36 = vadd.f32 %v2242_v19, %v2178_v5  ;;  %v2252_v55 = vadd.f32 %v2244_v9, %v2180_v42  ;;  %v3809_v41 = vpop.f32.mrf.mxu0 }
0x1138   :  { %5783 = vst [vmem:[#allocation22_spill] sm:$0xff] %v5095_v13  ;;  %v2256_v34 = vadd.f32 %v5095_v13, %v2248_v58  ;;  %5784 = vst [vmem:[#allocation23_spill] sm:$0xff] %v5101_v38  ;;  %v2183_v24 = vadd.f32 %v5101_v38, %v2167_v8  ;;  %v2251_v47 = vadd.f32 %v2243_v4, %v2179_v40 }
0x1139   :  { %v2253_v26 = vadd.f32 %v2245_v39, %v2181_v7  ;;  %v2254_v19 = vadd.f32 %v2246_v31, %v2182_v27  ;;  %v2257_v9 = vadd.f32 %v5095_v13, %v2249_v62  ;;  %v2258_v20 = vadd.f32 %v5095_v13, %v2250_v36 }
0x113a   :  { %v2260_v5 = vadd.f32 %v5095_v13, %v2252_v55  ;;  %3951 = vtanh.f32 %v2256_v34  ;;  %v2259_v41 = vadd.f32 %v5095_v13, %v2251_v47  ;;  %v2247_v42 = vmul.f32 %v5028_v59, %v2239_v12  ;;  %v5115_v34 = vld [vmem:[%s5634_s15] ss:$0 sm:$0xff] }
0x113b   :  { %v2262_v58 = vadd.f32 %v5095_v13, %v2254_v19  ;;  %3953 = vtanh.f32 %v2257_v9  ;;  %v2261_v40 = vadd.f32 %v5095_v13, %v2253_v26  ;;  %5785 = vst [vmem:[#allocation18_spill] sm:$0xff] %v5115_v34 }
0x113c   :  { %3955 = vtanh.f32 %v2258_v20  ;;  %v2255_v14 = vadd.f32 %v2247_v42, %v2183_v24 }
0x113d   :  { %3957 = vtanh.f32 %v2260_v5 }
0x113e   :  { %3959 = vtanh.f32 %v2259_v41  ;;  %v2263_v7 = vadd.f32 %v5095_v13, %v2255_v14  ;;  %v5230_v13 = vld [vmem:[%s5638_s1 + $0x38] sm:$0xff] }
0x113f   :  { %3961 = vtanh.f32 %v2262_v58  ;;  %5793 = vst [vmem:[#allocation36_spill] sm:$0xff] %v5230_v13 }
0x1140   :  { %3963 = vtanh.f32 %v2261_v40 }
0x1141   :  { %3965 = vtanh.f32 %v2263_v7 }
0x1147   :  { %v3952_v8 = vpop.eup %3951 }
0x1148   :  { %v2272_v12 = vmul.f32 %v5115_v34, %v3952_v8  ;;  %v3954_v31 = vpop.eup %3953 }
0x1149   :  { %v3956_v4 = vpop.eup %3955  ;;  %v2273_v39 = vmul.f32 %v5115_v34, %v3954_v31 }
0x114a   :  { %v2280_v24 = vsel %vm87_vm1, %v2272_v12, 0.0  ;;  %v3958_v27 = vpop.eup %3957  ;;  %v2274_v62 = vmul.f32 %v5115_v34, %v3956_v4 }
0x114b   :  { %2281 = vadd.xlane.f32.xlu0 %v2280_v24  ;;  %v3960_v14 = vpop.eup %3959  ;;  %v2283_v36 = vsel %vm87_vm1, %v2273_v39, 0.0  ;;  %v2276_v55 = vmul.f32 %v5115_v34, %v3958_v27 }
0x114c   :  { %v3962_v47 = vpop.eup %3961  ;;  %2284 = vadd.xlane.f32.xlu1 %v2283_v36  ;;  %v2286_v26 = vsel %vm87_vm1, %v2274_v62, 0.0  ;;  %v2275_v19 = vmul.f32 %v5115_v34, %v3960_v14 }
0x114d   :  { %v3964_v9 = vpop.eup %3963  ;;  %v2292_v20 = vsel %vm87_vm1, %v2276_v55, 0.0  ;;  %v2278_v5 = vmul.f32 %v5115_v34, %v3962_v47 }
0x114e   :  { %v2289_v41 = vsel %vm87_vm1, %v2275_v19, 0.0  ;;  %v2277_v42 = vmul.f32 %v5115_v34, %v3964_v9  ;;  %v3966_v58 = vpop.eup %3965 }
0x114f   :  { %2287 = vadd.xlane.f32.xlu0 %v2286_v26  ;;  %v2298_v40 = vsel %vm87_vm1, %v2278_v5, 0.0  ;;  %v2279_v8 = vmul.f32 %v5115_v34, %v3966_v58  ;;  %v5223_v34 = vld [vmem:[%s5638_s1 + $0x28] sm:$0xff] }
0x1150   :  { %2293 = vadd.xlane.f32.xlu1 %v2292_v20  ;;  %v2295_v7 = vsel %vm87_vm1, %v2277_v42, 0.0  ;;  %5792 = vst [vmem:[#allocation35_spill] sm:$0xff] %v5223_v34 }
0x1151   :  { %v2301_v12 = vsel %vm87_vm1, %v2279_v8, 0.0 }
0x1153   :  { %2290 = vadd.xlane.f32.xlu0 %v2289_v41 }
0x1154   :  { %2299 = vadd.xlane.f32.xlu1 %v2298_v40 }
0x1157   :  { %2296 = vadd.xlane.f32.xlu0 %v2295_v7 }
0x115b   :  { %2302 = vadd.xlane.f32.xlu0 %v2301_v12 }
0x11d4   :  { %v2282_v31 = vpop.xlane.xlu0 %2281 }
0x11d5   :  { %v2285_v4 = vpop.xlane.xlu1 %2284  ;;  %v2304_v24 = vadd.f32 %v2282_v31, %v5763_v21 }
0x11d6   :  { %v2305_v39 = vadd.f32 %v2285_v4, %v5763_v21 }
0x11d7   :  { %v2323_v55 = vrot.slane %v2304_v24, %v5764_v54 }
0x11d8   :  { %v2288_v27 = vpop.xlane.xlu0 %2287  ;;  %v2327_v62 = vrot.slane %v2305_v39, %v5764_v54 }
0x11d9   :  { %v2306_v14 = vadd.f32 %v2288_v27, %v5763_v21  ;;  %v2294_v36 = vpop.xlane.xlu1 %2293 }
0x11da   :  { %v2352_v19 = vsel %vm668_vm3, %v2327_v62, %v2323_v55  ;;  %v2308_v20 = vadd.f32 %v2294_v36, %v5763_v21 }
0x11db   :  { %v2331_v47 = vrot.slane %v2306_v14, %v5764_v54 }
0x11dc   :  { %v2291_v26 = vpop.xlane.xlu0 %2290  ;;  %v2339_v8 = vrot.slane %v2308_v20, %v5764_v54 }
0x11dd   :  { %v2307_v9 = vadd.f32 %v2291_v26, %v5763_v21  ;;  %v2300_v41 = vpop.xlane.xlu1 %2299  ;;  %v2353_v42 = vsel %vm670_vm4, %v2331_v47, %v2352_v19 }
0x11de   :  { %v2310_v12 = vadd.f32 %v2300_v41, %v5763_v21 }
0x11df   :  { %v2335_v5 = vrot.slane %v2307_v9, %v5764_v54 }
0x11e0   :  { %v2297_v58 = vpop.xlane.xlu0 %2296  ;;  %v2347_v62 = vrot.slane %v2310_v12, %v5764_v54 }
0x11e1   :  { %v2354_v40 = vsel %vm672_vm5, %v2335_v5, %v2353_v42  ;;  %v2309_v7 = vadd.f32 %v2297_v58, %v5763_v21 }
0x11e2   :  { %v2355_v24 = vsel %vm674_vm6, %v2339_v8, %v2354_v40 }
0x11e3   :  { %v2343_v31 = vrot.slane %v2309_v7, %v5764_v54 }
0x11e4   :  { %v2303_v4 = vpop.xlane.xlu0 %2302 }
0x11e5   :  { %v2311_v39 = vadd.f32 %v2303_v4, %v5763_v21  ;;  %v2356_v27 = vsel %vm676_vm7, %v2343_v31, %v2355_v24 }
0x11e6   :  { %v2357_v36 = vsel %vm678_vm8, %v2347_v62, %v2356_v27 }
0x11e7   :  { %v2351_v14 = vrot.slane %v2311_v39, %v5764_v54 }
0x11e9   :  { %v2358_v55 = vsel %vm680_vm9, %v2351_v14, %v2357_v36  ;;  %v5181_v36 = vld [vmem:[%s5638_s1 + $0x8] sm:$0xff] }
0x11ea   :  { %v2360_v47 = vsel %vm108_vm10, -1e+30, %v2358_v55  ;;  %5786 = vst [vmem:[#allocation24_spill] sm:$0xff] %v5181_v36 }
0x11eb   :  { %v2361_v26 = vsel %vm89_vm2, %v2360_v47, -inf }
0x11ec   :  { %2362 = vmax.xlane.f32.xlu1 %v2361_v26 }
0x1275   :  { %v2363_v19 = vpop.xlane.xlu1 %2362 }
0x1276   :  { %v2364_v9 = vsub.f32 %v2360_v47, %v2363_v19  ;;  %v5187_v47 = vld [vmem:[%s5638_s1] sm:$0xff] }
0x1277   :  { %5787 = vst [vmem:[#allocation30_spill] sm:$0xff] %v5187_v47 }
0x1278   :  { %v2365_v20 = vmul.f32 1.442695, %v2364_v9 }
0x127a   :  { %3967 = vpow2.f32 %v2365_v20 }
0x1287   :  { %v3968_v5 = vpop.eup %3967 }
0x1288   :  { %v2367_v41 = vsel %vm89_vm2, %v3968_v5, 0.0 }
0x1289   :  { %2368 = vadd.xlane.f32.xlu0 %v2367_v41 }
0x1312   :  { %v2369_v42 = vpop.xlane.xlu0 %2368 }
0x1313   :  { %3969 = vrcp.f32 %v2369_v42 }
0x1320   :  { %v3970_v58 = vpop.eup %3969 }
0x1321   :  { %v5160_v40 = vmul.f32 %v3970_v58, %v3968_v5  ;;  %v5195_v58 = vld [vmem:[%s5638_s1 + $0x20] sm:$0xff] }
0x1322   :  { %5788 = vst [vmem:[#allocation31_spill] sm:$0xff] %v5195_v58 }
0x1323   :  { %v2383_v7 = vrot.slane %v5160_v40, %v4292_v44  ;;  %v2376_v8 = vrot.slane %v5160_v40, %v4289_v43  ;;  %v2404_v12 = vrot.slane %v5160_v40, %v4311_v52  ;;  %v2390_v31 = vrot.slane %v5160_v40, %v4295_v45 }
0x1324   :  { %v2418_v4 = vrot.slane %v5160_v40, %v4321_v56  ;;  %v2397_v24 = vrot.slane %v5160_v40, %v4298_v46  ;;  %v2411_v39 = vrot.slane %v5160_v40, %v4314_v53  ;;  %v2425_v27 = vrot.slane %v5160_v40, %v4324_v57 }
0x1325   :  { %2385 = vbcast.lane.b32.xlu0 %v2383_v7, 256  ;;  %2378 = vbcast.lane.b32.xlu1 %v2376_v8, 256  ;;  %v5201_v8 = vld [vmem:[%s5638_s1 + $0x10] sm:$0xff] }
0x1326   :  { %5789 = vst [vmem:[#allocation32_spill] sm:$0xff] %v5201_v8 }
0x1329   :  { %2406 = vbcast.lane.b32.xlu0 %v2404_v12, 256  ;;  %2392 = vbcast.lane.b32.xlu1 %v2390_v31, 256 }
0x132d   :  { %2420 = vbcast.lane.b32.xlu0 %v2418_v4, 256  ;;  %2399 = vbcast.lane.b32.xlu1 %v2397_v24, 256 }
0x1331   :  { %2413 = vbcast.lane.b32.xlu1 %v2411_v39, 256 }
0x1335   :  { %2427 = vbcast.lane.b32.xlu1 %v2425_v27, 256 }
0x1397   :  { %v2386_v62 = vpop.permute.xlu0 %2385  ;;  %v2379_v14 = vpop.permute.xlu1 %2378 }
0x1398   :  { %v2430_v55 = vmul.f32 %v5181_v36, %v2386_v62  ;;  %v2429_v26 = vmul.f32 %v5187_v47, %v2379_v14 }
0x139a   :  { %v2444_v19 = vsel %vm761_vm11, %v2430_v55, 0.0  ;;  %v2437_v9 = vsel %vm761_vm11, %v2429_v26, 0.0 }
0x139b   :  { %v2445_v20 = vrot.slane %v2444_v19, 4  ;;  %v2438_v5 = vrot.slane %v2437_v9, 4  ;;  %v2407_v41 = vpop.permute.xlu0 %2406  ;;  %v2393_v42 = vpop.permute.xlu1 %2392 }
0x139c   :  { %v2433_v7 = vmul.f32 %v5195_v58, %v2407_v41  ;;  %v2431_v12 = vmul.f32 %v5201_v8, %v2393_v42  ;;  %v5209_v41 = vld [vmem:[%s5638_s1 + $0x30] sm:$0xff] }
0x139d   :  { %v2446_v31 = vadd.f32 %v2445_v20, %v2444_v19  ;;  %v2439_v4 = vadd.f32 %v2438_v5, %v2437_v9  ;;  %5790 = vst [vmem:[#allocation33_spill] sm:$0xff] %v5209_v41  ;;  %v5215_v19 = vld [vmem:[%s5638_s1 + $0x18] sm:$0xff] }
0x139e   :  { %v2465_v24 = vsel %vm761_vm11, %v2433_v7, 0.0  ;;  %v2451_v39 = vsel %vm761_vm11, %v2431_v12, 0.0  ;;  %5791 = vst [vmem:[#allocation34_spill] sm:$0xff] %v5215_v19 }
0x139f   :  { %v2447_v27 = vrot.slane %v2446_v31, 2  ;;  %v2440_v62 = vrot.slane %v2439_v4, 2  ;;  %v2466_v14 = vrot.slane %v2465_v24, 4  ;;  %v2452_v55 = vrot.slane %v2451_v39, 4  ;;  %v2421_v26 = vpop.permute.xlu0 %2420  ;;  %v2400_v47 = vpop.permute.xlu1 %2399 }
0x13a0   :  { %v2435_v58 = vmul.f32 %v5209_v41, %v2421_v26  ;;  %v2432_v9 = vmul.f32 %v5215_v19, %v2400_v47 }
0x13a1   :  { %v2448_v20 = vadd.f32 %v2447_v27, %v2446_v31  ;;  %v2441_v5 = vadd.f32 %v2440_v62, %v2439_v4  ;;  %v2467_v42 = vadd.f32 %v2466_v14, %v2465_v24  ;;  %v2453_v7 = vadd.f32 %v2452_v55, %v2451_v39 }
0x13a2   :  { %v2479_v12 = vsel %vm761_vm11, %v2435_v58, 0.0  ;;  %v2458_v8 = vsel %vm761_vm11, %v2432_v9, 0.0 }
0x13a3   :  { %v2449_v36 = vrot.slane %v2448_v20, 1  ;;  %v2442_v25 = vrot.slane %v2441_v5, 1  ;;  %v2468_v2 = vrot.slane %v2467_v42, 2  ;;  %v2454_v54 = vrot.slane %v2453_v7, 2  ;;  %v2414_v26 = vpop.permute.xlu1 %2413 }
0x13a4   :  { %v2480_v41 = vrot.slane %v2479_v12, 4  ;;  %v2459_v21 = vrot.slane %v2458_v8, 4  ;;  %v2434_v47 = vmul.f32 %v5223_v34, %v2414_v26 }
0x13a5   :  { %v2450_v31 = vadd.f32 %v2449_v36, %v2448_v20  ;;  %v2443_v4 = vadd.f32 %v2442_v25, %v2441_v5  ;;  %v2469_v24 = vadd.f32 %v2468_v2, %v2467_v42  ;;  %v2455_v58 = vadd.f32 %v2454_v54, %v2453_v7 }
0x13a6   :  { %v2481_v39 = vadd.f32 %v2480_v41, %v2479_v12  ;;  %v2460_v27 = vadd.f32 %v2459_v21, %v2458_v8  ;;  %v2472_v62 = vsel %vm761_vm11, %v2434_v47, 0.0 }
0x13a7   :  { %v2456_v14 = vrot.slane %v2455_v58, 1  ;;  %v2428_v55 = vpop.permute.xlu1 %2427  ;;  %v2473_v38 = vrot.slane %v2472_v62, 4  ;;  %v2494_v36 = vpack.c.bf16 %v2450_v31, %v2450_v31  ;;  %v2493_v25 = vpack.c.bf16 %v2443_v4, %v2443_v4 }
0x13a8   :  { %v2482_v9 = vrot.slane %v2481_v39, 2  ;;  %v2461_v19 = vrot.slane %v2460_v27, 2  ;;  %v2436_v26 = vmul.f32 %v5230_v13, %v2428_v55  ;;  %v2470_v2 = vrot.slane %v2469_v24, 1 }
0x13a9   :  { %v2457_v54 = vadd.f32 %v2456_v14, %v2455_v58  ;;  %v2474_v8 = vadd.f32 %v2473_v38, %v2472_v62  ;;  %v2510_v28 = vunpack.c.l.b16 %v2494_v36  ;;  %v2509_v10 = vunpack.c.l.b16 %v2493_v25 }
0x13aa   :  { %v2483_v41 = vadd.f32 %v2482_v9, %v2481_v39  ;;  %v2462_v21 = vadd.f32 %v2461_v19, %v2460_v27  ;;  %v2486_v20 = vsel %vm761_vm11, %v2436_v26, 0.0  ;;  %v2471_v34 = vadd.f32 %v2470_v2, %v2469_v24 }
0x13ab   :  { %v2495_v5 = vpack.c.bf16 %v2457_v54, %v2457_v54  ;;  %v2487_v42 = vrot.slane %v2486_v20, 4  ;;  %v2475_v47 = vrot.slane %v2474_v8, 2  ;;  %v2517_v27 = vsel %vm668_vm3, %v2510_v28, %v2509_v10 }
0x13ac   :  { %v2484_v7 = vrot.slane %v2483_v41, 1  ;;  %v2463_v12 = vrot.slane %v2462_v21, 1  ;;  %v2497_v19 = vpack.c.bf16 %v2471_v34, %v2471_v34 }
0x13ad   :  { %v2488_v49 = vadd.f32 %v2487_v42, %v2486_v20  ;;  %v2476_v55 = vadd.f32 %v2475_v47, %v2474_v8  ;;  %v2511_v31 = vunpack.c.l.b16 %v2495_v5 }
0x13ae   :  { %v2464_v61 = vadd.f32 %v2463_v12, %v2462_v21  ;;  %v2485_v13 = vadd.f32 %v2484_v7, %v2483_v41  ;;  %v2513_v2 = vunpack.c.l.b16 %v2497_v19 }
0x13af   :  { %v2489_v4 = vrot.slane %v2488_v49, 2  ;;  %v2477_v39 = vrot.slane %v2476_v55, 1  ;;  %v2518_v9 = vsel %vm670_vm4, %v2511_v31, %v2517_v27 }
0x13b0   :  { %v2496_v58 = vpack.c.bf16 %v2464_v61, %v2464_v61  ;;  %v2499_v24 = vpack.c.bf16 %v2485_v13, %v2485_v13  ;;  %v5251_v13 = vld [vmem:[%s5723_s16 + $0x18] sm:$0xff] }
0x13b1   :  { %v2490_v38 = vadd.f32 %v2489_v4, %v2488_v49  ;;  %v2478_v14 = vadd.f32 %v2477_v39, %v2476_v55  ;;  %v2719_v5 = vpack.c.bf16 %v5251_v13, %v5251_v13 }
0x13b2   :  { %v2512_v62 = vunpack.c.l.b16 %v2496_v58  ;;  %v2515_v8 = vunpack.c.l.b16 %v2499_v24 }
0x13b3   :  { %v2491_v26 = vrot.slane %v2490_v38, 1  ;;  %v2498_v25 = vpack.c.bf16 %v2478_v14, %v2478_v14 }
0x13b4   :  { %v2519_v36 = vsel %vm672_vm5, %v2512_v62, %v2518_v9 }
0x13b5   :  { %v2492_v54 = vadd.f32 %v2491_v26, %v2490_v38  ;;  %v2514_v21 = vunpack.c.l.b16 %v2498_v25  ;;  %v2520_v41 = vsel %vm674_vm6, %v2513_v2, %v2519_v36 }
0x13b7   :  { %v2500_v61 = vpack.c.bf16 %v2492_v54, %v2492_v54  ;;  %v2521_v49 = vsel %vm676_vm7, %v2514_v21, %v2520_v41 }
0x13b8   :  { %v2522_v10 = vsel %vm678_vm8, %v2515_v8, %v2521_v49 }
0x13b9   :  { %v2516_v34 = vunpack.c.l.b16 %v2500_v61 }
0x13bb   :  { %v2523_v28 = vsel %vm680_vm9, %v2516_v34, %v2522_v10 }
0x13bc   :  { %v2524_v20 = vpack.c.b16 %v2523_v28, %v2523_v28 }
0x13be   :  { %3799 = vmatmul.mubr.msk.bf16.vlgmr.msra.gmra.mxu1 %vm761_vm11, %v2524_v20 }
0x13bf   :  { %3819 = vmatpush3.bf16.msra.mxu1 %v4857_v11  ;;  %3822 = vmatprep.mubr.msk.bf16.mxu1 %vm4070_vm0, %v5749_v50 }
0x13c0   :  { %3820 = vmatprep.subr.bf16.mxu1 %v5749_v50 }
0x13c3   :  { %3821 = vmatpush3.bf16.msra.mxu1 %v4866_v35  ;;  %v5265_v35 = vld [vmem:[%s5639_s6] ss:$0 sm:$0xff] }
0x13c4   :  { %3834 = vmatprep.subr.bf16.mxu1 %v5749_v50 }
0x13c6   :  { %3823 = vmatmul.mubr.msk.bf16.vlgmr.msra.gmra.mxu1 %vm87_vm1, %v2719_v5 }
0x13c7   :  { %3835 = vmatpush3.bf16.msra.mxu1 %v4877_v33  ;;  %3838 = vmatprep.mubr.msk.bf16.mxu1 %vm4070_vm0, %v5749_v50 }
0x13c8   :  { %3836 = vmatprep.subr.bf16.mxu1 %v5749_v50 }
0x13cb   :  { %3837 = vmatpush3.bf16.msra.mxu1 %v4886_v60 }
0x13cc   :  { %3854 = vmatprep.subr.bf16.mxu1 %v5749_v50 }
0x147e   :  { %v2562_v11 = vpop.f32.mrf.mxu1 }
0x147f   :  { %v5268_v42 = vadd.f32 %v5265_v35, %v2562_v11 }
0x1480   :  { %v3800_v7 = vpop.f32.mrf.mxu1 }
0x1481   :  { %v2568_v33 = vpack.c.bf16 %v5268_v42, %v5268_v42 }
0x1482   :  { %v2565_v12 = vpop.f32.mrf.mxu1 }
0x1483   :  { %3815 = vmatmul.mubr.msk.bf16.vlgmr.msra.gmra.mxu0 %vm87_vm1, %v2568_v33 }
0x1484   :  { %3827 = vmatpush3.bf16.msra.mxu0 %v4899_v51  ;;  %v3801_v60 = vpop.f32.mrf.mxu1  ;;  %3830 = vmatprep.mubr.msk.bf16.mxu0 %vm4070_vm0, %v5749_v50 }
0x1485   :  { %3828 = vmatprep.subr.bf16.mxu0 %v5749_v50 }
0x1486   :  { %v2757_v51 = vpop.f32.mrf.mxu1 }
0x1487   :  { %v2758_v27 = vadd.f32 %v4955_v48, %v2757_v51 }
0x1488   :  { %3829 = vmatpush3.bf16.msra.mxu0 %v4908_v3  ;;  %v3824_v3 = vpop.f32.mrf.mxu1 }
0x1489   :  { %3842 = vmatprep.subr.bf16.mxu0 %v5749_v50 }
0x148a   :  { %v2760_v47 = vpop.f32.mrf.mxu1 }
0x148b   :  { %3831 = vmatmul.mubr.msk.bf16.vlgmr.msra.gmra.mxu0 %vm87_vm1, %v2568_v33 }
0x148c   :  { %3843 = vmatpush3.bf16.msra.mxu0 %v4916_v37  ;;  %3850 = vmatprep.mubr.msk.bf16.mxu0 %vm4070_vm0, %v5749_v50  ;;  %v3825_v55 = vpop.f32.mrf.mxu1 }
0x148d   :  { %3844 = vmatprep.subr.bf16.mxu0 %v5749_v50 }
0x1490   :  { %3845 = vmatpush3.bf16.msra.mxu0 %v4925_v29 }
0x1491   :  { %3846 = vmatprep.subr.bf16.mxu0 %v5749_v50 }
0x1494   :  { %3847 = vmatpush3.bf16.msra.mxu0 %v4932_v32 }
0x1495   :  { %3848 = vmatprep.subr.bf16.mxu0 %v5749_v50 }
0x1498   :  { %3849 = vmatpush3.bf16.msra.mxu0 %v4939_v6 }
0x1543   :  { %v5289_v37 = vpop.f32.mrf.mxu0 }
0x1545   :  { %v3816_v31 = vpop.f32.mrf.mxu0 }
0x1547   :  { %v2649_v4 = vpop.f32.mrf.mxu0 }
0x1549   :  { %v3817_v58 = vpop.f32.mrf.mxu0 }
0x154b   :  { %v2797_v39 = vpop.f32.mrf.mxu0 }
0x154c   :  { %v2798_v29 = vadd.f32 %v4948_v23, %v2797_v39  ;;  %v5297_v23 = vadd.f32 %v5160_v40, %v4961_v16 }
0x154d   :  { %v3832_v19 = vpop.f32.mrf.mxu0 }
0x154e   :  { %2811 = vrot.lane.b32.xlu0 %v2798_v29, %s5752_s28  ;;  %v2803_v6 = vadd.f32 %v2798_v29, %v2758_v27  ;;  %v2981_v48 = vrot.slane %v5297_v23, %v4289_v43  ;;  %v2995_v25 = vrot.slane %v5297_v23, %v4295_v45  ;;  %v3009_v2 = vrot.slane %v5297_v23, %v4311_v52 }
0x154f   :  { %v2800_v32 = vpop.f32.mrf.mxu0  ;;  %v3023_v54 = vrot.slane %v5297_v23, %v4321_v56  ;;  %v2988_v11 = vrot.slane %v5297_v23, %v4292_v44  ;;  %v3002_v7 = vrot.slane %v5297_v23, %v4298_v46  ;;  %v3016_v33 = vrot.slane %v5297_v23, %v4314_v53 }
0x1550   :  { %v3575_v62 = vmul.f32 -1.442695, %v2803_v6  ;;  %v3030_v12 = vrot.slane %v5297_v23, %v4324_v57 }
0x1551   :  { %v3833_v38 = vpop.f32.mrf.mxu0 }
0x1552   :  { %3971 = vpow2.f32 %v3575_v62 }
0x155f   :  { %v3972_v14 = vpop.eup %3971 }
0x1560   :  { %v2807_v9 = vadd.f32 1.0, %v3972_v14 }
0x1562   :  { %3973 = vrcp.f32 %v2807_v9 }
0x156f   :  { %v3974_v26 = vpop.eup %3973 }
0x1570   :  { %v2821_v49 = vsub.f32 1.0, %v3974_v26 }
0x15c0   :  { %v2812_v24 = vpop.permute.xlu0 %2811 }
0x15c1   :  { %v2814_v36 = vmul.f32 %v3974_v26, %v2812_v24 }
0x15c3   :  { %2816 = vrot.lane.b32.xlu1 %v2814_v36, %s5752_s28 }
0x15c7   :  { %2828 = vrot.lane.b32.xlu1 %v5268_v42, %s5754_s26 }
0x15cb   :  { %2983 = vbcast.lane.b32.xlu1 %v2981_v48, 256 }
0x15cf   :  { %2997 = vbcast.lane.b32.xlu1 %v2995_v25, 256 }
0x15d3   :  { %3011 = vbcast.lane.b32.xlu1 %v3009_v2, 256 }
0x15d7   :  { %3025 = vbcast.lane.b32.xlu1 %v3023_v54, 256 }
0x1635   :  { %v2817_v21 = vpop.permute.xlu1 %2816 }
0x1636   :  { %v2819_v41 = vadd.f32 %v2817_v21, %v2758_v27 }
0x1638   :  { %3975 = vtanh.f32 %v2819_v41 }
0x1639   :  { %v2829_v8 = vpop.permute.xlu1 %2828 }
0x163a   :  { %v2831_v10 = vmul.f32 %v3974_v26, %v2829_v8 }
0x163d   :  { %v2984_v51 = vpop.permute.xlu1 %2983 }
0x163e   :  { %v3034_v38 = vmul.f32 %v5028_v59, %v2984_v51 }
0x1641   :  { %v2998_v47 = vpop.permute.xlu1 %2997 }
0x1642   :  { %v3036_v27 = vmul.f32 %v5028_v59, %v2998_v47 }
0x1645   :  { %v3976_v61 = vpop.eup %3975  ;;  %v3012_v29 = vpop.permute.xlu1 %3011 }
0x1646   :  { %2823 = vrot.lane.b32.xlu0 %v3976_v61, %s5755_s4  ;;  %v3038_v24 = vmul.f32 %v5028_v59, %v3012_v29 }
0x16b8   :  { %v2824_v34 = vpop.permute.xlu0 %2823 }
0x16b9   :  { %v2826_v28 = vmul.f32 %v2824_v34, %v2821_v49 }
0x16bb   :  { %v5310_v20 = vadd.f32 %v2831_v10, %v2826_v28 }
0x16bd   :  { %v2833_v5 = vpack.c.bf16 %v5310_v20, %v5310_v20 }
0x16bf   :  { %2835 = vrot.lane.b32.xlu0 %v2833_v5, %s5755_s4 }
0x16c3   :  { %2990 = vbcast.lane.b32.xlu0 %v2988_v11, 256 }
0x16c7   :  { %3004 = vbcast.lane.b32.xlu0 %v3002_v7, 256 }
0x16cb   :  { %3018 = vbcast.lane.b32.xlu0 %v3016_v33, 256 }
0x16cf   :  { %3032 = vbcast.lane.b32.xlu0 %v3030_v12, 256 }
0x1731   :  { %v2836_v60 = vpop.permute.xlu0 %2835 }
0x1732   :  { %3839 = vmatmul.mubr.msk.bf16.vlgmr.msra.gmra.mxu1 %vm87_vm1, %v2836_v60 }
0x1733   :  { %3855 = vmatpush3.bf16.msra.mxu1 %v4991_v63  ;;  %3858 = vmatprep.mubr.msk.bf16.mxu1 %vm4070_vm0, %v5749_v50  ;;  %v4065_v63 = vld [vmem:[%s5637_s17] sm:$0xff]  }
0x1734   :  { %3856 = vmatprep.subr.bf16.mxu1 %v5749_v50 }
0x1735   :  { %v2991_v3 = vpop.permute.xlu0 %2990 }
0x1736   :  { %v3035_v36 = vmul.f32 %v5028_v59, %v2991_v3 }
0x1737   :  { %3857 = vmatpush3.bf16.msra.mxu1 %v5000_v30 }
0x1738   :  { %3862 = vmatprep.subr.bf16.mxu1 %v5749_v50 }
0x1739   :  { %v3005_v30 = vpop.permute.xlu0 %3004 }
0x173a   :  { %3859 = vmatmul.mubr.msk.bf16.vlgmr.msra.gmra.mxu1 %vm87_vm1, %v2836_v60  ;;  %v3037_v48 = vmul.f32 %v5028_v59, %v3005_v30  ;;  %v3026_v30 = vpop.permute.xlu1 %3025 }
0x173b   :  { %3863 = vmatpush3.bf16.msra.mxu1 %v5008_v22  ;;  %3866 = vmatprep.mubr.msk.bf16.mxu1 %vm4070_vm0, %v5749_v50 }
0x173c   :  { %3864 = vmatprep.subr.bf16.mxu1 %v5749_v50 }
0x173d   :  { %v3019_v6 = vpop.permute.xlu0 %3018 }
0x173e   :  { %v3039_v8 = vmul.f32 %v5028_v59, %v3019_v6 }
0x173f   :  { %3865 = vmatpush3.bf16.msra.mxu1 %v4065_v63  ;;  %v5794_v63 = vld [vmem:[#allocation19_spill] sm:$0xff] }
0x1741   :  { %v3033_v33 = vpop.permute.xlu0 %3032 }
0x17f2   :  { %v2874_v55 = vpop.f32.mrf.mxu1 }
0x17f3   :  { %v2875_v31 = vadd.f32 %v5019_v1, %v2874_v55  ;;  %v5795_v55 = vld [vmem:[#allocation17_spill] sm:$0xff] }
0x17f4   :  { %v3840_v4 = vpop.f32.mrf.mxu1 }
0x17f5   :  { %v2881_v58 = vcombine.high %v2875_v31, %v2875_v31  ;;  %v2888_v22 = vrot.slane %v2875_v31, %v4359_v15  ;;  %v5796_v4 = vld [vmem:[#allocation20_spill] sm:$0xff] }
0x17f6   :  { %v2877_v39 = vpop.f32.mrf.mxu1 }
0x17f7   :  { %v2895_v50 = vrot.slane %v2881_v58, %v4359_v15  ;;  %v2896_v19 = vcombine.high %v2888_v22, %v2888_v22  ;;  %v2904_v32 = vrot.slane %v2888_v22, %v4359_v15  ;;  %v5797_v22 = vld [vmem:[#allocation21_spill] sm:$0xff] }
0x17f8   :  { %v3841_v62 = vpop.f32.mrf.mxu1 }
0x17f9   :  { %v2897_v14 = vcombine.high %v2895_v50, %v2895_v50  ;;  %v2911_v1 = vrot.slane %v2895_v50, %v4359_v15  ;;  %v2918_v9 = vrot.slane %v2896_v19, %v4359_v15  ;;  %v2926_v26 = vcombine.high %v2904_v32, %v2904_v32  ;;  %v5799_v62 = vld [vmem:[#allocation23_spill] sm:$0xff] }
0x17fa   :  { %v2933_v25 = vrot.slane %v2904_v32, %v4289_v43  ;;  %v5350_v2 = vpop.f32.mrf.mxu1  ;;  %v5798_v32 = vld [vmem:[#allocation22_spill] sm:$0xff] }
0x17fb   :  { %v2925_v54 = vrot.slane %v2897_v14, %v4359_v15  ;;  %v2927_v21 = vcombine.high %v2911_v1, %v2911_v1  ;;  %v2928_v41 = vcombine.high %v2918_v9, %v2918_v9  ;;  %v2937_v61 = vrot.slane %v2918_v9, %v4289_v43 }
0x17fc   :  { %v2941_v49 = vrot.slane %v2926_v26, %v4289_v43  ;;  %v2949_v34 = vrot.slane %v2911_v1, %v4289_v43  ;;  %v2970_v10 = vadd.f32 %v5049_v17, %v2933_v25  ;;  %v3860_v28 = vpop.f32.mrf.mxu1  ;;  %v3040_v9 = vmul.f32 %v5028_v59, %v3026_v30 }
0x17fd   :  { %v2929_v5 = vcombine.high %v2925_v54, %v2925_v54  ;;  %v2945_v11 = vrot.slane %v2928_v41, %v4289_v43  ;;  %v2953_v7 = vrot.slane %v2925_v54, %v4289_v43  ;;  %v2957_v15 = vrot.slane %v2927_v21, %v4289_v43 }
0x17fe   :  { %v2971_v12 = vadd.f32 %v5058_v0, %v2937_v61  ;;  %v2972_v60 = vadd.f32 %v5064_v18, %v2941_v49  ;;  %v2974_v51 = vadd.f32 %v5794_v63, %v2949_v34  ;;  %v3042_v3 = vadd.f32 %v3034_v38, %v2970_v10  ;;  %v3400_v47 = vpop.f32.mrf.mxu1  ;;  %v5800_v61 = vld [vmem:[#allocation18_spill] sm:$0xff] }
0x17ff   :  { %v2961_v17 = vrot.slane %v2929_v5, %v4289_v43  ;;  %v2973_v31 = vadd.f32 %v5795_v55, %v2945_v11  ;;  %v2975_v58 = vadd.f32 %v5796_v4, %v2953_v7  ;;  %v2976_v39 = vadd.f32 %v5797_v22, %v2957_v15 }
0x1800   :  { %v3043_v29 = vadd.f32 %v3035_v36, %v2971_v12  ;;  %v3044_v50 = vadd.f32 %v3036_v27, %v2972_v60  ;;  %v3046_v19 = vadd.f32 %v3038_v24, %v2974_v51  ;;  %v3050_v0 = vadd.f32 %v5798_v32, %v3042_v3  ;;  %v3861_v6 = vpop.f32.mrf.mxu1 }
0x1801   :  { %v3041_v18 = vmul.f32 %v5028_v59, %v3033_v33  ;;  %v2977_v38 = vadd.f32 %v5799_v62, %v2961_v17  ;;  %v3045_v14 = vadd.f32 %v3037_v48, %v2973_v31  ;;  %v3047_v1 = vadd.f32 %v3039_v8, %v2975_v58  ;;  %v5802_v6 = vld [vmem:[#allocation13_spill] sm:$0xff] }
0x1802   :  { %v3051_v26 = vadd.f32 %v5798_v32, %v3043_v29  ;;  %v3052_v25 = vadd.f32 %v5798_v32, %v3044_v50  ;;  %3977 = vtanh.f32 %v3050_v0  ;;  %v3054_v24 = vadd.f32 %v5798_v32, %v3046_v19  ;;  %v5801_v50 = vld [vmem:[#allocation14_spill] sm:$0xff] }
0x1803   :  { %v3049_v54 = vadd.f32 %v3041_v18, %v2977_v38  ;;  %v3053_v27 = vadd.f32 %v5798_v32, %v3045_v14  ;;  %v3048_v36 = vadd.f32 %v3040_v9, %v2976_v39  ;;  %v3055_v21 = vadd.f32 %v5798_v32, %v3047_v1 }
0x1804   :  { %3979 = vtanh.f32 %v3051_v26 }
0x1805   :  { %3981 = vtanh.f32 %v3052_v25  ;;  %v3057_v48 = vadd.f32 %v5798_v32, %v3049_v54  ;;  %v3056_v59 = vadd.f32 %v5798_v32, %v3048_v36 }
0x1806   :  { %3983 = vtanh.f32 %v3053_v27 }
0x1807   :  { %3985 = vtanh.f32 %v3054_v24 }
0x1808   :  { %3987 = vtanh.f32 %v3055_v21 }
0x1809   :  { %3989 = vtanh.f32 %v3057_v48 }
0x180a   :  { %3991 = vtanh.f32 %v3056_v59 }
0x180f   :  { %v3978_v41 = vpop.eup %3977 }
0x1810   :  { %v3066_v8 = vmul.f32 %v5800_v61, %v3978_v41 }
0x1811   :  { %v3980_v49 = vpop.eup %3979 }
0x1812   :  { %v3982_v34 = vpop.eup %3981  ;;  %v3074_v10 = vsel %vm87_vm1, %v3066_v8, 0.0  ;;  %v3067_v28 = vmul.f32 %v5800_v61, %v3980_v49 }
0x1813   :  { %v3984_v5 = vpop.eup %3983  ;;  %3075 = vadd.xlane.f32.xlu1 %v3074_v10  ;;  %v3068_v33 = vmul.f32 %v5800_v61, %v3982_v34 }
0x1814   :  { %v3986_v11 = vpop.eup %3985  ;;  %v3077_v7 = vsel %vm87_vm1, %v3067_v28, 0.0  ;;  %v3069_v15 = vmul.f32 %v5800_v61, %v3984_v5 }
0x1815   :  { %v3988_v12 = vpop.eup %3987  ;;  %3078 = vadd.xlane.f32.xlu0 %v3077_v7  ;;  %v3080_v3 = vsel %vm87_vm1, %v3068_v33, 0.0  ;;  %v3070_v47 = vmul.f32 %v5800_v61, %v3986_v11  ;;  %v5811_v33 = vld [vmem:[#allocation35_spill] sm:$0xff] }
0x1816   :  { %v3083_v60 = vsel %vm87_vm1, %v3069_v15, 0.0  ;;  %v3071_v63 = vmul.f32 %v5800_v61, %v3988_v12  ;;  %v3990_v51 = vpop.eup %3989 }
0x1817   :  { %3084 = vadd.xlane.f32.xlu1 %v3083_v60  ;;  %v3992_v30 = vpop.eup %3991  ;;  %v3073_v55 = vmul.f32 %v5800_v61, %v3990_v51  ;;  %v3086_v31 = vsel %vm87_vm1, %v3070_v47, 0.0 }
0x1818   :  { %v3089_v17 = vsel %vm87_vm1, %v3071_v63, 0.0  ;;  %v3072_v4 = vmul.f32 %v5800_v61, %v3992_v30 }
0x1819   :  { %3081 = vadd.xlane.f32.xlu0 %v3080_v3  ;;  %v3095_v58 = vsel %vm87_vm1, %v3073_v55, 0.0 }
0x181a   :  { %v3092_v22 = vsel %vm87_vm1, %v3072_v4, 0.0 }
0x181b   :  { %3090 = vadd.xlane.f32.xlu1 %v3089_v17 }
0x181d   :  { %3087 = vadd.xlane.f32.xlu0 %v3086_v31 }
0x181f   :  { %3096 = vadd.xlane.f32.xlu1 %v3095_v58 }
0x1821   :  { %3093 = vadd.xlane.f32.xlu0 %v3092_v22 }
0x189c   :  { %v3076_v39 = vpop.xlane.xlu1 %3075 }
0x189d   :  { %v3098_v32 = vadd.f32 %v3076_v39, %v5801_v50 }
0x189e   :  { %v3079_v29 = vpop.xlane.xlu0 %3078 }
0x189f   :  { %v3099_v19 = vadd.f32 %v3079_v29, %v5801_v50  ;;  %v3117_v14 = vrot.slane %v3098_v32, %v5802_v6 }
0x18a0   :  { %v3085_v0 = vpop.xlane.xlu1 %3084 }
0x18a1   :  { %v3121_v18 = vrot.slane %v3099_v19, %v5802_v6  ;;  %v3101_v1 = vadd.f32 %v3085_v0, %v5801_v50  ;;  %v5805_v19 = vld [vmem:[#allocation26_spill] sm:$0xff] }
0x18a2   :  { %v3082_v62 = vpop.xlane.xlu0 %3081 }
0x18a3   :  { %v3100_v38 = vadd.f32 %v3082_v62, %v5801_v50  ;;  %v3146_v25 = vsel %vm668_vm3, %v3121_v18, %v3117_v14  ;;  %v3129_v36 = vrot.slane %v3101_v1, %v5802_v6  ;;  %v5806_v18 = vld [vmem:[#allocation24_spill] sm:$0xff] }
0x18a4   :  { %v3091_v9 = vpop.xlane.xlu1 %3090 }
0x18a5   :  { %v3125_v26 = vrot.slane %v3100_v38, %v5802_v6  ;;  %v3103_v21 = vadd.f32 %v3091_v9, %v5801_v50  ;;  %v5807_v38 = vld [vmem:[#allocation30_spill] sm:$0xff] }
0x18a6   :  { %v3088_v54 = vpop.xlane.xlu0 %3087 }
0x18a7   :  { %v3147_v27 = vsel %vm670_vm4, %v3125_v26, %v3146_v25  ;;  %v3102_v24 = vadd.f32 %v3088_v54, %v5801_v50  ;;  %v3137_v10 = vrot.slane %v3103_v21, %v5802_v6  ;;  %v5809_v21 = vld [vmem:[#allocation34_spill] sm:$0xff] }
0x18a8   :  { %v3097_v48 = vpop.xlane.xlu1 %3096  ;;  %v3148_v41 = vsel %vm672_vm5, %v3129_v36, %v3147_v27 }
0x18a9   :  { %v3133_v59 = vrot.slane %v3102_v24, %v5802_v6  ;;  %v3105_v61 = vadd.f32 %v3097_v48, %v5801_v50  ;;  %v5808_v24 = vld [vmem:[#allocation32_spill] sm:$0xff] }
0x18aa   :  { %v3094_v8 = vpop.xlane.xlu0 %3093 }
0x18ab   :  { %v3149_v49 = vsel %vm674_vm6, %v3133_v59, %v3148_v41  ;;  %v3104_v34 = vadd.f32 %v3094_v8, %v5801_v50  ;;  %v3145_v5 = vrot.slane %v3105_v61, %v5802_v6 }
0x18ac   :  { %v3150_v11 = vsel %vm676_vm7, %v3137_v10, %v3149_v49 }
0x18ad   :  { %v3141_v28 = vrot.slane %v3104_v34, %v5802_v6 }
0x18af   :  { %v3151_v7 = vsel %vm678_vm8, %v3141_v28, %v3150_v11 }
0x18b0   :  { %v3152_v15 = vsel %vm680_vm9, %v3145_v5, %v3151_v7  ;;  %v5810_v7 = vld [vmem:[#allocation31_spill] sm:$0xff] }
0x18b1   :  { %v3154_v12 = vsel %vm108_vm10, -1e+30, %v3152_v15 }
0x18b2   :  { %v3155_v60 = vsel %vm89_vm2, %v3154_v12, -inf }
0x18b3   :  { %3156 = vmax.xlane.f32.xlu0 %v3155_v60 }
0x193c   :  { %v3157_v63 = vpop.xlane.xlu0 %3156 }
0x193d   :  { %v3158_v51 = vsub.f32 %v3154_v12, %v3157_v63 }
0x193f   :  { %v3159_v3 = vmul.f32 1.442695, %v3158_v51 }
0x1941   :  { %3993 = vpow2.f32 %v3159_v3 }
0x194e   :  { %v3994_v47 = vpop.eup %3993 }
0x194f   :  { %v3161_v30 = vsel %vm89_vm2, %v3994_v47, 0.0 }
0x1950   :  { %3162 = vadd.xlane.f32.xlu1 %v3161_v30 }
0x19d9   :  { %v3163_v17 = vpop.xlane.xlu1 %3162 }
0x19da   :  { %3995 = vrcp.f32 %v3163_v17 }
0x19e7   :  { %v3996_v55 = vpop.eup %3995 }
0x19e8   :  { %v5422_v31 = vmul.f32 %v3996_v55, %v3994_v47 }
0x19ea   :  { %v3177_v4 = vrot.slane %v5422_v31, %v4292_v44  ;;  %v3170_v58 = vrot.slane %v5422_v31, %v4289_v43  ;;  %v5430_v22 = vadd.f32 %v5422_v31, %v5297_v23  ;;  %v3184_v39 = vrot.slane %v5422_v31, %v4295_v45 }
0x19eb   :  { %v3191_v29 = vrot.slane %v5422_v31, %v4298_v46  ;;  %v3198_v43 = vrot.slane %v5422_v31, %v4311_v52  ;;  %v3205_v44 = vrot.slane %v5422_v31, %v4314_v53  ;;  %v3212_v50 = vrot.slane %v5422_v31, %v4321_v56  ;;  %v3548_v46 = vld [vmem:[%s5640_s21] ss:$0 sm:$0xff] }
0x19ec   :  { %3179 = vbcast.lane.b32.xlu1 %v3177_v4, 256  ;;  %3172 = vbcast.lane.b32.xlu0 %v3170_v58, 256  ;;  %3512 = vst.msk [vmem:[#allocation3] sm:$0xff] %vm89_vm2, %v5430_v22  ;;  %v3219_v45 = vrot.slane %v5422_v31, %v4324_v57  ;;  %v5804_v52 = vld [vmem:[#allocation7_spill] sm:$0xff] }
0x19ed   :  { %v1026_v32 = vadd.f32 %v5805_v19, %v5804_v52  ;;  %v5455_v53 = vld [vmem:[%s5641_s19] ss:$0 sm:$0xff] }
0x19ef   :  { %v5458_v56 = vadd.f32 %v5455_v53, %v1026_v32 }
0x19f0   :  { %3186 = vbcast.lane.b32.xlu1 %v3184_v39, 256  ;;  %3193 = vbcast.lane.b32.xlu0 %v3191_v29, 256 }
0x19f1   :  { %v1038_v57 = vsel %vm87_vm1, %v5458_v56, -inf }
0x19f4   :  { %3200 = vbcast.lane.b32.xlu1 %v3198_v43, 256  ;;  %3207 = vbcast.lane.b32.xlu0 %v3205_v44, 256 }
0x19f8   :  { %3214 = vbcast.lane.b32.xlu1 %v3212_v50, 256  ;;  %3221 = vbcast.lane.b32.xlu0 %v3219_v45, 256  ;;  %v5812_v50 = vld [vmem:[#allocation33_spill] sm:$0xff] }
0x19fc   :  { %1064 = vrot.lane.b32.xlu1 %v3548_v46, %s5754_s26  ;;  %v5813_v46 = vld [vmem:[#allocation36_spill] sm:$0xff] }
0x1a17   :  { %1039 = vmax.xlane.f32.xlu0 %v1038_v57 }
0x1a5e   :  { %v3180_v0 = vpop.permute.xlu1 %3179  ;;  %v3173_v6 = vpop.permute.xlu0 %3172 }
0x1a5f   :  { %v3224_v62 = vmul.f32 %v5806_v18, %v3180_v0  ;;  %v3223_v14 = vmul.f32 %v5807_v38, %v3173_v6 }
0x1a61   :  { %v3238_v1 = vsel %vm761_vm11, %v3224_v62, 0.0  ;;  %v3231_v9 = vsel %vm761_vm11, %v3223_v14, 0.0 }
0x1a62   :  { %v3239_v26 = vrot.slane %v3238_v1, 4  ;;  %v3232_v25 = vrot.slane %v3231_v9, 4  ;;  %v3187_v54 = vpop.permute.xlu1 %3186  ;;  %v3194_v27 = vpop.permute.xlu0 %3193 }
0x1a63   :  { %v3225_v36 = vmul.f32 %v5808_v24, %v3187_v54  ;;  %v3226_v48 = vmul.f32 %v5809_v21, %v3194_v27 }
0x1a64   :  { %v3240_v59 = vadd.f32 %v3239_v26, %v3238_v1  ;;  %v3233_v41 = vadd.f32 %v3232_v25, %v3231_v9 }
0x1a65   :  { %v3245_v61 = vsel %vm761_vm11, %v3225_v36, 0.0  ;;  %v3252_v8 = vsel %vm761_vm11, %v3226_v48, 0.0 }
0x1a66   :  { %v3241_v49 = vrot.slane %v3240_v59, 2  ;;  %v3234_v34 = vrot.slane %v3233_v41, 2  ;;  %v3246_v10 = vrot.slane %v3245_v61, 4  ;;  %v3253_v28 = vrot.slane %v3252_v8, 4  ;;  %v3201_v5 = vpop.permute.xlu1 %3200  ;;  %v3208_v11 = vpop.permute.xlu0 %3207 }
0x1a67   :  { %v3227_v15 = vmul.f32 %v5810_v7, %v3201_v5  ;;  %v3228_v12 = vmul.f32 %v5811_v33, %v3208_v11  ;;  %v5814_v5 = vld [vmem:[#allocation6_spill] sm:$0xff] }
0x1a68   :  { %v3242_v60 = vadd.f32 %v3241_v49, %v3240_v59  ;;  %v3235_v63 = vadd.f32 %v3234_v34, %v3233_v41  ;;  %v3247_v51 = vadd.f32 %v3246_v10, %v3245_v61  ;;  %v3254_v3 = vadd.f32 %v3253_v28, %v3252_v8 }
0x1a69   :  { %v3259_v47 = vsel %vm761_vm11, %v3227_v15, 0.0  ;;  %v3266_v30 = vsel %vm761_vm11, %v3228_v12, 0.0 }
0x1a6a   :  { %v3243_v17 = vrot.slane %v3242_v60, 1  ;;  %v3236_v55 = vrot.slane %v3235_v63, 1  ;;  %v3248_v4 = vrot.slane %v3247_v51, 2  ;;  %v3255_v58 = vrot.slane %v3254_v3, 2  ;;  %v3215_v39 = vpop.permute.xlu1 %3214  ;;  %v3222_v29 = vpop.permute.xlu0 %3221 }
0x1a6b   :  { %v3260_v43 = vrot.slane %v3259_v47, 4  ;;  %v3267_v44 = vrot.slane %v3266_v30, 4  ;;  %v3229_v45 = vmul.f32 %v5812_v50, %v3215_v39  ;;  %v3230_v52 = vmul.f32 %v5813_v46, %v3222_v29 }
0x1a6c   :  { %v3244_v19 = vadd.f32 %v3243_v17, %v3242_v60  ;;  %v3237_v32 = vadd.f32 %v3236_v55, %v3235_v63  ;;  %v3249_v57 = vadd.f32 %v3248_v4, %v3247_v51  ;;  %v3256_v0 = vadd.f32 %v3255_v58, %v3254_v3  ;;  %v5815_v55 = vld [vmem:[#allocation11_spill] sm:$0xff] }
0x1a6d   :  { %v3261_v6 = vadd.f32 %v3260_v43, %v3259_v47  ;;  %v3268_v18 = vadd.f32 %v3267_v44, %v3266_v30  ;;  %v3273_v62 = vsel %vm761_vm11, %v3229_v45, 0.0  ;;  %v3280_v38 = vsel %vm761_vm11, %v3230_v52, 0.0 }
0x1a6e   :  { %v3288_v14 = vpack.c.bf16 %v3244_v19, %v3244_v19  ;;  %v3287_v1 = vpack.c.bf16 %v3237_v32, %v3237_v32  ;;  %v3250_v9 = vrot.slane %v3249_v57, 1  ;;  %v3257_v26 = vrot.slane %v3256_v0, 1  ;;  %v5478_v36 = vpop.permute.xlu1 %1064 }
0x1a6f   :  { %v3262_v25 = vrot.slane %v3261_v6, 2  ;;  %v3269_v54 = vrot.slane %v3268_v18, 2  ;;  %v3274_v27 = vrot.slane %v3273_v62, 4  ;;  %v3281_v24 = vrot.slane %v3280_v38, 4 }
0x1a70   :  { %v3304_v21 = vunpack.c.l.b16 %v3288_v14  ;;  %v3251_v48 = vadd.f32 %v3250_v9, %v3249_v57  ;;  %v3258_v59 = vadd.f32 %v3257_v26, %v3256_v0  ;;  %v3303_v34 = vunpack.c.l.b16 %v3287_v1  ;;  %v3547_v9 = vld [vmem:[%s5642_s20] ss:$0 sm:$0xff] }
0x1a71   :  { %v3263_v41 = vadd.f32 %v3262_v25, %v3261_v6  ;;  %v3270_v61 = vadd.f32 %v3269_v54, %v3268_v18  ;;  %v3275_v8 = vadd.f32 %v3274_v27, %v3273_v62  ;;  %v3282_v49 = vadd.f32 %v3281_v24, %v3280_v38  ;;  %v3549_v26 = vld [vmem:[%s5643_s22] ss:$0 sm:$0xff]  ;;  %v5816_v25 = vld [vmem:[#allocation25_spill] sm:$0xff] }
0x1a72   :  { %v3289_v10 = vpack.c.bf16 %v3251_v48, %v3251_v48  ;;  %v3290_v28 = vpack.c.bf16 %v3258_v59, %v3258_v59  ;;  %v1067_v11 = vmul.f32 %v5478_v36, %v5814_v5  ;;  %v3311_v30 = vsel %vm668_vm3, %v3304_v21, %v3303_v34  ;;  %v4066_v27 = vld [vmem:[%s5723_s16] sm:$0xff] }
0x1a73   :  { %v3264_v7 = vrot.slane %v3263_v41, 1  ;;  %v3271_v15 = vrot.slane %v3270_v61, 1  ;;  %v3276_v33 = vrot.slane %v3275_v8, 2  ;;  %v3283_v12 = vrot.slane %v3282_v49, 2  ;;  %v5817_v59 = vld [vmem:[#allocation27_spill] sm:$0xff] }
0x1a74   :  { %v3305_v60 = vunpack.c.l.b16 %v3289_v10  ;;  %1069 = vrot.lane.b32.xlu0 %v1067_v11, %s5755_s4  ;;  %v3306_v17 = vunpack.c.l.b16 %v3290_v28  ;;  %v2668_v4 = vmul.f32 %v5815_v55, %v5478_v36  ;;  %v1055_v54 = vmul.f32 %v3547_v9, %v5816_v25 }
0x1a75   :  { %v3265_v63 = vadd.f32 %v3264_v7, %v3263_v41  ;;  %v3272_v51 = vadd.f32 %v3271_v15, %v3270_v61  ;;  %v3277_v3 = vadd.f32 %v3276_v33, %v3275_v8  ;;  %v3284_v47 = vadd.f32 %v3283_v12, %v3282_v49  ;;  %v5818_v41 = vld [vmem:[#allocation16_spill] sm:$0xff]  ;;  %v5819_v49 = vld [vmem:[#allocation9_spill] sm:$0xff] }
0x1a76   :  { %v3312_v58 = vsel %vm670_vm4, %v3305_v60, %v3311_v30  ;;  %v1082_v24 = vmul.f32 %v4066_v27, %v3549_v26  ;;  %v1056_v21 = vsel %vm87_vm1, %v1055_v54, 0.0  ;;  %v1102_v61 = vmin.f32 %v5818_v41, %v5817_v59  ;;  %v5820_v33 = vld [vmem:[#allocation28_spill] sm:$0xff] }
0x1a77   :  { %v3291_v39 = vpack.c.bf16 %v3265_v63, %v3265_v63  ;;  %v3292_v29 = vpack.c.bf16 %v3272_v51, %v3272_v51  ;;  %v3278_v43 = vrot.slane %v3277_v3, 1  ;;  %v3285_v44 = vrot.slane %v3284_v47, 1 }
0x1a78   :  { %2670 = vrot.lane.b32.xlu0 %v2668_v4, %s5755_s4  ;;  %v3313_v46 = vsel %vm672_vm5, %v3306_v17, %v3312_v58  ;;  %v1083_v48 = vsel %vm87_vm1, %v1082_v24, 0.0  ;;  %v1103_v8 = vsel %vm89_vm2, %v1102_v61, 0.0  ;;  %v1870_v34 = vmul.f32 %v3547_v9, %v5819_v49  ;;  %v5821_v61 = vld [vmem:[#allocation29_spill] sm:$0xff] }
0x1a79   :  { %v3307_v50 = vunpack.c.l.b16 %v3291_v39  ;;  %v3279_v45 = vadd.f32 %v3278_v43, %v3277_v3  ;;  %v3308_v52 = vunpack.c.l.b16 %v3292_v29  ;;  %v3286_v19 = vadd.f32 %v3285_v44, %v3284_v47 }
0x1a7a   :  { %v1871_v5 = vsel %vm87_vm1, %v1870_v34, 0.0  ;;  %v1874_v12 = vmul.f32 %v5820_v33, %v5478_v36  ;;  %v3462_v60 = vmul.f32 %v5310_v20, %v5478_v36  ;;  %v2664_v17 = vmul.f32 %v3547_v9, %v5268_v42  ;;  %v4067_v42 = vld [vmem:[%s5723_s16 + $0x8] sm:$0xff] }
0x1a7b   :  { %v3314_v32 = vsel %vm674_vm6, %v3307_v50, %v3313_v46  ;;  %v3293_v57 = vpack.c.bf16 %v3279_v45, %v3279_v45  ;;  %v3294_v0 = vpack.c.bf16 %v3286_v19, %v3286_v19 }
0x1a7c   :  { %v3315_v18 = vsel %vm676_vm7, %v3308_v52, %v3314_v32  ;;  %v2665_v29 = vsel %vm87_vm1, %v2664_v17, 0.0  ;;  %v4068_v52 = vld [vmem:[%s5723_s16 + $0x10] sm:$0xff] }
0x1a7d   :  { %v3309_v6 = vunpack.c.l.b16 %v3293_v57  ;;  %v3310_v62 = vunpack.c.l.b16 %v3294_v0  ;;  %v2677_v19 = vmul.f32 %v4068_v52, %v3549_v26  ;;  %v3471_v0 = vmul.f32 %v5251_v13, %v3549_v26  ;;  %v5823_v52 = vld [vmem:[#allocation12_spill] sm:$0xff] }
0x1a7f   :  { %v3316_v38 = vsel %vm678_vm8, %v3309_v6, %v3315_v18  ;;  %v2678_v32 = vsel %vm87_vm1, %v2677_v19, 0.0  ;;  %v3472_v18 = vsel %vm87_vm1, %v3471_v0, 0.0  ;;  %v2647_v19 = vadd.f32 %v5289_v37, %v5823_v52 }
0x1a80   :  { %v3317_v14 = vsel %vm680_vm9, %v3310_v62, %v3316_v38 }
0x1a81   :  { %v3318_v1 = vpack.c.b16 %v3317_v14, %v3317_v14 }
0x1a83   :  { %3851 = vmatmul.mubr.msk.bf16.vlgmr.msra.gmra.mxu0 %vm761_vm11, %v3318_v1 }
0x1a97   :  { %1057 = vadd.xlane.f32.xlu0 %v1056_v21 }
0x1a9b   :  { %1084 = vadd.xlane.f32.xlu0 %v1083_v48 }
0x1a9f   :  { %1104 = vadd.xlane.f32.xlu0 %v1103_v8  ;;  %v5822_v8 = vld [vmem:[#allocation10_spill] sm:$0xff] }
0x1aa0   :  { %v1040_v10 = vpop.xlane.xlu0 %1039  ;;  %v1853_v49 = vadd.f32 %v5822_v8, %v5821_v61 }
0x1aa1   :  { %v1041_v28 = vsub.f32 %v5458_v56, %v1040_v10  ;;  %v31_v56 = vstv %s5644_s23 }
0x1aa2   :  { %32 = vst [vmem:[#allocation5] sm:$0x1] %v31_v56  ;;  %v1858_v34 = vadd.f32 %v5455_v53, %v1853_v49 }
0x1aa3   :  { %1872 = vadd.xlane.f32.xlu0 %v1871_v5  ;;  %v1042_v11 = vmul.f32 1.442695, %v1041_v28 }
0x1aa4   :  { %v1859_v10 = vsel %vm87_vm1, %v1858_v34, -inf }
0x1aa5   :  { %3997 = vpow2.f32 %v1042_v11 }
0x1aa9   :  { %v5547_v25 = vld [vmem:[#allocation5] ss:$0 sm:$0xff] }
0x1ab2   :  { %v5512_v7 = vpop.eup %3997 }
0x1ab3   :  { %v1044_v15 = vsel %vm87_vm1, %v5512_v7, 0.0 }
0x1ab4   :  { %1045 = vadd.xlane.f32.xlu1 %v1044_v15 }
0x1ac5   :  { %1876 = vrot.lane.b32.xlu1 %v1874_v12, %s5755_s4 }
0x1ac9   :  { %3464 = vrot.lane.b32.xlu1 %v3462_v60, %s5755_s4 }
0x1ae6   :  { %v1070_v63 = vpop.permute.xlu0 %1069 }
0x1ae7   :  { %v1072_v51 = vsel %vm87_vm1, %v1070_v63, 0.0 }
0x1aea   :  { %v2671_v43 = vpop.permute.xlu0 %2670 }
0x1aeb   :  { %v2673_v45 = vsel %vm87_vm1, %v2671_v43, 0.0 }
0x1aed   :  { %1073 = vadd.xlane.f32.xlu1 %v1072_v51 }
0x1b20   :  { %v1058_v62 = vpop.xlane.xlu0 %1057 }
0x1b24   :  { %v1085_v1 = vpop.xlane.xlu0 %1084 }
0x1b28   :  { %v5554_v28 = vpop.xlane.xlu0 %1104 }
0x1b2c   :  { %v1873_v5 = vpop.xlane.xlu0 %1872 }
0x1b3d   :  { %v5526_v3 = vpop.xlane.xlu1 %1045 }
0x1b41   :  { %v1877_v47 = vpop.permute.xlu1 %1876 }
0x1b42   :  { %v1879_v30 = vsel %vm87_vm1, %v1877_v47, 0.0 }
0x1b43   :  { %v3356_v55 = vpop.f32.mrf.mxu0  ;;  %1880 = vadd.xlane.f32.xlu0 %v1879_v30 }
0x1b44   :  { %v3357_v20 = vadd.f32 %v5265_v35, %v3356_v55  ;;  %v1883_v35 = vmul.f32 %v4067_v42, %v3549_v26 }
0x1b45   :  { %v3852_v36 = vpop.f32.mrf.mxu0  ;;  %v3465_v4 = vpop.permute.xlu1 %3464 }
0x1b46   :  { %v3362_v58 = vpack.c.bf16 %v3357_v20, %v3357_v20  ;;  %3511 = vst.msk [vmem:[#allocation2] sm:$0xff] %vm87_vm1, %v3357_v20  ;;  %v3467_v39 = vsel %vm87_vm1, %v3465_v4, 0.0  ;;  %v1884_v46 = vsel %vm87_vm1, %v1883_v35, 0.0  ;;  %v3458_v57 = vmul.f32 %v3547_v9, %v3357_v20 }
0x1b47   :  { %v3359_v44 = vpop.f32.mrf.mxu0  ;;  %2666 = vadd.xlane.f32.xlu0 %v2665_v29  ;;  %3468 = vadd.xlane.f32.xlu1 %v3467_v39 }
0x1b48   :  { %3867 = vmatmul.mubr.msk.bf16.vlgmr.msra.gmra.mxu1 %vm87_vm1, %v3362_v58  ;;  %v3459_v6 = vsel %vm87_vm1, %v3458_v57, 0.0  ;;  %v2652_v57 = vadd.f32 %v5455_v53, %v2647_v19 }
0x1b49   :  { %v3853_v50 = vpop.f32.mrf.mxu0 }
0x1b4a   :  { %v2653_v0 = vsel %vm87_vm1, %v2652_v57, -inf }
0x1b4b   :  { %2674 = vadd.xlane.f32.xlu0 %v2673_v45 }
0x1b4f   :  { %1885 = vadd.xlane.f32.xlu0 %v1884_v46 }
0x1b53   :  { %2679 = vadd.xlane.f32.xlu0 %v2678_v32 }
0x1b57   :  { %3460 = vadd.xlane.f32.xlu0 %v3459_v6 }
0x1b5b   :  { %3473 = vadd.xlane.f32.xlu0 %v3472_v18 }
0x1b76   :  { %v1074_v38 = vpop.xlane.xlu1 %1073 }
0x1b77   :  { %v1075_v14 = vadd.f32 %v1074_v38, %v1058_v62 }
0x1b79   :  { %v1086_v54 = vadd.f32 %v1085_v1, %v1075_v14 }
0x1b7b   :  { %v1093_v27 = vadd.f32 %v5547_v25, %v1086_v54 }
0x1b7d   :  { %v3551_v24 = vmul.f32 -1.442695, %v1093_v27 }
0x1b7f   :  { %3999 = vpow2.f32 %v3551_v24 }
0x1b8c   :  { %v4000_v9 = vpop.eup %3999 }
0x1b8d   :  { %v1097_v21 = vadd.f32 1.0, %v4000_v9 }
0x1b8f   :  { %4001 = vrcp.f32 %v1097_v21 }
0x1b9c   :  { %v4002_v13 = vpop.eup %4001 }
0x1b9d   :  { %v1100_v26 = vmax.f32 %v4002_v13, 0.001 }
0x1b9f   :  { %v1101_v48 = vmin.f32 %v1100_v26, 0.999 }
0x1ba1   :  { %v1112_v59 = vsub.f32 1.0, %v1101_v48 }
0x1ba3   :  { %1115 = vperm.xlu0 %3877, %v1112_v59  }
0x1bc2   :  { %1860 = vmax.xlane.f32.xlu0 %v1859_v10 }
0x1bcc   :  { %v1881_v11 = vpop.xlane.xlu0 %1880 }
0x1bcd   :  { %v1882_v44 = vadd.f32 %v1881_v11, %v1873_v5 }
0x1bd0   :  { %v2667_v15 = vpop.xlane.xlu0 %2666  ;;  %v3469_v47 = vpop.xlane.xlu1 %3468 }
0x1bd4   :  { %v2675_v33 = vpop.xlane.xlu0 %2674 }
0x1bd5   :  { %v2676_v12 = vadd.f32 %v2675_v33, %v2667_v15 }
0x1bd8   :  { %v1886_v60 = vpop.xlane.xlu0 %1885 }
0x1bd9   :  { %v1887_v50 = vadd.f32 %v1886_v60, %v1882_v44 }
0x1bdb   :  { %v1888_v45 = vadd.f32 %v5547_v25, %v1887_v50 }
0x1bdc   :  { %v2680_v56 = vpop.xlane.xlu0 %2679 }
0x1bdd   :  { %v2681_v63 = vadd.f32 %v2680_v56, %v2676_v12 }
0x1bdf   :  { %v2682_v9 = vadd.f32 %v5547_v25, %v2681_v63 }
0x1be0   :  { %v3461_v51 = vpop.xlane.xlu0 %3460 }
0x1be1   :  { %v3470_v30 = vadd.f32 %v3469_v47, %v3461_v51  ;;  %v3570_v21 = vmul.f32 -1.442695, %v2682_v9 }
0x1be4   :  { %v3474_v17 = vpop.xlane.xlu0 %3473 }
0x1be5   :  { %v3475_v55 = vadd.f32 %v3474_v17, %v3470_v30 }
0x1be7   :  { %v3476_v13 = vadd.f32 %v5547_v25, %v3475_v55 }
0x1be9   :  { %v3580_v26 = vmul.f32 -1.442695, %v3476_v13 }
0x1c08   :  { %v3440_v20 = vpop.f32.mrf.mxu1 }
0x1c09   :  { %v3441_v36 = vadd.f32 %v3440_v20, %v5350_v2  ;;  %v3560_v2 = vmul.f32 -1.442695, %v1888_v45 }
0x1c0a   :  { %v3868_v4 = vpop.f32.mrf.mxu1 }
0x1c0b   :  { %v5558_v58 = vadd.f32 %v5455_v53, %v3441_v36  ;;  %4003 = vpow2.f32 %v3560_v2  ;;  %v5824_v53 = vld [vmem:[#allocation8_spill] sm:$0xff]  ;;  %v2691_v4 = vmin.f32 %v5160_v40, %v5297_v23 }
0x1c0c   :  { %v3443_v39 = vpop.f32.mrf.mxu1  ;;  %v1897_v27 = vmin.f32 %v5824_v53, %v4961_v16 }
0x1c0d   :  { %v3447_v29 = vsel %vm87_vm1, %v5558_v58, -inf  ;;  %v2692_v39 = vsel %vm89_vm2, %v2691_v4, 0.0 }
0x1c0e   :  { %3448 = vmax.xlane.f32.xlu0 %v3447_v29  ;;  %v3869_v43 = vpop.f32.mrf.mxu1  ;;  %v1898_v24 = vsel %vm89_vm2, %v1897_v27, 0.0 }
0x1c18   :  { %v4004_v46 = vpop.eup %4003 }
0x1c19   :  { %v1892_v32 = vadd.f32 1.0, %v4004_v46 }
0x1c1b   :  { %4005 = vrcp.f32 %v1892_v32 }
0x1c1e   :  { %v1116_v42 = vpop.permute.xlu0 %1115 }
0x1c1f   :  { %v1118_v35 = vmul.f32 %v1116_v42, %v5818_v41  ;;  %v3485_v42 = vmin.f32 %v5422_v31, %v5430_v22 }
0x1c21   :  { %1120 = vrot.lane.b32.xlu1 %v1118_v35, %s5754_s26  ;;  %v3486_v35 = vsel %vm89_vm2, %v3485_v42, 0.0 }
0x1c28   :  { %v4006_v18 = vpop.eup %4005 }
0x1c29   :  { %v1895_v38 = vmax.f32 %v4006_v18, 0.001 }
0x1c2b   :  { %v1896_v14 = vmin.f32 %v1895_v38, 0.999 }
0x1c2d   :  { %v1907_v1 = vsub.f32 1.0, %v1896_v14 }
0x1c45   :  { %2654 = vmax.xlane.f32.xlu1 %v2653_v0 }
0x1c4b   :  { %v1861_v6 = vpop.xlane.xlu0 %1860 }
0x1c4c   :  { %v1862_v41 = vsub.f32 %v1858_v34, %v1861_v6 }
0x1c4e   :  { %v1863_v62 = vmul.f32 1.442695, %v1862_v41 }
0x1c50   :  { %4007 = vpow2.f32 %v1863_v62 }
0x1c51   :  { %4009 = vpow2.f32 %v3570_v21 }
0x1c52   :  { %4011 = vpow2.f32 %v3580_v26 }
0x1c53   :  { %4013 = vrcp.f32 %v5526_v3 }
0x1c56   :  { %1108 = vperm.xlu1 %3878, %v1101_v48  }
0x1c5a   :  { %1910 = vperm.xlu1 %3878, %v1907_v1  }
0x1c5d   :  { %v5569_v54 = vpop.eup %4007 }
0x1c5e   :  { %v1865_v37 = vsel %vm87_vm1, %v5569_v54, 0.0  ;;  %v4010_v48 = vpop.eup %4009 }
0x1c5f   :  { %1866 = vadd.xlane.f32.xlu0 %v1865_v37  ;;  %v2686_v59 = vadd.f32 1.0, %v4010_v48  ;;  %v4012_v61 = vpop.eup %4011 }
0x1c60   :  { %v3480_v16 = vadd.f32 1.0, %v4012_v61  ;;  %v4014_v49 = vpop.eup %4013 }
0x1c61   :  { %4015 = vrcp.f32 %v2686_v59  ;;  %v1048_v15 = vmul.f32 %v4014_v49, %v5512_v7 }
0x1c62   :  { %4017 = vrcp.f32 %v3480_v16 }
0x1c63   :  { %1899 = vadd.xlane.f32.xlu0 %v1898_v24 }
0x1c6e   :  { %v4016_v5 = vpop.eup %4015 }
0x1c6f   :  { %v2689_v12 = vmax.f32 %v4016_v5, 0.001  ;;  %v4018_v60 = vpop.eup %4017 }
0x1c70   :  { %v3483_v17 = vmax.f32 %v4018_v60, 0.001 }
0x1c71   :  { %v2690_v30 = vmin.f32 %v2689_v12, 0.999 }
0x1c72   :  { %v3484_v55 = vmin.f32 %v3483_v17, 0.999 }
0x1c73   :  { %v2701_v7 = vsub.f32 1.0, %v2690_v30 }
0x1c74   :  { %v3495_v20 = vsub.f32 1.0, %v3484_v55 }
0x1c79   :  { %1903 = vperm.xlu0 %3877, %v1896_v14  }
0x1c93   :  { %v1121_v8 = vpop.permute.xlu1 %1120 }
0x1c97   :  { %v3449_v29 = vpop.xlane.xlu0 %3448 }
0x1c98   :  { %v3450_v43 = vsub.f32 %v5558_v58, %v3449_v29 }
0x1c9a   :  { %v3451_v44 = vmul.f32 1.442695, %v3450_v43 }
0x1cce   :  { %v2655_v34 = vpop.xlane.xlu1 %2654 }
0x1ccf   :  { %v2656_v10 = vsub.f32 %v2652_v57, %v2655_v34 }
0x1cd1   :  { %v2657_v11 = vmul.f32 1.442695, %v2656_v10 }
0x1cd2   :  { %v1109_v25 = vpop.permute.xlu1 %1108 }
0x1cd3   :  { %4019 = vpow2.f32 %v2657_v11  ;;  %v1111_v33 = vmul.f32 %v1109_v25, %v1048_v15 }
0x1cd4   :  { %4021 = vpow2.f32 %v3451_v44 }
0x1cd5   :  { %v1123_v3 = vsel %vm87_vm1, %v1111_v33, %v1121_v8 }
0x1cd6   :  { %v1125_v56 = vsel %vm1124_vm12, %v1123_v3, %v5554_v28  ;;  %v1911_v63 = vpop.permute.xlu1 %1910 }
0x1cd7   :  { %v1127_v51 = vsel %vm1126_vm13, %v1125_v56, 0.0  ;;  %v1913_v47 = vmul.f32 %v1911_v63, %v5824_v53 }
0x1cd8   :  { %1128 = vst [vmem:[%s5645_s24] sm:$0xff] %v1127_v51 }
0x1cd9   :  { %1915 = vrot.lane.b32.xlu0 %v1913_v47, %s5754_s26 }
0x1cdd   :  { %2704 = vperm.xlu0 %3877, %v2701_v7  }
0x1ce0   :  { %v4020_v36 = vpop.eup %4019 }
0x1ce1   :  { %3498 = vperm.xlu0 %3877, %v3495_v20   ;;  %v2659_v28 = vsel %vm87_vm1, %v4020_v36, 0.0  ;;  %v4022_v50 = vpop.eup %4021 }
0x1ce2   :  { %2660 = vadd.xlane.f32.xlu1 %v2659_v28  ;;  %v3453_v45 = vsel %vm87_vm1, %v4022_v50, 0.0 }
0x1ce6   :  { %2693 = vadd.xlane.f32.xlu1 %v2692_v39 }
0x1ce8   :  { %v1867_v23 = vpop.xlane.xlu0 %1866 }
0x1ce9   :  { %4023 = vrcp.f32 %v1867_v23 }
0x1cec   :  { %v1900_v46 = vpop.xlane.xlu0 %1899 }
0x1cf4   :  { %v1904_v52 = vpop.permute.xlu0 %1903 }
0x1cf6   :  { %v4024_v2 = vpop.eup %4023 }
0x1cf7   :  { %2697 = vperm.xlu1 %3878, %v2690_v30   ;;  %v1869_v58 = vmul.f32 %v4024_v2, %v5569_v54 }
0x1cf9   :  { %v1906_v19 = vmul.f32 %v1904_v52, %v1869_v58 }
0x1d00   :  { %3487 = vadd.xlane.f32.xlu0 %v3486_v35 }
0x1d04   :  { %3454 = vadd.xlane.f32.xlu0 %v3453_v45 }
0x1d1a   :  { %3491 = vperm.xlu0 %3877, %v3484_v55  }
0x1d4b   :  { %v1916_v32 = vpop.permute.xlu0 %1915 }
0x1d4c   :  { %v1918_v57 = vsel %vm87_vm1, %v1906_v19, %v1916_v32 }
0x1d4d   :  { %v1919_v22 = vsel %vm1124_vm12, %v1918_v57, %v1900_v46 }
0x1d4e   :  { %v1920_v0 = vsel %vm1126_vm13, %v1919_v22, 0.0 }
0x1d4f   :  { %3561 = vst [vmem:[%s5645_s24 + $0x8] sm:$0xff] %v1920_v0 }
0x1d58   :  { %v2705_v6 = vpop.permute.xlu0 %2704 }
0x1d59   :  { %v2707_v41 = vmul.f32 %v2705_v6, %v5160_v40 }
0x1d5b   :  { %2709 = vrot.lane.b32.xlu1 %v2707_v41, %s5754_s26 }
0x1d5c   :  { %v3499_v18 = vpop.permute.xlu0 %3498 }
0x1d5d   :  { %v3501_v62 = vmul.f32 %v3499_v18, %v5422_v31 }
0x1d5f   :  { %3503 = vrot.lane.b32.xlu1 %v3501_v62, %s5754_s26 }
0x1d6b   :  { %v2661_v14 = vpop.xlane.xlu1 %2660 }
0x1d6c   :  { %4025 = vrcp.f32 %v2661_v14 }
0x1d6f   :  { %v2694_v54 = vpop.xlane.xlu1 %2693 }
0x1d73   :  { %v2698_v24 = vpop.permute.xlu1 %2697 }
0x1d79   :  { %v4026_v37 = vpop.eup %4025 }
0x1d7a   :  { %v2663_v53 = vmul.f32 %v4026_v37, %v4020_v36 }
0x1d7c   :  { %v2700_v9 = vmul.f32 %v2698_v24, %v2663_v53 }
0x1d89   :  { %v3488_v38 = vpop.xlane.xlu0 %3487 }
0x1d8d   :  { %v3455_v1 = vpop.xlane.xlu0 %3454 }
0x1d8e   :  { %4027 = vrcp.f32 %v3455_v1 }
0x1d95   :  { %v3492_v26 = vpop.permute.xlu0 %3491 }
0x1d9b   :  { %v4028_v27 = vpop.eup %4027 }
0x1d9c   :  { %v3457_v21 = vmul.f32 %v4028_v27, %v4022_v50 }
0x1d9e   :  { %v3494_v48 = vmul.f32 %v3492_v26, %v3457_v21 }
0x1dcd   :  { %v2710_v40 = vpop.permute.xlu1 %2709 }
0x1dce   :  { %v2712_v13 = vsel %vm87_vm1, %v2700_v9, %v2710_v40 }
0x1dcf   :  { %v2713_v31 = vsel %vm1124_vm12, %v2712_v13, %v2694_v54 }
0x1dd0   :  { %v2714_v59 = vsel %vm1126_vm13, %v2713_v31, 0.0 }
0x1dd1   :  { %3571 = vst [vmem:[%s5645_s24 + $0x10] sm:$0xff] %v2714_v59  ;;  %v3504_v61 = vpop.permute.xlu1 %3503 }
0x1dd2   :  { %v3506_v16 = vsel %vm87_vm1, %v3494_v48, %v3504_v61 }
0x1dd3   :  { %v3507_v8 = vsel %vm1124_vm12, %v3506_v16, %v3488_v38 }
0x1dd4   :  { %v3508_v49 = vsel %vm1126_vm13, %v3507_v8, 0.0 }
0x1dd5   :  { %3581 = vst [vmem:[%s5645_s24 + $0x18] sm:$0xff] %v3508_v49 }

</bundles_post_ra>
